<compile_context>
chip_gen: v7x
topology: tpu7x:2x2x1
jax: 0.10.0
libtpu: 0.0.40
codegen_flags: <defaults>
</compile_context>

<pallas_src>
import numpy as np
import jax
import jax.numpy as jnp
from jax.experimental import pallas as pl
from jax.experimental.pallas import tpu as pltpu

# -------------------- module hyper-parameters (PyTorch spec) --------------------
IN_FEATURES = 64            # % 32 == 0  -> C0 = 2, L0 = 32
LAYERS = (4, 4, 4)          # len == 3
OUT_CHANNELS = 3
OUT_FEATURES = 448
BATCH = 2

C0 = IN_FEATURES // 32      # 2
L0 = 32

K1, ST1 = 10, 3             # ConvTranspose1d(C0 -> 4,  k=10, s=3) + SiLU
K2, ST2 = 32, 2             # ConvTranspose1d(4  -> 4,  k=32, s=2) + SiLU
K3, ST3 = 32, 2             # ConvTranspose1d(4  -> 4,  k=32, s=2)   (+ Conv1d k=1 -> 3)

L1 = (L0 - 1) * ST1 + K1    # 103
L2 = (L1 - 1) * ST2 + K2    # 236
L3 = (L2 - 1) * ST3 + K3    # 502
assert OUT_FEATURES <= L3

J1, P1 = -(-K1 // ST1), -(-K1 // ST1) - 1     # 4, 3   taps / left pad per phase
J2, P2 = -(-K2 // ST2), -(-K2 // ST2) - 1     # 16, 15
J3, P3 = -(-K3 // ST3), -(-K3 // ST3) - 1     # 16, 15

M1 = 128                    # phase positions computed per phase (>= ceil(L1/3) = 35)
M2 = 128                    # >= ceil(L2/2) = 118
M3 = 256                    # >= ceil(448/2) = 224, kept 128-aligned for aligned concats
W_IN1 = 256                 # padded layer-1 input width
W_IN2 = 256                 # padded layer-2 input width
W_IN3 = 384                 # padded layer-3 input width (>= P3 + M3 = 271)

assert P1 + L0 <= W_IN1 and P1 + M1 <= W_IN1
assert P2 + L1 <= W_IN2 and P2 + M2 <= W_IN2
assert P3 + L2 <= W_IN3 and P3 + M3 <= W_IN3
assert (L1 - 1) // ST1 < M1 and (L2 - 1) // ST2 < M2 and (OUT_FEATURES - 1) // ST3 < M3
assert ST3 * M3 >= OUT_FEATURES

_HIGHEST = jax.lax.Precision.HIGHEST


# ------------------------------ in-kernel helpers ---------------------------------
def _onehot_bf16(colsrc, n_rows):
    """One-hot matrix S[i, t] = 1.0 iff i == colsrc[0, t] (built on the VPU)."""
    row = jax.lax.broadcasted_iota(jnp.int32, (n_rows, colsrc.shape[-1]), 0)
    return jnp.where(row == colsrc, 1.0, 0.0).astype(jnp.bfloat16)


def _split3_bf16(y):
    """3-term bf16 decomposition of an f32 array (reconstruction error ~2^-27)."""
    hi = y.astype(jnp.bfloat16)
    r1 = y - hi.astype(jnp.float32)
    mid = r1.astype(jnp.bfloat16)
    lo = (r1 - mid.astype(jnp.float32)).astype(jnp.bfloat16)
    return hi, mid, lo


def _scatter_bf16(y, onehot, c_rows):
    """y @ onehot with a single native bf16 MXU pass per chunk (f32-faithful)."""
    parts = _split3_bf16(y)
    z = jnp.dot(jnp.concatenate(parts, axis=0), onehot,
                preferred_element_type=jnp.float32)          # (3*c_rows, W)
    return z[:c_rows] + z[c_rows:2 * c_rows] + z[2 * c_rows:3 * c_rows]


def _layer(xin, w, b, scat, *, c_out, st, j_taps, pad, m, act):
    """Polyphase ConvTranspose1d (+ optional SiLU) + interleave into next input."""
    f32 = jnp.float32
    # im2col: J shifted views of the zero-padded input signal
    cols = jnp.concatenate(
        [xin[:, pad - j: pad - j + m] for j in range(j_taps)], axis=0)   # (J*C_in, M)
    # all `st` phase outputs with ONE MXU dot (phase weights row-stacked)
    y = jnp.dot(w, cols, precision=_HIGHEST,
                preferred_element_type=f32) + b                          # (st*C_out, M)
    if act:
        y = y * jax.nn.sigmoid(y)                                        # SiLU
    # phases -> lanes: (st*C_out, M) -> (C_out, st*M); pieces are 128-aligned
    ycat = jnp.concatenate([y[r * c_out:(r + 1) * c_out, :] for r in range(st)], axis=1)
    # interleave + zero-pad into the next layer's input with ONE bf16 dot
    return _scatter_bf16(ycat, scat, c_out)                              # (C_out, W_next)


# ------------------------------ fused Pallas kernel --------------------------------
def _make_kernel(bb):
    def kernel(x_ref, c0_ref, w1_ref, b1_ref, c1_ref, w2_ref, b2_ref, c2_ref,
               w3_ref, b3_ref, c3_ref, o_ref):
        # One-hot placement / interleave matrices: built on the VPU, never DMA'd.
        s0 = _onehot_bf16(c0_ref[...], L0)          # (32, 256)  input placement
        s1 = _onehot_bf16(c1_ref[...], ST1 * M1)    # (384, 256)
        s2 = _onehot_bf16(c2_ref[...], ST2 * M2)    # (256, 384)
        s3 = _onehot_bf16(c3_ref[...], ST3 * M3)    # (512, 448)
        w1, b1 = w1_ref[...], b1_ref[...]
        w2, b2 = w2_ref[...], b2_ref[...]
        w3, b3 = w3_ref[...], b3_ref[...]

        for b in range(bb):
            x0 = x_ref[b]                                                 # (C0, 32)
            # zero-padded layer-1 input: stride-1 "placement" scatter (no jnp.pad)
            xp = _scatter_bf16(x0, s0, C0)                                # (C0, 256)
            # layer 1: ConvTranspose1d(C0->4, k=10, s=3) + SiLU
            x2 = _layer(xp, w1, b1, s1, c_out=LAYERS[0], st=ST1,
                        j_taps=J1, pad=P1, m=M1, act=True)                # (4, 256)
            # layer 2: ConvTranspose1d(4->4, k=32, s=2) + SiLU
            x3 = _layer(x2, w2, b2, s2, c_out=LAYERS[1], st=ST2,
                        j_taps=J2, pad=P2, m=M2, act=True)                # (4, 384)
            # layer 3: ConvTranspose1d(4->4, k=32, s=2) fused with Conv1d(4->3, k=1)
            out = _layer(x3, w3, b3, s3, c_out=OUT_CHANNELS, st=ST3,
                         j_taps=J3, pad=P3, m=M3, act=False)              # (3, 448)
            o_ref[b] = out
    return kernel


# ------------------------- one-time parameter preparation --------------------------
def prepare_params(p):
    """Row-stacked polyphase weights, stacked biases, and the tiny int32 'source
    column' vectors used to synthesize the interleave matrices in-kernel."""
    def stacked(W, b, stride):
        # W: (C_in, C_out, K) PyTorch ConvTranspose1d layout.
        # Ws[r*C_out + co, j*C_in + ci] = W[ci, co, j*stride + r]   (0 where >= K)
        C_in, C_out, K = W.shape
        J = -(-K // stride)
        Wk = jnp.pad(W, ((0, 0), (0, 0), (0, J * stride - K)))
        Wk = Wk.reshape(C_in, C_out, J, stride)
        Ws = jnp.transpose(Wk, (3, 1, 2, 0)).reshape(stride * C_out, J * C_in)
        bs = jnp.tile(b.reshape(1, C_out), (stride, 1)).reshape(stride * C_out, 1)
        return Ws.astype(jnp.float32), bs.astype(jnp.float32)

    def colsrc(M, stride, L_valid, offset, width):
        # src[t] = r*M + m  if t == offset + stride*m + r and stride*m + r < L_valid
        #        = -1       otherwise (column stays exactly zero)
        t = np.arange(width)
        l = t - offset
        valid = (l >= 0) & (l < L_valid)
        r = np.mod(l, stride)
        m = np.floor_divide(l, stride)
        src = np.where(valid, r * M + m, -1).astype(np.int32)
        assert src.max() < stride * M
        return jnp.asarray(src.reshape(1, width))

    # Fold the final Conv1d(k=1) into layer 3 (both are linear in channels).
    W4m = p["W4"][:, :, 0]                                  # (3, 4)
    W3c = jnp.einsum("ick,oc->iok", p["W3"], W4m)           # (4, 3, 32)
    b3c = W4m @ p["b3"] + p["b4"]                           # (3,)

    W1s, b1s = stacked(p["W1"], p["b1"], ST1)               # (12, 8),  (12, 1)
    W2s, b2s = stacked(p["W2"], p["b2"], ST2)               # (8, 64),  (8, 1)
    W3s, b3s = stacked(W3c, b3c, ST3)                       # (6, 64),  (6, 1)

    return dict(
        c0=colsrc(L0, 1, L0, P1, W_IN1),                    # (1, 256) int32
        W1s=W1s, b1s=b1s, c1=colsrc(M1, ST1, L1, P2, W_IN2),              # (1, 256)
        W2s=W2s, b2s=b2s, c2=colsrc(M2, ST2, L2, P3, W_IN3),              # (1, 384)
        W3s=W3s, b3s=b3s, c3=colsrc(M3, ST3, OUT_FEATURES, 0, OUT_FEATURES),  # (1, 448)
    )


# ------------------------------------ forward --------------------------------------
def _block_batch(batch):
    """Samples per grid step: fold the tiny batch on single-TensorCore chips
    (v5e / v6e); keep one sample per step on multi-core chips (v4/v5p/v7x) so the
    'parallel' grid axis uses both TensorCores."""
    try:
        kind = jax.devices()[0].device_kind.lower()
    except Exception:
        return 1
    multi_core = any(s in kind for s in ("v4", "v5p", "v5 p", "v7", "7x"))
    if multi_core or batch > 8:
        return 1
    return batch


def forward(x, prep):
    B = x.shape[0]
    h = x.reshape(B, C0, L0)                      # nn.Unflatten(-1, (-1, 32)) -- a view
    bb = _block_batch(B)
    if B % bb:
        bb = 1

    out = pl.pallas_call(
        _make_kernel(bb),
        out_shape=jax.ShapeDtypeStruct((B, OUT_CHANNELS, OUT_FEATURES), jnp.float32),
        grid=(B // bb,),
        in_specs=[
            pl.BlockSpec((bb, C0, L0), lambda i: (i, 0, 0)),
            pl.BlockSpec((1, W_IN1), lambda i: (0, 0)),
            pl.BlockSpec((ST1 * LAYERS[0], J1 * C0), lambda i: (0, 0)),
            pl.BlockSpec((ST1 * LAYERS[0], 1), lambda i: (0, 0)),
            pl.BlockSpec((1, W_IN2), lambda i: (0, 0)),
            pl.BlockSpec((ST2 * LAYERS[1], J2 * LAYERS[0]), lambda i: (0, 0)),
            pl.BlockSpec((ST2 * LAYERS[1], 1), lambda i: (0, 0)),
            pl.BlockSpec((1, W_IN3), lambda i: (0, 0)),
            pl.BlockSpec((ST3 * OUT_CHANNELS, J3 * LAYERS[1]), lambda i: (0, 0)),
            pl.BlockSpec((ST3 * OUT_CHANNELS, 1), lambda i: (0, 0)),
            pl.BlockSpec((1, OUT_FEATURES), lambda i: (0, 0)),
        ],
        out_specs=pl.BlockSpec((bb, OUT_CHANNELS, OUT_FEATURES), lambda i: (i, 0, 0)),
        compiler_params=pltpu.CompilerParams(dimension_semantics=("parallel",)),
    )(h, prep["c0"],
      prep["W1s"], prep["b1s"], prep["c1"],
      prep["W2s"], prep["b2s"], prep["c2"],
      prep["W3s"], prep["b3s"], prep["c3"])
    return out


# ------------------------------ pure-JAX reference ---------------------------------
def _conv_transpose1d_ref(x, W, b, stride):
    B, C_in, L = x.shape
    _, C_out, K = W.shape
    out = jnp.zeros((B, C_out, (L - 1) * stride + K), jnp.float32)
    for l in range(L):
        contrib = jnp.einsum("bi,iok->bok", x[:, :, l], W, precision=_HIGHEST)
        out = out.at[:, :, l * stride:l * stride + K].add(contrib)
    return out + b[None, :, None]


def forward_ref(x, p):
    B = x.shape[0]
    h = x.reshape(B, C0, L0)
    h = _conv_transpose1d_ref(h, p["W1"], p["b1"], ST1); h = h * jax.nn.sigmoid(h)
    h = _conv_transpose1d_ref(h, p["W2"], p["b2"], ST2); h = h * jax.nn.sigmoid(h)
    h = _conv_transpose1d_ref(h, p["W3"], p["b3"], ST3)
    h = jnp.einsum("oi,bil->bol", p["W4"][:, :, 0], h,
                   precision=_HIGHEST) + p["b4"][None, :, None]
    return h[..., :OUT_FEATURES]


# -------------------------------- params / main -------------------------------------
def init_params(key):
    def _init(k, w_shape, b_shape, fan_in):
        kw, kb = jax.random.split(k)
        s = 1.0 / jnp.sqrt(jnp.float32(fan_in))
        return (s * jax.random.normal(kw, w_shape, jnp.float32),
                s * jax.random.normal(kb, b_shape, jnp.float32))

    k1, k2, k3, k4 = jax.random.split(key, 4)
    W1, b1 = _init(k1, (C0, LAYERS[0], K1), (LAYERS[0],), C0 * K1)                 # ConvTranspose1d
    W2, b2 = _init(k2, (LAYERS[0], LAYERS[1], K2), (LAYERS[1],), LAYERS[0] * K2)
    W3, b3 = _init(k3, (LAYERS[1], LAYERS[2], K3), (LAYERS[2],), LAYERS[1] * K3)
    W4, b4 = _init(k4, (OUT_CHANNELS, LAYERS[2], 1), (OUT_CHANNELS,), LAYERS[2])   # Conv1d k=1
    return dict(W1=W1, b1=b1, W2=W2, b2=b2, W3=W3, b3=b3, W4=W4, b4=b4)


if __name__ == "__main__":
    key = jax.random.PRNGKey(0)
    kx, kp = jax.random.split(key)
    params = init_params(kp)
    prep = prepare_params(params)          # one-time weight / index preprocessing
    x = jax.random.normal(kx, (BATCH, IN_FEATURES), jnp.float32)

    out = jax.jit(forward)(x, prep)
    out = jax.block_until_ready(out)
    assert out.shape == (BATCH, OUT_CHANNELS, OUT_FEATURES), out.shape

    ref = jax.jit(forward_ref)(x, params)
    ref = jax.block_until_ready(ref)
    max_err = float(jnp.max(jnp.abs(out - ref)))
    assert jnp.allclose(out, ref, rtol=1e-4, atol=1e-4), max_err

    print("KERNEL_OK")
</pallas_src>

<mosaic_0001>
module attributes {stable_mosaic.version = 11 : i64} {
  func.func @kernel(%arg0: i32, %arg1: memref<2x2x32xf32, #tpu.memory_space<vmem>>, %arg2: memref<1x256xi32, #tpu.memory_space<vmem>>, %arg3: memref<12x8xf32, #tpu.memory_space<vmem>>, %arg4: memref<12x1xf32, #tpu.memory_space<vmem>>, %arg5: memref<1x256xi32, #tpu.memory_space<vmem>>, %arg6: memref<8x64xf32, #tpu.memory_space<vmem>>, %arg7: memref<8x1xf32, #tpu.memory_space<vmem>>, %arg8: memref<1x384xi32, #tpu.memory_space<vmem>>, %arg9: memref<6x64xf32, #tpu.memory_space<vmem>>, %arg10: memref<6x1xf32, #tpu.memory_space<vmem>>, %arg11: memref<1x448xi32, #tpu.memory_space<vmem>>, %arg12: memref<2x3x448xf32, #tpu.memory_space<vmem>>) attributes {dimension_semantics = [#tpu.dimension_semantics<parallel>], iteration_bounds = array<i64: 1>, scalar_prefetch = 0 : i64, scratch_operands = 0 : i64, tpu.core_type = #tpu.core_type<tc>, window_params = [{transform_indices = @transform_0, window_bounds = array<i64: 2, 2, 32>}, {pipeline_mode = #tpu.pipeline_mode<synchronous>, transform_indices = @transform_1, window_bounds = array<i64: 1, 256>}, {pipeline_mode = #tpu.pipeline_mode<synchronous>, transform_indices = @transform_2, window_bounds = array<i64: 12, 8>}, {pipeline_mode = #tpu.pipeline_mode<synchronous>, transform_indices = @transform_3, window_bounds = array<i64: 12, 1>}, {pipeline_mode = #tpu.pipeline_mode<synchronous>, transform_indices = @transform_4, window_bounds = array<i64: 1, 256>}, {pipeline_mode = #tpu.pipeline_mode<synchronous>, transform_indices = @transform_5, window_bounds = array<i64: 8, 64>}, {pipeline_mode = #tpu.pipeline_mode<synchronous>, transform_indices = @transform_6, window_bounds = array<i64: 8, 1>}, {pipeline_mode = #tpu.pipeline_mode<synchronous>, transform_indices = @transform_7, window_bounds = array<i64: 1, 384>}, {pipeline_mode = #tpu.pipeline_mode<synchronous>, transform_indices = @transform_8, window_bounds = array<i64: 6, 64>}, {pipeline_mode = #tpu.pipeline_mode<synchronous>, transform_indices = @transform_9, window_bounds = array<i64: 6, 1>}, {pipeline_mode = #tpu.pipeline_mode<synchronous>, transform_indices = @transform_10, window_bounds = array<i64: 1, 448>}, {transform_indices = @transform_11, window_bounds = array<i64: 2, 3, 448>}]} {
    %c0 = arith.constant 0 : index
    %c0_0 = arith.constant 0 : index
    %0 = vector.load %arg2[%c0, %c0_0] : memref<1x256xi32, #tpu.memory_space<vmem>>, vector<1x256xi32>
    %1 = tpu.iota {dimensions = array<i32: 0>} : vector<32x256xi32>
    %2 = vector.broadcast %0 : vector<1x256xi32> to vector<32x256xi32>
    %3 = arith.cmpi eq, %1, %2 : vector<32x256xi32>
    %cst = arith.constant 1.000000e+00 : f32
    %cst_1 = arith.constant 0.000000e+00 : f32
    %4 = vector.broadcast %cst : f32 to vector<32x256xf32>
    %5 = vector.broadcast %cst_1 : f32 to vector<32x256xf32>
    %6 = arith.select %3, %4, %5 : vector<32x256xi1>, vector<32x256xf32>
    %7 = arith.truncf %6 : vector<32x256xf32> to vector<32x256xbf16>
    %c0_2 = arith.constant 0 : index
    %c0_3 = arith.constant 0 : index
    %8 = vector.load %arg5[%c0_2, %c0_3] : memref<1x256xi32, #tpu.memory_space<vmem>>, vector<1x256xi32>
    %9 = tpu.iota {dimensions = array<i32: 0>} : vector<384x256xi32>
    %10 = vector.broadcast %8 : vector<1x256xi32> to vector<384x256xi32>
    %11 = arith.cmpi eq, %9, %10 : vector<384x256xi32>
    %cst_4 = arith.constant 1.000000e+00 : f32
    %cst_5 = arith.constant 0.000000e+00 : f32
    %12 = vector.broadcast %cst_4 : f32 to vector<384x256xf32>
    %13 = vector.broadcast %cst_5 : f32 to vector<384x256xf32>
    %14 = arith.select %11, %12, %13 : vector<384x256xi1>, vector<384x256xf32>
    %15 = arith.truncf %14 : vector<384x256xf32> to vector<384x256xbf16>
    %c0_6 = arith.constant 0 : index
    %c0_7 = arith.constant 0 : index
    %16 = vector.load %arg8[%c0_6, %c0_7] : memref<1x384xi32, #tpu.memory_space<vmem>>, vector<1x384xi32>
    %17 = tpu.iota {dimensions = array<i32: 0>} : vector<256x384xi32>
    %18 = vector.broadcast %16 : vector<1x384xi32> to vector<256x384xi32>
    %19 = arith.cmpi eq, %17, %18 : vector<256x384xi32>
    %cst_8 = arith.constant 1.000000e+00 : f32
    %cst_9 = arith.constant 0.000000e+00 : f32
    %20 = vector.broadcast %cst_8 : f32 to vector<256x384xf32>
    %21 = vector.broadcast %cst_9 : f32 to vector<256x384xf32>
    %22 = arith.select %19, %20, %21 : vector<256x384xi1>, vector<256x384xf32>
    %23 = arith.truncf %22 : vector<256x384xf32> to vector<256x384xbf16>
    %c0_10 = arith.constant 0 : index
    %c0_11 = arith.constant 0 : index
    %24 = vector.load %arg11[%c0_10, %c0_11] : memref<1x448xi32, #tpu.memory_space<vmem>>, vector<1x448xi32>
    %25 = tpu.iota {dimensions = array<i32: 0>} : vector<512x448xi32>
    %26 = vector.broadcast %24 : vector<1x448xi32> to vector<512x448xi32>
    %27 = arith.cmpi eq, %25, %26 : vector<512x448xi32>
    %cst_12 = arith.constant 1.000000e+00 : f32
    %cst_13 = arith.constant 0.000000e+00 : f32
    %28 = vector.broadcast %cst_12 : f32 to vector<512x448xf32>
    %29 = vector.broadcast %cst_13 : f32 to vector<512x448xf32>
    %30 = arith.select %27, %28, %29 : vector<512x448xi1>, vector<512x448xf32>
    %31 = arith.truncf %30 : vector<512x448xf32> to vector<512x448xbf16>
    %c0_14 = arith.constant 0 : index
    %c0_15 = arith.constant 0 : index
    %32 = vector.load %arg3[%c0_14, %c0_15] : memref<12x8xf32, #tpu.memory_space<vmem>>, vector<12x8xf32>
    %c0_16 = arith.constant 0 : index
    %c0_17 = arith.constant 0 : index
    %33 = vector.load %arg4[%c0_16, %c0_17] : memref<12x1xf32, #tpu.memory_space<vmem>>, vector<12x1xf32>
    %c0_18 = arith.constant 0 : index
    %c0_19 = arith.constant 0 : index
    %34 = vector.load %arg6[%c0_18, %c0_19] : memref<8x64xf32, #tpu.memory_space<vmem>>, vector<8x64xf32>
    %c0_20 = arith.constant 0 : index
    %c0_21 = arith.constant 0 : index
    %35 = vector.load %arg7[%c0_20, %c0_21] : memref<8x1xf32, #tpu.memory_space<vmem>>, vector<8x1xf32>
    %c0_22 = arith.constant 0 : index
    %c0_23 = arith.constant 0 : index
    %36 = vector.load %arg9[%c0_22, %c0_23] : memref<6x64xf32, #tpu.memory_space<vmem>>, vector<6x64xf32>
    %c0_24 = arith.constant 0 : index
    %c0_25 = arith.constant 0 : index
    %37 = vector.load %arg10[%c0_24, %c0_25] : memref<6x1xf32, #tpu.memory_space<vmem>>, vector<6x1xf32>
    %c0_26 = arith.constant 0 : index
    %c0_27 = arith.constant 0 : index
    %c0_28 = arith.constant 0 : index
    %38 = vector.load %arg1[%c0_26, %c0_27, %c0_28] : memref<2x2x32xf32, #tpu.memory_space<vmem>>, vector<1x2x32xf32>
    %39 = vector.shape_cast %38 : vector<1x2x32xf32> to vector<2x32xf32>
    %40 = arith.truncf %39 : vector<2x32xf32> to vector<2x32xbf16>
    %41 = arith.extf %40 : vector<2x32xbf16> to vector<2x32xf32>
    %42 = arith.subf %39, %41 : vector<2x32xf32>
    %43 = arith.truncf %42 : vector<2x32xf32> to vector<2x32xbf16>
    %44 = arith.extf %43 : vector<2x32xbf16> to vector<2x32xf32>
    %45 = arith.subf %42, %44 : vector<2x32xf32>
    %46 = arith.truncf %45 : vector<2x32xf32> to vector<2x32xbf16>
    %47 = tpu.concatenate %40, %43, %46 in 0 : vector<2x32xbf16>, vector<2x32xbf16>, vector<2x32xbf16> -> vector<6x32xbf16>
    %cst_29 = arith.constant dense<0.000000e+00> : vector<6x256xf32>
    %48 = tpu.matmul %47, %7, %cst_29 {dimension_numbers = #tpu.dot_dimension_numbers<[1], [0], [0], [1], [0, 0, 1, 1], [], []>} : vector<6x32xbf16>, vector<32x256xbf16>, vector<6x256xf32> -> vector<6x256xf32>
    %49 = vector.extract_strided_slice %48 {offsets = [0, 0], sizes = [2, 256], strides = [1, 1]} : vector<6x256xf32> to vector<2x256xf32>
    %50 = vector.extract_strided_slice %48 {offsets = [2, 0], sizes = [2, 256], strides = [1, 1]} : vector<6x256xf32> to vector<2x256xf32>
    %51 = arith.addf %49, %50 : vector<2x256xf32>
    %52 = vector.extract_strided_slice %48 {offsets = [4, 0], sizes = [2, 256], strides = [1, 1]} : vector<6x256xf32> to vector<2x256xf32>
    %53 = arith.addf %51, %52 : vector<2x256xf32>
    %54 = vector.extract_strided_slice %53 {offsets = [0, 3], sizes = [2, 128], strides = [1, 1]} : vector<2x256xf32> to vector<2x128xf32>
    %55 = vector.extract_strided_slice %53 {offsets = [0, 2], sizes = [2, 128], strides = [1, 1]} : vector<2x256xf32> to vector<2x128xf32>
    %56 = vector.extract_strided_slice %53 {offsets = [0, 1], sizes = [2, 128], strides = [1, 1]} : vector<2x256xf32> to vector<2x128xf32>
    %57 = vector.extract_strided_slice %53 {offsets = [0, 0], sizes = [2, 128], strides = [1, 1]} : vector<2x256xf32> to vector<2x128xf32>
    %58 = tpu.concatenate %54, %55, %56, %57 in 0 : vector<2x128xf32>, vector<2x128xf32>, vector<2x128xf32>, vector<2x128xf32> -> vector<8x128xf32>
    %cst_30 = arith.constant dense<0.000000e+00> : vector<12x128xf32>
    %59 = tpu.matmul %32, %58, %cst_30 {dimension_numbers = #tpu.dot_dimension_numbers<[1], [0], [0], [1], [0, 0, 1, 1], [], []>, precision = #tpu.contract_precision<fp32>} : vector<12x8xf32>, vector<8x128xf32>, vector<12x128xf32> -> vector<12x128xf32>
    %60 = vector.broadcast %33 : vector<12x1xf32> to vector<12x128xf32>
    %61 = arith.addf %59, %60 : vector<12x128xf32>
    %62 = arith.negf %61 : vector<12x128xf32>
    %63 = math.exp %62 : vector<12x128xf32>
    %cst_31 = arith.constant 1.000000e+00 : f32
    %64 = vector.broadcast %cst_31 : f32 to vector<12x128xf32>
    %65 = arith.addf %64, %63 : vector<12x128xf32>
    %66 = arith.divf %64, %65 : vector<12x128xf32>
    %67 = arith.mulf %61, %66 : vector<12x128xf32>
    %68 = vector.extract_strided_slice %67 {offsets = [0, 0], sizes = [4, 128], strides = [1, 1]} : vector<12x128xf32> to vector<4x128xf32>
    %69 = vector.extract_strided_slice %67 {offsets = [4, 0], sizes = [4, 128], strides = [1, 1]} : vector<12x128xf32> to vector<4x128xf32>
    %70 = vector.extract_strided_slice %67 {offsets = [8, 0], sizes = [4, 128], strides = [1, 1]} : vector<12x128xf32> to vector<4x128xf32>
    %71 = tpu.concatenate %68, %69, %70 in 1 : vector<4x128xf32>, vector<4x128xf32>, vector<4x128xf32> -> vector<4x384xf32>
    %72 = arith.truncf %71 : vector<4x384xf32> to vector<4x384xbf16>
    %73 = arith.extf %72 : vector<4x384xbf16> to vector<4x384xf32>
    %74 = arith.subf %71, %73 : vector<4x384xf32>
    %75 = arith.truncf %74 : vector<4x384xf32> to vector<4x384xbf16>
    %76 = arith.extf %75 : vector<4x384xbf16> to vector<4x384xf32>
    %77 = arith.subf %74, %76 : vector<4x384xf32>
    %78 = arith.truncf %77 : vector<4x384xf32> to vector<4x384xbf16>
    %79 = tpu.concatenate %72, %75, %78 in 0 : vector<4x384xbf16>, vector<4x384xbf16>, vector<4x384xbf16> -> vector<12x384xbf16>
    %cst_32 = arith.constant dense<0.000000e+00> : vector<12x256xf32>
    %80 = tpu.matmul %79, %15, %cst_32 {dimension_numbers = #tpu.dot_dimension_numbers<[1], [0], [0], [1], [0, 0, 1, 1], [], []>} : vector<12x384xbf16>, vector<384x256xbf16>, vector<12x256xf32> -> vector<12x256xf32>
    %81 = vector.extract_strided_slice %80 {offsets = [0, 0], sizes = [4, 256], strides = [1, 1]} : vector<12x256xf32> to vector<4x256xf32>
    %82 = vector.extract_strided_slice %80 {offsets = [4, 0], sizes = [4, 256], strides = [1, 1]} : vector<12x256xf32> to vector<4x256xf32>
    %83 = arith.addf %81, %82 : vector<4x256xf32>
    %84 = vector.extract_strided_slice %80 {offsets = [8, 0], sizes = [4, 256], strides = [1, 1]} : vector<12x256xf32> to vector<4x256xf32>
    %85 = arith.addf %83, %84 : vector<4x256xf32>
    %86 = vector.extract_strided_slice %85 {offsets = [0, 15], sizes = [4, 128], strides = [1, 1]} : vector<4x256xf32> to vector<4x128xf32>
    %87 = vector.extract_strided_slice %85 {offsets = [0, 14], sizes = [4, 128], strides = [1, 1]} : vector<4x256xf32> to vector<4x128xf32>
    %88 = vector.extract_strided_slice %85 {offsets = [0, 13], sizes = [4, 128], strides = [1, 1]} : vector<4x256xf32> to vector<4x128xf32>
    %89 = vector.extract_strided_slice %85 {offsets = [0, 12], sizes = [4, 128], strides = [1, 1]} : vector<4x256xf32> to vector<4x128xf32>
    %90 = vector.extract_strided_slice %85 {offsets = [0, 11], sizes = [4, 128], strides = [1, 1]} : vector<4x256xf32> to vector<4x128xf32>
    %91 = vector.extract_strided_slice %85 {offsets = [0, 10], sizes = [4, 128], strides = [1, 1]} : vector<4x256xf32> to vector<4x128xf32>
    %92 = vector.extract_strided_slice %85 {offsets = [0, 9], sizes = [4, 128], strides = [1, 1]} : vector<4x256xf32> to vector<4x128xf32>
    %93 = vector.extract_strided_slice %85 {offsets = [0, 8], sizes = [4, 128], strides = [1, 1]} : vector<4x256xf32> to vector<4x128xf32>
    %94 = vector.extract_strided_slice %85 {offsets = [0, 7], sizes = [4, 128], strides = [1, 1]} : vector<4x256xf32> to vector<4x128xf32>
    %95 = vector.extract_strided_slice %85 {offsets = [0, 6], sizes = [4, 128], strides = [1, 1]} : vector<4x256xf32> to vector<4x128xf32>
    %96 = vector.extract_strided_slice %85 {offsets = [0, 5], sizes = [4, 128], strides = [1, 1]} : vector<4x256xf32> to vector<4x128xf32>
    %97 = vector.extract_strided_slice %85 {offsets = [0, 4], sizes = [4, 128], strides = [1, 1]} : vector<4x256xf32> to vector<4x128xf32>
    %98 = vector.extract_strided_slice %85 {offsets = [0, 3], sizes = [4, 128], strides = [1, 1]} : vector<4x256xf32> to vector<4x128xf32>
    %99 = vector.extract_strided_slice %85 {offsets = [0, 2], sizes = [4, 128], strides = [1, 1]} : vector<4x256xf32> to vector<4x128xf32>
    %100 = vector.extract_strided_slice %85 {offsets = [0, 1], sizes = [4, 128], strides = [1, 1]} : vector<4x256xf32> to vector<4x128xf32>
    %101 = vector.extract_strided_slice %85 {offsets = [0, 0], sizes = [4, 128], strides = [1, 1]} : vector<4x256xf32> to vector<4x128xf32>
    %102 = tpu.concatenate %86, %87, %88, %89, %90, %91, %92, %93, %94, %95, %96, %97, %98, %99, %100, %101 in 0 : vector<4x128xf32>, vector<4x128xf32>, vector<4x128xf32>, vector<4x128xf32>, vector<4x128xf32>, vector<4x128xf32>, vector<4x128xf32>, vector<4x128xf32>, vector<4x128xf32>, vector<4x128xf32>, vector<4x128xf32>, vector<4x128xf32>, vector<4x128xf32>, vector<4x128xf32>, vector<4x128xf32>, vector<4x128xf32> -> vector<64x128xf32>
    %cst_33 = arith.constant dense<0.000000e+00> : vector<8x128xf32>
    %103 = tpu.matmul %34, %102, %cst_33 {dimension_numbers = #tpu.dot_dimension_numbers<[1], [0], [0], [1], [0, 0, 1, 1], [], []>, precision = #tpu.contract_precision<fp32>} : vector<8x64xf32>, vector<64x128xf32>, vector<8x128xf32> -> vector<8x128xf32>
    %104 = vector.broadcast %35 : vector<8x1xf32> to vector<8x128xf32>
    %105 = arith.addf %103, %104 : vector<8x128xf32>
    %106 = arith.negf %105 : vector<8x128xf32>
    %107 = math.exp %106 : vector<8x128xf32>
    %cst_34 = arith.constant 1.000000e+00 : f32
    %108 = vector.broadcast %cst_34 : f32 to vector<8x128xf32>
    %109 = arith.addf %108, %107 : vector<8x128xf32>
    %110 = arith.divf %108, %109 : vector<8x128xf32>
    %111 = arith.mulf %105, %110 : vector<8x128xf32>
    %112 = vector.extract_strided_slice %111 {offsets = [0, 0], sizes = [4, 128], strides = [1, 1]} : vector<8x128xf32> to vector<4x128xf32>
    %113 = vector.extract_strided_slice %111 {offsets = [4, 0], sizes = [4, 128], strides = [1, 1]} : vector<8x128xf32> to vector<4x128xf32>
    %114 = tpu.concatenate %112, %113 in 1 : vector<4x128xf32>, vector<4x128xf32> -> vector<4x256xf32>
    %115 = arith.truncf %114 : vector<4x256xf32> to vector<4x256xbf16>
    %116 = arith.extf %115 : vector<4x256xbf16> to vector<4x256xf32>
    %117 = arith.subf %114, %116 : vector<4x256xf32>
    %118 = arith.truncf %117 : vector<4x256xf32> to vector<4x256xbf16>
    %119 = arith.extf %118 : vector<4x256xbf16> to vector<4x256xf32>
    %120 = arith.subf %117, %119 : vector<4x256xf32>
    %121 = arith.truncf %120 : vector<4x256xf32> to vector<4x256xbf16>
    %122 = tpu.concatenate %115, %118, %121 in 0 : vector<4x256xbf16>, vector<4x256xbf16>, vector<4x256xbf16> -> vector<12x256xbf16>
    %cst_35 = arith.constant dense<0.000000e+00> : vector<12x384xf32>
    %123 = tpu.matmul %122, %23, %cst_35 {dimension_numbers = #tpu.dot_dimension_numbers<[1], [0], [0], [1], [0, 0, 1, 1], [], []>} : vector<12x256xbf16>, vector<256x384xbf16>, vector<12x384xf32> -> vector<12x384xf32>
    %124 = vector.extract_strided_slice %123 {offsets = [0, 0], sizes = [4, 384], strides = [1, 1]} : vector<12x384xf32> to vector<4x384xf32>
    %125 = vector.extract_strided_slice %123 {offsets = [4, 0], sizes = [4, 384], strides = [1, 1]} : vector<12x384xf32> to vector<4x384xf32>
    %126 = arith.addf %124, %125 : vector<4x384xf32>
    %127 = vector.extract_strided_slice %123 {offsets = [8, 0], sizes = [4, 384], strides = [1, 1]} : vector<12x384xf32> to vector<4x384xf32>
    %128 = arith.addf %126, %127 : vector<4x384xf32>
    %129 = vector.extract_strided_slice %128 {offsets = [0, 15], sizes = [4, 256], strides = [1, 1]} : vector<4x384xf32> to vector<4x256xf32>
    %130 = vector.extract_strided_slice %128 {offsets = [0, 14], sizes = [4, 256], strides = [1, 1]} : vector<4x384xf32> to vector<4x256xf32>
    %131 = vector.extract_strided_slice %128 {offsets = [0, 13], sizes = [4, 256], strides = [1, 1]} : vector<4x384xf32> to vector<4x256xf32>
    %132 = vector.extract_strided_slice %128 {offsets = [0, 12], sizes = [4, 256], strides = [1, 1]} : vector<4x384xf32> to vector<4x256xf32>
    %133 = vector.extract_strided_slice %128 {offsets = [0, 11], sizes = [4, 256], strides = [1, 1]} : vector<4x384xf32> to vector<4x256xf32>
    %134 = vector.extract_strided_slice %128 {offsets = [0, 10], sizes = [4, 256], strides = [1, 1]} : vector<4x384xf32> to vector<4x256xf32>
    %135 = vector.extract_strided_slice %128 {offsets = [0, 9], sizes = [4, 256], strides = [1, 1]} : vector<4x384xf32> to vector<4x256xf32>
    %136 = vector.extract_strided_slice %128 {offsets = [0, 8], sizes = [4, 256], strides = [1, 1]} : vector<4x384xf32> to vector<4x256xf32>
    %137 = vector.extract_strided_slice %128 {offsets = [0, 7], sizes = [4, 256], strides = [1, 1]} : vector<4x384xf32> to vector<4x256xf32>
    %138 = vector.extract_strided_slice %128 {offsets = [0, 6], sizes = [4, 256], strides = [1, 1]} : vector<4x384xf32> to vector<4x256xf32>
    %139 = vector.extract_strided_slice %128 {offsets = [0, 5], sizes = [4, 256], strides = [1, 1]} : vector<4x384xf32> to vector<4x256xf32>
    %140 = vector.extract_strided_slice %128 {offsets = [0, 4], sizes = [4, 256], strides = [1, 1]} : vector<4x384xf32> to vector<4x256xf32>
    %141 = vector.extract_strided_slice %128 {offsets = [0, 3], sizes = [4, 256], strides = [1, 1]} : vector<4x384xf32> to vector<4x256xf32>
    %142 = vector.extract_strided_slice %128 {offsets = [0, 2], sizes = [4, 256], strides = [1, 1]} : vector<4x384xf32> to vector<4x256xf32>
    %143 = vector.extract_strided_slice %128 {offsets = [0, 1], sizes = [4, 256], strides = [1, 1]} : vector<4x384xf32> to vector<4x256xf32>
    %144 = vector.extract_strided_slice %128 {offsets = [0, 0], sizes = [4, 256], strides = [1, 1]} : vector<4x384xf32> to vector<4x256xf32>
    %145 = tpu.concatenate %129, %130, %131, %132, %133, %134, %135, %136, %137, %138, %139, %140, %141, %142, %143, %144 in 0 : vector<4x256xf32>, vector<4x256xf32>, vector<4x256xf32>, vector<4x256xf32>, vector<4x256xf32>, vector<4x256xf32>, vector<4x256xf32>, vector<4x256xf32>, vector<4x256xf32>, vector<4x256xf32>, vector<4x256xf32>, vector<4x256xf32>, vector<4x256xf32>, vector<4x256xf32>, vector<4x256xf32>, vector<4x256xf32> -> vector<64x256xf32>
    %cst_36 = arith.constant dense<0.000000e+00> : vector<6x256xf32>
    %146 = tpu.matmul %36, %145, %cst_36 {dimension_numbers = #tpu.dot_dimension_numbers<[1], [0], [0], [1], [0, 0, 1, 1], [], []>, precision = #tpu.contract_precision<fp32>} : vector<6x64xf32>, vector<64x256xf32>, vector<6x256xf32> -> vector<6x256xf32>
    %147 = vector.broadcast %37 : vector<6x1xf32> to vector<6x256xf32>
    %148 = arith.addf %146, %147 : vector<6x256xf32>
    %149 = vector.extract_strided_slice %148 {offsets = [0, 0], sizes = [3, 256], strides = [1, 1]} : vector<6x256xf32> to vector<3x256xf32>
    %150 = vector.extract_strided_slice %148 {offsets = [3, 0], sizes = [3, 256], strides = [1, 1]} : vector<6x256xf32> to vector<3x256xf32>
    %151 = tpu.concatenate %149, %150 in 1 : vector<3x256xf32>, vector<3x256xf32> -> vector<3x512xf32>
    %152 = arith.truncf %151 : vector<3x512xf32> to vector<3x512xbf16>
    %153 = arith.extf %152 : vector<3x512xbf16> to vector<3x512xf32>
    %154 = arith.subf %151, %153 : vector<3x512xf32>
    %155 = arith.truncf %154 : vector<3x512xf32> to vector<3x512xbf16>
    %156 = arith.extf %155 : vector<3x512xbf16> to vector<3x512xf32>
    %157 = arith.subf %154, %156 : vector<3x512xf32>
    %158 = arith.truncf %157 : vector<3x512xf32> to vector<3x512xbf16>
    %159 = tpu.concatenate %152, %155, %158 in 0 : vector<3x512xbf16>, vector<3x512xbf16>, vector<3x512xbf16> -> vector<9x512xbf16>
    %cst_37 = arith.constant dense<0.000000e+00> : vector<9x448xf32>
    %160 = tpu.matmul %159, %31, %cst_37 {dimension_numbers = #tpu.dot_dimension_numbers<[1], [0], [0], [1], [0, 0, 1, 1], [], []>} : vector<9x512xbf16>, vector<512x448xbf16>, vector<9x448xf32> -> vector<9x448xf32>
    %161 = vector.extract_strided_slice %160 {offsets = [0, 0], sizes = [3, 448], strides = [1, 1]} : vector<9x448xf32> to vector<3x448xf32>
    %162 = vector.extract_strided_slice %160 {offsets = [3, 0], sizes = [3, 448], strides = [1, 1]} : vector<9x448xf32> to vector<3x448xf32>
    %163 = arith.addf %161, %162 : vector<3x448xf32>
    %164 = vector.extract_strided_slice %160 {offsets = [6, 0], sizes = [3, 448], strides = [1, 1]} : vector<9x448xf32> to vector<3x448xf32>
    %165 = arith.addf %163, %164 : vector<3x448xf32>
    %c0_38 = arith.constant 0 : index
    %c0_39 = arith.constant 0 : index
    %c0_40 = arith.constant 0 : index
    %166 = vector.load %arg12[%c0_38, %c0_39, %c0_40] : memref<2x3x448xf32, #tpu.memory_space<vmem>>, vector<1x3x448xf32>
    %167 = vector.shape_cast %166 : vector<1x3x448xf32> to vector<3x448xf32>
    %168 = vector.shape_cast %165 : vector<3x448xf32> to vector<1x3x448xf32>
    tpu.vector_store %arg12[%c0_38, %c0_39, %c0_40], %168 {strides = array<i32>} : memref<2x3x448xf32, #tpu.memory_space<vmem>>, vector<1x3x448xf32>,
    %c1 = arith.constant 1 : index
    %c0_41 = arith.constant 0 : index
    %c0_42 = arith.constant 0 : index
    %169 = vector.load %arg1[%c1, %c0_41, %c0_42] : memref<2x2x32xf32, #tpu.memory_space<vmem>>, vector<1x2x32xf32>
    %170 = vector.shape_cast %169 : vector<1x2x32xf32> to vector<2x32xf32>
    %171 = arith.truncf %170 : vector<2x32xf32> to vector<2x32xbf16>
    %172 = arith.extf %171 : vector<2x32xbf16> to vector<2x32xf32>
    %173 = arith.subf %170, %172 : vector<2x32xf32>
    %174 = arith.truncf %173 : vector<2x32xf32> to vector<2x32xbf16>
    %175 = arith.extf %174 : vector<2x32xbf16> to vector<2x32xf32>
    %176 = arith.subf %173, %175 : vector<2x32xf32>
    %177 = arith.truncf %176 : vector<2x32xf32> to vector<2x32xbf16>
    %178 = tpu.concatenate %171, %174, %177 in 0 : vector<2x32xbf16>, vector<2x32xbf16>, vector<2x32xbf16> -> vector<6x32xbf16>
    %cst_43 = arith.constant dense<0.000000e+00> : vector<6x256xf32>
    %179 = tpu.matmul %178, %7, %cst_43 {dimension_numbers = #tpu.dot_dimension_numbers<[1], [0], [0], [1], [0, 0, 1, 1], [], []>} : vector<6x32xbf16>, vector<32x256xbf16>, vector<6x256xf32> -> vector<6x256xf32>
    %180 = vector.extract_strided_slice %179 {offsets = [0, 0], sizes = [2, 256], strides = [1, 1]} : vector<6x256xf32> to vector<2x256xf32>
    %181 = vector.extract_strided_slice %179 {offsets = [2, 0], sizes = [2, 256], strides = [1, 1]} : vector<6x256xf32> to vector<2x256xf32>
    %182 = arith.addf %180, %181 : vector<2x256xf32>
    %183 = vector.extract_strided_slice %179 {offsets = [4, 0], sizes = [2, 256], strides = [1, 1]} : vector<6x256xf32> to vector<2x256xf32>
    %184 = arith.addf %182, %183 : vector<2x256xf32>
    %185 = vector.extract_strided_slice %184 {offsets = [0, 3], sizes = [2, 128], strides = [1, 1]} : vector<2x256xf32> to vector<2x128xf32>
    %186 = vector.extract_strided_slice %184 {offsets = [0, 2], sizes = [2, 128], strides = [1, 1]} : vector<2x256xf32> to vector<2x128xf32>
    %187 = vector.extract_strided_slice %184 {offsets = [0, 1], sizes = [2, 128], strides = [1, 1]} : vector<2x256xf32> to vector<2x128xf32>
    %188 = vector.extract_strided_slice %184 {offsets = [0, 0], sizes = [2, 128], strides = [1, 1]} : vector<2x256xf32> to vector<2x128xf32>
    %189 = tpu.concatenate %185, %186, %187, %188 in 0 : vector<2x128xf32>, vector<2x128xf32>, vector<2x128xf32>, vector<2x128xf32> -> vector<8x128xf32>
    %cst_44 = arith.constant dense<0.000000e+00> : vector<12x128xf32>
    %190 = tpu.matmul %32, %189, %cst_44 {dimension_numbers = #tpu.dot_dimension_numbers<[1], [0], [0], [1], [0, 0, 1, 1], [], []>, precision = #tpu.contract_precision<fp32>} : vector<12x8xf32>, vector<8x128xf32>, vector<12x128xf32> -> vector<12x128xf32>
    %191 = vector.broadcast %33 : vector<12x1xf32> to vector<12x128xf32>
    %192 = arith.addf %190, %191 : vector<12x128xf32>
    %193 = arith.negf %192 : vector<12x128xf32>
    %194 = math.exp %193 : vector<12x128xf32>
    %cst_45 = arith.constant 1.000000e+00 : f32
    %195 = vector.broadcast %cst_45 : f32 to vector<12x128xf32>
    %196 = arith.addf %195, %194 : vector<12x128xf32>
    %197 = arith.divf %195, %196 : vector<12x128xf32>
    %198 = arith.mulf %192, %197 : vector<12x128xf32>
    %199 = vector.extract_strided_slice %198 {offsets = [0, 0], sizes = [4, 128], strides = [1, 1]} : vector<12x128xf32> to vector<4x128xf32>
    %200 = vector.extract_strided_slice %198 {offsets = [4, 0], sizes = [4, 128], strides = [1, 1]} : vector<12x128xf32> to vector<4x128xf32>
    %201 = vector.extract_strided_slice %198 {offsets = [8, 0], sizes = [4, 128], strides = [1, 1]} : vector<12x128xf32> to vector<4x128xf32>
    %202 = tpu.concatenate %199, %200, %201 in 1 : vector<4x128xf32>, vector<4x128xf32>, vector<4x128xf32> -> vector<4x384xf32>
    %203 = arith.truncf %202 : vector<4x384xf32> to vector<4x384xbf16>
    %204 = arith.extf %203 : vector<4x384xbf16> to vector<4x384xf32>
    %205 = arith.subf %202, %204 : vector<4x384xf32>
    %206 = arith.truncf %205 : vector<4x384xf32> to vector<4x384xbf16>
    %207 = arith.extf %206 : vector<4x384xbf16> to vector<4x384xf32>
    %208 = arith.subf %205, %207 : vector<4x384xf32>
    %209 = arith.truncf %208 : vector<4x384xf32> to vector<4x384xbf16>
    %210 = tpu.concatenate %203, %206, %209 in 0 : vector<4x384xbf16>, vector<4x384xbf16>, vector<4x384xbf16> -> vector<12x384xbf16>
    %cst_46 = arith.constant dense<0.000000e+00> : vector<12x256xf32>
    %211 = tpu.matmul %210, %15, %cst_46 {dimension_numbers = #tpu.dot_dimension_numbers<[1], [0], [0], [1], [0, 0, 1, 1], [], []>} : vector<12x384xbf16>, vector<384x256xbf16>, vector<12x256xf32> -> vector<12x256xf32>
    %212 = vector.extract_strided_slice %211 {offsets = [0, 0], sizes = [4, 256], strides = [1, 1]} : vector<12x256xf32> to vector<4x256xf32>
    %213 = vector.extract_strided_slice %211 {offsets = [4, 0], sizes = [4, 256], strides = [1, 1]} : vector<12x256xf32> to vector<4x256xf32>
    %214 = arith.addf %212, %213 : vector<4x256xf32>
    %215 = vector.extract_strided_slice %211 {offsets = [8, 0], sizes = [4, 256], strides = [1, 1]} : vector<12x256xf32> to vector<4x256xf32>
    %216 = arith.addf %214, %215 : vector<4x256xf32>
    %217 = vector.extract_strided_slice %216 {offsets = [0, 15], sizes = [4, 128], strides = [1, 1]} : vector<4x256xf32> to vector<4x128xf32>
    %218 = vector.extract_strided_slice %216 {offsets = [0, 14], sizes = [4, 128], strides = [1, 1]} : vector<4x256xf32> to vector<4x128xf32>
    %219 = vector.extract_strided_slice %216 {offsets = [0, 13], sizes = [4, 128], strides = [1, 1]} : vector<4x256xf32> to vector<4x128xf32>
    %220 = vector.extract_strided_slice %216 {offsets = [0, 12], sizes = [4, 128], strides = [1, 1]} : vector<4x256xf32> to vector<4x128xf32>
    %221 = vector.extract_strided_slice %216 {offsets = [0, 11], sizes = [4, 128], strides = [1, 1]} : vector<4x256xf32> to vector<4x128xf32>
    %222 = vector.extract_strided_slice %216 {offsets = [0, 10], sizes = [4, 128], strides = [1, 1]} : vector<4x256xf32> to vector<4x128xf32>
    %223 = vector.extract_strided_slice %216 {offsets = [0, 9], sizes = [4, 128], strides = [1, 1]} : vector<4x256xf32> to vector<4x128xf32>
    %224 = vector.extract_strided_slice %216 {offsets = [0, 8], sizes = [4, 128], strides = [1, 1]} : vector<4x256xf32> to vector<4x128xf32>
    %225 = vector.extract_strided_slice %216 {offsets = [0, 7], sizes = [4, 128], strides = [1, 1]} : vector<4x256xf32> to vector<4x128xf32>
    %226 = vector.extract_strided_slice %216 {offsets = [0, 6], sizes = [4, 128], strides = [1, 1]} : vector<4x256xf32> to vector<4x128xf32>
    %227 = vector.extract_strided_slice %216 {offsets = [0, 5], sizes = [4, 128], strides = [1, 1]} : vector<4x256xf32> to vector<4x128xf32>
    %228 = vector.extract_strided_slice %216 {offsets = [0, 4], sizes = [4, 128], strides = [1, 1]} : vector<4x256xf32> to vector<4x128xf32>
    %229 = vector.extract_strided_slice %216 {offsets = [0, 3], sizes = [4, 128], strides = [1, 1]} : vector<4x256xf32> to vector<4x128xf32>
    %230 = vector.extract_strided_slice %216 {offsets = [0, 2], sizes = [4, 128], strides = [1, 1]} : vector<4x256xf32> to vector<4x128xf32>
    %231 = vector.extract_strided_slice %216 {offsets = [0, 1], sizes = [4, 128], strides = [1, 1]} : vector<4x256xf32> to vector<4x128xf32>
    %232 = vector.extract_strided_slice %216 {offsets = [0, 0], sizes = [4, 128], strides = [1, 1]} : vector<4x256xf32> to vector<4x128xf32>
    %233 = tpu.concatenate %217, %218, %219, %220, %221, %222, %223, %224, %225, %226, %227, %228, %229, %230, %231, %232 in 0 : vector<4x128xf32>, vector<4x128xf32>, vector<4x128xf32>, vector<4x128xf32>, vector<4x128xf32>, vector<4x128xf32>, vector<4x128xf32>, vector<4x128xf32>, vector<4x128xf32>, vector<4x128xf32>, vector<4x128xf32>, vector<4x128xf32>, vector<4x128xf32>, vector<4x128xf32>, vector<4x128xf32>, vector<4x128xf32> -> vector<64x128xf32>
    %cst_47 = arith.constant dense<0.000000e+00> : vector<8x128xf32>
    %234 = tpu.matmul %34, %233, %cst_47 {dimension_numbers = #tpu.dot_dimension_numbers<[1], [0], [0], [1], [0, 0, 1, 1], [], []>, precision = #tpu.contract_precision<fp32>} : vector<8x64xf32>, vector<64x128xf32>, vector<8x128xf32> -> vector<8x128xf32>
    %235 = vector.broadcast %35 : vector<8x1xf32> to vector<8x128xf32>
    %236 = arith.addf %234, %235 : vector<8x128xf32>
    %237 = arith.negf %236 : vector<8x128xf32>
    %238 = math.exp %237 : vector<8x128xf32>
    %cst_48 = arith.constant 1.000000e+00 : f32
    %239 = vector.broadcast %cst_48 : f32 to vector<8x128xf32>
    %240 = arith.addf %239, %238 : vector<8x128xf32>
    %241 = arith.divf %239, %240 : vector<8x128xf32>
    %242 = arith.mulf %236, %241 : vector<8x128xf32>
    %243 = vector.extract_strided_slice %242 {offsets = [0, 0], sizes = [4, 128], strides = [1, 1]} : vector<8x128xf32> to vector<4x128xf32>
    %244 = vector.extract_strided_slice %242 {offsets = [4, 0], sizes = [4, 128], strides = [1, 1]} : vector<8x128xf32> to vector<4x128xf32>
    %245 = tpu.concatenate %243, %244 in 1 : vector<4x128xf32>, vector<4x128xf32> -> vector<4x256xf32>
    %246 = arith.truncf %245 : vector<4x256xf32> to vector<4x256xbf16>
    %247 = arith.extf %246 : vector<4x256xbf16> to vector<4x256xf32>
    %248 = arith.subf %245, %247 : vector<4x256xf32>
    %249 = arith.truncf %248 : vector<4x256xf32> to vector<4x256xbf16>
    %250 = arith.extf %249 : vector<4x256xbf16> to vector<4x256xf32>
    %251 = arith.subf %248, %250 : vector<4x256xf32>
    %252 = arith.truncf %251 : vector<4x256xf32> to vector<4x256xbf16>
    %253 = tpu.concatenate %246, %249, %252 in 0 : vector<4x256xbf16>, vector<4x256xbf16>, vector<4x256xbf16> -> vector<12x256xbf16>
    %cst_49 = arith.constant dense<0.000000e+00> : vector<12x384xf32>
    %254 = tpu.matmul %253, %23, %cst_49 {dimension_numbers = #tpu.dot_dimension_numbers<[1], [0], [0], [1], [0, 0, 1, 1], [], []>} : vector<12x256xbf16>, vector<256x384xbf16>, vector<12x384xf32> -> vector<12x384xf32>
    %255 = vector.extract_strided_slice %254 {offsets = [0, 0], sizes = [4, 384], strides = [1, 1]} : vector<12x384xf32> to vector<4x384xf32>
    %256 = vector.extract_strided_slice %254 {offsets = [4, 0], sizes = [4, 384], strides = [1, 1]} : vector<12x384xf32> to vector<4x384xf32>
    %257 = arith.addf %255, %256 : vector<4x384xf32>
    %258 = vector.extract_strided_slice %254 {offsets = [8, 0], sizes = [4, 384], strides = [1, 1]} : vector<12x384xf32> to vector<4x384xf32>
    %259 = arith.addf %257, %258 : vector<4x384xf32>
    %260 = vector.extract_strided_slice %259 {offsets = [0, 15], sizes = [4, 256], strides = [1, 1]} : vector<4x384xf32> to vector<4x256xf32>
    %261 = vector.extract_strided_slice %259 {offsets = [0, 14], sizes = [4, 256], strides = [1, 1]} : vector<4x384xf32> to vector<4x256xf32>
    %262 = vector.extract_strided_slice %259 {offsets = [0, 13], sizes = [4, 256], strides = [1, 1]} : vector<4x384xf32> to vector<4x256xf32>
    %263 = vector.extract_strided_slice %259 {offsets = [0, 12], sizes = [4, 256], strides = [1, 1]} : vector<4x384xf32> to vector<4x256xf32>
    %264 = vector.extract_strided_slice %259 {offsets = [0, 11], sizes = [4, 256], strides = [1, 1]} : vector<4x384xf32> to vector<4x256xf32>
    %265 = vector.extract_strided_slice %259 {offsets = [0, 10], sizes = [4, 256], strides = [1, 1]} : vector<4x384xf32> to vector<4x256xf32>
    %266 = vector.extract_strided_slice %259 {offsets = [0, 9], sizes = [4, 256], strides = [1, 1]} : vector<4x384xf32> to vector<4x256xf32>
    %267 = vector.extract_strided_slice %259 {offsets = [0, 8], sizes = [4, 256], strides = [1, 1]} : vector<4x384xf32> to vector<4x256xf32>
    %268 = vector.extract_strided_slice %259 {offsets = [0, 7], sizes = [4, 256], strides = [1, 1]} : vector<4x384xf32> to vector<4x256xf32>
    %269 = vector.extract_strided_slice %259 {offsets = [0, 6], sizes = [4, 256], strides = [1, 1]} : vector<4x384xf32> to vector<4x256xf32>
    %270 = vector.extract_strided_slice %259 {offsets = [0, 5], sizes = [4, 256], strides = [1, 1]} : vector<4x384xf32> to vector<4x256xf32>
    %271 = vector.extract_strided_slice %259 {offsets = [0, 4], sizes = [4, 256], strides = [1, 1]} : vector<4x384xf32> to vector<4x256xf32>
    %272 = vector.extract_strided_slice %259 {offsets = [0, 3], sizes = [4, 256], strides = [1, 1]} : vector<4x384xf32> to vector<4x256xf32>
    %273 = vector.extract_strided_slice %259 {offsets = [0, 2], sizes = [4, 256], strides = [1, 1]} : vector<4x384xf32> to vector<4x256xf32>
    %274 = vector.extract_strided_slice %259 {offsets = [0, 1], sizes = [4, 256], strides = [1, 1]} : vector<4x384xf32> to vector<4x256xf32>
    %275 = vector.extract_strided_slice %259 {offsets = [0, 0], sizes = [4, 256], strides = [1, 1]} : vector<4x384xf32> to vector<4x256xf32>
    %276 = tpu.concatenate %260, %261, %262, %263, %264, %265, %266, %267, %268, %269, %270, %271, %272, %273, %274, %275 in 0 : vector<4x256xf32>, vector<4x256xf32>, vector<4x256xf32>, vector<4x256xf32>, vector<4x256xf32>, vector<4x256xf32>, vector<4x256xf32>, vector<4x256xf32>, vector<4x256xf32>, vector<4x256xf32>, vector<4x256xf32>, vector<4x256xf32>, vector<4x256xf32>, vector<4x256xf32>, vector<4x256xf32>, vector<4x256xf32> -> vector<64x256xf32>
    %cst_50 = arith.constant dense<0.000000e+00> : vector<6x256xf32>
    %277 = tpu.matmul %36, %276, %cst_50 {dimension_numbers = #tpu.dot_dimension_numbers<[1], [0], [0], [1], [0, 0, 1, 1], [], []>, precision = #tpu.contract_precision<fp32>} : vector<6x64xf32>, vector<64x256xf32>, vector<6x256xf32> -> vector<6x256xf32>
    %278 = vector.broadcast %37 : vector<6x1xf32> to vector<6x256xf32>
    %279 = arith.addf %277, %278 : vector<6x256xf32>
    %280 = vector.extract_strided_slice %279 {offsets = [0, 0], sizes = [3, 256], strides = [1, 1]} : vector<6x256xf32> to vector<3x256xf32>
    %281 = vector.extract_strided_slice %279 {offsets = [3, 0], sizes = [3, 256], strides = [1, 1]} : vector<6x256xf32> to vector<3x256xf32>
    %282 = tpu.concatenate %280, %281 in 1 : vector<3x256xf32>, vector<3x256xf32> -> vector<3x512xf32>
    %283 = arith.truncf %282 : vector<3x512xf32> to vector<3x512xbf16>
    %284 = arith.extf %283 : vector<3x512xbf16> to vector<3x512xf32>
    %285 = arith.subf %282, %284 : vector<3x512xf32>
    %286 = arith.truncf %285 : vector<3x512xf32> to vector<3x512xbf16>
    %287 = arith.extf %286 : vector<3x512xbf16> to vector<3x512xf32>
    %288 = arith.subf %285, %287 : vector<3x512xf32>
    %289 = arith.truncf %288 : vector<3x512xf32> to vector<3x512xbf16>
    %290 = tpu.concatenate %283, %286, %289 in 0 : vector<3x512xbf16>, vector<3x512xbf16>, vector<3x512xbf16> -> vector<9x512xbf16>
    %cst_51 = arith.constant dense<0.000000e+00> : vector<9x448xf32>
    %291 = tpu.matmul %290, %31, %cst_51 {dimension_numbers = #tpu.dot_dimension_numbers<[1], [0], [0], [1], [0, 0, 1, 1], [], []>} : vector<9x512xbf16>, vector<512x448xbf16>, vector<9x448xf32> -> vector<9x448xf32>
    %292 = vector.extract_strided_slice %291 {offsets = [0, 0], sizes = [3, 448], strides = [1, 1]} : vector<9x448xf32> to vector<3x448xf32>
    %293 = vector.extract_strided_slice %291 {offsets = [3, 0], sizes = [3, 448], strides = [1, 1]} : vector<9x448xf32> to vector<3x448xf32>
    %294 = arith.addf %292, %293 : vector<3x448xf32>
    %295 = vector.extract_strided_slice %291 {offsets = [6, 0], sizes = [3, 448], strides = [1, 1]} : vector<9x448xf32> to vector<3x448xf32>
    %296 = arith.addf %294, %295 : vector<3x448xf32>
    %c1_52 = arith.constant 1 : index
    %c0_53 = arith.constant 0 : index
    %c0_54 = arith.constant 0 : index
    %297 = vector.load %arg12[%c1_52, %c0_53, %c0_54] : memref<2x3x448xf32, #tpu.memory_space<vmem>>, vector<1x3x448xf32>
    %298 = vector.shape_cast %297 : vector<1x3x448xf32> to vector<3x448xf32>
    %299 = vector.shape_cast %296 : vector<3x448xf32> to vector<1x3x448xf32>
    tpu.vector_store %arg12[%c1_52, %c0_53, %c0_54], %299 {strides = array<i32>} : memref<2x3x448xf32, #tpu.memory_space<vmem>>, vector<1x3x448xf32>,
    return
  }
  func.func @transform_0(%arg0: i32) -> (i32, i32, i32) {
    %c0_i32 = arith.constant 0 : i32
    %c0_i32_0 = arith.constant 0 : i32
    %c0_i32_1 = arith.constant 0 : i32
    return %arg0, %c0_i32, %c0_i32_0 : i32, i32, i32
  }
  func.func @transform_1(%arg0: i32) -> (i32, i32) {
    %c0_i32 = arith.constant 0 : i32
    %c0_i32_0 = arith.constant 0 : i32
    %c0_i32_1 = arith.constant 0 : i32
    return %c0_i32, %c0_i32_0 : i32, i32
  }
  func.func @transform_2(%arg0: i32) -> (i32, i32) {
    %c0_i32 = arith.constant 0 : i32
    %c0_i32_0 = arith.constant 0 : i32
    %c0_i32_1 = arith.constant 0 : i32
    return %c0_i32, %c0_i32_0 : i32, i32
  }
  func.func @transform_3(%arg0: i32) -> (i32, i32) {
    %c0_i32 = arith.constant 0 : i32
    %c0_i32_0 = arith.constant 0 : i32
    %c0_i32_1 = arith.constant 0 : i32
    return %c0_i32, %c0_i32_0 : i32, i32
  }
  func.func @transform_4(%arg0: i32) -> (i32, i32) {
    %c0_i32 = arith.constant 0 : i32
    %c0_i32_0 = arith.constant 0 : i32
    %c0_i32_1 = arith.constant 0 : i32
    return %c0_i32, %c0_i32_0 : i32, i32
  }
  func.func @transform_5(%arg0: i32) -> (i32, i32) {
    %c0_i32 = arith.constant 0 : i32
    %c0_i32_0 = arith.constant 0 : i32
    %c0_i32_1 = arith.constant 0 : i32
    return %c0_i32, %c0_i32_0 : i32, i32
  }
  func.func @transform_6(%arg0: i32) -> (i32, i32) {
    %c0_i32 = arith.constant 0 : i32
    %c0_i32_0 = arith.constant 0 : i32
    %c0_i32_1 = arith.constant 0 : i32
    return %c0_i32, %c0_i32_0 : i32, i32
  }
  func.func @transform_7(%arg0: i32) -> (i32, i32) {
    %c0_i32 = arith.constant 0 : i32
    %c0_i32_0 = arith.constant 0 : i32
    %c0_i32_1 = arith.constant 0 : i32
    return %c0_i32, %c0_i32_0 : i32, i32
  }
  func.func @transform_8(%arg0: i32) -> (i32, i32) {
    %c0_i32 = arith.constant 0 : i32
    %c0_i32_0 = arith.constant 0 : i32
    %c0_i32_1 = arith.constant 0 : i32
    return %c0_i32, %c0_i32_0 : i32, i32
  }
  func.func @transform_9(%arg0: i32) -> (i32, i32) {
    %c0_i32 = arith.constant 0 : i32
    %c0_i32_0 = arith.constant 0 : i32
    %c0_i32_1 = arith.constant 0 : i32
    return %c0_i32, %c0_i32_0 : i32, i32
  }
  func.func @transform_10(%arg0: i32) -> (i32, i32) {
    %c0_i32 = arith.constant 0 : i32
    %c0_i32_0 = arith.constant 0 : i32
    %c0_i32_1 = arith.constant 0 : i32
    return %c0_i32, %c0_i32_0 : i32, i32
  }
  func.func @transform_11(%arg0: i32) -> (i32, i32, i32) {
    %c0_i32 = arith.constant 0 : i32
    %c0_i32_0 = arith.constant 0 : i32
    %c0_i32_1 = arith.constant 0 : i32
    return %arg0, %c0_i32, %c0_i32_0 : i32, i32, i32
  }
}

</mosaic_0001>

<bundles_post_ra>
// kernel: forward.1
= control target key start
LH: loop header
LB: loop body
LE: loop exit
PB: predicated region body
PF: predicated region fallthrough
CT: control target
= control target key end

     0   :  { %v40_v0 = vlaneseq  ;;  %v14168_v1 = vmov 0   ;;  %v14730_v14 = vmov 0  ;;  %v14256_v15 = vmov 1.0|1.0   ;;  %s9033_s21 = smov 1   ;;  %s9034_s22 = smov 3   ;;  %s14132_s1 = inlined_call_operand.vmem [shape: s32[1,256], index: 1, kind: input, shape index: {}]   ;;  %s14133_s0 = inlined_call_operand.vmem [shape: f32[2,2,32], index: 0, kind: input, shape index: {}]   ;;  %s14134_s2 = inlined_call_operand.vmem [shape: f32[12,8], index: 2, kind: input, shape index: {}]   ;;  %s14135_s4 = inlined_call_operand.vmem [shape: s32[1,256], index: 4, kind: input, shape index: {}]   ;;  %s14136_s3 = inlined_call_operand.vmem [shape: f32[12,1], index: 3, kind: input, shape index: {}]   ;;  %s14137_s6 = inlined_call_operand.vmem [shape: f32[8,1], index: 6, kind: input, shape index: {}]   ;;  %s14138_s7 = inlined_call_operand.vmem [shape: s32[1,384], index: 7, kind: input, shape index: {}]   ;;  %s14139_s5 = inlined_call_operand.vmem [shape: f32[8,64], index: 5, kind: input, shape index: {}]   ;;  %s14140_s9 = inlined_call_operand.vmem [shape: f32[6,1], index: 9, kind: input, shape index: {}]   ;;  %s14141_s10 = inlined_call_operand.vmem [shape: s32[1,448], index: 10, kind: input, shape index: {}]   ;;  %s14142_s8 = inlined_call_operand.vmem [shape: f32[6,64], index: 8, kind: input, shape index: {}]   ;;  %s14143_s11 = inlined_call_operand.vmem [shape: f32[2,3,448], index: 11, kind: output, shape index: {}]  }
   0x1   :  { %1354 = vmatprep.mubr.bf16.mxu1 %v14168_v1  ;;  %9005 = vset.pattern.permute.xlu0 %v14168_v1  ;;  %v1300_v3 = vld [vmem:[%s14133_s0] sm:$0x3]  ;;  %v14733_v16 = vmov 0  ;;  %v14736_v18 = vmov 0  ;;  %v14739_v19 = vmov 0  ;;  %vm14146_vm12 = vcmask 1040384  }
   0x2   :  { %v9114_v2 = vshrl.u32 %v40_v0, 7  ;;  %9004 = vset.pattern.permute.xlu1 %v14168_v1  ;;  %v39_v4 = vld [vmem:[%s14132_s1] sm:$0x3]  ;;  %v1301_v5 = vpack.c.bf16 %v1300_v3, %v1300_v3  ;;  %vm14150_vm13 = vcmask 1041408   ;;  %vm14145_vm14 = vcmask 261120   ;;  %s9032_s1 = smov 2  }
   0x3   :  { %v1292_v45 = vld [vmem:[%s14134_s2] sm:$0xff]  ;;  %vm14151_vm15 = vcmask 64512   ;;  %s9035_s25 = smov 125   ;;  %s9037_s13 = smov 6  }
   0x4   :  { %v9124_v6 = vadd.s32 8, %v9114_v2  ;;  %v9127_v7 = vsub.s32 1, %v9114_v2  ;;  %v9130_v8 = vsub.s32 0, %v9114_v2  ;;  %v9133_v9 = vadd.s32 16, %v9114_v2  ;;  %s9038_s14 = smov 8   ;;  %s9039_s15 = smov 10  }
   0x5   :  { %v9136_v10 = vadd.s32 24, %v9114_v2  ;;  %v1302_v12 = vunpack.c.l.bf16 %v1301_v5  ;;  %v1432_v46 = vsel %vm14151_vm15, %v1292_v45, 0  ;;  %v9353_v45 = vadd.s32 64, %v9114_v2  ;;  %s9040_s16 = smov 12   ;;  %s9041_s17 = smov 14  }
   0x6   :  { %14728 = vst [vmem:[#allocation2_spill] sm:$0xff] %v9127_v7  ;;  %14729 = vst [vmem:[#allocation3_spill] sm:$0xff] %v9130_v8  ;;  %v52_v11 = vrot.slane %v39_v4, %v9127_v7  ;;  %v48_v13 = vrot.slane %v39_v4, %v9130_v8  ;;  %v9188_v47 = vand.u32 4294901760, %v1432_v46  ;;  %s9042_s18 = smov 5   ;;  %s9043_s19 = smov 7  }
   0x7   :  { %v1303_v17 = vsub.f32 %v1300_v3, %v1302_v12  ;;  %v73_v3 = vld [vmem:[%s14135_s4] sm:$0x3]  ;;  %s9044_s20 = smov 9   ;;  %s9045_s23 = smov 11  }
   0x8   :  { %vm54_vm0 = vcmp.eq.s32.totalorder %v9114_v2, %v52_v11  ;;  %vm56_vm1 = vcmp.eq.s32.totalorder %v9124_v6, %v52_v11  ;;  %vm58_vm2 = vcmp.eq.s32.totalorder %v9133_v9, %v52_v11  ;;  %vm60_vm3 = vcmp.eq.s32.totalorder %v9136_v10, %v52_v11  ;;  %14742 = vst [vmem:[#allocation8_spill] sm:$0xff] %v9188_v47  ;;  %v1295_v11 = vld [vmem:[%s14136_s3 + $0x8] sm:$0xf]  ;;  %v1294_v12 = vld [vmem:[%s14136_s3] sm:$0xff]  ;;  %s9046_s24 = smov 13   ;;  %s9047_s26 = smov 15  }
   0x9   :  { %vm9144_vm4 = vmpackc.low %vm56_vm1, %vm54_vm0  ;;  %vm53_vm5 = vcmp.eq.s32.totalorder %v9114_v2, %v48_v13  ;;  %vm55_vm6 = vcmp.eq.s32.totalorder %v9124_v6, %v48_v13  ;;  %vm57_vm7 = vcmp.eq.s32.totalorder %v9133_v9, %v48_v13  ;;  %vm59_vm8 = vcmp.eq.s32.totalorder %v9136_v10, %v48_v13  ;;  %s9048_s27 = smov 113  }
   0xa   :  { %v14731_v14 = vsel %vm9144_vm4, 4294967295, %v14730_v14  ;;  %7154 = vmatprep.subr.msk.bf16.mxu1 %vm9144_vm4, %v14256_v15  ;;  %vm9155_vm9 = vmpackc.low %vm55_vm6, %vm53_vm5  ;;  %v1304_v20 = vpack.c.bf16 %v1303_v17, %v1303_v17  ;;  %v9191_v48 = vsub.f32 %v1432_v46, %v9188_v47  ;;  %vm14147_vm0 = vcmask 15360  }
   0xb   :  { %14732 = vst [vmem:[#allocation4_spill] sm:$0xff] %v14731_v14  ;;  %v14734_v16 = vsel %vm9155_vm9, 4294967295, %v14733_v16  ;;  %7156 = vmatpush1.bf16.msk.msra.mxu1 %vm9155_vm9, %v14256_v15  ;;  %vm9162_vm10 = vmpackc.low %vm60_vm3, %vm58_vm2  ;;  %vm14148_vm1 = vcmask 7168   ;;  %vm14149_vm2 = vcmask 1043456   ;;  %vm14144_vm3 = vcmask 1045504  }
   0xc   :  { %14735 = vst [vmem:[#allocation5_spill] sm:$0xff] %v14734_v16  ;;  %v14737_v18 = vsel %vm9162_vm10, 4294967295, %v14736_v18  ;;  %7158 = vmatprep.subr.msk.bf16.mxu1 %vm9162_vm10, %v14256_v15  ;;  %vm9169_vm11 = vmpackc.low %vm59_vm8, %vm57_vm7  ;;  %v1305_v21 = vunpack.c.l.bf16 %v1304_v20  ;;  %v1309_v22 = vrot.slane %v1304_v20, 7  ;;  %v9194_v49 = vand.u32 4294901760, %v9191_v48 }
   0xd   :  { %14738 = vst [vmem:[#allocation6_spill] sm:$0xff] %v14737_v18  ;;  %v14740_v19 = vsel %vm9169_vm11, 4294967295, %v14739_v19  ;;  %14743 = vst [vmem:[#allocation9_spill] sm:$0xff] %v9191_v48  ;;  %v9215_v4 = vrot.slane %v73_v3, %v9127_v7  ;;  %v14746_v13 = vmov 0  ;;  %v9251_v20 = vadd.s32 32, %v9114_v2 }
   0xe   :  { %14741 = vst [vmem:[#allocation7_spill] sm:$0xff] %v14740_v19  ;;  %v1306_v23 = vsub.f32 %v1303_v17, %v1305_v21  ;;  %v1315_v25 = vsel %vm14146_vm12, %v1301_v5, %v1309_v22  ;;  %14744 = vst [vmem:[#allocation10_spill] sm:$0xff] %v9194_v49  ;;  %v1506_v50 = vsub.f32 %v9191_v48, %v9194_v49  ;;  %v14749_v17 = vmov 0 }
   0xf   :  { %7160 = vmatpush1.bf16.msk.msra.mxu1 %vm9169_vm11, %v14256_v15  ;;  %v9218_v5 = vrot.slane %v73_v3, %v9130_v8  ;;  %vm127_vm5 = vcmp.eq.s32.totalorder %v9114_v2, %v9215_v4  ;;  %vm129_vm6 = vcmp.eq.s32.totalorder %v9124_v6, %v9215_v4  ;;  %vm133_vm12 = vcmp.eq.s32.totalorder %v9136_v10, %v9215_v4 }
  0x10   :  { %v1307_v24 = vpack.c.bf16 %v1306_v23, %v1306_v23  ;;  %v9198_v51 = vand.u32 4294901760, %v1506_v50  ;;  %v9254_v21 = vadd.s32 40, %v9114_v2  ;;  %v14752_v22 = vmov 0 }
  0x11   :  { %vm126_vm7 = vcmp.eq.s32.totalorder %v9114_v2, %v9218_v5  ;;  %vm128_vm8 = vcmp.eq.s32.totalorder %v9124_v6, %v9218_v5  ;;  %v9264_v23 = vadd.s32 48, %v9114_v2  ;;  %v9356_v46 = vadd.s32 72, %v9114_v2 }
  0x12   :  { %v1311_v26 = vrot.slane %v1307_v24, 6  ;;  %14745 = vst [vmem:[#allocation11_spill] sm:$0xff] %v9198_v51  ;;  %v9267_v24 = vadd.s32 56, %v9114_v2  ;;  %v14775_v50 = vmov 0  ;;  %v14800_v3 = vmov 0 }
  0x13   :  { %vm139_vm15 = vcmp.eq.s32.totalorder %v9264_v23, %v9215_v4 }
  0x14   :  { %v1318_v27 = vsel %vm14150_vm13, %v1315_v25, %v1311_v26  ;;  %v14755_v25 = vmov 0  ;;  %v14758_v26 = vmov 0 }
  0x15   :  { %7161 = vmatmul.mubr.msk.bf16.vlgmr.msra.gmra.mrb[0].mxu1 %vm14145_vm14, %v1318_v27  ;;  %vm131_vm14 = vcmp.eq.s32.totalorder %v9133_v9, %v9215_v4  ;;  %v14761_v27 = vmov 0 }
  0x16   :  { %8266 = vmatprep.mubr.f32.mxu1 %v9198_v51 }
  0xe8   :  { %v1356_v28 = vpop.f32.mrb[0].mxu1 }
  0xe9   :  { %v1365_v29 = vrot.slane %v1356_v28, 2  ;;  %v1358_v30 = vpop.f32.mrb[1].mxu1  ;;  %v1371_v34 = vrot.slane %v1356_v28, 4 }
  0xea   :  { %v1366_v31 = vrot.slane %v1358_v30, 2  ;;  %v1360_v32 = vpop.f32.mrb[2].mxu1  ;;  %v1372_v38 = vrot.slane %v1358_v30, 4 }
  0xeb   :  { %v1369_v33 = vadd.f32 %v1365_v29, %v1356_v28  ;;  %v1361_v35 = vpop.f32.mrb[3].mxu1  ;;  %v14764_v28 = vmov 0  ;;  %v1293_v29 = vld [vmem:[%s14134_s2 + $0x8] sm:$0xf]  ;;  %s9036_s2 = smov 4  }
  0xec   :  { %v1370_v36 = vadd.f32 %v1366_v31, %v1358_v30 }
  0xed   :  { %v1375_v37 = vadd.f32 %v1371_v34, %v1369_v33 }
  0xee   :  { %v1376_v39 = vadd.f32 %v1372_v38, %v1370_v36 }
  0xef   :  { %v1389_v40 = vrot.slane %v1375_v37, 4  ;;  %v1379_v41 = vrot.slane %v1375_v37, 6  ;;  %v1399_v44 = vrot.slane %v1375_v37, 2 }
  0xf0   :  { %v1390_v42 = vrot.slane %v1376_v39, 4  ;;  %v1380_v43 = vrot.slane %v1376_v39, 6 }
  0xf1   :  { %1391 = vrot.lane.b32.xlu1 %v1389_v40, %s9032_s1  ;;  %1381 = vrot.lane.b32.xlu0 %v1379_v41, %s9033_s21 }
  0xf5   :  { %1393 = vrot.lane.b32.xlu1 %v1390_v42, %s9032_s1  ;;  %1383 = vrot.lane.b32.xlu0 %v1380_v43, %s9033_s21 }
  0xf9   :  { %1400 = vrot.lane.b32.xlu0 %v1399_v44, %s9034_s22  ;;  %v14772_v44 = vmov 0 }
 0x163   :  { %v1392_v52 = vpop.permute.xlu1 %1391  ;;  %v1382_v53 = vpop.permute.xlu0 %1381 }
 0x164   :  { %v1403_v56 = vsel %vm14150_vm13, %v1375_v37, %v1382_v53 }
 0x165   :  { %v1406_v62 = vsel %vm14149_vm2, %v1403_v56, %v1392_v52  ;;  %v14785_v56 = vmov 0 }
 0x167   :  { %v1394_v54 = vpop.permute.xlu1 %1393  ;;  %v1384_v55 = vpop.permute.xlu0 %1383 }
 0x168   :  { %v1396_v57 = vsel %vm14147_vm0, %v1392_v52, %v1394_v54  ;;  %v1386_v58 = vsel %vm14148_vm1, %v1382_v53, %v1384_v55  ;;  %vm9242_vm0 = vmpackc.low %vm128_vm8, %vm126_vm7  ;;  %vm130_vm1 = vcmp.eq.s32.totalorder %v9133_v9, %v9218_v5  ;;  %vm135_vm7 = vcmp.eq.s32.totalorder %v9251_v20, %v9215_v4 }
 0x169   :  { %v1404_v59 = vsel %vm14150_vm13, %v1376_v39, %v1386_v58  ;;  %v14750_v17 = vsel %vm9242_vm0, 4294967295, %v14749_v17  ;;  %vm137_vm8 = vcmp.eq.s32.totalorder %v9254_v21, %v9215_v4  ;;  %vm136_vm13 = vcmp.eq.s32.totalorder %v9254_v21, %v9218_v5 }
 0x16a   :  { %v1407_v60 = vsel %vm14149_vm2, %v1404_v59, %v1396_v57  ;;  %14751 = vst [vmem:[#allocation13_spill] sm:$0xff] %v14750_v17  ;;  %vm134_vm2 = vcmp.eq.s32.totalorder %v9251_v20, %v9218_v5  ;;  %v14778_v52 = vmov 0  ;;  %v9381_v53 = vadd.s32 80, %v9114_v2 }
 0x16b   :  { %v1401_v61 = vpop.permute.xlu0 %1400  ;;  %v9384_v54 = vadd.s32 88, %v9114_v2  ;;  %v14782_v55 = vmov 0  ;;  %v9409_v57 = vadd.s32 96, %v9114_v2  ;;  %v9412_v58 = vadd.s32 104, %v9114_v2 }
 0x16c   :  { %v1410_v63 = vsel %vm14144_vm3, %v1407_v60, %v1401_v61  ;;  %v1409_v0 = vsel %vm14144_vm3, %v1406_v62, %v1401_v61  ;;  %vm9234_vm3 = vmpackc.low %vm129_vm6, %vm127_vm5  ;;  %vm132_vm5 = vcmp.eq.s32.totalorder %v9136_v10, %v9218_v5  ;;  %v14790_v59 = vmov 0 }
 0x16d   :  { %1425 = vrot.lane.b32.xlu0 %v1410_v63, %s9035_s25  ;;  %1423 = vrot.lane.b32.xlu1 %v1409_v0, %s9035_s25  ;;  %v14747_v13 = vsel %vm9234_vm3, 4294967295, %v14746_v13  ;;  %vm9259_vm6 = vmpackc.low %vm133_vm12, %vm131_vm14  ;;  %14781 = vst [vmem:[#allocation26_spill] sm:$0xff] %v9384_v54  ;;  %v14793_v60 = vmov 0  ;;  %v9437_v61 = vadd.s32 112, %v9114_v2  ;;  %v9440_v62 = vadd.s32 120, %v9114_v2 }
 0x16e   :  { %14748 = vst [vmem:[#allocation12_spill] sm:$0xff] %v14747_v13  ;;  %7165 = vmatprep.subr.msk.bf16.mxu0 %vm9234_vm3, %v14256_v15  ;;  %v14753_v22 = vsel %vm9259_vm6, 4294967295, %v14752_v22  ;;  %vm9279_vm12 = vmpackc.low %vm132_vm5, %vm130_vm1  ;;  %v9443_v63 = vadd.s32 256, %v9114_v2  ;;  %v9446_v0 = vadd.s32 264, %v9114_v2  ;;  %v9818_v17 = vadd.s32 232, %v9114_v2 }
 0x16f   :  { %14754 = vst [vmem:[#allocation14_spill] sm:$0xff] %v14753_v22  ;;  %7167 = vmatpush1.bf16.msk.msra.mxu0 %vm9242_vm0, %v14256_v15  ;;  %v14756_v25 = vsel %vm9279_vm12, 4294967295, %v14755_v25  ;;  %vm9283_vm14 = vmpackc.low %vm137_vm8, %vm135_vm7  ;;  %vm143_vm8 = vcmp.eq.s32.totalorder %v9353_v45, %v9215_v4  ;;  %v14893_v22 = vmov 0  ;;  %v9821_v13 = vadd.s32 368, %v9114_v2 }
 0x170   :  { %7169 = vmatprep.subr.msk.bf16.mxu0 %vm9259_vm6, %v14256_v15  ;;  %14757 = vst [vmem:[#allocation15_spill] sm:$0xff] %v14756_v25  ;;  %v14759_v26 = vsel %vm9283_vm14, 4294967295, %v14758_v26  ;;  %vm141_vm6 = vcmp.eq.s32.totalorder %v9267_v24, %v9215_v4  ;;  %vm9301_vm1 = vmpackc.low %vm136_vm13, %vm134_vm2  ;;  %vm14767_vm13 = vcmask 64512   ;;  %vm138_vm2 = vcmp.eq.s32.totalorder %v9264_v23, %v9218_v5 }
 0x171   :  { %1418 = vperm.xlu0 %9005, %v1295_v11   ;;  %1413 = vperm.xlu1 %9004, %v1294_v12   ;;  %14760 = vst [vmem:[#allocation16_spill] sm:$0xff] %v14759_v26  ;;  %v14762_v27 = vsel %vm9301_vm1, 4294967295, %v14761_v27  ;;  %vm9305_vm5 = vmpackc.low %vm141_vm6, %vm139_vm15  ;;  %v1435_v30 = vsel %vm14767_vm13, %v1293_v29, 0  ;;  %vm14153_vm15 = vcmask 1022976   ;;  %vm140_vm6 = vcmp.eq.s32.totalorder %v9267_v24, %v9218_v5 }
 0x172   :  { %14763 = vst [vmem:[#allocation17_spill] sm:$0xff] %v14762_v27  ;;  %v14765_v28 = vsel %vm9305_vm5, 4294967295, %v14764_v28  ;;  %v9319_v31 = vand.u32 4294901760, %v1435_v30  ;;  %vm9348_vm7 = vmpackc.low %vm140_vm6, %vm138_vm2  ;;  %vm145_vm13 = vcmp.eq.s32.totalorder %v9356_v46, %v9215_v4  ;;  %vm142_vm6 = vcmp.eq.s32.totalorder %v9353_v45, %v9218_v5 }
 0x173   :  { %7171 = vmatpush1.bf16.msk.msra.mxu0 %vm9279_vm12, %v14256_v15  ;;  %14766 = vst [vmem:[#allocation18_spill] sm:$0xff] %v14765_v28  ;;  %v14773_v44 = vsel %vm9348_vm7, 4294967295, %v14772_v44  ;;  %vm9365_vm2 = vmpackc.low %vm145_vm13, %vm143_vm8  ;;  %vm147_vm8 = vcmp.eq.s32.totalorder %v9381_v53, %v9215_v4  ;;  %vm149_vm13 = vcmp.eq.s32.totalorder %v9384_v54, %v9215_v4  ;;  %v14803_v11 = vmov 0 }
 0x174   :  { %7173 = vmatprep.subr.msk.bf16.mxu0 %vm9283_vm14, %v14256_v15  ;;  %14768 = vst [vmem:[#allocation19_spill] sm:$0xff] %v9319_v31  ;;  %v9322_v32 = vsub.f32 %v1435_v30, %v9319_v31  ;;  %14774 = vst [vmem:[#allocation23_spill] sm:$0xff] %v14773_v44  ;;  %v14776_v50 = vsel %vm9365_vm2, 4294967295, %v14775_v50  ;;  %vm192_vm14 = vcmp.eq.s32.totalorder %v9446_v0, %v9218_v5  ;;  %v9479_v12 = vadd.s32 128, %v9114_v2 }
 0x175   :  { %14777 = vst [vmem:[#allocation24_spill] sm:$0xff] %v14776_v50  ;;  %14788 = vst [vmem:[#allocation29_spill] sm:$0xff] %v9409_v57  ;;  %v9482_v29 = vadd.s32 136, %v9114_v2  ;;  %v9485_v30 = vadd.s32 272, %v9114_v2  ;;  %v9709_v50 = vadd.s32 336, %v9114_v2  ;;  %v9712_v44 = vadd.s32 344, %v9114_v2 }
 0x176   :  { %14769 = vst [vmem:[#allocation20_spill] sm:$0xff] %v9322_v32  ;;  %v9325_v33 = vand.u32 4294901760, %v9322_v32  ;;  %14789 = vst [vmem:[#allocation30_spill] sm:$0xff] %v9412_v58  ;;  %v14877_v28 = vmov 0  ;;  %v9762_v27 = vadd.s32 216, %v9114_v2  ;;  %v9765_v26 = vadd.s32 352, %v9114_v2 }
 0x177   :  { %7175 = vmatpush1.bf16.msk.msra.mxu0 %vm9301_vm1, %v14256_v15  ;;  %14796 = vst [vmem:[#allocation33_spill] sm:$0xff] %v9437_v61  ;;  %14797 = vst [vmem:[#allocation34_spill] sm:$0xff] %v9440_v62  ;;  %vm190_vm1 = vcmp.eq.s32.totalorder %v9443_v63, %v9218_v5  ;;  %v9768_v25 = vadd.s32 360, %v9114_v2 }
 0x178   :  { %7177 = vmatprep.subr.msk.bf16.mxu0 %vm9305_vm5, %v14256_v15  ;;  %14770 = vst [vmem:[#allocation21_spill] sm:$0xff] %v9325_v33  ;;  %v1516_v34 = vsub.f32 %v9322_v32, %v9325_v33  ;;  %14798 = vst [vmem:[#allocation35_spill] sm:$0xff] %v9443_v63  ;;  %vm154_vm5 = vcmp.eq.s32.totalorder %v9437_v61, %v9218_v5 }
 0x179   :  { %14799 = vst [vmem:[#allocation36_spill] sm:$0xff] %v9446_v0  ;;  %14806 = vst [vmem:[#allocation39_spill] sm:$0xff] %v9479_v12 }
 0x17a   :  { %v9330_v39 = vand.u32 4294901760, %v1516_v34  ;;  %14807 = vst [vmem:[#allocation40_spill] sm:$0xff] %v9482_v29  ;;  %14808 = vst [vmem:[#allocation41_spill] sm:$0xff] %v9485_v30  ;;  %v9488_v34 = vadd.s32 280, %v9114_v2 }
 0x17b   :  { %7179 = vmatpush1.bf16.msk.msra.mxu0 %vm9348_vm7, %v14256_v15  ;;  %14872 = vst [vmem:[#allocation73_spill] sm:$0xff] %v9709_v50  ;;  %14873 = vst [vmem:[#allocation74_spill] sm:$0xff] %v9712_v44 }
 0x17c   :  { %14771 = vst [vmem:[#allocation22_spill] sm:$0xff] %v9330_v39  ;;  %7181 = vmatprep.subr.msk.bf16.mxu0 %vm9365_vm2, %v14256_v15  ;;  %vm148_vm2 = vcmp.eq.s32.totalorder %v9384_v54, %v9218_v5  ;;  %14809 = vst [vmem:[#allocation42_spill] sm:$0xff] %v9488_v34  ;;  %vm196_vm12 = vcmp.eq.s32.totalorder %v9488_v34, %v9218_v5 }
 0x17d   :  { %14887 = vst [vmem:[#allocation80_spill] sm:$0xff] %v9762_v27  ;;  %14888 = vst [vmem:[#allocation81_spill] sm:$0xff] %v9765_v26 }
 0x17e   :  { %14889 = vst [vmem:[#allocation82_spill] sm:$0xff] %v9768_v25  ;;  %14903 = vst [vmem:[#allocation88_spill] sm:$0xff] %v9818_v17 }
 0x17f   :  { %14904 = vst [vmem:[#allocation89_spill] sm:$0xff] %v9821_v13 }
 0x1df   :  { %v1426_v35 = vpop.permute.xlu0 %1425  ;;  %v1424_v36 = vpop.permute.xlu1 %1423 }
 0x1e0   :  { %v1428_v37 = vsel %vm14153_vm15, %v1424_v36, %v1426_v35  ;;  %vm144_vm15 = vcmp.eq.s32.totalorder %v9356_v46, %v9218_v5  ;;  %v14810_v35 = vmov 0  ;;  %v14813_v36 = vmov 0 }
 0x1e1   :  { %v1438_v38 = vand.u32 4294901760, %v1428_v37  ;;  %vm9376_vm7 = vmpackc.low %vm144_vm15, %vm142_vm6  ;;  %vm146_vm6 = vcmp.eq.s32.totalorder %v9381_v53, %v9218_v5 }
 0x1e2   :  { %v14779_v52 = vsel %vm9376_vm7, 4294967295, %v14778_v52  ;;  %7183 = vmatpush1.bf16.msk.msra.mxu0 %vm9376_vm7, %v14256_v15  ;;  %vm9393_vm15 = vmpackc.low %vm149_vm13, %vm147_vm8  ;;  %vm151_vm8 = vcmp.eq.s32.totalorder %v9409_v57, %v9215_v4  ;;  %vm153_vm13 = vcmp.eq.s32.totalorder %v9412_v58, %v9215_v4 }
 0x1e3   :  { %v1525_v40 = vsub.f32 %v1428_v37, %v1438_v38  ;;  %8264 = vmatprep.subr.mxu1 %v1438_v38  ;;  %14780 = vst [vmem:[#allocation25_spill] sm:$0xff] %v14779_v52  ;;  %v14783_v55 = vsel %vm9393_vm15, 4294967295, %v14782_v55  ;;  %7185 = vmatprep.subr.msk.bf16.mxu0 %vm9393_vm15, %v14256_v15  ;;  %vm9404_vm7 = vmpackc.low %vm148_vm2, %vm146_vm6  ;;  %vm150_vm6 = vcmp.eq.s32.totalorder %v9409_v57, %v9218_v5  ;;  %v14816_v37 = vmov 0 }
 0x1e4   :  { %8265 = vmatpush3.msra.mxu1 %v1438_v38  ;;  %14784 = vst [vmem:[#allocation27_spill] sm:$0xff] %v14783_v55  ;;  %v14786_v56 = vsel %vm9404_vm7, 4294967295, %v14785_v56  ;;  %vm9421_vm2 = vmpackc.low %vm153_vm13, %vm151_vm8  ;;  %vm152_vm15 = vcmp.eq.s32.totalorder %v9412_v58, %v9218_v5  ;;  %vm157_vm8 = vcmp.eq.s32.totalorder %v9440_v62, %v9215_v4  ;;  %vm191_vm13 = vcmp.eq.s32.totalorder %v9443_v63, %v9215_v4 }
 0x1e5   :  { %8267 = vmatmul.mubr.f32.vlgmr.msra.gmra.mrb[4].mxu1 %v9330_v39  ;;  %v1526_v41 = vand.u32 4294901760, %v1525_v40  ;;  %14787 = vst [vmem:[#allocation28_spill] sm:$0xff] %v14786_v56  ;;  %v14791_v59 = vsel %vm9421_vm2, 4294967295, %v14790_v59  ;;  %v9656_v56 = vadd.s32 328, %v9114_v2  ;;  %v14861_v55 = vmov 0 }
 0x1e6   :  { %8271 = vmatprep.mubr.f32.mxu1 %v9188_v47  ;;  %7187 = vmatpush1.bf16.msk.msra.mxu0 %vm9404_vm7, %v14256_v15  ;;  %14792 = vst [vmem:[#allocation31_spill] sm:$0xff] %v14791_v59  ;;  %vm9432_vm7 = vmpackc.low %vm152_vm15, %vm150_vm6  ;;  %vm155_vm15 = vcmp.eq.s32.totalorder %v9437_v61, %v9215_v4  ;;  %vm193_vm6 = vcmp.eq.s32.totalorder %v9446_v0, %v9215_v4  ;;  %v9653_v59 = vadd.s32 320, %v9114_v2  ;;  %v9706_v52 = vadd.s32 200, %v9114_v2 }
 0x1e7   :  { %v1527_v42 = vsub.f32 %v1525_v40, %v1526_v41  ;;  %7189 = vmatprep.subr.msk.bf16.mxu0 %vm9421_vm2, %v14256_v15  ;;  %v14794_v60 = vsel %vm9432_vm7, 4294967295, %v14793_v60  ;;  %vm9459_vm2 = vmpackc.low %vm157_vm8, %vm155_vm15  ;;  %14857 = vst [vmem:[#allocation66_spill] sm:$0xff] %v9656_v56 }
 0x1e8   :  { %14795 = vst [vmem:[#allocation32_spill] sm:$0xff] %v14794_v60  ;;  %v14801_v3 = vsel %vm9459_vm2, 4294967295, %v14800_v3  ;;  %vm9474_vm15 = vmpackc.low %vm193_vm6, %vm191_vm13  ;;  %vm159_vm6 = vcmp.eq.s32.totalorder %v9479_v12, %v9215_v4  ;;  %v9650_v60 = vadd.s32 184, %v9114_v2 }
 0x1e9   :  { %v1528_v43 = vand.u32 4294901760, %v1527_v42  ;;  %14802 = vst [vmem:[#allocation37_spill] sm:$0xff] %v14801_v3  ;;  %v14804_v11 = vsel %vm9474_vm15, 4294967295, %v14803_v11  ;;  %vm9500_vm13 = vmpackc.low %vm192_vm14, %vm190_vm1  ;;  %vm158_vm1 = vcmp.eq.s32.totalorder %v9479_v12, %v9218_v5  ;;  %v9541_v42 = vadd.s32 288, %v9114_v2 }
 0x1ea   :  { %7191 = vmatpush1.bf16.msk.msra.mxu0 %vm9432_vm7, %v14256_v15  ;;  %vm156_vm7 = vcmp.eq.s32.totalorder %v9440_v62, %v9218_v5  ;;  %14805 = vst [vmem:[#allocation38_spill] sm:$0xff] %v14804_v11  ;;  %v14814_v36 = vsel %vm9500_vm13, 4294967295, %v14813_v36  ;;  %v9591_v11 = vadd.s32 160, %v9114_v2  ;;  %v14845_v3 = vmov 0  ;;  %14855 = vst [vmem:[#allocation64_spill] sm:$0xff] %v9650_v60 }
 0x1eb   :  { %8269 = vmatprep.subr.mxu1 %v1528_v43  ;;  %7193 = vmatprep.subr.msk.bf16.mxu0 %vm9459_vm2, %v14256_v15  ;;  %vm9493_vm8 = vmpackc.low %vm156_vm7, %vm154_vm5  ;;  %14815 = vst [vmem:[#allocation44_spill] sm:$0xff] %v14814_v36  ;;  %vm161_vm2 = vcmp.eq.s32.totalorder %v9482_v29, %v9215_v4  ;;  %vm195_vm5 = vcmp.eq.s32.totalorder %v9485_v30, %v9215_v4  ;;  %v14829_v36 = vmov 0 }
 0x1ec   :  { %8270 = vmatpush3.msra.mxu1 %v1528_v43  ;;  %v14811_v35 = vsel %vm9493_vm8, 4294967295, %v14810_v35  ;;  %vm197_vm7 = vcmp.eq.s32.totalorder %v9488_v34, %v9215_v4  ;;  %vm9515_vm14 = vmpackc.low %vm161_vm2, %vm159_vm6  ;;  %14824 = vst [vmem:[#allocation49_spill] sm:$0xff] %v9541_v42  ;;  %v9544_v43 = vadd.s32 296, %v9114_v2 }
 0x1ed   :  { %8272 = vmatmul.mubr.f32.vlgmr.msra.gmra.mrb[4].mxu1 %v9319_v31  ;;  %8274 = vmatprep.subr.mxu1 %v1525_v40  ;;  %14812 = vst [vmem:[#allocation43_spill] sm:$0xff] %v14811_v35  ;;  %v14817_v37 = vsel %vm9515_vm14, 4294967295, %v14816_v37  ;;  %vm9530_vm2 = vmpackc.low %vm197_vm7, %vm195_vm5  ;;  %v9600_v35 = vadd.s32 312, %v9114_v2 }
 0x1ee   :  { %8275 = vmatpush3.msra.mxu1 %v1525_v40  ;;  %8276 = vmatprep.mubr.f32.mxu1 %v9191_v48  ;;  %14818 = vst [vmem:[#allocation45_spill] sm:$0xff] %v14817_v37  ;;  %v9535_v40 = vadd.s32 144, %v9114_v2  ;;  %14825 = vst [vmem:[#allocation50_spill] sm:$0xff] %v9544_v43  ;;  %v9597_v37 = vadd.s32 304, %v9114_v2  ;;  %v14920_v48 = vmov 0 }
 0x1ef   :  { %8279 = vmatprep.subr.mxu1 %v1438_v38  ;;  %7195 = vmatpush1.bf16.msk.msra.mxu0 %vm9493_vm8, %v14256_v15  ;;  %vm194_vm8 = vcmp.eq.s32.totalorder %v9485_v30, %v9218_v5  ;;  %14838 = vst [vmem:[#allocation55_spill] sm:$0xff] %v9591_v11  ;;  %14841 = vst [vmem:[#allocation58_spill] sm:$0xff] %v9600_v35 }
 0x1f0   :  { %7197 = vmatprep.subr.msk.bf16.mxu0 %vm9515_vm14, %v14256_v15  ;;  %14822 = vst [vmem:[#allocation47_spill] sm:$0xff] %v9535_v40  ;;  %vm9556_vm5 = vmpackc.low %vm196_vm12, %vm194_vm8  ;;  %vm163_vm7 = vcmp.eq.s32.totalorder %v9535_v40, %v9215_v4  ;;  %vm162_vm8 = vcmp.eq.s32.totalorder %v9535_v40, %v9218_v5  ;;  %vm200_vm14 = vcmp.eq.s32.totalorder %v9544_v43, %v9218_v5 }
 0x1f1   :  { %v14830_v36 = vsel %vm9556_vm5, 4294967295, %v14829_v36  ;;  %14840 = vst [vmem:[#allocation57_spill] sm:$0xff] %v9597_v37  ;;  %14856 = vst [vmem:[#allocation65_spill] sm:$0xff] %v9653_v59 }
 0x1f2   :  { %14831 = vst [vmem:[#allocation52_spill] sm:$0xff] %v14830_v36  ;;  %v14835_v36 = vmov 0  ;;  %14871 = vst [vmem:[#allocation72_spill] sm:$0xff] %v9706_v52 }
 0x1f5   :  { %8277 = vmatmul.mubr.f32.vlgmr.msra.gmra.mrb[4].mxu1 %v9322_v32  ;;  %v9874_v32 = vadd.s32 248, %v9114_v2 }
 0x1f6   :  { %8280 = vmatpush3.msra.mxu1 %v1438_v38  ;;  %8281 = vmatprep.mubr.f32.mxu1 %v9194_v49  ;;  %v14909_v49 = vmov 0 }
 0x1f7   :  { %8284 = vmatprep.subr.mxu1 %v1526_v41  ;;  %14919 = vst [vmem:[#allocation96_spill] sm:$0xff] %v9874_v32 }
 0x1fd   :  { %8282 = vmatmul.mubr.f32.vlgmr.msra.gmra.mrb[4].mxu1 %v9325_v33  ;;  %v9824_v33 = vadd.s32 376, %v9114_v2 }
 0x1fe   :  { %8285 = vmatpush3.msra.mxu1 %v1526_v41  ;;  %8286 = vmatprep.mubr.f32.mxu1 %v9188_v47  ;;  %v9538_v41 = vadd.s32 152, %v9114_v2 }
 0x1ff   :  { %8289 = vmatprep.subr.mxu1 %v1438_v38  ;;  %14905 = vst [vmem:[#allocation90_spill] sm:$0xff] %v9824_v33 }
 0x200   :  { %14823 = vst [vmem:[#allocation48_spill] sm:$0xff] %v9538_v41 }
 0x205   :  { %8287 = vmatmul.mubr.f32.vlgmr.msra.gmra.mrb[4].mxu1 %v9319_v31 }
 0x206   :  { %8290 = vmatpush3.msra.mxu1 %v1438_v38  ;;  %8291 = vmatprep.mubr.f32.mxu1 %v9188_v47  ;;  %v14819_v38 = vmov 0 }
 0x207   :  { %7229 = vmatprep.subr.msk.bf16.mxu1 %vm9474_vm15, %v14256_v15  ;;  %vm160_vm15 = vcmp.eq.s32.totalorder %v9482_v29, %v9218_v5  ;;  %v14820_v38 = vsel %vm9530_vm2, 4294967295, %v14819_v38 }
 0x208   :  { %14821 = vst [vmem:[#allocation46_spill] sm:$0xff] %v14820_v38  ;;  %vm9549_vm6 = vmpackc.low %vm160_vm15, %vm158_vm1  ;;  %vm199_vm15 = vcmp.eq.s32.totalorder %v9541_v42, %v9215_v4  ;;  %vm201_vm1 = vcmp.eq.s32.totalorder %v9544_v43, %v9215_v4  ;;  %v14832_v38 = vmov 0 }
 0x209   :  { %7199 = vmatpush1.bf16.msk.msra.mxu0 %vm9549_vm6, %v14256_v15 }
 0x20d   :  { %8292 = vmatmul.mubr.f32.vlgmr.msra.gmra.mrb[4].mxu1 %v9319_v31 }
 0x20e   :  { %2069 = vmatprep.mubr.bf16.mxu1 %v14168_v1  ;;  %7231 = vmatpush1.bf16.msk.msra.mxu1 %vm9500_vm13, %v14256_v15  ;;  %v14826_v1 = vmov 0  ;;  %vm165_vm13 = vcmp.eq.s32.totalorder %v9538_v41, %v9215_v4 }
 0x20f   :  { %7233 = vmatprep.subr.msk.bf16.mxu1 %vm9530_vm2, %v14256_v15  ;;  %v14827_v1 = vsel %vm9549_vm6, 4294967295, %v14826_v1  ;;  %vm9571_vm12 = vmpackc.low %vm165_vm13, %vm163_vm7  ;;  %vm164_vm2 = vcmp.eq.s32.totalorder %v9538_v41, %v9218_v5  ;;  %vm198_vm6 = vcmp.eq.s32.totalorder %v9541_v42, %v9218_v5 }
 0x210   :  { %14828 = vst [vmem:[#allocation51_spill] sm:$0xff] %v14827_v1  ;;  %v14833_v38 = vsel %vm9571_vm12, 4294967295, %v14832_v38  ;;  %7201 = vmatprep.subr.msk.bf16.mxu0 %vm9571_vm12, %v14256_v15  ;;  %vm9586_vm13 = vmpackc.low %vm201_vm1, %vm199_vm15  ;;  %v9594_v1 = vadd.s32 168, %v9114_v2  ;;  %vm167_vm1 = vcmp.eq.s32.totalorder %v9591_v11, %v9215_v4  ;;  %vm204_vm12 = vcmp.eq.s32.totalorder %v9600_v35, %v9218_v5 }
 0x211   :  { %14834 = vst [vmem:[#allocation53_spill] sm:$0xff] %v14833_v38  ;;  %v14836_v36 = vsel %vm9586_vm13, 4294967295, %v14835_v36  ;;  %vm9605_vm7 = vmpackc.low %vm164_vm2, %vm162_vm8  ;;  %v14842_v38 = vmov 0  ;;  %vm203_vm2 = vcmp.eq.s32.totalorder %v9597_v37, %v9215_v4  ;;  %vm205_vm8 = vcmp.eq.s32.totalorder %v9600_v35, %v9215_v4 }
 0x212   :  { %7235 = vmatpush1.bf16.msk.msra.mxu1 %vm9556_vm5, %v14256_v15  ;;  %14837 = vst [vmem:[#allocation54_spill] sm:$0xff] %v14836_v36  ;;  %14839 = vst [vmem:[#allocation56_spill] sm:$0xff] %v9594_v1  ;;  %v14843_v38 = vsel %vm9605_vm7, 4294967295, %v14842_v38  ;;  %7203 = vmatpush1.bf16.msk.msra.mxu0 %vm9605_vm7, %v14256_v15  ;;  %vm169_vm5 = vcmp.eq.s32.totalorder %v9594_v1, %v9215_v4  ;;  %v14848_v36 = vmov 0  ;;  %vm202_vm7 = vcmp.eq.s32.totalorder %v9597_v37, %v9218_v5 }
 0x213   :  { %7237 = vmatprep.subr.msk.bf16.mxu1 %vm9586_vm13, %v14256_v15  ;;  %14844 = vst [vmem:[#allocation59_spill] sm:$0xff] %v14843_v38  ;;  %vm9612_vm15 = vmpackc.low %vm200_vm14, %vm198_vm6  ;;  %vm166_vm6 = vcmp.eq.s32.totalorder %v9591_v11, %v9218_v5  ;;  %vm168_vm13 = vcmp.eq.s32.totalorder %v9594_v1, %v9218_v5  ;;  %v9647_v38 = vadd.s32 176, %v9114_v2 }
 0x214   :  { %v14846_v3 = vsel %vm9612_vm15, 4294967295, %v14845_v3  ;;  %vm9627_vm14 = vmpackc.low %vm169_vm5, %vm167_vm1 }
 0x215   :  { %14847 = vst [vmem:[#allocation60_spill] sm:$0xff] %v14846_v3  ;;  %v14849_v36 = vsel %vm9627_vm14, 4294967295, %v14848_v36  ;;  %7205 = vmatprep.subr.msk.bf16.mxu0 %vm9627_vm14, %v14256_v15  ;;  %vm9642_vm5 = vmpackc.low %vm205_vm8, %vm203_vm2  ;;  %v14851_v3 = vmov 0  ;;  %vm171_vm8 = vcmp.eq.s32.totalorder %v9647_v38, %v9215_v4  ;;  %vm208_vm14 = vcmp.eq.s32.totalorder %v9656_v56, %v9218_v5 }
 0x216   :  { %7239 = vmatpush1.bf16.msk.msra.mxu1 %vm9612_vm15, %v14256_v15  ;;  %14850 = vst [vmem:[#allocation61_spill] sm:$0xff] %v14849_v36  ;;  %v14852_v3 = vsel %vm9642_vm5, 4294967295, %v14851_v3  ;;  %14854 = vst [vmem:[#allocation63_spill] sm:$0xff] %v9647_v38  ;;  %v14858_v36 = vmov 0  ;;  %vm173_vm15 = vcmp.eq.s32.totalorder %v9650_v60, %v9215_v4 }
 0x217   :  { %14853 = vst [vmem:[#allocation62_spill] sm:$0xff] %v14852_v3  ;;  %7241 = vmatprep.subr.msk.bf16.mxu1 %vm9642_vm5, %v14256_v15  ;;  %vm9661_vm1 = vmpackc.low %vm168_vm13, %vm166_vm6  ;;  %vm207_vm13 = vcmp.eq.s32.totalorder %v9653_v59, %v9215_v4  ;;  %vm209_vm6 = vcmp.eq.s32.totalorder %v9656_v56, %v9215_v4  ;;  %v14864_v3 = vmov 0  ;;  %vm172_vm5 = vcmp.eq.s32.totalorder %v9650_v60, %v9218_v5 }
 0x218   :  { %v14859_v36 = vsel %vm9661_vm1, 4294967295, %v14858_v36  ;;  %7207 = vmatpush1.bf16.msk.msra.mxu0 %vm9661_vm1, %v14256_v15  ;;  %vm9668_vm2 = vmpackc.low %vm204_vm12, %vm202_vm7  ;;  %vm170_vm7 = vcmp.eq.s32.totalorder %v9647_v38, %v9218_v5  ;;  %vm206_vm1 = vcmp.eq.s32.totalorder %v9653_v59, %v9218_v5 }
 0x219   :  { %14860 = vst [vmem:[#allocation67_spill] sm:$0xff] %v14859_v36  ;;  %v14862_v55 = vsel %vm9668_vm2, 4294967295, %v14861_v55  ;;  %vm9683_vm12 = vmpackc.low %vm173_vm15, %vm171_vm8  ;;  %v9703_v36 = vadd.s32 192, %v9114_v2 }
 0x21a   :  { %14863 = vst [vmem:[#allocation68_spill] sm:$0xff] %v14862_v55  ;;  %7243 = vmatpush1.bf16.msk.msra.mxu1 %vm9668_vm2, %v14256_v15  ;;  %v14865_v3 = vsel %vm9683_vm12, 4294967295, %v14864_v3  ;;  %7209 = vmatprep.subr.msk.bf16.mxu0 %vm9683_vm12, %v14256_v15  ;;  %vm9698_vm15 = vmpackc.low %vm209_vm6, %vm207_vm13  ;;  %v14867_v55 = vmov 0  ;;  %vm177_vm2 = vcmp.eq.s32.totalorder %v9706_v52, %v9215_v4  ;;  %vm212_vm12 = vcmp.eq.s32.totalorder %v9712_v44, %v9218_v5 }
 0x21b   :  { %14866 = vst [vmem:[#allocation69_spill] sm:$0xff] %v14865_v3  ;;  %v14868_v55 = vsel %vm9698_vm15, 4294967295, %v14867_v55  ;;  %14870 = vst [vmem:[#allocation71_spill] sm:$0xff] %v9703_v36  ;;  %7245 = vmatprep.subr.msk.bf16.mxu1 %vm9698_vm15, %v14256_v15  ;;  %v14874_v3 = vmov 0  ;;  %vm175_vm6 = vcmp.eq.s32.totalorder %v9703_v36, %v9215_v4  ;;  %vm176_vm15 = vcmp.eq.s32.totalorder %v9706_v52, %v9218_v5 }
 0x21c   :  { %14869 = vst [vmem:[#allocation70_spill] sm:$0xff] %v14868_v55  ;;  %vm9717_vm8 = vmpackc.low %vm172_vm5, %vm170_vm7  ;;  %vm211_vm5 = vcmp.eq.s32.totalorder %v9709_v50, %v9215_v4  ;;  %vm213_vm7 = vcmp.eq.s32.totalorder %v9712_v44, %v9215_v4  ;;  %v14880_v55 = vmov 0 }
 0x21d   :  { %v14875_v3 = vsel %vm9717_vm8, 4294967295, %v14874_v3  ;;  %7211 = vmatpush1.bf16.msk.msra.mxu0 %vm9717_vm8, %v14256_v15  ;;  %vm9724_vm13 = vmpackc.low %vm208_vm14, %vm206_vm1  ;;  %vm174_vm1 = vcmp.eq.s32.totalorder %v9703_v36, %v9218_v5  ;;  %vm210_vm8 = vcmp.eq.s32.totalorder %v9709_v50, %v9218_v5 }
 0x21e   :  { %14876 = vst [vmem:[#allocation75_spill] sm:$0xff] %v14875_v3  ;;  %v14878_v28 = vsel %vm9724_vm13, 4294967295, %v14877_v28  ;;  %7247 = vmatpush1.bf16.msk.msra.mxu1 %vm9724_vm13, %v14256_v15  ;;  %vm9739_vm14 = vmpackc.low %vm177_vm2, %vm175_vm6  ;;  %v9759_v3 = vadd.s32 208, %v9114_v2  ;;  %vm181_vm13 = vcmp.eq.s32.totalorder %v9762_v27, %v9215_v4 }
 0x21f   :  { %14879 = vst [vmem:[#allocation76_spill] sm:$0xff] %v14878_v28  ;;  %v14881_v55 = vsel %vm9739_vm14, 4294967295, %v14880_v55  ;;  %7213 = vmatprep.subr.msk.bf16.mxu0 %vm9739_vm14, %v14256_v15  ;;  %vm9754_vm2 = vmpackc.low %vm213_vm7, %vm211_vm5  ;;  %v14883_v28 = vmov 0  ;;  %vm216_vm14 = vcmp.eq.s32.totalorder %v9768_v25, %v9218_v5 }
 0x220   :  { %14882 = vst [vmem:[#allocation77_spill] sm:$0xff] %v14881_v55  ;;  %v14884_v28 = vsel %vm9754_vm2, 4294967295, %v14883_v28  ;;  %14886 = vst [vmem:[#allocation79_spill] sm:$0xff] %v9759_v3  ;;  %7249 = vmatprep.subr.msk.bf16.mxu1 %vm9754_vm2, %v14256_v15  ;;  %v14890_v55 = vmov 0  ;;  %vm179_vm7 = vcmp.eq.s32.totalorder %v9759_v3, %v9215_v4  ;;  %vm180_vm2 = vcmp.eq.s32.totalorder %v9762_v27, %v9218_v5 }
 0x221   :  { %14885 = vst [vmem:[#allocation78_spill] sm:$0xff] %v14884_v28  ;;  %vm9773_vm6 = vmpackc.low %vm176_vm15, %vm174_vm1  ;;  %vm215_vm15 = vcmp.eq.s32.totalorder %v9765_v26, %v9215_v4  ;;  %vm217_vm1 = vcmp.eq.s32.totalorder %v9768_v25, %v9215_v4  ;;  %v14896_v28 = vmov 0 }
 0x222   :  { %v14891_v55 = vsel %vm9773_vm6, 4294967295, %v14890_v55  ;;  %7215 = vmatpush1.bf16.msk.msra.mxu0 %vm9773_vm6, %v14256_v15  ;;  %vm9780_vm5 = vmpackc.low %vm212_vm12, %vm210_vm8  ;;  %vm178_vm8 = vcmp.eq.s32.totalorder %v9759_v3, %v9218_v5  ;;  %vm214_vm6 = vcmp.eq.s32.totalorder %v9765_v26, %v9218_v5 }
 0x223   :  { %14892 = vst [vmem:[#allocation83_spill] sm:$0xff] %v14891_v55  ;;  %v14894_v22 = vsel %vm9780_vm5, 4294967295, %v14893_v22  ;;  %7251 = vmatpush1.bf16.msk.msra.mxu1 %vm9780_vm5, %v14256_v15  ;;  %vm9795_vm12 = vmpackc.low %vm181_vm13, %vm179_vm7  ;;  %v9815_v55 = vadd.s32 224, %v9114_v2  ;;  %vm185_vm5 = vcmp.eq.s32.totalorder %v9818_v17, %v9215_v4 }
 0x224   :  { %14895 = vst [vmem:[#allocation84_spill] sm:$0xff] %v14894_v22  ;;  %v14897_v28 = vsel %vm9795_vm12, 4294967295, %v14896_v28  ;;  %7217 = vmatprep.subr.msk.bf16.mxu0 %vm9795_vm12, %v14256_v15  ;;  %vm9810_vm13 = vmpackc.low %vm217_vm1, %vm215_vm15  ;;  %v14899_v22 = vmov 0  ;;  %vm220_vm12 = vcmp.eq.s32.totalorder %v9824_v33, %v9218_v5 }
 0x225   :  { %14898 = vst [vmem:[#allocation85_spill] sm:$0xff] %v14897_v28  ;;  %v14900_v22 = vsel %vm9810_vm13, 4294967295, %v14899_v22  ;;  %14902 = vst [vmem:[#allocation87_spill] sm:$0xff] %v9815_v55  ;;  %7253 = vmatprep.subr.msk.bf16.mxu1 %vm9810_vm13, %v14256_v15  ;;  %v14906_v28 = vmov 0  ;;  %vm183_vm1 = vcmp.eq.s32.totalorder %v9815_v55, %v9215_v4  ;;  %vm184_vm13 = vcmp.eq.s32.totalorder %v9818_v17, %v9218_v5 }
 0x226   :  { %14901 = vst [vmem:[#allocation86_spill] sm:$0xff] %v14900_v22  ;;  %vm9829_vm7 = vmpackc.low %vm180_vm2, %vm178_vm8  ;;  %vm219_vm2 = vcmp.eq.s32.totalorder %v9821_v13, %v9215_v4  ;;  %vm221_vm8 = vcmp.eq.s32.totalorder %v9824_v33, %v9215_v4  ;;  %v14912_v22 = vmov 0 }
 0x227   :  { %v14907_v28 = vsel %vm9829_vm7, 4294967295, %v14906_v28  ;;  %7219 = vmatpush1.bf16.msk.msra.mxu0 %vm9829_vm7, %v14256_v15  ;;  %vm9836_vm15 = vmpackc.low %vm216_vm14, %vm214_vm6  ;;  %vm182_vm6 = vcmp.eq.s32.totalorder %v9815_v55, %v9218_v5  ;;  %vm218_vm7 = vcmp.eq.s32.totalorder %v9821_v13, %v9218_v5 }
 0x228   :  { %14908 = vst [vmem:[#allocation91_spill] sm:$0xff] %v14907_v28  ;;  %v14910_v49 = vsel %vm9836_vm15, 4294967295, %v14909_v49  ;;  %7255 = vmatpush1.bf16.msk.msra.mxu1 %vm9836_vm15, %v14256_v15  ;;  %vm9851_vm14 = vmpackc.low %vm185_vm5, %vm183_vm1  ;;  %v9871_v28 = vadd.s32 240, %v9114_v2  ;;  %vm189_vm15 = vcmp.eq.s32.totalorder %v9874_v32, %v9215_v4 }
 0x229   :  { %14911 = vst [vmem:[#allocation92_spill] sm:$0xff] %v14910_v49  ;;  %v14913_v22 = vsel %vm9851_vm14, 4294967295, %v14912_v22  ;;  %7221 = vmatprep.subr.msk.bf16.mxu0 %vm9851_vm14, %v14256_v15  ;;  %vm9866_vm5 = vmpackc.low %vm221_vm8, %vm219_vm2  ;;  %v14915_v49 = vmov 0 }
 0x22a   :  { %14914 = vst [vmem:[#allocation93_spill] sm:$0xff] %v14913_v22  ;;  %v14916_v49 = vsel %vm9866_vm5, 4294967295, %v14915_v49  ;;  %14918 = vst [vmem:[#allocation95_spill] sm:$0xff] %v9871_v28  ;;  %7257 = vmatprep.subr.msk.bf16.mxu1 %vm9866_vm5, %v14256_v15  ;;  %v14923_v22 = vmov 0  ;;  %vm187_vm8 = vcmp.eq.s32.totalorder %v9871_v28, %v9215_v4  ;;  %v14929_v4 = vmov 0 }
 0x22b   :  { %14917 = vst [vmem:[#allocation94_spill] sm:$0xff] %v14916_v49  ;;  %vm9879_vm1 = vmpackc.low %vm184_vm13, %vm182_vm6  ;;  %v14926_v49 = vmov 0 }
 0x22c   :  { %v14921_v48 = vsel %vm9879_vm1, 4294967295, %v14920_v48  ;;  %7223 = vmatpush1.bf16.msk.msra.mxu0 %vm9879_vm1, %v14256_v15  ;;  %vm9886_vm2 = vmpackc.low %vm220_vm12, %vm218_vm7  ;;  %vm186_vm12 = vcmp.eq.s32.totalorder %v9871_v28, %v9218_v5  ;;  %vm188_vm7 = vcmp.eq.s32.totalorder %v9874_v32, %v9218_v5 }
 0x22d   :  { %14922 = vst [vmem:[#allocation97_spill] sm:$0xff] %v14921_v48  ;;  %v14924_v22 = vsel %vm9886_vm2, 4294967295, %v14923_v22  ;;  %7259 = vmatpush1.bf16.msk.msra.mxu1 %vm9886_vm2, %v14256_v15  ;;  %vm9897_vm13 = vmpackc.low %vm189_vm15, %vm187_vm8  ;;  %v9917_v48 = vpop.permute.xlu1 %1413  ;;  %vm14934_vm15 = vcmask 1041408   ;;  %vm14935_vm8 = vcmask 1043456  }
 0x22e   :  { %14925 = vst [vmem:[#allocation98_spill] sm:$0xff] %v14924_v22  ;;  %v14927_v49 = vsel %vm9897_vm13, 4294967295, %v14926_v49  ;;  %7225 = vmatprep.subr.msk.bf16.mxu0 %vm9897_vm13, %v14256_v15  ;;  %vm9908_vm6 = vmpackc.low %vm188_vm7, %vm186_vm12  ;;  %v9915_v22 = vpop.permute.xlu0 %1418 }
 0x22f   :  { %14928 = vst [vmem:[#allocation99_spill] sm:$0xff] %v14927_v49  ;;  %v14930_v4 = vsel %vm9908_vm6, 4294967295, %v14929_v4  ;;  %14932 = vst [vmem:[#allocation101_spill] sm:$0xff] %v9915_v22 }
 0x230   :  { %14931 = vst [vmem:[#allocation100_spill] sm:$0xff] %v14930_v4  ;;  %7227 = vmatpush1.bf16.msk.msra.mxu0 %vm9908_vm6, %v14256_v15  ;;  %14933 = vst [vmem:[#allocation102_spill] sm:$0xff] %v9917_v48  ;;  %vm14291_vm6 = vcmask 31744  }
 0x231   :  { %vm14936_vm12 = vmmov %vm14934_vm15 }
 0x232   :  { %vm14937_vm7 = vmmov %vm14935_vm8 }
 0x233   :  { %vm14938_vm2 = vmmov %vm14936_vm12 }
 0x234   :  { %vm14939_vm5 = vmmov %vm14937_vm7 }
 0x2e0   :  { %v8293_v31 = vpop.f32.mrb[4].mxu1 }
 0x2e1   :  { %v8888_v47 = vadd.f32 %v8293_v31, %v9915_v22  ;;  %v1916_v5 = vpop.f32.mrb[5].mxu1 }
 0x2e2   :  { %v8889_v39 = vadd.f32 %v1916_v5, %v9917_v48 }
 0x2e3   :  { %v7163_v49 = vmul.f32 -1.442695, %v8888_v47 }
 0x2e4   :  { %v7162_v51 = vmul.f32 -1.442695, %v8889_v39 }
 0x2e5   :  { %9006 = vpow2.f32 %v7163_v49 }
 0x2e6   :  { %9008 = vpow2.f32 %v7162_v51 }
 0x2ef   :  { %v9007_v19 = vpop.eup %9006 }
 0x2f0   :  { %v9009_v18 = vpop.eup %9008  ;;  %v1933_v16 = vadd.f32 1.0, %v9007_v19 }
 0x2f1   :  { %v1932_v14 = vadd.f32 1.0, %v9009_v18 }
 0x2f2   :  { %9010 = vrcp.f32 %v1933_v16 }
 0x2f3   :  { %9012 = vrcp.f32 %v1932_v14 }
 0x2fc   :  { %v9011_v15 = vpop.eup %9010 }
 0x2fd   :  { %v9013_v4 = vpop.eup %9012  ;;  %v1939_v33 = vmul.f32 %v9011_v15, %v8888_v47 }
 0x2fe   :  { %v1938_v13 = vmul.f32 %v9013_v4, %v8889_v39 }
 0x2ff   :  { %v1945_v25 = vpack.c.bf16 %v1939_v33, %v1939_v33 }
 0x300   :  { %v1941_v26 = vrot.slane %v1938_v13, 4  ;;  %v1943_v31 = vpack.c.bf16 %v1938_v13, %v1938_v13 }
 0x301   :  { %v1948_v22 = vunpack.c.l.bf16 %v1945_v25 }
 0x302   :  { %v1946_v44 = vunpack.c.l.bf16 %v1943_v31  ;;  %v1944_v5 = vpack.c.bf16 %v1941_v26, %v1941_v26 }
 0x303   :  { %v1951_v48 = vsub.f32 %v1939_v33, %v1948_v22 }
 0x304   :  { %v1949_v50 = vsub.f32 %v1938_v13, %v1946_v44  ;;  %v1947_v49 = vunpack.c.l.bf16 %v1944_v5 }
 0x305   :  { %v1954_v51 = vpack.c.bf16 %v1951_v48, %v1951_v48 }
 0x306   :  { %v1952_v56 = vpack.c.bf16 %v1949_v50, %v1949_v50  ;;  %v1950_v59 = vsub.f32 %v1941_v26, %v1947_v49 }
 0x307   :  { %v1957_v19 = vunpack.c.l.bf16 %v1954_v51  ;;  %v1969_v35 = vrot.slane %v1954_v51, 6 }
 0x308   :  { %v1953_v18 = vpack.c.bf16 %v1950_v59, %v1950_v59  ;;  %v1955_v16 = vunpack.c.l.bf16 %v1952_v56  ;;  %v1967_v13 = vrot.slane %v1952_v56, 6 }
 0x309   :  { %v1960_v14 = vsub.f32 %v1951_v48, %v1957_v19  ;;  %v1984_v34 = vsel %vm14934_vm15, %v1945_v25, %v1969_v35  ;;  %vm14941_vm15 = vcmask 7168  }
 0x30a   :  { %v1956_v37 = vunpack.c.l.bf16 %v1953_v18  ;;  %v1958_v15 = vsub.f32 %v1949_v50, %v1955_v16  ;;  %v1968_v42 = vrot.slane %v1953_v18, 6  ;;  %v1978_v50 = vsel %vm14938_vm2, %v1943_v31, %v1967_v13  ;;  %vm14940_vm2 = vmmov %vm14939_vm5 }
 0x30b   :  { %v1963_v47 = vpack.c.bf16 %v1960_v14, %v1960_v14 }
 0x30c   :  { %v1959_v39 = vsub.f32 %v1950_v59, %v1956_v37  ;;  %v1961_v4 = vpack.c.bf16 %v1958_v15, %v1958_v15  ;;  %v1981_v49 = vsel %vm14936_vm12, %v1944_v5, %v1968_v42  ;;  %vm14290_vm12 = vcmask 23552  }
 0x30d   :  { %v1975_v43 = vrot.slane %v1963_v47, 4 }
 0x30e   :  { %v1962_v22 = vpack.c.bf16 %v1959_v39, %v1959_v39  ;;  %v1973_v44 = vrot.slane %v1961_v4, 4 }
 0x30f   :  { %v1992_v33 = vsel %vm14935_vm8, %v1984_v34, %v1975_v43  ;;  %vm14942_vm8 = vmmov %vm14940_vm2 }
 0x310   :  { %2070 = vmatmul.mubr.bf16.vlgmr.msra.gmra.mrb[8].mxu1 %v1992_v33  ;;  %v1974_v26 = vrot.slane %v1962_v22, 4  ;;  %v1986_v59 = vsel %vm14939_vm5, %v1978_v50, %v1973_v44 }
 0x312   :  { %v1989_v48 = vsel %vm14937_vm7, %v1981_v49, %v1974_v26  ;;  %vm14943_vm7 = vmmov %vm14940_vm2 }
 0x313   :  { %2026 = vmatprep.mubr.bf16.mxu0 %v1989_v48 }
 0x314   :  { %2027 = vmatmul.mubr.bf16.vlgmr.msra.gmra.mrb[0].mxu0 %v1986_v59 }
 0x3e3   :  { %v2071_v37 = vpop.f32.mrb[8].mxu1 }
 0x3e4   :  { %v2073_v51 = vpop.f32.mrb[9].mxu1 }
 0x3e5   :  { %v2075_v25 = vpop.f32.mrb[10].mxu1 }
 0x3e6   :  { %v2077_v35 = vpop.f32.mrb[11].mxu1 }
 0x3e7   :  { %v2028_v56 = vpop.f32.mrb[0].mxu0 }
 0x3e8   :  { %v2072_v19 = vadd.f32 %v2071_v37, %v2028_v56  ;;  %v2030_v34 = vpop.f32.mrb[1].mxu0 }
 0x3e9   :  { %v2074_v43 = vadd.f32 %v2073_v51, %v2030_v34  ;;  %v2032_v18 = vpop.f32.mrb[2].mxu0 }
 0x3ea   :  { %v2082_v16 = vrot.slane %v2072_v19, 4  ;;  %v2076_v14 = vadd.f32 %v2075_v25, %v2032_v18  ;;  %v2034_v42 = vpop.f32.mrb[3].mxu0 }
 0x3eb   :  { %v2083_v5 = vrot.slane %v2074_v43, 4  ;;  %v2078_v15 = vadd.f32 %v2077_v35, %v2034_v42 }
 0x3ec   :  { %v2086_v47 = vadd.f32 %v2082_v16, %v2072_v19  ;;  %v14314_v16 = vmov 0.0|0.0  }
 0x3ed   :  { %v2087_v31 = vadd.f32 %v2083_v5, %v2074_v43  ;;  %8552 = vmatprep.subr.bf16.mxu1 %v14314_v16 }
 0x3ee   :  { %v2088_v39 = vadd.f32 %v2086_v47, %v2076_v14 }
 0x3ef   :  { %v9927_v4 = vadd.f32 %v2087_v31, %v2078_v15 }
 0x3f0   :  { %2101 = vrot.lane.b32.xlu0 %v2088_v39, %s9032_s1  ;;  %v2092_v22 = vrot.slane %v2088_v39, 4 }
 0x3f1   :  { %2103 = vrot.lane.b32.xlu1 %v9927_v4, %s9032_s1  ;;  %v2093_v13 = vrot.slane %v9927_v4, 4 }
 0x3f4   :  { %2116 = vrot.lane.b32.xlu0 %v2088_v39, %s9036_s2 }
 0x3f5   :  { %2118 = vrot.lane.b32.xlu1 %v9927_v4, %s9036_s2 }
 0x3f8   :  { %2132 = vrot.lane.b32.xlu0 %v2088_v39, %s9037_s13 }
 0x3f9   :  { %2134 = vrot.lane.b32.xlu1 %v9927_v4, %s9037_s13 }
 0x3fc   :  { %2148 = vrot.lane.b32.xlu0 %v2088_v39, %s9038_s14 }
 0x3fd   :  { %2150 = vrot.lane.b32.xlu1 %v9927_v4, %s9038_s14 }
 0x400   :  { %2163 = vrot.lane.b32.xlu0 %v2088_v39, %s9039_s15 }
 0x401   :  { %2165 = vrot.lane.b32.xlu1 %v9927_v4, %s9039_s15 }
 0x404   :  { %2179 = vrot.lane.b32.xlu0 %v2088_v39, %s9040_s16 }
 0x405   :  { %2181 = vrot.lane.b32.xlu1 %v9927_v4, %s9040_s16 }
 0x408   :  { %2195 = vrot.lane.b32.xlu0 %v2088_v39, %s9041_s17 }
 0x409   :  { %2094 = vrot.lane.b32.xlu1 %v2092_v22, %s9033_s21 }
 0x40c   :  { %2108 = vrot.lane.b32.xlu0 %v2092_v22, %s9034_s22 }
 0x40d   :  { %2096 = vrot.lane.b32.xlu1 %v2093_v13, %s9033_s21 }
 0x410   :  { %2124 = vrot.lane.b32.xlu0 %v2092_v22, %s9042_s18 }
 0x411   :  { %2110 = vrot.lane.b32.xlu1 %v2093_v13, %s9034_s22 }
 0x414   :  { %2140 = vrot.lane.b32.xlu0 %v2092_v22, %s9043_s19 }
 0x415   :  { %2126 = vrot.lane.b32.xlu1 %v2093_v13, %s9042_s18 }
 0x418   :  { %2155 = vrot.lane.b32.xlu0 %v2092_v22, %s9044_s20 }
 0x419   :  { %2142 = vrot.lane.b32.xlu1 %v2093_v13, %s9043_s19 }
 0x41c   :  { %2171 = vrot.lane.b32.xlu0 %v2092_v22, %s9045_s23 }
 0x41d   :  { %2157 = vrot.lane.b32.xlu1 %v2093_v13, %s9044_s20 }
 0x420   :  { %2187 = vrot.lane.b32.xlu0 %v2092_v22, %s9046_s24 }
 0x421   :  { %2173 = vrot.lane.b32.xlu1 %v2093_v13, %s9045_s23 }
 0x424   :  { %2203 = vrot.lane.b32.xlu0 %v2092_v22, %s9047_s26 }
 0x425   :  { %2189 = vrot.lane.b32.xlu1 %v2093_v13, %s9046_s24 }
 0x429   :  { %2197 = vrot.lane.b32.xlu1 %v9927_v4, %s9041_s17 }
 0x462   :  { %v2102_v33 = vpop.permute.xlu0 %2101 }
 0x463   :  { %v2104_v44 = vpop.permute.xlu1 %2103 }
 0x466   :  { %v2117_v26 = vpop.permute.xlu0 %2116 }
 0x467   :  { %v2119_v49 = vpop.permute.xlu1 %2118 }
 0x46a   :  { %v2133_v48 = vpop.permute.xlu0 %2132 }
 0x46b   :  { %v2135_v50 = vpop.permute.xlu1 %2134 }
 0x46e   :  { %v2149_v59 = vpop.permute.xlu0 %2148 }
 0x46f   :  { %v2151_v37 = vpop.permute.xlu1 %2150 }
 0x472   :  { %v2164_v51 = vpop.permute.xlu0 %2163 }
 0x473   :  { %v2166_v25 = vpop.permute.xlu1 %2165 }
 0x476   :  { %v9966_v35 = vpop.permute.xlu0 %2179 }
 0x477   :  { %v9968_v56 = vpop.permute.xlu1 %2181 }
 0x47a   :  { %v9970_v19 = vpop.permute.xlu0 %2195 }
 0x47b   :  { %v2095_v34 = vpop.permute.xlu1 %2094 }
 0x47c   :  { %v2206_v43 = vsel %vm14939_vm5, %v2088_v39, %v2095_v34  ;;  %vm14944_vm5 = vcmask 15360  }
 0x47d   :  { %2243 = vrot.lane.b32.xlu1 %v2206_v43, %s9048_s27  ;;  %v2105_v22 = vsel %vm14944_vm5, %v2102_v33, %v2104_v44  ;;  %vm14946_vm5 = vmmov %vm14940_vm2 }
 0x47e   :  { %v2109_v18 = vpop.permute.xlu0 %2108 }
 0x47f   :  { %v2097_v14 = vpop.permute.xlu1 %2096  ;;  %v2208_v42 = vsel %vm14940_vm2, %v2102_v33, %v2109_v18 }
 0x480   :  { %v2098_v5 = vsel %vm14941_vm15, %v2095_v34, %v2097_v14  ;;  %vm14292_vm15 = vcmask 39936  }
 0x481   :  { %2247 = vrot.lane.b32.xlu1 %v2208_v42, %s9048_s27  ;;  %v2207_v15 = vsel %vm14942_vm8, %v9927_v4, %v2098_v5  ;;  %vm14945_vm8 = vmmov %vm14940_vm2  ;;  %v2121_v42 = vsel %vm14291_vm6, %v2117_v26, %v2119_v49  ;;  %vm14295_vm6 = vcmask 72704  }
 0x482   :  { %v2125_v47 = vpop.permute.xlu0 %2124  ;;  %2245 = vrot.lane.b32.xlu0 %v2207_v15, %s9048_s27 }
 0x483   :  { %v2111_v31 = vpop.permute.xlu1 %2110  ;;  %v2210_v39 = vsel %vm14943_vm7, %v2117_v26, %v2125_v47  ;;  %vm14293_vm7 = vcmask 48128  }
 0x484   :  { %v2113_v13 = vsel %vm14290_vm12, %v2109_v18, %v2111_v31  ;;  %vm14294_vm12 = vcmask 56320   ;;  %v2137_v31 = vsel %vm14293_vm7, %v2133_v48, %v2135_v50 }
 0x485   :  { %2251 = vrot.lane.b32.xlu1 %v2210_v39, %s9048_s27  ;;  %v2209_v34 = vsel %vm14940_vm2, %v2105_v22, %v2113_v13 }
 0x486   :  { %v2141_v43 = vpop.permute.xlu0 %2140  ;;  %2249 = vrot.lane.b32.xlu0 %v2209_v34, %s9048_s27 }
 0x487   :  { %v2127_v4 = vpop.permute.xlu1 %2126  ;;  %v2212_v14 = vsel %vm14945_vm8, %v2133_v48, %v2141_v43  ;;  %vm14947_vm8 = vmmov %vm14940_vm2 }
 0x488   :  { %v2129_v5 = vsel %vm14292_vm15, %v2125_v47, %v2127_v4  ;;  %vm14949_vm15 = vcmask 64512  }
 0x489   :  { %2255 = vrot.lane.b32.xlu1 %v2212_v14, %s9048_s27  ;;  %v2211_v33 = vsel %vm14946_vm5, %v2121_v42, %v2129_v5  ;;  %vm14948_vm5 = vmmov %vm14940_vm2  ;;  %v2152_v13 = vsel %vm14949_vm15, %v2149_v59, %v2151_v37  ;;  %vm14299_vm15 = vcmask 97280  }
 0x48a   :  { %v2156_v44 = vpop.permute.xlu0 %2155  ;;  %2253 = vrot.lane.b32.xlu0 %v2211_v33, %s9048_s27  ;;  %vm14950_vm7 = vmmov %vm14948_vm5 }
 0x48b   :  { %v2143_v18 = vpop.permute.xlu1 %2142  ;;  %v2214_v15 = vsel %vm14940_vm2, %v2149_v59, %v2156_v44  ;;  %vm14300_vm2 = vcmask 80896  }
 0x48c   :  { %v2145_v39 = vsel %vm14294_vm12, %v2141_v43, %v2143_v18  ;;  %vm14296_vm12 = vcmask 89088   ;;  %v2168_v14 = vsel %vm14300_vm2, %v2164_v51, %v2166_v25  ;;  %v1297_v18 = vld [vmem:[%s14137_s6] sm:$0xff] }
 0x48d   :  { %2259 = vrot.lane.b32.xlu1 %v2214_v15, %s9048_s27  ;;  %v2213_v26 = vsel %vm14947_vm8, %v2137_v31, %v2145_v39  ;;  %vm14951_vm8 = vmmov %vm14948_vm5  ;;  %v14308_v15 = vmov 0.0   ;;  %v10033_v39 = vld [vmem:[%s14138_s7] sm:$0x7] }
 0x48e   :  { %v2172_v49 = vpop.permute.xlu0 %2171  ;;  %2257 = vrot.lane.b32.xlu0 %v2213_v26, %s9048_s27  ;;  %v10037_v26 = vrot.slane %v10033_v39, %v9127_v7 }
 0x48f   :  { %v2158_v47 = vpop.permute.xlu1 %2157  ;;  %v2216_v22 = vsel %vm14948_vm5, %v2164_v51, %v2172_v49 }
 0x490   :  { %v2160_v34 = vsel %vm14295_vm6, %v2156_v44, %v2158_v47  ;;  %vm14298_vm6 = vcmask 105472   ;;  %v2184_v44 = vsel %vm14299_vm15, %v9966_v35, %v9968_v56  ;;  %vm386_vm2 = vcmp.eq.s32.totalorder %v9133_v9, %v10037_v26 }
 0x491   :  { %2263 = vrot.lane.b32.xlu1 %v2216_v22, %s9048_s27  ;;  %v2215_v48 = vsel %vm14950_vm7, %v2152_v13, %v2160_v34  ;;  %vm14952_vm7 = vmmov %vm14948_vm5  ;;  %v14957_v47 = vmov 1.0|1.0   ;;  %v14958_v22 = vmov 0  ;;  %vm395_vm14 = vcmp.eq.s32.totalorder %v9254_v21, %v10037_v26 }
 0x492   :  { %v2188_v50 = vpop.permute.xlu0 %2187  ;;  %2261 = vrot.lane.b32.xlu0 %v2215_v48, %s9048_s27  ;;  %v14961_v13 = vmov 0  ;;  %v14964_v34 = vmov 0  ;;  %v14967_v48 = vmov 0 }
 0x493   :  { %v2174_v43 = vpop.permute.xlu1 %2173  ;;  %v2218_v4 = vsel %vm14951_vm8, %v9966_v35, %v2188_v50  ;;  %vm14953_vm8 = vmmov %vm14948_vm5 }
 0x494   :  { %v2176_v42 = vsel %vm14296_vm12, %v2172_v49, %v2174_v43  ;;  %vm14297_vm12 = vcmask 113664   ;;  %v10041_v49 = vrot.slane %v10033_v39, %v9130_v8  ;;  %v14970_v43 = vmov 0 }
 0x495   :  { %2267 = vrot.lane.b32.xlu1 %v2218_v4, %s9048_s27  ;;  %v2217_v59 = vsel %vm14948_vm5, %v2168_v14, %v2176_v42  ;;  %vm14301_vm5 = vmmov 0   ;;  %v14973_v4 = vmov 0 }
 0x496   :  { %v2204_v37 = vpop.permute.xlu0 %2203  ;;  %2265 = vrot.lane.b32.xlu0 %v2217_v59, %s9048_s27  ;;  %8310 = vmatprep.mubr.msk.f32.mxu1 %vm14301_vm5, %v14308_v15  ;;  %vm389_vm5 = vcmp.eq.s32.totalorder %v9136_v10, %v10037_v26  ;;  %vm385_vm13 = vcmp.eq.s32.totalorder %v9133_v9, %v10041_v49  ;;  %vm388_vm1 = vcmp.eq.s32.totalorder %v9136_v10, %v10041_v49 }
 0x497   :  { %v2190_v5 = vpop.permute.xlu1 %2189  ;;  %v2220_v33 = vsel %vm14952_vm7, %v9970_v19, %v2204_v37  ;;  %vm10077_vm0 = vmpackc.low %vm389_vm5, %vm386_vm2  ;;  %vm394_vm2 = vcmp.eq.s32.totalorder %v9254_v21, %v10041_v49  ;;  %vm398_vm5 = vcmp.eq.s32.totalorder %v9264_v23, %v10037_v26 }
 0x498   :  { %v2192_v51 = vsel %vm14298_vm6, %v2188_v50, %v2190_v5  ;;  %vm382_vm6 = vcmp.eq.s32.totalorder %v9124_v6, %v10041_v49  ;;  %v14962_v13 = vsel %vm10077_vm0, 4294967295, %v14961_v13 }
 0x499   :  { %2271 = vrot.lane.b32.xlu1 %v2220_v33, %s9048_s27  ;;  %v2219_v25 = vsel %vm14953_vm8, %v2184_v44, %v2192_v51  ;;  %vm380_vm8 = vcmp.eq.s32.totalorder %v9114_v2, %v10037_v26  ;;  %14963 = vst [vmem:[#allocation105_spill] sm:$0xff] %v14962_v13  ;;  %v14977_v13 = vmov 0.0|0.0  }
 0x49a   :  { %2269 = vrot.lane.b32.xlu0 %v2219_v25, %s9048_s27 }
 0x49b   :  { %v2198_v31 = vpop.permute.xlu1 %2197 }
 0x49c   :  { %v2200_v35 = vsel %vm14297_vm12, %v9970_v19, %v2198_v31  ;;  %vm379_vm12 = vcmp.eq.s32.totalorder %v9114_v2, %v10041_v49  ;;  %v14954_v19 = vmov 0 }
 0x49d   :  { %2224 = vperm.xlu1 %9004, %v1297_v18   ;;  %v2221_v56 = vsel %vm14952_vm7, %v2200_v35, %v2204_v37  ;;  %vm383_vm7 = vcmp.eq.s32.totalorder %v9124_v6, %v10037_v26 }
 0x49e   :  { %2273 = vrot.lane.b32.xlu0 %v2221_v56, %s9048_s27  ;;  %vm10051_vm15 = vmpackc.low %vm383_vm7, %vm380_vm8  ;;  %vm392_vm7 = vcmp.eq.s32.totalorder %v9251_v20, %v10037_v26 }
 0x49f   :  { %v14955_v19 = vsel %vm10051_vm15, 4294967295, %v14954_v19  ;;  %7262 = vmatprep.subr.msk.bf16.mxu0 %vm10051_vm15, %v14957_v47  ;;  %vm10066_vm8 = vmpackc.low %vm382_vm6, %vm379_vm12  ;;  %vm391_vm15 = vcmp.eq.s32.totalorder %v9251_v20, %v10041_v49 }
 0x4a0   :  { %14956 = vst [vmem:[#allocation103_spill] sm:$0xff] %v14955_v19  ;;  %v14959_v22 = vsel %vm10066_vm8, 4294967295, %v14958_v22  ;;  %7264 = vmatpush1.bf16.msk.msra.mxu0 %vm10066_vm8, %v14957_v47  ;;  %vm10084_vm6 = vmpackc.low %vm388_vm1, %vm385_vm13  ;;  %vm401_vm1 = vcmp.eq.s32.totalorder %v9267_v24, %v10037_v26 }
 0x4a1   :  { %14960 = vst [vmem:[#allocation104_spill] sm:$0xff] %v14959_v22  ;;  %7266 = vmatprep.subr.msk.bf16.mxu0 %vm10077_vm0, %v14957_v47  ;;  %v14965_v34 = vsel %vm10084_vm6, 4294967295, %v14964_v34  ;;  %vm10088_vm12 = vmpackc.low %vm395_vm14, %vm392_vm7  ;;  %vm14342_vm7 = vcmask 924672  }
 0x4a2   :  { %14966 = vst [vmem:[#allocation106_spill] sm:$0xff] %v14965_v34  ;;  %v14968_v48 = vsel %vm10088_vm12, 4294967295, %v14967_v48  ;;  %vm10106_vm14 = vmpackc.low %vm394_vm2, %vm391_vm15  ;;  %vm14343_vm15 = vcmask 523264   ;;  %vm14983_vm2 = vmmov 0  }
 0x4a3   :  { %14969 = vst [vmem:[#allocation107_spill] sm:$0xff] %v14968_v48  ;;  %v14971_v43 = vsel %vm10106_vm14, 4294967295, %v14970_v43  ;;  %vm10110_vm13 = vmpackc.low %vm401_vm1, %vm398_vm5  ;;  %vm397_vm5 = vcmp.eq.s32.totalorder %v9264_v23, %v10041_v49  ;;  %vm400_vm1 = vcmp.eq.s32.totalorder %v9267_v24, %v10041_v49 }
 0x4a4   :  { %7268 = vmatpush1.bf16.msk.msra.mxu0 %vm10084_vm6, %v14957_v47  ;;  %14972 = vst [vmem:[#allocation108_spill] sm:$0xff] %v14971_v43  ;;  %v14974_v4 = vsel %vm10110_vm13, 4294967295, %v14973_v4 }
 0x4a5   :  { %7270 = vmatprep.subr.msk.bf16.mxu0 %vm10088_vm12, %v14957_v47  ;;  %14975 = vst [vmem:[#allocation109_spill] sm:$0xff] %v14974_v4 }
 0x4a8   :  { %7272 = vmatpush1.bf16.msk.msra.mxu0 %vm10106_vm14, %v14957_v47 }
 0x4a9   :  { %7274 = vmatprep.subr.msk.bf16.mxu0 %vm10110_vm13, %v14957_v47  ;;  %vm407_vm13 = vcmp.eq.s32.totalorder %v9356_v46, %v10037_v26 }
 0x4ef   :  { %v2244_v50 = vpop.permute.xlu1 %2243 }
 0x4f3   :  { %v2248_v14 = vpop.permute.xlu1 %2247 }
 0x4f4   :  { %v2246_v42 = vpop.permute.xlu0 %2245 }
 0x4f5   :  { %v2276_v59 = vsel %vm14342_vm7, %v2244_v50, %v2246_v42  ;;  %v1296_v50 = vld [vmem:[%s14139_s5] sm:$0xff] }
 0x4f6   :  { %v2297_v44 = vand.u32 4294901760, %v2276_v59  ;;  %v2294_v4 = vsel %vm14343_vm15, %v1296_v50, 0  ;;  %vm404_vm15 = vcmp.eq.s32.totalorder %v9353_v45, %v10037_v26 }
 0x4f7   :  { %v2252_v37 = vpop.permute.xlu1 %2251  ;;  %vm10278_vm14 = vmpackc.low %vm407_vm13, %vm404_vm15  ;;  %vm410_vm13 = vcmp.eq.s32.totalorder %v9381_v53, %v10037_v26  ;;  %vm413_vm15 = vcmp.eq.s32.totalorder %v9384_v54, %v10037_v26 }
 0x4f8   :  { %v2250_v5 = vpop.permute.xlu0 %2249  ;;  %vm10300_vm12 = vmpackc.low %vm413_vm15, %vm410_vm13  ;;  %vm416_vm13 = vcmp.eq.s32.totalorder %v9409_v57, %v10037_v26  ;;  %vm419_vm15 = vcmp.eq.s32.totalorder %v9412_v58, %v10037_v26 }
 0x4f9   :  { %v2277_v33 = vsel %vm14342_vm7, %v2248_v14, %v2250_v5 }
 0x4fa   :  { %v2300_v51 = vand.u32 4294901760, %v2277_v33 }
 0x4fb   :  { %v2256_v25 = vpop.permute.xlu1 %2255 }
 0x4fc   :  { %v10122_v18 = vpack.c.bf16 %v2300_v51, %v2297_v44  ;;  %v2254_v31 = vpop.permute.xlu0 %2253 }
 0x4fd   :  { %v2278_v35 = vsel %vm14342_vm7, %v2252_v37, %v2254_v31  ;;  %v10134_v37 = vand.u32 4294901760, %v2294_v4  ;;  %v10137_v31 = vsub.f32 %v2277_v33, %v2300_v51 }
 0x4fe   :  { %8554 = vmatpush3.bf16.msra.mxu1 %v10122_v18  ;;  %v2303_v5 = vand.u32 4294901760, %v2278_v35 }
 0x4ff   :  { %v2260_v56 = vpop.permute.xlu1 %2259  ;;  %8555 = vmatprep.subr.bf16.mxu1 %v14314_v16  ;;  %14976 = vst [vmem:[#allocation110_spill] sm:$0xff] %v10134_v37  ;;  %v10145_v50 = vsub.f32 %v2294_v4, %v10134_v37  ;;  %v14327_v63 = vand.u32 4294901760, %v10137_v31 }
 0x500   :  { %v2258_v42 = vpop.permute.xlu0 %2257 }
 0x501   :  { %v2279_v14 = vsel %vm14342_vm7, %v2256_v25, %v2258_v42  ;;  %v10141_v25 = vsub.f32 %v2276_v59, %v2297_v44  ;;  %14978 = vst [vmem:[#allocation111_spill] sm:$0xff] %v10145_v50  ;;  %v10154_v59 = vand.u32 4294901760, %v10145_v50  ;;  %v10156_v44 = vsub.f32 %v2278_v35, %v2303_v5 }
 0x502   :  { %v2306_v15 = vand.u32 4294901760, %v2279_v14 }
 0x503   :  { %v2264_v48 = vpop.permute.xlu1 %2263  ;;  %v14334_v51 = vand.u32 4294901760, %v10141_v25  ;;  %14979 = vst [vmem:[#allocation112_spill] sm:$0xff] %v10154_v59  ;;  %v2372_v7 = vsub.f32 %v10145_v50, %v10154_v59 }
 0x504   :  { %v10132_v43 = vpack.c.bf16 %v2306_v15, %v2303_v5  ;;  %v2262_v34 = vpop.permute.xlu0 %2261  ;;  %v10148_v8 = vsub.f32 %v2279_v14, %v2306_v15 }
 0x505   :  { %v2280_v16 = vsel %vm14342_vm7, %v2260_v56, %v2262_v34  ;;  %v2383_v35 = vsub.f32 %v10141_v25, %v14334_v51 }
 0x506   :  { %8557 = vmatpush3.bf16.msra.mxu1 %v10132_v43  ;;  %v2309_v19 = vand.u32 4294901760, %v2280_v16 }
 0x507   :  { %8558 = vmatprep.subr.bf16.mxu1 %v14977_v13  ;;  %v2268_v30 = vpop.permute.xlu1 %2267 }
 0x508   :  { %v2266_v22 = vpop.permute.xlu0 %2265 }
 0x509   :  { %v2281_v42 = vsel %vm14342_vm7, %v2264_v48, %v2266_v22  ;;  %v2390_v22 = vsub.f32 %v10137_v31, %v14327_v63  ;;  %v14335_v63 = vand.u32 4294901760, %v10156_v44 }
 0x50a   :  { %v2312_v0 = vand.u32 4294901760, %v2281_v42 }
 0x50b   :  { %v2272_v56 = vpop.permute.xlu1 %2271  ;;  %v2391_v15 = vand.u32 4294901760, %v2390_v22 }
 0x50c   :  { %v10150_v33 = vpack.c.bf16 %v2312_v0, %v2309_v19  ;;  %v2270_v34 = vpop.permute.xlu0 %2269  ;;  %v10165_v4 = vsub.f32 %v2281_v42, %v2312_v0  ;;  %v14980_v0 = vand.u32 4294901760, %v10148_v8 }
 0x50d   :  { %v2282_v48 = vsel %vm14342_vm7, %v2268_v30, %v2270_v34  ;;  %v10174_v30 = vsub.f32 %v2280_v16, %v2309_v19  ;;  %v2397_v16 = vsub.f32 %v10156_v44, %v14335_v63 }
 0x50e   :  { %8560 = vmatpush3.bf16.msra.mxu1 %v10150_v33  ;;  %v2315_v34 = vand.u32 4294901760, %v2282_v48  ;;  %v2404_v42 = vsub.f32 %v10148_v8, %v14980_v0  ;;  %v14338_v28 = vand.u32 4294901760, %v10165_v4 }
 0x50f   :  { %8561 = vmatprep.subr.bf16.mxu1 %v14977_v13  ;;  %v2410_v19 = vand.u32 4294901760, %v10174_v30 }
 0x510   :  { %v2274_v14 = vpop.permute.xlu0 %2273  ;;  %v10190_v22 = vsub.f32 %v2282_v48, %v2315_v34  ;;  %v2405_v0 = vand.u32 4294901760, %v2404_v42 }
 0x511   :  { %v2283_v5 = vsel %vm14342_vm7, %v2272_v56, %v2274_v14  ;;  %v10184_v56 = vand.u32 4294901760, %v2372_v7  ;;  %v2384_v14 = vand.u32 4294901760, %v2383_v35  ;;  %v2411_v63 = vsub.f32 %v10174_v30, %v2410_v19  ;;  %vm10267_vm7 = vmpackc.low %vm400_vm1, %vm397_vm5 }
 0x512   :  { %v2318_v32 = vand.u32 4294901760, %v2283_v5  ;;  %v2424_v48 = vand.u32 4294901760, %v10190_v22  ;;  %7276 = vmatpush1.bf16.msk.msra.mxu0 %vm10267_vm7, %v14957_v47  ;;  %vm403_vm5 = vcmp.eq.s32.totalorder %v9353_v45, %v10041_v49  ;;  %vm406_vm1 = vcmp.eq.s32.totalorder %v9356_v46, %v10041_v49 }
 0x513   :  { %14981 = vst [vmem:[#allocation113_spill] sm:$0xff] %v10184_v56  ;;  %v8565_v35 = vpack.c.bf16 %v2391_v15, %v2384_v14  ;;  %v2412_v27 = vand.u32 4294901760, %v2411_v63  ;;  %v14984_v63 = vand.u32 4294901760, %v10141_v25  ;;  %7278 = vmatprep.subr.msk.bf16.mxu0 %vm10278_vm14, %v14957_v47 }
 0x514   :  { %v10180_v17 = vpack.c.bf16 %v2318_v32, %v2315_v34  ;;  %v10182_v51 = vsub.f32 %v2283_v5, %v2318_v32  ;;  %v2418_v32 = vsub.f32 %v10165_v4, %v14338_v28  ;;  %v2398_v5 = vand.u32 4294901760, %v2397_v16 }
 0x515   :  { %v14982_v34 = vmov 0.0   ;;  %v2425_v15 = vsub.f32 %v10190_v22, %v2424_v48 }
 0x516   :  { %8563 = vmatpush3.bf16.msra.mxu1 %v10180_v17  ;;  %v2431_v7 = vand.u32 4294901760, %v10182_v51  ;;  %v2419_v42 = vand.u32 4294901760, %v2418_v32  ;;  %v8568_v28 = vpack.c.bf16 %v2405_v0, %v2398_v5  ;;  %v8577_v32 = vpack.c.bf16 %v10137_v31, %v10141_v25 }
 0x517   :  { %8564 = vmatprep.subr.bf16.mxu1 %v14977_v13  ;;  %v14988_v25 = vand.u32 4294901760, %v10165_v4 }
 0x518   :  { %v2432_v55 = vsub.f32 %v10182_v51, %v2431_v7  ;;  %v8571_v16 = vpack.c.bf16 %v2419_v42, %v2412_v27  ;;  %v8580_v27 = vpack.c.bf16 %v10148_v8, %v10156_v44  ;;  %v8610_v5 = vpack.c.bf16 %v2431_v7, %v2424_v48 }
 0x519   :  { %8311 = vmatmul.mubr.f32.vlgmr.msra.gmra.mrb[6].mxu1 %v10184_v56  ;;  %v2426_v56 = vand.u32 4294901760, %v2425_v15  ;;  %v15010_v7 = vmov 0  ;;  %v15013_v48 = vmov 0  ;;  %v15016_v15 = vmov 0 }
 0x51a   :  { %8566 = vmatpush3.bf16.msra.mxu1 %v8565_v35  ;;  %8329 = vmatprep.mubr.msk.f32.mxu1 %vm14983_vm2, %v14982_v34  ;;  %v2433_v14 = vand.u32 4294901760, %v2432_v55  ;;  %v8586_v55 = vpack.c.bf16 %v10182_v51, %v10190_v22  ;;  %v14985_v51 = vand.u32 4294901760, %v10137_v31  ;;  %v14987_v22 = vand.u32 4294901760, %v10148_v8 }
 0x51b   :  { %8567 = vmatprep.subr.bf16.mxu1 %v14977_v13  ;;  %v8607_v31 = vpack.c.bf16 %v14988_v25, %v2410_v19  ;;  %v14989_v8 = vmov 0  ;;  %v14374_v19 = vsub.s32 2, %v9114_v2  ;;  %v15061_v25 = vmov 0 }
 0x51c   :  { %v8574_v35 = vpack.c.bf16 %v2433_v14, %v2426_v56  ;;  %v14986_v56 = vand.u32 4294901760, %v10156_v44  ;;  %v14990_v8 = vsel %vm10267_vm7, 4294967295, %v14989_v8  ;;  %vm10289_vm7 = vmpackc.low %vm406_vm1, %vm403_vm5  ;;  %vm409_vm5 = vcmp.eq.s32.totalorder %v9381_v53, %v10041_v49 }
 0x51d   :  { %14991 = vst [vmem:[#allocation114_spill] sm:$0xff] %v14990_v8  ;;  %7280 = vmatpush1.bf16.msk.msra.mxu0 %vm10289_vm7, %v14957_v47  ;;  %vm412_vm1 = vcmp.eq.s32.totalorder %v9384_v54, %v10041_v49  ;;  %v15004_v44 = vmov 0  ;;  %v10363_v42 = vrot.slane %v10033_v39, %v14374_v19  ;;  %v15019_v39 = vmov 0 }
 0x51e   :  { %8569 = vmatpush3.bf16.msra.mxu1 %v8568_v28  ;;  %v8583_v28 = vpack.c.bf16 %v10165_v4, %v10174_v30  ;;  %v8601_v30 = vpack.c.bf16 %v14985_v51, %v14984_v63  ;;  %v8604_v0 = vpack.c.bf16 %v14987_v22, %v14986_v56  ;;  %7282 = vmatprep.subr.msk.bf16.mxu0 %vm10300_vm12, %v14957_v47  ;;  %v15007_v4 = vmov 0 }
 0x51f   :  { %8570 = vmatprep.subr.bf16.mxu1 %v14977_v13  ;;  %vm381_vm6 = vcmp.eq.s32.totalorder %v9114_v2, %v10363_v42  ;;  %vm384_vm0 = vcmp.eq.s32.totalorder %v9124_v6, %v10363_v42  ;;  %v15022_v14 = vmov 0  ;;  %v15043_v63 = vmov 0 }
 0x520   :  { %vm10405_vm8 = vmpackc.low %vm384_vm0, %vm381_vm6  ;;  %vm433_vm6 = vcmp.eq.s32.totalorder %v9535_v40, %v10041_v49  ;;  %v15046_v51 = vmov 0  ;;  %v15052_v56 = vmov 0  ;;  %v15055_v22 = vmov 0 }
 0x521   :  { %v15070_v19 = vmov 0 }
 0x522   :  { %8572 = vmatpush3.bf16.msra.mxu1 %v8571_v16  ;;  %v15025_v16 = vmov 0 }
 0x523   :  { %8573 = vmatprep.subr.bf16.mxu1 %v14977_v13  ;;  %v15026_v16 = vsel %vm10405_vm8, 4294967295, %v15025_v16 }
 0x524   :  { %15027 = vst [vmem:[#allocation126_spill] sm:$0xff] %v15026_v16  ;;  %v15094_v16 = vmov 0 }
 0x526   :  { %8575 = vmatpush3.bf16.msra.mxu1 %v8574_v35  ;;  %v15028_v35 = vmov 0 }
 0x527   :  { %8576 = vmatprep.subr.bf16.mxu1 %v14977_v13 }
 0x529   :  { %8330 = vmatmul.mubr.f32.vlgmr.msra.gmra.mrb[6].mxu1 %v10134_v37 }
 0x52a   :  { %8578 = vmatpush3.bf16.msra.mxu1 %v8577_v32  ;;  %8348 = vmatprep.mubr.msk.f32.mxu1 %vm14983_vm2, %v14982_v34  ;;  %v15031_v32 = vmov 0 }
 0x52b   :  { %8579 = vmatprep.subr.bf16.mxu1 %v14977_v13 }
 0x52e   :  { %8581 = vmatpush3.bf16.msra.mxu1 %v8580_v27  ;;  %v15034_v27 = vmov 0 }
 0x52f   :  { %8582 = vmatprep.subr.bf16.mxu1 %v14977_v13 }
 0x532   :  { %8584 = vmatpush3.bf16.msra.mxu1 %v8583_v28  ;;  %v15037_v28 = vmov 0 }
 0x533   :  { %8585 = vmatprep.subr.bf16.mxu1 %v14977_v13 }
 0x536   :  { %8587 = vmatpush3.bf16.msra.mxu1 %v8586_v55  ;;  %v15040_v55 = vmov 0 }
 0x537   :  { %8588 = vmatprep.subr.bf16.mxu1 %v14977_v13 }
 0x539   :  { %8349 = vmatmul.mubr.f32.vlgmr.msra.gmra.mrb[6].mxu1 %v10145_v50  ;;  %v10720_v50 = vpop.permute.xlu1 %2224 }
 0x53a   :  { %8590 = vmatpush3.bf16.msra.mxu1 %v10122_v18  ;;  %8367 = vmatprep.mubr.msk.f32.mxu1 %vm14983_vm2, %v14982_v34  ;;  %15117 = vst [vmem:[#allocation155_spill] sm:$0xff] %v10720_v50 }
 0x53b   :  { %8591 = vmatprep.subr.bf16.mxu1 %v14977_v13 }
 0x53e   :  { %8593 = vmatpush3.bf16.msra.mxu1 %v10132_v43 }
 0x53f   :  { %8594 = vmatprep.subr.bf16.mxu1 %v14977_v13 }
 0x542   :  { %8596 = vmatpush3.bf16.msra.mxu1 %v10150_v33 }
 0x543   :  { %8597 = vmatprep.subr.bf16.mxu1 %v14977_v13 }
 0x546   :  { %8599 = vmatpush3.bf16.msra.mxu1 %v10180_v17 }
 0x547   :  { %8600 = vmatprep.subr.bf16.mxu1 %v14977_v13 }
 0x549   :  { %8368 = vmatmul.mubr.f32.vlgmr.msra.gmra.mrb[6].mxu1 %v10154_v59  ;;  %v15099_v59 = vmov 0 }
 0x54a   :  { %8602 = vmatpush3.bf16.msra.mxu1 %v8601_v30  ;;  %8386 = vmatprep.mubr.msk.f32.mxu1 %vm14983_vm2, %v14982_v34  ;;  %v15049_v30 = vmov 0 }
 0x54b   :  { %8603 = vmatprep.subr.bf16.mxu1 %v14977_v13 }
 0x54e   :  { %8605 = vmatpush3.bf16.msra.mxu1 %v8604_v0  ;;  %v15058_v0 = vmov 0 }
 0x54f   :  { %8606 = vmatprep.subr.bf16.mxu1 %v14977_v13 }
 0x552   :  { %8608 = vmatpush3.bf16.msra.mxu1 %v8607_v31  ;;  %v15064_v31 = vmov 0 }
 0x553   :  { %8609 = vmatprep.subr.bf16.mxu1 %v14977_v13 }
 0x556   :  { %8611 = vmatpush3.bf16.msra.mxu1 %v8610_v5  ;;  %v15067_v5 = vmov 0 }
 0x557   :  { %8612 = vmatprep.subr.bf16.mxu1 %v14977_v13 }
 0x559   :  { %8387 = vmatmul.mubr.f32.vlgmr.msra.gmra.mrb[6].mxu1 %v10134_v37 }
 0x55a   :  { %8614 = vmatpush3.bf16.msra.mxu1 %v10122_v18  ;;  %8405 = vmatprep.mubr.msk.f32.mxu1 %vm14983_vm2, %v14982_v34  ;;  %v14998_v18 = vmov 0 }
 0x55b   :  { %8615 = vmatprep.subr.bf16.mxu1 %v14977_v13  ;;  %v14999_v18 = vsel %vm10300_vm12, 4294967295, %v14998_v18 }
 0x55c   :  { %15000 = vst [vmem:[#allocation117_spill] sm:$0xff] %v14999_v18 }
 0x55e   :  { %8617 = vmatpush3.bf16.msra.mxu1 %v10132_v43  ;;  %v14995_v43 = vmov 0 }
 0x55f   :  { %8618 = vmatprep.subr.bf16.mxu1 %v14977_v13  ;;  %v14996_v43 = vsel %vm10289_vm7, 4294967295, %v14995_v43  ;;  %vm10311_vm7 = vmpackc.low %vm412_vm1, %vm409_vm5  ;;  %vm415_vm5 = vcmp.eq.s32.totalorder %v9409_v57, %v10041_v49  ;;  %vm418_vm1 = vcmp.eq.s32.totalorder %v9412_v58, %v10041_v49 }
 0x560   :  { %14997 = vst [vmem:[#allocation116_spill] sm:$0xff] %v14996_v43  ;;  %7284 = vmatpush1.bf16.msk.msra.mxu0 %vm10311_vm7, %v14957_v47 }
 0x562   :  { %8620 = vmatpush3.bf16.msra.mxu1 %v10150_v33  ;;  %v15001_v33 = vmov 0 }
 0x563   :  { %8621 = vmatprep.subr.bf16.mxu1 %v14977_v13  ;;  %v15002_v33 = vsel %vm10311_vm7, 4294967295, %v15001_v33  ;;  %vm10333_vm7 = vmpackc.low %vm418_vm1, %vm415_vm5  ;;  %vm421_vm5 = vcmp.eq.s32.totalorder %v9437_v61, %v10041_v49  ;;  %vm424_vm1 = vcmp.eq.s32.totalorder %v9440_v62, %v10041_v49 }
 0x564   :  { %15003 = vst [vmem:[#allocation118_spill] sm:$0xff] %v15002_v33  ;;  %v15008_v4 = vsel %vm10333_vm7, 4294967295, %v15007_v4 }
 0x565   :  { %15009 = vst [vmem:[#allocation120_spill] sm:$0xff] %v15008_v4 }
 0x566   :  { %8623 = vmatpush3.bf16.msra.mxu1 %v10180_v17  ;;  %v14992_v17 = vmov 0 }
 0x567   :  { %v14993_v17 = vsel %vm10278_vm14, 4294967295, %v14992_v17  ;;  %vm10322_vm14 = vmpackc.low %vm419_vm15, %vm416_vm13  ;;  %vm422_vm13 = vcmp.eq.s32.totalorder %v9437_v61, %v10037_v26  ;;  %vm425_vm15 = vcmp.eq.s32.totalorder %v9440_v62, %v10037_v26 }
 0x568   :  { %14994 = vst [vmem:[#allocation115_spill] sm:$0xff] %v14993_v17  ;;  %v15005_v44 = vsel %vm10322_vm14, 4294967295, %v15004_v44  ;;  %7286 = vmatprep.subr.msk.bf16.mxu0 %vm10322_vm14, %v14957_v47  ;;  %vm10345_vm12 = vmpackc.low %vm425_vm15, %vm422_vm13  ;;  %vm428_vm13 = vcmp.eq.s32.totalorder %v9479_v12, %v10037_v26  ;;  %vm431_vm15 = vcmp.eq.s32.totalorder %v9482_v29, %v10037_v26  ;;  %vm427_vm14 = vcmp.eq.s32.totalorder %v9479_v12, %v10041_v49 }
 0x569   :  { %8406 = vmatmul.mubr.f32.vlgmr.msra.gmra.mrb[6].mxu1 %v10134_v37  ;;  %15006 = vst [vmem:[#allocation119_spill] sm:$0xff] %v15005_v44  ;;  %7288 = vmatpush1.bf16.msk.msra.mxu0 %vm10333_vm7, %v14957_v47  ;;  %v15011_v7 = vsel %vm10345_vm12, 4294967295, %v15010_v7  ;;  %vm10356_vm7 = vmpackc.low %vm424_vm1, %vm421_vm5  ;;  %vm429_vm5 = vcmp.eq.s32.totalorder %v9479_v12, %v10363_v42  ;;  %vm432_vm1 = vcmp.eq.s32.totalorder %v9482_v29, %v10363_v42 }
 0x56a   :  { %15012 = vst [vmem:[#allocation121_spill] sm:$0xff] %v15011_v7  ;;  %7290 = vmatprep.subr.msk.bf16.mxu0 %vm10345_vm12, %v14957_v47  ;;  %v15014_v48 = vsel %vm10356_vm7, 4294967295, %v15013_v48  ;;  %vm10376_vm12 = vmpackc.low %vm431_vm15, %vm428_vm13 }
 0x56b   :  { %15015 = vst [vmem:[#allocation122_spill] sm:$0xff] %v15014_v48  ;;  %v15017_v15 = vsel %vm10376_vm12, 4294967295, %v15016_v15  ;;  %vm10391_vm13 = vmpackc.low %vm432_vm1, %vm429_vm5  ;;  %vm434_vm5 = vcmp.eq.s32.totalorder %v9535_v40, %v10037_v26  ;;  %vm437_vm1 = vcmp.eq.s32.totalorder %v9538_v41, %v10037_v26 }
 0x56c   :  { %15018 = vst [vmem:[#allocation123_spill] sm:$0xff] %v15017_v15  ;;  %v15020_v39 = vsel %vm10391_vm13, 4294967295, %v15019_v39  ;;  %8148 = vmatprep.subr.msk.bf16.mxu1 %vm10391_vm13, %v14957_v47  ;;  %vm10420_vm0 = vmpackc.low %vm437_vm1, %vm434_vm5  ;;  %vm436_vm13 = vcmp.eq.s32.totalorder %v9538_v41, %v10041_v49 }
 0x56d   :  { %7292 = vmatpush1.bf16.msk.msra.mxu0 %vm10356_vm7, %v14957_v47  ;;  %vm430_vm7 = vcmp.eq.s32.totalorder %v9482_v29, %v10041_v49  ;;  %15021 = vst [vmem:[#allocation124_spill] sm:$0xff] %v15020_v39  ;;  %8149 = vmatpush3.bf16.msk.msra.mxu1 %vm10405_vm8, %v14957_v47  ;;  %v15029_v35 = vsel %vm10420_vm0, 4294967295, %v15028_v35  ;;  %vm10442_vm1 = vmpackc.low %vm436_vm13, %vm433_vm6  ;;  %vm441_vm13 = vcmp.eq.s32.totalorder %v9591_v11, %v10363_v42  ;;  %v15098_v39 = vld [vmem:[#allocation96_spill] sm:$0xff] }
 0x56e   :  { %7294 = vmatprep.subr.msk.bf16.mxu0 %vm10376_vm12, %v14957_v47  ;;  %vm10398_vm15 = vmpackc.low %vm430_vm7, %vm427_vm14  ;;  %vm435_vm14 = vcmp.eq.s32.totalorder %v9535_v40, %v10363_v42  ;;  %vm438_vm7 = vcmp.eq.s32.totalorder %v9538_v41, %v10363_v42  ;;  %15030 = vst [vmem:[#allocation127_spill] sm:$0xff] %v15029_v35  ;;  %vm390_vm12 = vcmp.eq.s32.totalorder %v9136_v10, %v10363_v42  ;;  %v15035_v27 = vsel %vm10442_vm1, 4294967295, %v15034_v27 }
 0x56f   :  { %v15023_v14 = vsel %vm10398_vm15, 4294967295, %v15022_v14  ;;  %vm10435_vm5 = vmpackc.low %vm438_vm7, %vm435_vm14  ;;  %15036 = vst [vmem:[#allocation129_spill] sm:$0xff] %v15035_v27  ;;  %vm440_vm14 = vcmp.eq.s32.totalorder %v9591_v11, %v10037_v26  ;;  %vm443_vm7 = vcmp.eq.s32.totalorder %v9594_v1, %v10037_v26  ;;  %vm444_vm6 = vcmp.eq.s32.totalorder %v9594_v1, %v10363_v42 }
 0x570   :  { %15024 = vst [vmem:[#allocation125_spill] sm:$0xff] %v15023_v14  ;;  %v15032_v32 = vsel %vm10435_vm5, 4294967295, %v15031_v32  ;;  %8150 = vmatprep.subr.msk.bf16.mxu1 %vm10435_vm5, %v14957_v47  ;;  %vm442_vm5 = vcmp.eq.s32.totalorder %v9594_v1, %v10041_v49 }
 0x571   :  { %7296 = vmatpush1.bf16.msk.msra.mxu0 %vm10398_vm15, %v14957_v47  ;;  %vm387_vm15 = vcmp.eq.s32.totalorder %v9133_v9, %v10363_v42  ;;  %15033 = vst [vmem:[#allocation128_spill] sm:$0xff] %v15032_v32  ;;  %v15088_v32 = vmov 0 }
 0x572   :  { %7298 = vmatprep.subr.msk.bf16.mxu0 %vm10420_vm0, %v14957_v47  ;;  %vm10449_vm8 = vmpackc.low %vm390_vm12, %vm387_vm15  ;;  %vm439_vm15 = vcmp.eq.s32.totalorder %v9591_v11, %v10041_v49  ;;  %vm396_vm0 = vcmp.eq.s32.totalorder %v9254_v21, %v10363_v42 }
 0x573   :  { %v15038_v28 = vsel %vm10449_vm8, 4294967295, %v15037_v28  ;;  %8151 = vmatpush3.bf16.msk.msra.mxu1 %vm10449_vm8, %v14957_v47  ;;  %vm10464_vm12 = vmpackc.low %vm443_vm7, %vm440_vm14 }
 0x574   :  { %15039 = vst [vmem:[#allocation130_spill] sm:$0xff] %v15038_v28  ;;  %v15041_v55 = vsel %vm10464_vm12, 4294967295, %v15040_v55  ;;  %vm10479_vm14 = vmpackc.low %vm444_vm6, %vm441_vm13  ;;  %vm446_vm13 = vcmp.eq.s32.totalorder %v9647_v38, %v10037_v26  ;;  %vm449_vm6 = vcmp.eq.s32.totalorder %v9650_v60, %v10037_v26  ;;  %v15085_v28 = vmov 0 }
 0x575   :  { %7300 = vmatpush1.bf16.msk.msra.mxu0 %vm10442_vm1, %v14957_v47  ;;  %15042 = vst [vmem:[#allocation131_spill] sm:$0xff] %v15041_v55  ;;  %vm393_vm1 = vcmp.eq.s32.totalorder %v9251_v20, %v10363_v42  ;;  %v15044_v63 = vsel %vm10479_vm14, 4294967295, %v15043_v63  ;;  %8152 = vmatprep.subr.msk.bf16.mxu1 %vm10479_vm14, %v14957_v47  ;;  %vm10486_vm7 = vmpackc.low %vm442_vm5, %vm439_vm15  ;;  %vm447_vm5 = vcmp.eq.s32.totalorder %v9647_v38, %v10363_v42 }
 0x576   :  { %7302 = vmatprep.subr.msk.bf16.mxu0 %vm10464_vm12, %v14957_v47  ;;  %15045 = vst [vmem:[#allocation132_spill] sm:$0xff] %v15044_v63  ;;  %v15047_v51 = vsel %vm10486_vm7, 4294967295, %v15046_v51  ;;  %vm10493_vm8 = vmpackc.low %vm396_vm0, %vm393_vm1  ;;  %vm450_vm15 = vcmp.eq.s32.totalorder %v9650_v60, %v10363_v42  ;;  %vm445_vm1 = vcmp.eq.s32.totalorder %v9647_v38, %v10041_v49  ;;  %vm448_vm14 = vcmp.eq.s32.totalorder %v9650_v60, %v10041_v49  ;;  %v15084_v63 = vld [vmem:[#allocation88_spill] sm:$0xff] }
 0x577   :  { %15048 = vst [vmem:[#allocation133_spill] sm:$0xff] %v15047_v51  ;;  %v15050_v30 = vsel %vm10493_vm8, 4294967295, %v15049_v30  ;;  %8153 = vmatpush3.bf16.msk.msra.mxu1 %vm10493_vm8, %v14957_v47  ;;  %vm10508_vm0 = vmpackc.low %vm449_vm6, %vm446_vm13  ;;  %vm402_vm12 = vcmp.eq.s32.totalorder %v9267_v24, %v10363_v42 }
 0x578   :  { %15051 = vst [vmem:[#allocation134_spill] sm:$0xff] %v15050_v30  ;;  %v15053_v56 = vsel %vm10508_vm0, 4294967295, %v15052_v56  ;;  %vm10523_vm13 = vmpackc.low %vm450_vm15, %vm447_vm5  ;;  %vm452_vm5 = vcmp.eq.s32.totalorder %v9703_v36, %v10037_v26  ;;  %vm455_vm15 = vcmp.eq.s32.totalorder %v9706_v52, %v10037_v26  ;;  %v15080_v30 = vmov 0 }
 0x579   :  { %7304 = vmatpush1.bf16.msk.msra.mxu0 %vm10486_vm7, %v14957_v47  ;;  %15054 = vst [vmem:[#allocation135_spill] sm:$0xff] %v15053_v56  ;;  %vm399_vm7 = vcmp.eq.s32.totalorder %v9264_v23, %v10363_v42  ;;  %v15056_v22 = vsel %vm10523_vm13, 4294967295, %v15055_v22  ;;  %8154 = vmatprep.subr.msk.bf16.mxu1 %vm10523_vm13, %v14957_v47  ;;  %vm10530_vm6 = vmpackc.low %vm448_vm14, %vm445_vm1  ;;  %vm453_vm14 = vcmp.eq.s32.totalorder %v9703_v36, %v10363_v42 }
 0x57a   :  { %7306 = vmatprep.subr.msk.bf16.mxu0 %vm10508_vm0, %v14957_v47  ;;  %15057 = vst [vmem:[#allocation136_spill] sm:$0xff] %v15056_v22  ;;  %v15059_v0 = vsel %vm10530_vm6, 4294967295, %v15058_v0  ;;  %vm10537_vm8 = vmpackc.low %vm402_vm12, %vm399_vm7  ;;  %vm456_vm1 = vcmp.eq.s32.totalorder %v9706_v52, %v10363_v42  ;;  %vm451_vm7 = vcmp.eq.s32.totalorder %v9703_v36, %v10041_v49  ;;  %vm454_vm13 = vcmp.eq.s32.totalorder %v9706_v52, %v10041_v49 }
 0x57b   :  { %15060 = vst [vmem:[#allocation137_spill] sm:$0xff] %v15059_v0  ;;  %v15062_v25 = vsel %vm10537_vm8, 4294967295, %v15061_v25  ;;  %8155 = vmatpush3.bf16.msk.msra.mxu1 %vm10537_vm8, %v14957_v47  ;;  %vm10552_vm12 = vmpackc.low %vm455_vm15, %vm452_vm5  ;;  %vm408_vm0 = vcmp.eq.s32.totalorder %v9356_v46, %v10363_v42  ;;  %vm458_vm8 = vcmp.eq.s32.totalorder %v9759_v3, %v10037_v26  ;;  %v15077_v22 = vmov 0 }
 0x57c   :  { %15063 = vst [vmem:[#allocation138_spill] sm:$0xff] %v15062_v25  ;;  %v15065_v31 = vsel %vm10552_vm12, 4294967295, %v15064_v31  ;;  %vm10567_vm5 = vmpackc.low %vm456_vm1, %vm453_vm14  ;;  %v15073_v25 = vld [vmem:[#allocation80_spill] sm:$0xff]  ;;  %vm459_vm14 = vcmp.eq.s32.totalorder %v9759_v3, %v10363_v42 }
 0x57d   :  { %7308 = vmatpush1.bf16.msk.msra.mxu0 %vm10530_vm6, %v14957_v47  ;;  %15066 = vst [vmem:[#allocation139_spill] sm:$0xff] %v15065_v31  ;;  %vm405_vm6 = vcmp.eq.s32.totalorder %v9353_v45, %v10363_v42  ;;  %v15068_v5 = vsel %vm10567_vm5, 4294967295, %v15067_v5  ;;  %8156 = vmatprep.subr.msk.bf16.mxu1 %vm10567_vm5, %v14957_v47  ;;  %vm10574_vm15 = vmpackc.low %vm454_vm13, %vm451_vm7  ;;  %vm461_vm3 = vcmp.eq.s32.totalorder %v15073_v25, %v10037_v26 }
 0x57e   :  { %7310 = vmatprep.subr.msk.bf16.mxu0 %vm10552_vm12, %v14957_v47  ;;  %15069 = vst [vmem:[#allocation140_spill] sm:$0xff] %v15068_v5  ;;  %v15071_v19 = vsel %vm10574_vm15, 4294967295, %v15070_v19  ;;  %vm10587_vm1 = vmpackc.low %vm408_vm0, %vm405_vm6  ;;  %v15074_v5 = vmov 0  ;;  %vm462_vm13 = vcmp.eq.s32.totalorder %v15073_v25, %v10363_v42  ;;  %vm457_vm7 = vcmp.eq.s32.totalorder %v9759_v3, %v10041_v49 }
 0x57f   :  { %15072 = vst [vmem:[#allocation141_spill] sm:$0xff] %v15071_v19  ;;  %v15075_v5 = vsel %vm10587_vm1, 4294967295, %v15074_v5  ;;  %vm460_vm5 = vcmp.eq.s32.totalorder %v15073_v25, %v10041_v49  ;;  %8157 = vmatpush3.bf16.msk.msra.mxu1 %vm10587_vm1, %v14957_v47  ;;  %vm10600_vm12 = vmpackc.low %vm461_vm3, %vm458_vm8  ;;  %vm411_vm0 = vcmp.eq.s32.totalorder %v9381_v53, %v10363_v42  ;;  %vm414_vm6 = vcmp.eq.s32.totalorder %v9384_v54, %v10363_v42 }
 0x580   :  { %15076 = vst [vmem:[#allocation142_spill] sm:$0xff] %v15075_v5  ;;  %v15078_v22 = vsel %vm10600_vm12, 4294967295, %v15077_v22  ;;  %v15083_v5 = vld [vmem:[#allocation87_spill] sm:$0xff]  ;;  %vm467_vm8 = vcmp.eq.s32.totalorder %v15084_v63, %v10037_v26  ;;  %vm10622_vm1 = vmpackc.low %vm460_vm5, %vm457_vm7  ;;  %vm466_vm7 = vcmp.eq.s32.totalorder %v15084_v63, %v10041_v49 }
 0x581   :  { %7312 = vmatpush1.bf16.msk.msra.mxu0 %vm10574_vm15, %v14957_v47  ;;  %15079 = vst [vmem:[#allocation143_spill] sm:$0xff] %v15078_v22  ;;  %vm10611_vm15 = vmpackc.low %vm462_vm13, %vm459_vm14  ;;  %vm464_vm3 = vcmp.eq.s32.totalorder %v15083_v5, %v10037_v26  ;;  %v15086_v28 = vsel %vm10622_vm1, 4294967295, %v15085_v28  ;;  %vm465_vm14 = vcmp.eq.s32.totalorder %v15083_v5, %v10363_v42  ;;  %vm468_vm13 = vcmp.eq.s32.totalorder %v15084_v63, %v10363_v42 }
 0x582   :  { %7314 = vmatprep.subr.msk.bf16.mxu0 %vm10600_vm12, %v14957_v47  ;;  %v15081_v30 = vsel %vm10611_vm15, 4294967295, %v15080_v30  ;;  %8158 = vmatprep.subr.msk.bf16.mxu1 %vm10611_vm15, %v14957_v47  ;;  %15087 = vst [vmem:[#allocation145_spill] sm:$0xff] %v15086_v28  ;;  %vm10633_vm12 = vmpackc.low %vm414_vm6, %vm411_vm0  ;;  %vm463_vm5 = vcmp.eq.s32.totalorder %v15083_v5, %v10041_v49  ;;  %vm417_vm0 = vcmp.eq.s32.totalorder %v9409_v57, %v10363_v42 }
 0x583   :  { %15082 = vst [vmem:[#allocation144_spill] sm:$0xff] %v15081_v30  ;;  %v15089_v32 = vsel %vm10633_vm12, 4294967295, %v15088_v32  ;;  %8159 = vmatpush3.bf16.msk.msra.mxu1 %vm10633_vm12, %v14957_v47  ;;  %vm10644_vm15 = vmpackc.low %vm467_vm8, %vm464_vm3  ;;  %v15091_v30 = vmov 0  ;;  %vm420_vm6 = vcmp.eq.s32.totalorder %v9412_v58, %v10363_v42  ;;  %vm473_vm8 = vcmp.eq.s32.totalorder %v15098_v39, %v10037_v26 }
 0x584   :  { %15090 = vst [vmem:[#allocation146_spill] sm:$0xff] %v15089_v32  ;;  %v15092_v30 = vsel %vm10644_vm15, 4294967295, %v15091_v30  ;;  %v15097_v32 = vld [vmem:[#allocation95_spill] sm:$0xff]  ;;  %vm10666_vm12 = vmpackc.low %vm466_vm7, %vm463_vm5  ;;  %vm472_vm7 = vcmp.eq.s32.totalorder %v15098_v39, %v10041_v49 }
 0x585   :  { %7316 = vmatpush1.bf16.msk.msra.mxu0 %vm10622_vm1, %v14957_v47  ;;  %15093 = vst [vmem:[#allocation147_spill] sm:$0xff] %v15092_v30  ;;  %vm10655_vm1 = vmpackc.low %vm468_vm13, %vm465_vm14  ;;  %vm470_vm3 = vcmp.eq.s32.totalorder %v15097_v32, %v10037_v26  ;;  %v15100_v59 = vsel %vm10666_vm12, 4294967295, %v15099_v59  ;;  %vm471_vm14 = vcmp.eq.s32.totalorder %v15097_v32, %v10363_v42  ;;  %vm474_vm13 = vcmp.eq.s32.totalorder %v15098_v39, %v10363_v42 }
 0x586   :  { %7318 = vmatprep.subr.msk.bf16.mxu0 %vm10644_vm15, %v14957_v47  ;;  %v15095_v16 = vsel %vm10655_vm1, 4294967295, %v15094_v16  ;;  %8160 = vmatprep.subr.msk.bf16.mxu1 %vm10655_vm1, %v14957_v47  ;;  %15101 = vst [vmem:[#allocation149_spill] sm:$0xff] %v15100_v59  ;;  %vm10677_vm15 = vmpackc.low %vm420_vm6, %vm417_vm0  ;;  %v15102_v26 = vmov 0  ;;  %vm469_vm5 = vcmp.eq.s32.totalorder %v15097_v32, %v10041_v49  ;;  %vm423_vm0 = vcmp.eq.s32.totalorder %v9437_v61, %v10363_v42 }
 0x587   :  { %15096 = vst [vmem:[#allocation148_spill] sm:$0xff] %v15095_v16  ;;  %v15103_v26 = vsel %vm10677_vm15, 4294967295, %v15102_v26  ;;  %8161 = vmatpush3.bf16.msk.msra.mxu1 %vm10677_vm15, %v14957_v47  ;;  %vm10688_vm1 = vmpackc.low %vm473_vm8, %vm470_vm3  ;;  %v15105_v16 = vmov 0  ;;  %vm426_vm6 = vcmp.eq.s32.totalorder %v9440_v62, %v10363_v42  ;;  %v15108_v49 = vmov 0 }
 0x588   :  { %15104 = vst [vmem:[#allocation150_spill] sm:$0xff] %v15103_v26  ;;  %v15106_v16 = vsel %vm10688_vm1, 4294967295, %v15105_v16  ;;  %vm10706_vm3 = vmpackc.low %vm472_vm7, %vm469_vm5  ;;  %v15111_v26 = vmov 0  ;;  %v15114_v42 = vmov 0 }
 0x589   :  { %7320 = vmatpush1.bf16.msk.msra.mxu0 %vm10666_vm12, %v14957_v47  ;;  %15107 = vst [vmem:[#allocation151_spill] sm:$0xff] %v15106_v16  ;;  %vm10699_vm12 = vmpackc.low %vm474_vm13, %vm471_vm14  ;;  %v15112_v26 = vsel %vm10706_vm3, 4294967295, %v15111_v26  ;;  %vm15118_vm14 = vcmask 1041408   ;;  %vm15119_vm13 = vcmask 1043456  }
 0x58a   :  { %7322 = vmatprep.subr.msk.bf16.mxu0 %vm10688_vm1, %v14957_v47  ;;  %v15109_v49 = vsel %vm10699_vm12, 4294967295, %v15108_v49  ;;  %8162 = vmatprep.subr.msk.bf16.mxu1 %vm10699_vm12, %v14957_v47  ;;  %15113 = vst [vmem:[#allocation153_spill] sm:$0xff] %v15112_v26  ;;  %vm10713_vm8 = vmpackc.low %vm426_vm6, %vm423_vm0 }
 0x58b   :  { %15110 = vst [vmem:[#allocation152_spill] sm:$0xff] %v15109_v49  ;;  %v15115_v42 = vsel %vm10713_vm8, 4294967295, %v15114_v42  ;;  %8163 = vmatpush3.bf16.msk.msra.mxu1 %vm10713_vm8, %v14957_v47  ;;  %vm15120_vm5 = vmmov %vm15118_vm14  ;;  %vm15161_vm8 = vcmask 89088  }
 0x58c   :  { %15116 = vst [vmem:[#allocation154_spill] sm:$0xff] %v15115_v42  ;;  %vm15121_vm7 = vmmov %vm15119_vm13 }
 0x58d   :  { %7324 = vmatpush1.bf16.msk.msra.mxu0 %vm10706_vm3, %v14957_v47  ;;  %vm15122_vm0 = vmmov %vm15121_vm7 }
 0x58e   :  { %vm15123_vm6 = vmmov %vm15122_vm0 }
 0x63c   :  { %v2829_v49 = vpop.f32.mrb[6].mxu1 }
 0x63d   :  { %v8894_v37 = vadd.f32 %v2829_v49, %v10720_v50  ;;  %v8407_v16 = vpop.f32.mrb[7].mxu1 }
 0x63f   :  { %v7260_v59 = vmul.f32 -1.442695, %v8894_v37 }
 0x641   :  { %9014 = vpow2.f32 %v7260_v59 }
 0x64b   :  { %v9015_v30 = vpop.eup %9014 }
 0x64c   :  { %v2836_v28 = vadd.f32 1.0, %v9015_v30 }
 0x64e   :  { %9016 = vrcp.f32 %v2836_v28 }
 0x658   :  { %v9017_v26 = vpop.eup %9016 }
 0x659   :  { %v2839_v22 = vmul.f32 %v9017_v26, %v8894_v37 }
 0x65b   :  { %v2841_v19 = vrot.slane %v2839_v22, 4  ;;  %v2843_v31 = vpack.c.bf16 %v2839_v22, %v2839_v22 }
 0x65d   :  { %v2845_v0 = vunpack.c.l.bf16 %v2843_v31  ;;  %v2844_v56 = vpack.c.bf16 %v2841_v19, %v2841_v19 }
 0x65f   :  { %v2847_v51 = vsub.f32 %v2839_v22, %v2845_v0  ;;  %v2846_v42 = vunpack.c.l.bf16 %v2844_v56 }
 0x661   :  { %v2849_v55 = vpack.c.bf16 %v2847_v51, %v2847_v51  ;;  %v2848_v27 = vsub.f32 %v2841_v19, %v2846_v42 }
 0x663   :  { %v2850_v35 = vpack.c.bf16 %v2848_v27, %v2848_v27  ;;  %v2851_v14 = vunpack.c.l.bf16 %v2849_v55  ;;  %v2859_v30 = vrot.slane %v2849_v55, 6 }
 0x665   :  { %v2852_v15 = vunpack.c.l.bf16 %v2850_v35  ;;  %v2853_v49 = vsub.f32 %v2847_v51, %v2851_v14  ;;  %v2860_v59 = vrot.slane %v2850_v35, 6  ;;  %v2867_v22 = vsel %vm15120_vm5, %v2843_v31, %v2859_v30  ;;  %vm15126_vm5 = vmmov %vm15122_vm0 }
 0x667   :  { %v2854_v16 = vsub.f32 %v2848_v27, %v2852_v15  ;;  %v2855_v50 = vpack.c.bf16 %v2853_v49, %v2853_v49  ;;  %v2870_v37 = vsel %vm15118_vm14, %v2844_v56, %v2860_v59  ;;  %vm15124_vm14 = vmmov %vm15122_vm0 }
 0x669   :  { %v2856_v48 = vpack.c.bf16 %v2854_v16, %v2854_v16  ;;  %v2863_v28 = vrot.slane %v2855_v50, 4 }
 0x66b   :  { %v2864_v7 = vrot.slane %v2856_v48, 4  ;;  %v2872_v19 = vsel %vm15121_vm7, %v2867_v22, %v2863_v28  ;;  %vm15127_vm7 = vcmask 7168  }
 0x66d   :  { %v2875_v26 = vsel %vm15119_vm13, %v2870_v37, %v2864_v7  ;;  %vm15125_vm13 = vmmov %vm15122_vm0 }
 0x66e   :  { %2909 = vmatprep.mubr.bf16.mxu0 %v2875_v26  ;;  %2952 = vmatprep.mubr.bf16.mxu1 %v2875_v26 }
 0x66f   :  { %2910 = vmatmul.mubr.bf16.vlgmr.msra.gmra.mrb[4].mxu0 %v2872_v19  ;;  %2953 = vmatmul.mubr.bf16.vlgmr.msra.gmra.mrb[12].mxu1 %v2872_v19 }
 0x670   :  { %3361 = vmatprep.mubr.f32.mxu1 %v14982_v34 }
 0x742   :  { %v2911_v15 = vpop.f32.mrb[4].mxu0  ;;  %v8164_v14 = vpop.f32.mrb[12].mxu1 }
 0x743   :  { %v2964_v35 = vrot.slane %v2911_v15, 4  ;;  %v2913_v27 = vpop.f32.mrb[5].mxu0  ;;  %v8165_v50 = vpop.f32.mrb[13].mxu1 }
 0x744   :  { %v2965_v48 = vrot.slane %v2913_v27, 4  ;;  %v8166_v55 = vadd.f32 %v8165_v50, %v8164_v14  ;;  %v2915_v51 = vpop.f32.mrb[6].mxu0  ;;  %v8167_v56 = vpop.f32.mrb[14].mxu1 }
 0x745   :  { %v2970_v7 = vadd.f32 %v2964_v35, %v2911_v15  ;;  %v2917_v0 = vpop.f32.mrb[7].mxu0  ;;  %v8168_v31 = vpop.f32.mrb[15].mxu1 }
 0x746   :  { %v2971_v42 = vadd.f32 %v2965_v48, %v2913_v27  ;;  %v2966_v49 = vrot.slane %v8166_v55, 4  ;;  %v8169_v16 = vadd.f32 %v8168_v31, %v8167_v56 }
 0x747   :  { %v10728_v59 = vadd.f32 %v2970_v7, %v2915_v51 }
 0x748   :  { %v2972_v30 = vadd.f32 %v8166_v55, %v2966_v49  ;;  %v10730_v28 = vadd.f32 %v2971_v42, %v2917_v0 }
 0x749   :  { %2993 = vrot.lane.b32.xlu1 %v10728_v59, %s9032_s1  ;;  %v2979_v22 = vrot.slane %v10728_v59, 4 }
 0x74a   :  { %v10734_v37 = vadd.f32 %v8169_v16, %v2972_v30  ;;  %2995 = vrot.lane.b32.xlu0 %v10730_v28, %s9032_s1  ;;  %v2980_v26 = vrot.slane %v10730_v28, 4 }
 0x74c   :  { %v2981_v19 = vrot.slane %v10734_v37, 4 }
 0x74d   :  { %3015 = vrot.lane.b32.xlu1 %v10728_v59, %s9036_s2 }
 0x74e   :  { %3017 = vrot.lane.b32.xlu0 %v10730_v28, %s9036_s2 }
 0x751   :  { %3037 = vrot.lane.b32.xlu1 %v10728_v59, %s9037_s13 }
 0x752   :  { %3039 = vrot.lane.b32.xlu0 %v10730_v28, %s9037_s13 }
 0x755   :  { %3059 = vrot.lane.b32.xlu1 %v10728_v59, %s9038_s14 }
 0x756   :  { %3061 = vrot.lane.b32.xlu0 %v10730_v28, %s9038_s14 }
 0x759   :  { %3081 = vrot.lane.b32.xlu1 %v10728_v59, %s9039_s15 }
 0x75a   :  { %3083 = vrot.lane.b32.xlu0 %v10730_v28, %s9039_s15 }
 0x75d   :  { %3103 = vrot.lane.b32.xlu1 %v10728_v59, %s9040_s16 }
 0x75e   :  { %3105 = vrot.lane.b32.xlu0 %v10730_v28, %s9040_s16 }
 0x761   :  { %3125 = vrot.lane.b32.xlu1 %v10728_v59, %s9041_s17 }
 0x762   :  { %3127 = vrot.lane.b32.xlu0 %v10730_v28, %s9041_s17 }
 0x765   :  { %2984 = vrot.lane.b32.xlu1 %v2980_v26, %s9033_s21 }
 0x766   :  { %2982 = vrot.lane.b32.xlu0 %v2979_v22, %s9033_s21 }
 0x769   :  { %2997 = vrot.lane.b32.xlu1 %v10734_v37, %s9032_s1 }
 0x76a   :  { %3004 = vrot.lane.b32.xlu0 %v2979_v22, %s9034_s22 }
 0x76d   :  { %3006 = vrot.lane.b32.xlu1 %v2980_v26, %s9034_s22 }
 0x76e   :  { %3026 = vrot.lane.b32.xlu0 %v2979_v22, %s9042_s18 }
 0x771   :  { %3019 = vrot.lane.b32.xlu1 %v10734_v37, %s9036_s2 }
 0x772   :  { %3048 = vrot.lane.b32.xlu0 %v2979_v22, %s9043_s19 }
 0x775   :  { %3028 = vrot.lane.b32.xlu1 %v2980_v26, %s9042_s18 }
 0x776   :  { %3070 = vrot.lane.b32.xlu0 %v2979_v22, %s9044_s20 }
 0x779   :  { %3041 = vrot.lane.b32.xlu1 %v10734_v37, %s9037_s13 }
 0x77a   :  { %3092 = vrot.lane.b32.xlu0 %v2979_v22, %s9045_s23 }
 0x77d   :  { %3050 = vrot.lane.b32.xlu1 %v2980_v26, %s9043_s19 }
 0x77e   :  { %3114 = vrot.lane.b32.xlu0 %v2979_v22, %s9046_s24 }
 0x781   :  { %3063 = vrot.lane.b32.xlu1 %v10734_v37, %s9038_s14 }
 0x782   :  { %2986 = vrot.lane.b32.xlu0 %v2981_v19, %s9033_s21 }
 0x785   :  { %3072 = vrot.lane.b32.xlu1 %v2980_v26, %s9044_s20 }
 0x786   :  { %3008 = vrot.lane.b32.xlu0 %v2981_v19, %s9034_s22 }
 0x789   :  { %3085 = vrot.lane.b32.xlu1 %v10734_v37, %s9039_s15 }
 0x78a   :  { %3030 = vrot.lane.b32.xlu0 %v2981_v19, %s9042_s18 }
 0x78d   :  { %3094 = vrot.lane.b32.xlu1 %v2980_v26, %s9045_s23 }
 0x78e   :  { %3052 = vrot.lane.b32.xlu0 %v2981_v19, %s9043_s19 }
 0x791   :  { %3107 = vrot.lane.b32.xlu1 %v10734_v37, %s9040_s16 }
 0x792   :  { %3074 = vrot.lane.b32.xlu0 %v2981_v19, %s9044_s20 }
 0x795   :  { %3116 = vrot.lane.b32.xlu1 %v2980_v26, %s9046_s24 }
 0x796   :  { %3096 = vrot.lane.b32.xlu0 %v2981_v19, %s9045_s23 }
 0x799   :  { %3129 = vrot.lane.b32.xlu1 %v10734_v37, %s9041_s17 }
 0x79a   :  { %3118 = vrot.lane.b32.xlu0 %v2981_v19, %s9046_s24 }
 0x79d   :  { %3138 = vrot.lane.b32.xlu1 %v2980_v26, %s9047_s26 }
 0x79e   :  { %3136 = vrot.lane.b32.xlu0 %v2979_v22, %s9047_s26 }
 0x7bb   :  { %v2994_v15 = vpop.permute.xlu1 %2993 }
 0x7bc   :  { %v10802_v14 = vpop.permute.xlu0 %2995 }
 0x7bf   :  { %v3016_v35 = vpop.permute.xlu1 %3015 }
 0x7c0   :  { %v10804_v27 = vpop.permute.xlu0 %3017 }
 0x7c3   :  { %v3038_v50 = vpop.permute.xlu1 %3037 }
 0x7c4   :  { %v10806_v48 = vpop.permute.xlu0 %3039 }
 0x7c7   :  { %v3060_v55 = vpop.permute.xlu1 %3059 }
 0x7c8   :  { %v10808_v51 = vpop.permute.xlu0 %3061 }
 0x7cb   :  { %v3082_v56 = vpop.permute.xlu1 %3081 }
 0x7cc   :  { %v10810_v7 = vpop.permute.xlu0 %3083 }
 0x7cf   :  { %v10812_v0 = vpop.permute.xlu1 %3103 }
 0x7d0   :  { %v10814_v31 = vpop.permute.xlu0 %3105 }
 0x7d3   :  { %v10816_v42 = vpop.permute.xlu1 %3125 }
 0x7d4   :  { %v10818_v49 = vpop.permute.xlu0 %3127 }
 0x7d7   :  { %v10820_v16 = vpop.permute.xlu1 %2984 }
 0x7d8   :  { %v2983_v30 = vpop.permute.xlu0 %2982 }
 0x7d9   :  { %v3145_v26 = vsel %vm15122_vm0, %v10728_v59, %v2983_v30 }
 0x7da   :  { %3198 = vrot.lane.b32.xlu0 %v3145_v26, %s9048_s27 }
 0x7db   :  { %v10825_v22 = vpop.permute.xlu1 %2997 }
 0x7dc   :  { %v3005_v19 = vpop.permute.xlu0 %3004 }
 0x7dd   :  { %v3148_v4 = vsel %vm15123_vm6, %v2994_v15, %v3005_v19  ;;  %vm15128_vm6 = vmmov %vm15122_vm0 }
 0x7de   :  { %3204 = vrot.lane.b32.xlu1 %v3148_v4, %s9048_s27  ;;  %v2988_v4 = vsel %vm15127_vm7, %v2983_v30, %v10820_v16  ;;  %vm15132_vm7 = vcmask 39936  }
 0x7df   :  { %v10829_v44 = vpop.permute.xlu1 %3006  ;;  %v3146_v63 = vsel %vm15128_vm6, %v10730_v28, %v2988_v4 }
 0x7e0   :  { %v3027_v33 = vpop.permute.xlu0 %3026 }
 0x7e1   :  { %v3151_v18 = vsel %vm15124_vm14, %v3016_v35, %v3027_v33  ;;  %vm15129_vm14 = vcmask 23552  }
 0x7e2   :  { %3210 = vrot.lane.b32.xlu0 %v3151_v18, %s9048_s27 }
 0x7e3   :  { %v10833_v43 = vpop.permute.xlu1 %3019 }
 0x7e4   :  { %v3049_v17 = vpop.permute.xlu0 %3048 }
 0x7e5   :  { %v3154_v59 = vsel %vm15125_vm13, %v3038_v50, %v3049_v17  ;;  %vm15130_vm13 = vcmask 15360  }
 0x7e6   :  { %3216 = vrot.lane.b32.xlu1 %v3154_v59, %s9048_s27  ;;  %v3010_v59 = vsel %vm15129_vm14, %v3005_v19, %v10829_v44  ;;  %vm15135_vm14 = vcmask 56320  }
 0x7e7   :  { %v10837_v26 = vpop.permute.xlu1 %3028 }
 0x7e8   :  { %v3071_v8 = vpop.permute.xlu0 %3070  ;;  %v3032_v3 = vsel %vm15132_vm7, %v3027_v33, %v10837_v26  ;;  %vm15137_vm7 = vcmask 72704  }
 0x7e9   :  { %v3157_v13 = vsel %vm15126_vm5, %v3060_v55, %v3071_v8  ;;  %vm15131_vm5 = vmmov %vm15122_vm0 }
 0x7ea   :  { %3222 = vrot.lane.b32.xlu0 %v3157_v13, %s9048_s27  ;;  %v2999_v13 = vsel %vm15130_vm13, %v2994_v15, %v10802_v14  ;;  %vm15134_vm6 = vmmov %vm15131_vm5  ;;  %vm15136_vm13 = vcmask 48128  }
 0x7eb   :  { %v10843_v39 = vpop.permute.xlu1 %3041  ;;  %v3149_v25 = vsel %vm15131_vm5, %v2999_v13, %v3010_v59  ;;  %v3043_v59 = vsel %vm15136_vm13, %v3038_v50, %v10806_v48  ;;  %vm15141_vm13 = vcmask 89088  }
 0x7ec   :  { %v3093_v18 = vpop.permute.xlu0 %3092 }
 0x7ed   :  { %v3160_v32 = vsel %vm15122_vm0, %v3082_v56, %v3093_v18  ;;  %vm15133_vm0 = vcmask 31744  }
 0x7ee   :  { %3228 = vrot.lane.b32.xlu1 %v3160_v32, %s9048_s27  ;;  %3200 = vrot.lane.b32.xlu0 %v3146_v63, %s9048_s27  ;;  %v3021_v32 = vsel %vm15133_vm0, %v3016_v35, %v10804_v27  ;;  %vm15138_vm0 = vcmask 64512  }
 0x7ef   :  { %v10852_v5 = vpop.permute.xlu1 %3050  ;;  %v3152_v63 = vsel %vm15134_vm6, %v3021_v32, %v3032_v3  ;;  %v3065_v3 = vsel %vm15138_vm0, %v3060_v55, %v10808_v51  ;;  %vm15139_vm6 = vmmov %vm15131_vm5  ;;  %vm15143_vm0 = vcmask 105472  }
 0x7f0   :  { %v3115_v30 = vpop.permute.xlu0 %3114  ;;  %v3054_v4 = vsel %vm15135_vm14, %v3049_v17, %v10852_v5  ;;  %vm15140_vm14 = vcmask 80896  }
 0x7f1   :  { %v3087_v50 = vsel %vm15140_vm14, %v3082_v56, %v10810_v7  ;;  %vm14451_vm14 = vcmask 121856  }
 0x7f2   :  { %3206 = vrot.lane.b32.xlu0 %v3149_v25, %s9048_s27  ;;  %v3155_v25 = vsel %vm15131_vm5, %v3043_v59, %v3054_v4 }
 0x7f3   :  { %v10860_v28 = vpop.permute.xlu1 %3063 }
 0x7f4   :  { %v2987_v19 = vpop.permute.xlu0 %2986 }
 0x7f6   :  { %3212 = vrot.lane.b32.xlu0 %v3152_v63, %s9048_s27 }
 0x7f7   :  { %v3073_v15 = vpop.permute.xlu1 %3072 }
 0x7f8   :  { %v3009_v33 = vpop.permute.xlu0 %3008  ;;  %v3076_v13 = vsel %vm15137_vm7, %v3071_v8, %v3073_v15  ;;  %vm15142_vm7 = vcmask 97280  }
 0x7f9   :  { %v3158_v17 = vsel %vm15139_vm6, %v3065_v3, %v3076_v13  ;;  %v3109_v55 = vsel %vm15142_vm7, %v10812_v0, %v10814_v31  ;;  %vm15144_vm6 = vmmov %vm15131_vm5 }
 0x7fa   :  { %3218 = vrot.lane.b32.xlu0 %v3155_v25, %s9048_s27 }
 0x7fb   :  { %v3086_v35 = vpop.permute.xlu1 %3085 }
 0x7fc   :  { %v3031_v32 = vpop.permute.xlu0 %3030 }
 0x7fe   :  { %3224 = vrot.lane.b32.xlu0 %v3158_v17, %s9048_s27 }
 0x7ff   :  { %v3095_v63 = vpop.permute.xlu1 %3094 }
 0x800   :  { %v3098_v52 = vsel %vm15141_vm13, %v3093_v18, %v3095_v63  ;;  %v3053_v4 = vpop.permute.xlu0 %3052  ;;  %vm15145_vm13 = vcmask 113664  }
 0x801   :  { %v3161_v8 = vsel %vm15131_vm5, %v3087_v50, %v3098_v52  ;;  %vm15146_vm7 = vmmov %vm15145_vm13 }
 0x802   :  { %3230 = vrot.lane.b32.xlu0 %v3161_v8, %s9048_s27  ;;  %v3131_v38 = vsel %vm15146_vm7, %v10816_v42, %v10818_v49 }
 0x803   :  { %v3108_v59 = vpop.permute.xlu1 %3107 }
 0x804   :  { %v3075_v25 = vpop.permute.xlu0 %3074 }
 0x807   :  { %v3117_v36 = vpop.permute.xlu1 %3116 }
 0x808   :  { %v3120_v13 = vsel %vm15143_vm0, %v3115_v30, %v3117_v36  ;;  %v3097_v3 = vpop.permute.xlu0 %3096  ;;  %vm15147_vm0 = vcmask 7168  }
 0x809   :  { %v3164_v17 = vsel %vm15144_vm6, %v3109_v55, %v3120_v13  ;;  %v2989_v34 = vsel %vm15147_vm0, %v10820_v16, %v2987_v19  ;;  %vm15148_vm6 = vmmov %vm15131_vm5  ;;  %vm15152_vm0 = vcmask 15360  }
 0x80a   :  { %3236 = vrot.lane.b32.xlu0 %v3164_v17, %s9048_s27  ;;  %vm15151_vm7 = vmmov %vm15148_vm6  ;;  %v3000_v16 = vsel %vm15152_vm0, %v10802_v14, %v10825_v22  ;;  %vm15156_vm0 = vcmask 56320  }
 0x80b   :  { %v3130_v56 = vpop.permute.xlu1 %3129  ;;  %v3055_v14 = vsel %vm15156_vm0, %v10852_v5, %v3053_v4  ;;  %v3099_v5 = vsel %vm15161_vm8, %v3095_v63, %v3097_v3  ;;  %vm15162_vm0 = vcmask 80896   ;;  %v15172_v3 = vmov 0 }
 0x80c   :  { %v3119_v18 = vpop.permute.xlu0 %3118  ;;  %v3132_v52 = vsel %vm15145_vm13, %v10818_v49, %v3130_v56  ;;  %vm15149_vm13 = vmmov %vm15131_vm5  ;;  %v3163_v49 = vsel %vm15151_vm7, %v10812_v0, %v3115_v30  ;;  %v3088_v30 = vsel %vm15162_vm0, %v10810_v7, %v3086_v35  ;;  %v10956_v35 = vld [vmem:[%s14141_s10] sm:$0xf] }
 0x80d   :  { %v3147_v17 = vsel %vm15149_vm13, %v10734_v37, %v2989_v34  ;;  %vm15153_vm13 = vcmask 39936   ;;  %vm15155_vm7 = vmmov %vm15148_vm6 }
 0x80e   :  { %v3033_v34 = vsel %vm15153_vm13, %v10837_v26, %v3031_v32  ;;  %vm15159_vm13 = vcmask 72704   ;;  %v15168_v32 = vld [vmem:[#allocation2_spill] sm:$0xff] }
 0x80f   :  { %v3139_v50 = vpop.permute.xlu1 %3138  ;;  %v3077_v26 = vsel %vm15159_vm13, %v3073_v15, %v3075_v25  ;;  %vm15165_vm13 = vcmask 97280   ;;  %v10960_v63 = vrot.slane %v10956_v35, %v15168_v32 }
 0x810   :  { %v3137_v8 = vpop.permute.xlu0 %3136  ;;  %v3168_v60 = vsel %vm15131_vm5, %v3132_v52, %v3139_v50  ;;  %vm15150_vm5 = vcmask 23552   ;;  %v3110_v19 = vsel %vm15165_vm13, %v10814_v31, %v3108_v59  ;;  %v15175_v52 = vmov 0 }
 0x811   :  { %v3141_v55 = vsel %vm14451_vm14, %v3137_v8, %v3139_v50  ;;  %3244 = vrot.lane.b32.xlu1 %v3168_v60, %s9048_s27  ;;  %v3011_v56 = vsel %vm15150_vm5, %v10829_v44, %v3009_v33  ;;  %vm15154_vm5 = vcmask 31744   ;;  %vm15158_vm14 = vmmov %vm15155_vm7  ;;  %15169 = vst [vmem:[#allocation2_spill] sm:$0xff] %v10960_v63  ;;  %vm661_vm13 = vcmp.eq.s32.totalorder %v9133_v9, %v10960_v63 }
 0x812   :  { %v3167_v13 = vsel %vm15148_vm6, %v3131_v38, %v3141_v55  ;;  %v3150_v60 = vsel %vm15148_vm6, %v3000_v16, %v3011_v56  ;;  %v1299_v38 = vld [vmem:[%s14140_s9] sm:$0x3f]  ;;  %v3022_v44 = vsel %vm15154_vm5, %v10804_v27, %v10833_v43  ;;  %vm15157_vm6 = vcmask 48128  }
 0x813   :  { %3242 = vrot.lane.b32.xlu0 %v3167_v13, %s9048_s27  ;;  %v3153_v37 = vsel %vm15155_vm7, %v3022_v44, %v3033_v34  ;;  %v3044_v0 = vsel %vm15157_vm6, %v10806_v48, %v10843_v39  ;;  %vm15160_vm5 = vcmask 64512   ;;  %vm15163_vm6 = vmmov %vm15155_vm7  ;;  %v15181_v55 = vmov 0  ;;  %v1298_v13 = vld [vmem:[%s14142_s8] sm:$0x3f] }
 0x814   :  { %v3156_v22 = vsel %vm15158_vm14, %v3044_v0, %v3055_v14  ;;  %v3066_v43 = vsel %vm15160_vm5, %v10808_v51, %v10860_v28  ;;  %v3162_v39 = vsel %vm15163_vm6, %v3088_v30, %v3099_v5  ;;  %vm15164_vm14 = vcmask 105472   ;;  %vm15166_vm12 = vmmov %vm15163_vm6 }
 0x815   :  { %3202 = vrot.lane.b32.xlu1 %v3147_v17, %s9048_s27  ;;  %v3159_v27 = vsel %vm15155_vm7, %v3066_v43, %v3077_v26  ;;  %v3121_v48 = vsel %vm15164_vm14, %v3117_v36, %v3119_v18  ;;  %vm15167_vm8 = vmmov %vm15163_vm6  ;;  %vm657_vm5 = vcmp.eq.s32.totalorder %v9124_v6, %v10960_v63  ;;  %v15185_v16 = vmov 0 }
 0x816   :  { %v3165_v51 = vsel %vm15166_vm12, %v3110_v19, %v3121_v48  ;;  %v3166_v28 = vsel %vm15167_vm8, %v10816_v42, %v3137_v8  ;;  %v15170_v42 = vld [vmem:[#allocation3_spill] sm:$0xff]  ;;  %vm653_vm12 = vcmp.eq.s32.totalorder %v9114_v2, %v10960_v63  ;;  %vm665_vm8 = vcmp.eq.s32.totalorder %v9136_v10, %v10960_v63 }
 0x817   :  { %3234 = vrot.lane.b32.xlu0 %v3163_v49, %s9048_s27  ;;  %v10964_v59 = vrot.slane %v10956_v35, %v15170_v42  ;;  %vm10970_vm7 = vmpackc.low %vm657_vm5, %vm653_vm12  ;;  %v15178_v8 = vmov 0 }
 0x818   :  { %v15173_v3 = vsel %vm10970_vm7, 4294967295, %v15172_v3  ;;  %7358 = vmatprep.subr.msk.bf16.mxu0 %vm10970_vm7, %v14957_v47  ;;  %vm681_vm7 = vcmp.eq.s32.totalorder %v9267_v24, %v10960_v63 }
 0x819   :  { %3208 = vrot.lane.b32.xlu1 %v3150_v60, %s9048_s27  ;;  %15171 = vst [vmem:[#allocation3_spill] sm:$0xff] %v10964_v59  ;;  %15174 = vst [vmem:[#allocation156_spill] sm:$0xff] %v15173_v3  ;;  %vm652_vm0 = vcmp.eq.s32.totalorder %v9114_v2, %v10964_v59  ;;  %vm656_vm6 = vcmp.eq.s32.totalorder %v9124_v6, %v10964_v59  ;;  %vm660_vm12 = vcmp.eq.s32.totalorder %v9133_v9, %v10964_v59  ;;  %v15235_v3 = vmov 0 }
 0x81a   :  { %vm10983_vm14 = vmpackc.low %vm656_vm6, %vm652_vm0  ;;  %vm664_vm5 = vcmp.eq.s32.totalorder %v9136_v10, %v10964_v59 }
 0x81b   :  { %3171 = vperm.xlu0 %9005, %v1299_v38   ;;  %v15176_v52 = vsel %vm10983_vm14, 4294967295, %v15175_v52  ;;  %7360 = vmatpush1.bf16.msk.msra.mxu0 %vm10983_vm14, %v14957_v47  ;;  %vm11000_vm0 = vmpackc.low %vm665_vm8, %vm661_vm13  ;;  %vm669_vm14 = vcmp.eq.s32.totalorder %v9251_v20, %v10960_v63  ;;  %vm673_vm13 = vcmp.eq.s32.totalorder %v9254_v21, %v10960_v63  ;;  %vm668_vm8 = vcmp.eq.s32.totalorder %v9251_v20, %v10964_v59 }
 0x81c   :  { %15177 = vst [vmem:[#allocation157_spill] sm:$0xff] %v15176_v52  ;;  %v15179_v8 = vsel %vm11000_vm0, 4294967295, %v15178_v8  ;;  %7362 = vmatprep.subr.msk.bf16.mxu0 %vm11000_vm0, %v14957_v47  ;;  %vm11007_vm6 = vmpackc.low %vm664_vm5, %vm660_vm12  ;;  %vm672_vm12 = vcmp.eq.s32.totalorder %v9254_v21, %v10964_v59  ;;  %vm15184_vm5 = vcmask 523264   ;;  %v15188_v38 = vmov 0 }
 0x81d   :  { %3214 = vrot.lane.b32.xlu1 %v3153_v37, %s9048_s27  ;;  %15180 = vst [vmem:[#allocation158_spill] sm:$0xff] %v15179_v8  ;;  %v15182_v55 = vsel %vm11007_vm6, 4294967295, %v15181_v55  ;;  %v3279_v49 = vsel %vm15184_vm5, %v1298_v13, 0  ;;  %vm11030_vm0 = vmpackc.low %vm673_vm13, %vm669_vm14  ;;  %vm15191_vm5 = vcmask 924672   ;;  %vm676_vm14 = vcmp.eq.s32.totalorder %v9264_v23, %v10964_v59 }
 0x81e   :  { %15183 = vst [vmem:[#allocation159_spill] sm:$0xff] %v15182_v55  ;;  %v15186_v16 = vsel %vm11030_vm0, 4294967295, %v15185_v16  ;;  %vm11041_vm15 = vmpackc.low %vm672_vm12, %vm668_vm8  ;;  %v11046_v44 = vand.u32 4294901760, %v3279_v49  ;;  %vm680_vm13 = vcmp.eq.s32.totalorder %v9267_v24, %v10964_v59  ;;  %v15192_v37 = vmov 0 }
 0x81f   :  { %7364 = vmatpush1.bf16.msk.msra.mxu0 %vm11007_vm6, %v14957_v47  ;;  %15187 = vst [vmem:[#allocation160_spill] sm:$0xff] %v15186_v16  ;;  %vm677_vm6 = vcmp.eq.s32.totalorder %v9264_v23, %v10960_v63  ;;  %v15189_v38 = vsel %vm11041_vm15, 4294967295, %v15188_v38  ;;  %vm15195_vm8 = vmmov %vm15191_vm5  ;;  %v15231_v52 = vmov 0 }
 0x820   :  { %7366 = vmatprep.subr.msk.bf16.mxu0 %vm11030_vm0, %v14957_v47  ;;  %15190 = vst [vmem:[#allocation161_spill] sm:$0xff] %v15189_v38  ;;  %vm11055_vm0 = vmpackc.low %vm681_vm7, %vm677_vm6  ;;  %vm689_vm7 = vcmp.eq.s32.totalorder %v9356_v46, %v10960_v63  ;;  %v11078_v30 = vsub.f32 %v3279_v49, %v11046_v44 }
 0x821   :  { %3220 = vrot.lane.b32.xlu1 %v3156_v22, %s9048_s27  ;;  %v15193_v37 = vsel %vm11055_vm0, 4294967295, %v15192_v37  ;;  %vm15196_vm12 = vmmov %vm15191_vm5 }
 0x822   :  { %15194 = vst [vmem:[#allocation162_spill] sm:$0xff] %v15193_v37  ;;  %vm11072_vm6 = vmpackc.low %vm680_vm13, %vm676_vm14  ;;  %v11125_v49 = vand.u32 4294901760, %v11078_v30 }
 0x823   :  { %7368 = vmatpush1.bf16.msk.msra.mxu0 %vm11041_vm15, %v14957_v47  ;;  %vm15200_vm14 = vmmov %vm15195_vm8 }
 0x824   :  { %7370 = vmatprep.subr.msk.bf16.mxu0 %vm11055_vm0, %v14957_v47  ;;  %vm688_vm0 = vcmp.eq.s32.totalorder %v9356_v46, %v10964_v59 }
 0x825   :  { %3226 = vrot.lane.b32.xlu1 %v3159_v27, %s9048_s27  ;;  %v15197_v27 = vmov 0 }
 0x826   :  { %v15198_v27 = vsel %vm11072_vm6, 4294967295, %v15197_v27 }
 0x827   :  { %15199 = vst [vmem:[#allocation163_spill] sm:$0xff] %v15198_v27  ;;  %7372 = vmatpush1.bf16.msk.msra.mxu0 %vm11072_vm6, %v14957_v47  ;;  %vm697_vm6 = vcmp.eq.s32.totalorder %v9384_v54, %v10960_v63 }
 0x829   :  { %3232 = vrot.lane.b32.xlu1 %v3162_v39, %s9048_s27 }
 0x82d   :  { %3238 = vrot.lane.b32.xlu1 %v3165_v51, %s9048_s27 }
 0x831   :  { %3240 = vrot.lane.b32.xlu1 %v3166_v28, %s9048_s27  ;;  %v15201_v28 = vmov 0 }
 0x84c   :  { %v3199_v15 = vpop.permute.xlu0 %3198 }
 0x850   :  { %v3205_v31 = vpop.permute.xlu1 %3204 }
 0x854   :  { %v10949_v7 = vpop.permute.xlu0 %3210 }
 0x858   :  { %v3217_v25 = vpop.permute.xlu1 %3216 }
 0x85c   :  { %v10951_v33 = vpop.permute.xlu0 %3222 }
 0x860   :  { %v3201_v36 = vpop.permute.xlu0 %3200  ;;  %v10991_v50 = vpop.permute.xlu1 %3228 }
 0x861   :  { %v3246_v14 = vsel %vm15195_vm8, %v3199_v15, %v3201_v36 }
 0x862   :  { %v3283_v39 = vand.u32 4294901760, %v3246_v14 }
 0x864   :  { %v3207_v4 = vpop.permute.xlu0 %3206 }
 0x865   :  { %v3248_v34 = vsel %vm15191_vm5, %v3205_v31, %v3207_v4  ;;  %vm685_vm5 = vcmp.eq.s32.totalorder %v9353_v45, %v10960_v63 }
 0x866   :  { %v3287_v26 = vand.u32 4294901760, %v3248_v34  ;;  %vm11090_vm13 = vmpackc.low %vm689_vm7, %vm685_vm5  ;;  %vm692_vm7 = vcmp.eq.s32.totalorder %v9381_v53, %v10964_v59 }
 0x867   :  { %v15202_v28 = vsel %vm11090_vm13, 4294967295, %v15201_v28  ;;  %7374 = vmatprep.subr.msk.bf16.mxu0 %vm11090_vm13, %v14957_v47 }
 0x868   :  { %v10978_v18 = vpop.permute.xlu0 %3212  ;;  %15203 = vst [vmem:[#allocation164_spill] sm:$0xff] %v15202_v28  ;;  %v11101_v15 = vsub.f32 %v3248_v34, %v3287_v26  ;;  %v11112_v42 = vpack.c.bf16 %v3287_v26, %v3283_v39 }
 0x86c   :  { %v11023_v56 = vpop.permute.xlu0 %3218 }
 0x86d   :  { %v3252_v48 = vsel %vm15200_vm14, %v3217_v25, %v11023_v56 }
 0x86e   :  { %v3295_v25 = vand.u32 4294901760, %v3252_v48 }
 0x870   :  { %v11060_v0 = vpop.permute.xlu0 %3224 }
 0x874   :  { %v3231_v13 = vpop.permute.xlu0 %3230 }
 0x87c   :  { %v11152_v28 = vpop.permute.xlu0 %3236 }
 0x883   :  { %v11018_v17 = vpop.permute.xlu1 %3244 }
 0x885   :  { %v11201_v8 = vpop.permute.xlu0 %3242 }
 0x887   :  { %v3203_v60 = vpop.permute.xlu1 %3202 }
 0x888   :  { %v11063_v22 = vsel %vm15196_vm12, %v3201_v36, %v3203_v60  ;;  %vm684_vm12 = vcmp.eq.s32.totalorder %v9353_v45, %v10964_v59  ;;  %v3250_v36 = vsel %vm15200_vm14, %v10949_v7, %v10978_v18  ;;  %vm696_vm14 = vcmp.eq.s32.totalorder %v9384_v54, %v10964_v59 }
 0x889   :  { %v3281_v19 = vand.u32 4294901760, %v11063_v22  ;;  %vm11108_vm5 = vmpackc.low %vm688_vm0, %vm684_vm12  ;;  %v11121_v7 = vsub.f32 %v3246_v14, %v3283_v39  ;;  %v15207_v60 = vmov 0  ;;  %v3291_v34 = vand.u32 4294901760, %v3250_v36 }
 0x88a   :  { %7376 = vmatpush1.bf16.msk.msra.mxu0 %vm11108_vm5, %v14957_v47  ;;  %vm15210_vm12 = vcmask 924672   ;;  %v15211_v39 = vmov 0 }
 0x88b   :  { %v3209_v43 = vpop.permute.xlu1 %3208 }
 0x88c   :  { %v3249_v5 = vsel %vm15195_vm8, %v3207_v4, %v3209_v43  ;;  %vm693_vm8 = vcmp.eq.s32.totalorder %v9381_v53, %v10960_v63  ;;  %v15204_v4 = vmov 0 }
 0x88d   :  { %v3285_v51 = vand.u32 4294901760, %v3249_v5  ;;  %v15205_v4 = vsel %vm11108_vm5, 4294967295, %v15204_v4  ;;  %vm11133_vm0 = vmpackc.low %vm697_vm6, %vm693_vm8  ;;  %vm701_vm8 = vcmp.eq.s32.totalorder %v9409_v57, %v10960_v63 }
 0x88e   :  { %15206 = vst [vmem:[#allocation165_spill] sm:$0xff] %v15205_v4  ;;  %v15208_v60 = vsel %vm11133_vm0, 4294967295, %v15207_v60  ;;  %7378 = vmatprep.subr.msk.bf16.mxu0 %vm11133_vm0, %v14957_v47  ;;  %vm11146_vm5 = vmpackc.low %vm696_vm14, %vm692_vm7  ;;  %v11150_v4 = vsub.f32 %v3252_v48, %v3295_v25  ;;  %vm705_vm7 = vcmp.eq.s32.totalorder %v9412_v58, %v10960_v63  ;;  %vm720_vm0 = vcmp.eq.s32.totalorder %v9482_v29, %v10964_v59 }
 0x88f   :  { %v3215_v31 = vpop.permute.xlu1 %3214  ;;  %v11106_v32 = vpack.c.bf16 %v3285_v51, %v3281_v19  ;;  %15209 = vst [vmem:[#allocation166_spill] sm:$0xff] %v15208_v60  ;;  %v15212_v39 = vsel %vm11146_vm5, 4294967295, %v15211_v39  ;;  %vm15214_vm6 = vmmov %vm15210_vm12  ;;  %7380 = vmatpush1.bf16.msk.msra.mxu0 %vm11146_vm5, %v14957_v47  ;;  %v3365_v60 = vsub.f32 %v11078_v30, %v11125_v49  ;;  %vm704_vm5 = vcmp.eq.s32.totalorder %v9412_v58, %v10964_v59 }
 0x890   :  { %v11139_v14 = vsel %vm15210_vm12, %v10978_v18, %v3215_v31  ;;  %15213 = vst [vmem:[#allocation167_spill] sm:$0xff] %v15212_v39  ;;  %vm11167_vm14 = vmpackc.low %vm705_vm7, %vm701_vm8  ;;  %v15219_v31 = vand.u32 4294901760, %v11101_v15  ;;  %v11190_v37 = vsub.f32 %v3249_v5, %v3285_v51  ;;  %v15224_v5 = vand.u32 4294901760, %v11121_v7 }
 0x891   :  { %8625 = vmatprep.subr.bf16.mxu1 %v11106_v32  ;;  %v3289_v48 = vand.u32 4294901760, %v11139_v14  ;;  %vm15218_vm12 = vmmov %vm15214_vm6  ;;  %7382 = vmatprep.subr.msk.bf16.mxu0 %vm11167_vm14, %v14957_v47 }
 0x892   :  { %8627 = vmatpush1.bf16.msra.mxu1 %v11112_v42  ;;  %v3254_v39 = vsel %vm15218_vm12, %v10951_v33, %v11060_v0  ;;  %v11186_v27 = vsub.f32 %v11101_v15, %v15219_v31  ;;  %vm15223_vm7 = vmmov %vm15218_vm12  ;;  %vm709_vm12 = vcmp.eq.s32.totalorder %v9437_v61, %v10960_v63  ;;  %v11213_v51 = vsub.f32 %v11121_v7, %v15224_v5 }
 0x893   :  { %v3221_v43 = vpop.permute.xlu1 %3220  ;;  %v3256_v55 = vsel %vm15223_vm7, %v10991_v50, %v3231_v13  ;;  %v11216_v50 = vsub.f32 %v11063_v22, %v3281_v19  ;;  %v15226_v31 = vmov 0 }
 0x894   :  { %v3253_v18 = vsel %vm15214_vm6, %v11023_v56, %v3221_v43  ;;  %v15215_v56 = vmov 0  ;;  %v11171_v43 = vsub.f32 %v3250_v36, %v3291_v34  ;;  %vm700_vm6 = vcmp.eq.s32.totalorder %v9409_v57, %v10964_v59 }
 0x895   :  { %v3293_v26 = vand.u32 4294901760, %v3253_v18  ;;  %v15216_v56 = vsel %vm11167_vm14, 4294967295, %v15215_v56  ;;  %v11188_v36 = vpack.c.bf16 %v3295_v25, %v3291_v34  ;;  %vm11194_vm8 = vmpackc.low %vm704_vm5, %vm700_vm6  ;;  %vm713_vm5 = vcmp.eq.s32.totalorder %v9440_v62, %v10960_v63 }
 0x896   :  { %15217 = vst [vmem:[#allocation168_spill] sm:$0xff] %v15216_v56  ;;  %v15220_v56 = vmov 0  ;;  %7384 = vmatpush1.bf16.msk.msra.mxu0 %vm11194_vm8, %v14957_v47  ;;  %v3299_v25 = vand.u32 4294901760, %v3254_v39  ;;  %v11219_v34 = vand.u32 4294901760, %v3365_v60  ;;  %vm11221_vm6 = vmpackc.low %vm713_vm5, %vm709_vm12  ;;  %vm712_vm12 = vcmp.eq.s32.totalorder %v9440_v62, %v10964_v59 }
 0x897   :  { %v3227_v33 = vpop.permute.xlu1 %3226  ;;  %v11192_v38 = vpack.c.bf16 %v3293_v26, %v3289_v48  ;;  %v15221_v56 = vsel %vm11194_vm8, 4294967295, %v15220_v56  ;;  %v15227_v31 = vsel %vm11221_vm6, 4294967295, %v15226_v31  ;;  %7386 = vmatprep.subr.msk.bf16.mxu0 %vm11221_vm6, %v14957_v47  ;;  %vm708_vm8 = vcmp.eq.s32.totalorder %v9437_v61, %v10964_v59  ;;  %vm15230_vm5 = vmmov %vm15223_vm7 }
 0x898   :  { %15222 = vst [vmem:[#allocation169_spill] sm:$0xff] %v15221_v56  ;;  %15225 = vst [vmem:[#allocation170_spill] sm:$0xff] %v11219_v34  ;;  %v3255_v56 = vsel %vm15223_vm7, %v11060_v0, %v3227_v33  ;;  %v3303_v22 = vand.u32 4294901760, %v3256_v55  ;;  %v11237_v60 = vsub.f32 %v3253_v18, %v3293_v26  ;;  %v15229_v33 = vand.u32 4294901760, %v11150_v4 }
 0x899   :  { %8629 = vmatprep.subr.bf16.mxu1 %v11192_v38  ;;  %15228 = vst [vmem:[#allocation171_spill] sm:$0xff] %v15227_v31  ;;  %vm11246_vm7 = vmpackc.low %vm712_vm12, %vm708_vm8  ;;  %vm717_vm6 = vcmp.eq.s32.totalorder %v9479_v12, %v10960_v63  ;;  %vm721_vm14 = vcmp.eq.s32.totalorder %v9482_v29, %v10960_v63  ;;  %v11254_v26 = vsub.f32 %v3254_v39, %v3299_v25  ;;  %v3297_v0 = vand.u32 4294901760, %v3255_v56 }
 0x89a   :  { %8631 = vmatpush1.bf16.msra.mxu1 %v11188_v36  ;;  %v11243_v16 = vsub.f32 %v11150_v4, %v15229_v33  ;;  %v15232_v52 = vsel %vm11246_vm7, 4294967295, %v15231_v52  ;;  %7388 = vmatpush1.bf16.msk.msra.mxu0 %vm11246_vm7, %v14957_v47  ;;  %vm15234_vm8 = vmmov %vm15230_vm5  ;;  %v11264_v33 = vsub.f32 %v11139_v14, %v3289_v48  ;;  %v11274_v39 = vpack.c.bf16 %v3303_v22, %v3299_v25 }
 0x89b   :  { %v3233_v5 = vpop.permute.xlu1 %3232  ;;  %15233 = vst [vmem:[#allocation172_spill] sm:$0xff] %v15232_v52  ;;  %vm11266_vm12 = vmpackc.low %vm721_vm14, %vm717_vm6  ;;  %v15238_v14 = vand.u32 4294901760, %v11190_v37  ;;  %v15240_v25 = vmov 0  ;;  %vm729_vm7 = vcmp.eq.s32.totalorder %v9538_v41, %v10960_v63  ;;  %v15245_v61 = vmov 0 }
 0x89c   :  { %v3257_v31 = vsel %vm15230_vm5, %v3231_v13, %v3233_v5  ;;  %v3261_v13 = vsel %vm15234_vm8, %v11201_v8, %v11018_v17  ;;  %v3235_v5 = vpop.permute.xlu0 %3234  ;;  %v15236_v3 = vsel %vm11266_vm12, 4294967295, %v15235_v3  ;;  %vm716_vm5 = vcmp.eq.s32.totalorder %v9479_v12, %v10964_v59  ;;  %7390 = vmatprep.subr.msk.bf16.mxu0 %vm11266_vm12, %v14957_v47  ;;  %vm15239_vm14 = vmmov %vm15234_vm8 }
 0x89d   :  { %v3301_v19 = vand.u32 4294901760, %v3257_v31  ;;  %15237 = vst [vmem:[#allocation173_spill] sm:$0xff] %v15236_v3  ;;  %v3388_v48 = vsub.f32 %v11190_v37, %v15238_v14  ;;  %vm11289_vm6 = vmpackc.low %vm720_vm0, %vm716_vm5  ;;  %vm725_vm8 = vcmp.eq.s32.totalorder %v9535_v40, %v10960_v63  ;;  %v3309_v14 = vand.u32 4294901760, %v3261_v13 }
 0x89e   :  { %v15241_v25 = vsel %vm11289_vm6, 4294967295, %v15240_v25  ;;  %vm15243_vm13 = vmmov %vm15239_vm14  ;;  %7392 = vmatpush1.bf16.msk.msra.mxu0 %vm11289_vm6, %v14957_v47  ;;  %v11307_v12 = vsub.f32 %v3255_v56, %v3297_v0  ;;  %vm728_vm5 = vcmp.eq.s32.totalorder %v9538_v41, %v10964_v59  ;;  %v15248_v56 = vand.u32 4294901760, %v11237_v60 }
 0x89f   :  { %v3239_v52 = vpop.permute.xlu1 %3238  ;;  %v11277_v17 = vpack.c.bf16 %v3301_v19, %v3297_v0  ;;  %v11285_v62 = vsub.f32 %v3257_v31, %v3301_v19  ;;  %15242 = vst [vmem:[#allocation174_spill] sm:$0xff] %v15241_v25  ;;  %v3258_v18 = vsel %vm15243_vm13, %v3235_v5, %v11152_v28  ;;  %v15244_v31 = vand.u32 4294901760, %v11216_v50  ;;  %vm11310_vm0 = vmpackc.low %vm729_vm7, %vm725_vm8 }
 0x8a0   :  { %v3259_v29 = vsel %vm15239_vm14, %v11152_v28, %v3239_v52  ;;  %v15246_v61 = vsel %vm11310_vm0, 4294967295, %v15245_v61  ;;  %vm724_vm13 = vcmp.eq.s32.totalorder %v9535_v40, %v10964_v59  ;;  %v11318_v28 = vsub.f32 %v3256_v55, %v3303_v22  ;;  %7394 = vmatprep.subr.msk.bf16.mxu0 %vm11310_vm0, %v14957_v47  ;;  %vm15249_vm7 = vmmov %vm15239_vm14 }
 0x8a1   :  { %v3305_v3 = vand.u32 4294901760, %v3259_v29  ;;  %8633 = vmatprep.subr.bf16.mxu1 %v11277_v17  ;;  %v3376_v52 = vsub.f32 %v11216_v50, %v15244_v31  ;;  %15247 = vst [vmem:[#allocation175_spill] sm:$0xff] %v15246_v61  ;;  %v3389_v19 = vand.u32 4294901760, %v3388_v48  ;;  %v3412_v0 = vsub.f32 %v11237_v60, %v15248_v56  ;;  %vm11333_vm14 = vmpackc.low %vm728_vm5, %vm724_vm13 }
 0x8a2   :  { %8635 = vmatpush1.bf16.msra.mxu1 %v11274_v39  ;;  %v15250_v22 = vmov 0  ;;  %vm733_vm8 = vcmp.eq.s32.totalorder %v9591_v11, %v10960_v63  ;;  %v11339_v48 = vsub.f32 %v3261_v13, %v3309_v14  ;;  %v3307_v56 = vand.u32 4294901760, %v3258_v18  ;;  %7396 = vmatpush1.bf16.msk.msra.mxu0 %vm11333_vm14, %v14957_v47 }
 0x8a3   :  { %v3241_v5 = vpop.permute.xlu1 %3240  ;;  %v11320_v31 = vpack.c.bf16 %v3309_v14, %v3305_v3  ;;  %v11329_v40 = vsub.f32 %v3259_v29, %v3305_v3  ;;  %v15251_v22 = vsel %vm11333_vm14, 4294967295, %v15250_v22  ;;  %v3377_v61 = vand.u32 4294901760, %v3376_v52 }
 0x8a4   :  { %v3260_v55 = vsel %vm15249_vm7, %v3241_v5, %v11201_v8  ;;  %15252 = vst [vmem:[#allocation176_spill] sm:$0xff] %v15251_v22  ;;  %v15253_v3 = vand.u32 4294901760, %v11264_v33  ;;  %vm737_vm13 = vcmp.eq.s32.totalorder %v9594_v1, %v10960_v63  ;;  %v15254_v29 = vmov 0 }
 0x8a5   :  { %v3311_v41 = vand.u32 4294901760, %v3260_v55  ;;  %8637 = vmatprep.subr.bf16.mxu1 %v11320_v31  ;;  %v8640_v5 = vpack.c.bf16 %v3389_v19, %v3377_v61  ;;  %vm11361_vm7 = vmpackc.low %vm737_vm13, %vm733_vm8  ;;  %v3413_v25 = vand.u32 4294901760, %v3412_v0  ;;  %v15257_v22 = vand.u32 4294901760, %v11285_v62 }
 0x8a6   :  { %v3400_v8 = vsub.f32 %v11264_v33, %v15253_v3  ;;  %v15255_v29 = vsel %vm11361_vm7, 4294967295, %v15254_v29  ;;  %7398 = vmatprep.subr.msk.bf16.mxu0 %vm11361_vm7, %v14957_v47  ;;  %vm736_vm5 = vcmp.eq.s32.totalorder %v9594_v1, %v10964_v59  ;;  %v15258_v61 = vand.u32 4294901760, %v11171_v43 }
 0x8a7   :  { %v11354_v14 = vpack.c.bf16 %v3311_v41, %v3307_v56  ;;  %v11356_v52 = vsub.f32 %v3260_v55, %v3311_v41  ;;  %15256 = vst [vmem:[#allocation177_spill] sm:$0xff] %v15255_v29  ;;  %v3436_v58 = vsub.f32 %v11285_v62, %v15257_v22  ;;  %v11378_v55 = vsub.f32 %v3258_v18, %v3307_v56 }
 0x8a8   :  { %v3406_v41 = vsub.f32 %v11171_v43, %v15258_v61  ;;  %v3383_v0 = vand.u32 4294901760, %v11213_v51  ;;  %vm15259_vm8 = vcmp.eq.s32.totalorder %v9591_v11, %v10964_v59  ;;  %v15260_v22 = vmov 0 }
 0x8a9   :  { %8639 = vmatpush1.bf16.msra.mxu1 %v11354_v14  ;;  %vm11385_vm13 = vmpackc.low %vm736_vm5, %vm15259_vm8  ;;  %v3401_v3 = vand.u32 4294901760, %v3400_v8  ;;  %v15263_v13 = vand.u32 4294901760, %v11307_v12  ;;  %v15264_v51 = vand.u32 4294901760, %v11318_v28  ;;  %v15265_v29 = vand.u32 4294901760, %v11186_v27 }
 0x8aa   :  { %v15261_v22 = vsel %vm11385_vm13, 4294967295, %v15260_v22  ;;  %8641 = vmatprep.subr.bf16.mxu1 %v8640_v5  ;;  %7400 = vmatpush1.bf16.msk.msra.mxu0 %vm11385_vm13, %v14957_v47  ;;  %v3419_v8 = vand.u32 4294901760, %v11243_v16  ;;  %v3437_v59 = vand.u32 4294901760, %v3436_v58  ;;  %v15266_v18 = vand.u32 4294901760, %v11329_v40 }
 0x8ab   :  { %15262 = vst [vmem:[#allocation178_spill] sm:$0xff] %v15261_v22  ;;  %v3424_v61 = vsub.f32 %v11307_v12, %v15263_v13  ;;  %v3442_v56 = vsub.f32 %v11318_v28, %v15264_v51  ;;  %v8642_v5 = vpack.c.bf16 %v15265_v29, %v3383_v0  ;;  %v8644_v13 = vpack.c.bf16 %v3413_v25, %v3401_v3 }
 0x8ac   :  { %3367 = vmatmul.mubr.f32.vlgmr.msra.gmra.mrb[16].mxu1 %v11219_v34  ;;  %v3448_v22 = vsub.f32 %v11329_v40, %v15266_v18  ;;  %v15267_v63 = vand.u32 4294901760, %v11254_v26  ;;  %v3453_v51 = vand.u32 4294901760, %v11378_v55  ;;  %v3407_v19 = vand.u32 4294901760, %v3406_v41 }
 0x8ad   :  { %8643 = vmatpush1.bf16.msra.mxu1 %v8642_v5  ;;  %v15268_v27 = vmov 0.0   ;;  %v3425_v16 = vand.u32 4294901760, %v3424_v61  ;;  %v15269_v29 = vand.u32 4294901760, %v11339_v48  ;;  %v15270_v25 = vand.u32 4294901760, %v11356_v52 }
 0x8ae   :  { %v3430_v1 = vsub.f32 %v11254_v26, %v15267_v63  ;;  %3517 = vmatprep.mubr.f32.mxu1 %v15268_v27  ;;  %8645 = vmatprep.subr.bf16.mxu1 %v8644_v13  ;;  %v8646_v0 = vpack.c.bf16 %v3419_v8, %v3407_v19  ;;  %v3443_v18 = vand.u32 4294901760, %v3442_v56  ;;  %v3449_v63 = vand.u32 4294901760, %v3448_v22 }
 0x8af   :  { %v3460_v58 = vsub.f32 %v11339_v48, %v15269_v29  ;;  %v3466_v3 = vsub.f32 %v11356_v52, %v15270_v25  ;;  %v8648_v34 = vpack.c.bf16 %v3437_v59, %v3425_v16  ;;  %v3454_v41 = vsub.f32 %v11378_v55, %v3453_v51 }
 0x8b0   :  { %v3431_v5 = vand.u32 4294901760, %v3430_v1  ;;  %v8656_v19 = vpack.c.bf16 %v11190_v37, %v11216_v50  ;;  %v8658_v59 = vpack.c.bf16 %v11101_v15, %v11121_v7  ;;  %v8660_v1 = vpack.c.bf16 %v11237_v60, %v11264_v33 }
 0x8b1   :  { %8647 = vmatpush1.bf16.msra.mxu1 %v8646_v0  ;;  %v3461_v61 = vand.u32 4294901760, %v3460_v58  ;;  %v3467_v13 = vand.u32 4294901760, %v3466_v3  ;;  %v3455_v29 = vand.u32 4294901760, %v3454_v41  ;;  %v8670_v22 = vpack.c.bf16 %v11356_v52, %v11378_v55  ;;  %v15325_v55 = vld [vmem:[#allocation40_spill] sm:$0xff] }
 0x8b2   :  { %8649 = vmatprep.subr.bf16.mxu1 %v8648_v34  ;;  %v8650_v11 = vpack.c.bf16 %v3443_v18, %v3431_v5  ;;  %v8668_v34 = vpack.c.bf16 %v11339_v48, %v11329_v40  ;;  %v15271_v56 = vand.u32 4294901760, %v11216_v50  ;;  %v15272_v8 = vand.u32 4294901760, %v11190_v37 }
 0x8b3   :  { %v8652_v57 = vpack.c.bf16 %v3461_v61, %v3449_v63  ;;  %v8654_v54 = vpack.c.bf16 %v3467_v13, %v3455_v29  ;;  %v15273_v58 = vand.u32 4294901760, %v11121_v7  ;;  %v15274_v25 = vand.u32 4294901760, %v11101_v15 }
 0x8b4   :  { %v8688_v16 = vpack.c.bf16 %v15272_v8, %v15271_v56  ;;  %v15275_v0 = vand.u32 4294901760, %v11264_v33  ;;  %v15276_v18 = vand.u32 4294901760, %v11237_v60  ;;  %v15277_v37 = vand.u32 4294901760, %v11171_v43 }
 0x8b5   :  { %8651 = vmatpush1.bf16.msra.mxu1 %v8650_v11  ;;  %v8664_v11 = vpack.c.bf16 %v11285_v62, %v11307_v12  ;;  %v8690_v3 = vpack.c.bf16 %v15274_v25, %v15273_v58  ;;  %v15278_v50 = vand.u32 4294901760, %v11150_v4  ;;  %v15279_v7 = vand.u32 4294901760, %v11307_v12  ;;  %v15352_v58 = vld [vmem:[#allocation63_spill] sm:$0xff]  ;;  %v15353_v25 = vld [vmem:[#allocation64_spill] sm:$0xff] }
 0x8b6   :  { %8653 = vmatprep.subr.bf16.mxu1 %v8652_v57  ;;  %v8662_v57 = vpack.c.bf16 %v11150_v4, %v11171_v43  ;;  %v8692_v63 = vpack.c.bf16 %v15276_v18, %v15275_v0  ;;  %v15280_v15 = vand.u32 4294901760, %v11285_v62  ;;  %v15281_v33 = vand.u32 4294901760, %v11254_v26  ;;  %v15356_v0 = vld [vmem:[#allocation3_spill] sm:$0xff] }
 0x8b7   :  { %v8694_v41 = vpack.c.bf16 %v15278_v50, %v15277_v37  ;;  %v15282_v60 = vand.u32 4294901760, %v11318_v28  ;;  %v15283_v13 = vand.u32 4294901760, %v11329_v40  ;;  %v15284_v29 = vand.u32 4294901760, %v11339_v48  ;;  %v15365_v50 = vld [vmem:[#allocation71_spill] sm:$0xff] }
 0x8b8   :  { %v8696_v5 = vpack.c.bf16 %v15280_v15, %v15279_v7  ;;  %v15285_v12 = vand.u32 4294901760, %v11356_v52  ;;  %v650_v4 = vsub.s32 3, %v9114_v2  ;;  %v15318_v48 = vmov 0  ;;  %v15324_v52 = vld [vmem:[#allocation39_spill] sm:$0xff] }
 0x8b9   :  { %8655 = vmatpush1.bf16.msra.mxu1 %v8654_v54  ;;  %v8666_v54 = vpack.c.bf16 %v11318_v28, %v11254_v26  ;;  %v8698_v61 = vpack.c.bf16 %v15282_v60, %v15281_v33  ;;  %v8700_v43 = vpack.c.bf16 %v15284_v29, %v15283_v13  ;;  %v15286_v26 = vsub.s32 2, %v9114_v2  ;;  %v15316_v28 = vld [vmem:[#allocation33_spill] sm:$0xff]  ;;  %v15377_v60 = vld [vmem:[#allocation79_spill] sm:$0xff] }
 0x8ba   :  { %8657 = vmatprep.subr.bf16.mxu1 %v8656_v19  ;;  %v8702_v62 = vpack.c.bf16 %v15285_v12, %v3453_v51  ;;  %v11490_v40 = vrot.slane %v10956_v35, %v650_v4  ;;  %v15326_v51 = vmov 0  ;;  %v15329_v19 = vmov 0  ;;  %v15390_v4 = vld [vmem:[#allocation88_spill] sm:$0xff] }
 0x8bb   :  { %v15345_v56 = vmov 0  ;;  %v15348_v8 = vmov 0  ;;  %v15357_v18 = vmov 0  ;;  %v15362_v37 = vmov 0 }
 0x8bc   :  { %3519 = vmatmul.mubr.f32.vlgmr.msra.gmra.mrb[16].mxu1 %v11046_v44  ;;  %vm655_vm5 = vcmp.eq.s32.totalorder %v9114_v2, %v11490_v40  ;;  %vm659_vm8 = vcmp.eq.s32.totalorder %v9124_v6, %v11490_v40  ;;  %vm663_vm0 = vcmp.eq.s32.totalorder %v9133_v9, %v11490_v40  ;;  %vm667_vm6 = vcmp.eq.s32.totalorder %v9136_v10, %v11490_v40 }
 0x8bd   :  { %8659 = vmatpush1.bf16.msra.mxu1 %v8658_v59  ;;  %3621 = vmatprep.mubr.f32.mxu1 %v15268_v27  ;;  %vm11505_vm13 = vmpackc.low %vm659_vm8, %vm655_vm5  ;;  %vm671_vm3 = vcmp.eq.s32.totalorder %v9251_v20, %v11490_v40  ;;  %v15332_v59 = vld [vmem:[#allocation47_spill] sm:$0xff]  ;;  %v15367_v7 = vmov 0  ;;  %v15369_v15 = vmov 0  ;;  %v15374_v33 = vmov 0 }
 0x8be   :  { %8661 = vmatprep.subr.bf16.mxu1 %v8660_v1  ;;  %vm11525_vm8 = vmpackc.low %vm667_vm6, %vm663_vm0  ;;  %v15333_v1 = vld [vmem:[#allocation48_spill] sm:$0xff]  ;;  %v15379_v13 = vmov 0  ;;  %v15381_v29 = vmov 0  ;;  %v15386_v12 = vmov 0 }
 0x8c1   :  { %8663 = vmatpush1.bf16.msra.mxu1 %v8662_v57  ;;  %v15334_v57 = vmov 0 }
 0x8c2   :  { %8665 = vmatprep.subr.bf16.mxu1 %v8664_v11  ;;  %v15337_v11 = vmov 0 }
 0x8c5   :  { %8667 = vmatpush1.bf16.msra.mxu1 %v8666_v54  ;;  %v15340_v54 = vld [vmem:[#allocation55_spill] sm:$0xff] }
 0x8c6   :  { %8669 = vmatprep.subr.bf16.mxu1 %v8668_v34  ;;  %v15341_v34 = vld [vmem:[#allocation56_spill] sm:$0xff] }
 0x8c9   :  { %8671 = vmatpush1.bf16.msra.mxu1 %v8670_v22  ;;  %v15342_v22 = vmov 0 }
 0x8ca   :  { %8673 = vmatprep.subr.bf16.mxu1 %v11106_v32 }
 0x8cc   :  { %3624 = vmatmul.mubr.f32.vlgmr.msra.gmra.mrb[16].mxu1 %v11078_v30 }
 0x8cd   :  { %8675 = vmatpush1.bf16.msra.mxu1 %v11112_v42  ;;  %3710 = vmatprep.mubr.f32.mxu1 %v15268_v27 }
 0x8ce   :  { %8677 = vmatprep.subr.bf16.mxu1 %v11192_v38 }
 0x8d1   :  { %8679 = vmatpush1.bf16.msra.mxu1 %v11188_v36 }
 0x8d2   :  { %8681 = vmatprep.subr.bf16.mxu1 %v11277_v17 }
 0x8d5   :  { %8683 = vmatpush1.bf16.msra.mxu1 %v11274_v39 }
 0x8d6   :  { %8685 = vmatprep.subr.bf16.mxu1 %v11320_v31 }
 0x8d9   :  { %8687 = vmatpush1.bf16.msra.mxu1 %v11354_v14 }
 0x8da   :  { %8689 = vmatprep.subr.bf16.mxu1 %v8688_v16  ;;  %v15351_v16 = vld [vmem:[#allocation2_spill] sm:$0xff] }
 0x8dc   :  { %3714 = vmatmul.mubr.f32.vlgmr.msra.gmra.mrb[16].mxu1 %v11125_v49 }
 0x8dd   :  { %8691 = vmatpush1.bf16.msra.mxu1 %v8690_v3  ;;  %3832 = vmatprep.mubr.f32.mxu1 %v15268_v27  ;;  %v15354_v3 = vmov 0 }
 0x8de   :  { %8693 = vmatprep.subr.bf16.mxu1 %v8692_v63  ;;  %v15360_v63 = vmov 0 }
 0x8e1   :  { %8695 = vmatpush1.bf16.msra.mxu1 %v8694_v41  ;;  %v15366_v41 = vld [vmem:[#allocation72_spill] sm:$0xff] }
 0x8e2   :  { %8697 = vmatprep.subr.bf16.mxu1 %v8696_v5  ;;  %v15372_v5 = vmov 0 }
 0x8e5   :  { %8699 = vmatpush1.bf16.msra.mxu1 %v8698_v61  ;;  %v15378_v61 = vld [vmem:[#allocation80_spill] sm:$0xff] }
 0x8e6   :  { %8701 = vmatprep.subr.bf16.mxu1 %v8700_v43  ;;  %v15384_v43 = vmov 0 }
 0x8e9   :  { %8703 = vmatpush1.bf16.msra.mxu1 %v8702_v62  ;;  %v15389_v62 = vld [vmem:[#allocation87_spill] sm:$0xff] }
 0x8ea   :  { %8705 = vmatprep.subr.bf16.mxu1 %v11106_v32  ;;  %v11497_v32 = vrot.slane %v10956_v35, %v15286_v26  ;;  %v15289_v35 = vmov 0  ;;  %v15391_v26 = vmov 0 }
 0x8ec   :  { %3834 = vmatmul.mubr.f32.vlgmr.msra.gmra.mrb[16].mxu1 %v11046_v44  ;;  %vm654_vm7 = vcmp.eq.s32.totalorder %v9114_v2, %v11497_v32  ;;  %vm658_vm14 = vcmp.eq.s32.totalorder %v9124_v6, %v11497_v32  ;;  %vm662_vm12 = vcmp.eq.s32.totalorder %v9133_v9, %v11497_v32  ;;  %vm666_vm15 = vcmp.eq.s32.totalorder %v9136_v10, %v11497_v32 }
 0x8ed   :  { %8707 = vmatpush1.bf16.msra.mxu1 %v11112_v42  ;;  %3920 = vmatprep.mubr.f32.mxu1 %v15268_v27  ;;  %vm11521_vm5 = vmpackc.low %vm658_vm14, %vm654_vm7  ;;  %v15291_v42 = vmov 0  ;;  %vm675_vm14 = vcmp.eq.s32.totalorder %v9254_v21, %v11490_v40  ;;  %v15293_v6 = vmov 0  ;;  %v15295_v9 = vmov 0 }
 0x8ee   :  { %8709 = vmatprep.subr.bf16.mxu1 %v11192_v38  ;;  %v15287_v38 = vmov 0  ;;  %v15290_v35 = vsel %vm11521_vm5, 4294967295, %v15289_v35  ;;  %v15292_v42 = vsel %vm11525_vm8, 4294967295, %v15291_v42  ;;  %vm11544_vm6 = vmpackc.low %vm666_vm15, %vm662_vm12  ;;  %vm670_vm7 = vcmp.eq.s32.totalorder %v9251_v20, %v11497_v32 }
 0x8ef   :  { %v15288_v38 = vsel %vm11505_vm13, 4294967295, %v15287_v38  ;;  %v15294_v6 = vsel %vm11544_vm6, 4294967295, %v15293_v6  ;;  %vm11548_vm0 = vmpackc.low %vm675_vm14, %vm671_vm3  ;;  %v15297_v10 = vmov 0  ;;  %v15299_v20 = vmov 0 }
 0x8f0   :  { %v15296_v9 = vsel %vm11548_vm0, 4294967295, %v15295_v9  ;;  %vm678_vm12 = vcmp.eq.s32.totalorder %v9264_v23, %v11497_v32  ;;  %vm682_vm14 = vcmp.eq.s32.totalorder %v9267_v24, %v11497_v32 }
 0x8f1   :  { %8711 = vmatpush1.bf16.msra.mxu1 %v11188_v36  ;;  %v15306_v36 = vmov 0 }
 0x8f2   :  { %8713 = vmatprep.subr.bf16.mxu1 %v11277_v17  ;;  %v15312_v17 = vmov 0 }
 0x8f5   :  { %8715 = vmatpush1.bf16.msra.mxu1 %v11274_v39  ;;  %v15311_v39 = vld [vmem:[#allocation30_spill] sm:$0xff] }
 0x8f6   :  { %8717 = vmatprep.subr.bf16.mxu1 %v11320_v31  ;;  %v15317_v31 = vld [vmem:[#allocation34_spill] sm:$0xff] }
 0x8f9   :  { %8719 = vmatpush1.bf16.msra.mxu1 %v11354_v14  ;;  %v15321_v14 = vmov 0 }
 0x8fa   :  { %7486 = vmatprep.subr.msk.bf16.mxu1 %vm11505_vm13, %v14957_v47  ;;  %vm674_vm13 = vcmp.eq.s32.totalorder %v9254_v21, %v11497_v32  ;;  %v15301_v21 = vmov 0 }
 0x8fb   :  { %vm11566_vm15 = vmpackc.low %vm674_vm13, %vm670_vm7  ;;  %vm690_vm7 = vcmp.eq.s32.totalorder %v9356_v46, %v11497_v32 }
 0x8fc   :  { %3922 = vmatmul.mubr.f32.vlgmr.msra.gmra.mrb[16].mxu1 %v11046_v44  ;;  %v15298_v10 = vsel %vm11566_vm15, 4294967295, %v15297_v10  ;;  %vm11588_vm13 = vmpackc.low %vm682_vm14, %vm678_vm12  ;;  %vm694_vm12 = vcmp.eq.s32.totalorder %v9381_v53, %v11497_v32 }
 0x8fd   :  { %7488 = vmatpush1.bf16.msk.msra.mxu1 %vm11521_vm5, %v14957_v47  ;;  %vm679_vm5 = vcmp.eq.s32.totalorder %v9264_v23, %v11490_v40  ;;  %v15302_v21 = vsel %vm11588_vm13, 4294967295, %v15301_v21  ;;  %v15303_v23 = vmov 0 }
 0x8fe   :  { %7490 = vmatprep.subr.msk.bf16.mxu1 %vm11525_vm8, %v14957_v47  ;;  %vm683_vm8 = vcmp.eq.s32.totalorder %v9267_v24, %v11490_v40  ;;  %v15305_v24 = vld [vmem:[#allocation26_spill] sm:$0xff] }
 0x8ff   :  { %vm11570_vm3 = vmpackc.low %vm683_vm8, %vm679_vm5  ;;  %vm686_vm8 = vcmp.eq.s32.totalorder %v9353_v45, %v11497_v32  ;;  %vm698_vm14 = vcmp.eq.s32.totalorder %v15305_v24, %v11497_v32 }
 0x900   :  { %v15300_v20 = vsel %vm11570_vm3, 4294967295, %v15299_v20 }
 0x901   :  { %7492 = vmatpush1.bf16.msk.msra.mxu1 %vm11544_vm6, %v14957_v47  ;;  %vm687_vm6 = vcmp.eq.s32.totalorder %v9353_v45, %v11490_v40  ;;  %v15308_v45 = vmov 0 }
 0x902   :  { %7494 = vmatprep.subr.msk.bf16.mxu1 %vm11548_vm0, %v14957_v47  ;;  %vm691_vm0 = vcmp.eq.s32.totalorder %v9356_v46, %v11490_v40  ;;  %v15310_v46 = vld [vmem:[#allocation29_spill] sm:$0xff] }
 0x903   :  { %vm11592_vm5 = vmpackc.low %vm691_vm0, %vm687_vm6 }
 0x904   :  { %v15304_v23 = vsel %vm11592_vm5, 4294967295, %v15303_v23  ;;  %vm11610_vm6 = vmpackc.low %vm690_vm7, %vm686_vm8  ;;  %vm702_vm8 = vcmp.eq.s32.totalorder %v15310_v46, %v11497_v32  ;;  %vm706_vm7 = vcmp.eq.s32.totalorder %v15311_v39, %v11497_v32 }
 0x905   :  { %7496 = vmatpush1.bf16.msk.msra.mxu1 %vm11566_vm15, %v14957_v47  ;;  %vm695_vm15 = vcmp.eq.s32.totalorder %v9381_v53, %v11490_v40  ;;  %v15307_v36 = vsel %vm11610_vm6, 4294967295, %v15306_v36  ;;  %v15314_v53 = vmov 0 }
 0x906   :  { %7498 = vmatprep.subr.msk.bf16.mxu1 %vm11570_vm3, %v14957_v47  ;;  %vm699_vm3 = vcmp.eq.s32.totalorder %v15305_v24, %v11490_v40  ;;  %v15393_v24 = vmov 0 }
 0x907   :  { %vm11614_vm0 = vmpackc.low %vm699_vm3, %vm695_vm15 }
 0x908   :  { %v15309_v45 = vsel %vm11614_vm0, 4294967295, %v15308_v45  ;;  %vm11632_vm15 = vmpackc.low %vm698_vm14, %vm694_vm12  ;;  %vm710_vm12 = vcmp.eq.s32.totalorder %v15316_v28, %v11497_v32  ;;  %vm714_vm14 = vcmp.eq.s32.totalorder %v15317_v31, %v11497_v32 }
 0x909   :  { %7500 = vmatpush1.bf16.msk.msra.mxu1 %vm11588_vm13, %v14957_v47  ;;  %vm703_vm13 = vcmp.eq.s32.totalorder %v15310_v46, %v11490_v40  ;;  %v15313_v17 = vsel %vm11632_vm15, 4294967295, %v15312_v17  ;;  %v15396_v46 = vmov 0 }
 0x90a   :  { %7502 = vmatprep.subr.msk.bf16.mxu1 %vm11592_vm5, %v14957_v47  ;;  %vm707_vm5 = vcmp.eq.s32.totalorder %v15311_v39, %v11490_v40  ;;  %v15398_v39 = vld [vmem:[#allocation95_spill] sm:$0xff] }
 0x90b   :  { %vm11636_vm3 = vmpackc.low %vm707_vm5, %vm703_vm13 }
 0x90c   :  { %v15315_v53 = vsel %vm11636_vm3, 4294967295, %v15314_v53  ;;  %vm11654_vm13 = vmpackc.low %vm706_vm7, %vm702_vm8  ;;  %vm718_vm8 = vcmp.eq.s32.totalorder %v15324_v52, %v11497_v32  ;;  %vm722_vm7 = vcmp.eq.s32.totalorder %v15325_v55, %v11497_v32 }
 0x90d   :  { %7504 = vmatpush1.bf16.msk.msra.mxu1 %vm11610_vm6, %v14957_v47  ;;  %vm711_vm6 = vcmp.eq.s32.totalorder %v15316_v28, %v11490_v40  ;;  %v15319_v48 = vsel %vm11654_vm13, 4294967295, %v15318_v48  ;;  %v15399_v28 = vld [vmem:[#allocation96_spill] sm:$0xff] }
 0x90e   :  { %7506 = vmatprep.subr.msk.bf16.mxu1 %vm11614_vm0, %v14957_v47  ;;  %vm715_vm0 = vcmp.eq.s32.totalorder %v15317_v31, %v11490_v40  ;;  %15320 = vst [vmem:[#allocation26_spill] sm:$0xff] %v15319_v48  ;;  %vm777_vm1 = vcmp.eq.s32.totalorder %v15399_v28, %v15351_v16  ;;  %v15400_v31 = vmov 0 }
 0x90f   :  { %vm11658_vm5 = vmpackc.low %vm715_vm0, %vm711_vm6 }
 0x910   :  { %v15322_v14 = vsel %vm11658_vm5, 4294967295, %v15321_v14  ;;  %vm11676_vm6 = vmpackc.low %vm714_vm14, %vm710_vm12  ;;  %vm726_vm12 = vcmp.eq.s32.totalorder %v15332_v59, %v11497_v32  ;;  %vm730_vm14 = vcmp.eq.s32.totalorder %v15333_v1, %v11497_v32 }
 0x911   :  { %7508 = vmatpush1.bf16.msk.msra.mxu1 %vm11632_vm15, %v14957_v47  ;;  %15323 = vst [vmem:[#allocation29_spill] sm:$0xff] %v15322_v14  ;;  %vm719_vm15 = vcmp.eq.s32.totalorder %v15324_v52, %v11490_v40  ;;  %v15327_v51 = vsel %vm11676_vm6, 4294967295, %v15326_v51  ;;  %v15403_v52 = vmov 0 }
 0x912   :  { %7510 = vmatprep.subr.msk.bf16.mxu1 %vm11636_vm3, %v14957_v47  ;;  %vm723_vm3 = vcmp.eq.s32.totalorder %v15325_v55, %v11490_v40  ;;  %15328 = vst [vmem:[#allocation30_spill] sm:$0xff] %v15327_v51  ;;  %v15405_v55 = vmov 0 }
 0x913   :  { %vm11680_vm0 = vmpackc.low %vm723_vm3, %vm719_vm15 }
 0x914   :  { %v15330_v19 = vsel %vm11680_vm0, 4294967295, %v15329_v19  ;;  %vm11698_vm15 = vmpackc.low %vm722_vm7, %vm718_vm8  ;;  %vm734_vm8 = vcmp.eq.s32.totalorder %v15340_v54, %v11497_v32  ;;  %vm738_vm7 = vcmp.eq.s32.totalorder %v15341_v34, %v11497_v32 }
 0x915   :  { %7512 = vmatpush1.bf16.msk.msra.mxu1 %vm11654_vm13, %v14957_v47  ;;  %15331 = vst [vmem:[#allocation33_spill] sm:$0xff] %v15330_v19  ;;  %vm727_vm13 = vcmp.eq.s32.totalorder %v15332_v59, %v11490_v40  ;;  %v15335_v57 = vsel %vm11698_vm15, 4294967295, %v15334_v57  ;;  %v15408_v59 = vmov 0 }
 0x916   :  { %7514 = vmatprep.subr.msk.bf16.mxu1 %vm11658_vm5, %v14957_v47  ;;  %vm731_vm5 = vcmp.eq.s32.totalorder %v15333_v1, %v11490_v40  ;;  %15336 = vst [vmem:[#allocation34_spill] sm:$0xff] %v15335_v57  ;;  %v15410_v1 = vmov 0 }
 0x917   :  { %vm11702_vm3 = vmpackc.low %vm731_vm5, %vm727_vm13 }
 0x918   :  { %v15338_v11 = vsel %vm11702_vm3, 4294967295, %v15337_v11  ;;  %vm11720_vm13 = vmpackc.low %vm730_vm14, %vm726_vm12  ;;  %vm743_vm14 = vcmp.eq.s32.totalorder %v15352_v58, %v11490_v40 }
 0x919   :  { %7516 = vmatpush1.bf16.msk.msra.mxu1 %vm11676_vm6, %v14957_v47  ;;  %15339 = vst [vmem:[#allocation39_spill] sm:$0xff] %v15338_v11  ;;  %vm735_vm6 = vcmp.eq.s32.totalorder %v15340_v54, %v11490_v40  ;;  %v15343_v22 = vsel %vm11720_vm13, 4294967295, %v15342_v22  ;;  %vm11738_vm12 = vmpackc.low %vm738_vm7, %vm734_vm8  ;;  %vm740_vm7 = vcmp.eq.s32.totalorder %v15352_v58, %v15356_v0  ;;  %v15413_v54 = vld [vmem:[#allocation35_spill] sm:$0xff] }
 0x91a   :  { %7518 = vmatprep.subr.msk.bf16.mxu1 %vm11680_vm0, %v14957_v47  ;;  %vm739_vm0 = vcmp.eq.s32.totalorder %v15341_v34, %v11490_v40  ;;  %15344 = vst [vmem:[#allocation40_spill] sm:$0xff] %v15343_v22  ;;  %v15349_v8 = vsel %vm11738_vm12, 4294967295, %v15348_v8  ;;  %v15414_v34 = vld [vmem:[#allocation36_spill] sm:$0xff] }
 0x91b   :  { %vm11724_vm5 = vmpackc.low %vm739_vm0, %vm735_vm6  ;;  %15350 = vst [vmem:[#allocation48_spill] sm:$0xff] %v15349_v8  ;;  %vm741_vm6 = vcmp.eq.s32.totalorder %v15352_v58, %v15351_v16  ;;  %vm745_vm0 = vcmp.eq.s32.totalorder %v15353_v25, %v15351_v16 }
 0x91c   :  { %v15346_v56 = vsel %vm11724_vm5, 4294967295, %v15345_v56  ;;  %vm11753_vm8 = vmpackc.low %vm745_vm0, %vm741_vm6 }
 0x91d   :  { %7520 = vmatpush1.bf16.msk.msra.mxu1 %vm11698_vm15, %v14957_v47  ;;  %15347 = vst [vmem:[#allocation47_spill] sm:$0xff] %v15346_v56  ;;  %v15355_v3 = vsel %vm11753_vm8, 4294967295, %v15354_v3  ;;  %7402 = vmatprep.subr.msk.bf16.mxu0 %vm11753_vm8, %v14957_v47  ;;  %vm754_vm8 = vcmp.eq.s32.totalorder %v15366_v41, %v11497_v32 }
 0x91e   :  { %7522 = vmatprep.subr.msk.bf16.mxu1 %vm11702_vm3, %v14957_v47  ;;  %vm746_vm3 = vcmp.eq.s32.totalorder %v15353_v25, %v11497_v32 }
 0x921   :  { %7524 = vmatpush1.bf16.msk.msra.mxu1 %vm11720_vm13, %v14957_v47  ;;  %vm742_vm13 = vcmp.eq.s32.totalorder %v15352_v58, %v11497_v32  ;;  %v15415_v58 = vmov 0 }
 0x922   :  { %7526 = vmatprep.subr.msk.bf16.mxu1 %vm11724_vm5, %v14957_v47  ;;  %vm747_vm5 = vcmp.eq.s32.totalorder %v15353_v25, %v11490_v40  ;;  %vm11782_vm15 = vmpackc.low %vm746_vm3, %vm742_vm13  ;;  %vm748_vm13 = vcmp.eq.s32.totalorder %v15365_v50, %v15356_v0 }
 0x923   :  { %vm11768_vm6 = vmpackc.low %vm747_vm5, %vm743_vm14  ;;  %v15363_v37 = vsel %vm11782_vm15, 4294967295, %v15362_v37  ;;  %vm749_vm5 = vcmp.eq.s32.totalorder %v15365_v50, %v15351_v16  ;;  %vm753_vm14 = vcmp.eq.s32.totalorder %v15366_v41, %v15351_v16 }
 0x924   :  { %v15358_v18 = vsel %vm11768_vm6, 4294967295, %v15357_v18  ;;  %15364 = vst [vmem:[#allocation56_spill] sm:$0xff] %v15363_v37  ;;  %vm11797_vm3 = vmpackc.low %vm753_vm14, %vm749_vm5 }
 0x925   :  { %7528 = vmatpush1.bf16.msk.msra.mxu1 %vm11738_vm12, %v14957_v47  ;;  %vm744_vm12 = vcmp.eq.s32.totalorder %v15353_v25, %v15356_v0  ;;  %15359 = vst [vmem:[#allocation55_spill] sm:$0xff] %v15358_v18  ;;  %v15368_v7 = vsel %vm11797_vm3, 4294967295, %v15367_v7  ;;  %v15417_v25 = vmov 0 }
 0x926   :  { %7530 = vmatprep.subr.msk.bf16.mxu1 %vm11768_vm6, %v14957_v47  ;;  %vm11775_vm0 = vmpackc.low %vm744_vm12, %vm740_vm7  ;;  %vm751_vm12 = vcmp.eq.s32.totalorder %v15365_v50, %v11490_v40  ;;  %vm755_vm7 = vcmp.eq.s32.totalorder %v15366_v41, %v11490_v40  ;;  %vm752_vm6 = vcmp.eq.s32.totalorder %v15366_v41, %v15356_v0 }
 0x927   :  { %v15361_v63 = vsel %vm11775_vm0, 4294967295, %v15360_v63  ;;  %7404 = vmatpush1.bf16.msk.msra.mxu0 %vm11775_vm0, %v14957_v47  ;;  %vm750_vm0 = vcmp.eq.s32.totalorder %v15365_v50, %v11497_v32  ;;  %vm11812_vm5 = vmpackc.low %vm755_vm7, %vm751_vm12  ;;  %vm757_vm12 = vcmp.eq.s32.totalorder %v15377_v60, %v15351_v16  ;;  %vm761_vm7 = vcmp.eq.s32.totalorder %v15378_v61, %v15351_v16  ;;  %v11987_v50 = vpop.permute.xlu0 %3171 }
 0x928   :  { %7406 = vmatprep.subr.msk.bf16.mxu0 %vm11797_vm3, %v14957_v47  ;;  %v15370_v15 = vsel %vm11812_vm5, 4294967295, %v15369_v15  ;;  %vm11819_vm14 = vmpackc.low %vm752_vm6, %vm748_vm13  ;;  %vm759_vm6 = vcmp.eq.s32.totalorder %v15377_v60, %v11490_v40  ;;  %vm763_vm13 = vcmp.eq.s32.totalorder %v15378_v61, %v11490_v40  ;;  %vm762_vm3 = vcmp.eq.s32.totalorder %v15378_v61, %v11497_v32  ;;  %15420 = vst [vmem:[#allocation88_spill] sm:$0xff] %v11987_v50 }
 0x929   :  { %7532 = vmatpush1.bf16.msk.msra.mxu1 %vm11782_vm15, %v14957_v47  ;;  %15371 = vst [vmem:[#allocation2_spill] sm:$0xff] %v15370_v15  ;;  %v15373_v5 = vsel %vm11819_vm14, 4294967295, %v15372_v5  ;;  %vm11826_vm15 = vmpackc.low %vm754_vm8, %vm750_vm0  ;;  %vm756_vm0 = vcmp.eq.s32.totalorder %v15377_v60, %v15356_v0 }
 0x92a   :  { %7534 = vmatprep.subr.msk.bf16.mxu1 %vm11812_vm5, %v14957_v47  ;;  %v15375_v33 = vsel %vm11826_vm15, 4294967295, %v15374_v33  ;;  %vm11841_vm8 = vmpackc.low %vm761_vm7, %vm757_vm12  ;;  %vm760_vm5 = vcmp.eq.s32.totalorder %v15378_v61, %v15356_v0 }
 0x92b   :  { %7408 = vmatpush1.bf16.msk.msra.mxu0 %vm11819_vm14, %v14957_v47  ;;  %15376 = vst [vmem:[#allocation63_spill] sm:$0xff] %v15375_v33  ;;  %v15380_v13 = vsel %vm11841_vm8, 4294967295, %v15379_v13  ;;  %vm758_vm14 = vcmp.eq.s32.totalorder %v15377_v60, %v11497_v32  ;;  %vm11856_vm12 = vmpackc.low %vm763_vm13, %vm759_vm6  ;;  %vm765_vm6 = vcmp.eq.s32.totalorder %v15389_v62, %v15351_v16  ;;  %vm769_vm13 = vcmp.eq.s32.totalorder %v15390_v4, %v15351_v16 }
 0x92c   :  { %7410 = vmatprep.subr.msk.bf16.mxu0 %vm11841_vm8, %v14957_v47  ;;  %v15382_v29 = vsel %vm11856_vm12, 4294967295, %v15381_v29  ;;  %vm11863_vm7 = vmpackc.low %vm760_vm5, %vm756_vm0  ;;  %vm767_vm5 = vcmp.eq.s32.totalorder %v15389_v62, %v11490_v40  ;;  %vm771_vm0 = vcmp.eq.s32.totalorder %v15390_v4, %v11490_v40  ;;  %vm770_vm8 = vcmp.eq.s32.totalorder %v15390_v4, %v11497_v32 }
 0x92d   :  { %7536 = vmatpush1.bf16.msk.msra.mxu1 %vm11826_vm15, %v14957_v47  ;;  %15383 = vst [vmem:[#allocation64_spill] sm:$0xff] %v15382_v29  ;;  %v15385_v43 = vsel %vm11863_vm7, 4294967295, %v15384_v43  ;;  %vm11870_vm15 = vmpackc.low %vm762_vm3, %vm758_vm14  ;;  %vm764_vm14 = vcmp.eq.s32.totalorder %v15389_v62, %v15356_v0 }
 0x92e   :  { %7538 = vmatprep.subr.msk.bf16.mxu1 %vm11856_vm12, %v14957_v47  ;;  %v15387_v12 = vsel %vm11870_vm15, 4294967295, %v15386_v12  ;;  %vm11885_vm3 = vmpackc.low %vm769_vm13, %vm765_vm6  ;;  %vm768_vm12 = vcmp.eq.s32.totalorder %v15390_v4, %v15356_v0 }
 0x92f   :  { %7412 = vmatpush1.bf16.msk.msra.mxu0 %vm11863_vm7, %v14957_v47  ;;  %15388 = vst [vmem:[#allocation3_spill] sm:$0xff] %v15387_v12  ;;  %v15392_v26 = vsel %vm11885_vm3, 4294967295, %v15391_v26  ;;  %vm766_vm7 = vcmp.eq.s32.totalorder %v15389_v62, %v11497_v32  ;;  %vm11900_vm6 = vmpackc.low %vm771_vm0, %vm767_vm5  ;;  %vm775_vm5 = vcmp.eq.s32.totalorder %v15398_v39, %v11490_v40  ;;  %vm779_vm0 = vcmp.eq.s32.totalorder %v15399_v28, %v11490_v40 }
 0x930   :  { %7414 = vmatprep.subr.msk.bf16.mxu0 %vm11885_vm3, %v14957_v47  ;;  %v15394_v24 = vsel %vm11900_vm6, 4294967295, %v15393_v24  ;;  %vm11907_vm13 = vmpackc.low %vm768_vm12, %vm764_vm14  ;;  %vm772_vm14 = vcmp.eq.s32.totalorder %v15398_v39, %v15356_v0 }
 0x931   :  { %7540 = vmatpush1.bf16.msk.msra.mxu1 %vm11870_vm15, %v14957_v47  ;;  %15395 = vst [vmem:[#allocation71_spill] sm:$0xff] %v15394_v24  ;;  %v15397_v46 = vsel %vm11907_vm13, 4294967295, %v15396_v46  ;;  %vm773_vm15 = vcmp.eq.s32.totalorder %v15398_v39, %v15351_v16  ;;  %vm11922_vm12 = vmpackc.low %vm770_vm8, %vm766_vm7  ;;  %vm774_vm8 = vcmp.eq.s32.totalorder %v15398_v39, %v11497_v32  ;;  %vm778_vm7 = vcmp.eq.s32.totalorder %v15399_v28, %v11497_v32 }
 0x932   :  { %7542 = vmatprep.subr.msk.bf16.mxu1 %vm11900_vm6, %v14957_v47  ;;  %v15401_v31 = vsel %vm11922_vm12, 4294967295, %v15400_v31  ;;  %vm776_vm6 = vcmp.eq.s32.totalorder %v15399_v28, %v15356_v0  ;;  %vm11933_vm3 = vmpackc.low %vm777_vm1, %vm773_vm15 }
 0x933   :  { %7416 = vmatpush1.bf16.msk.msra.mxu0 %vm11907_vm13, %v14957_v47  ;;  %15402 = vst [vmem:[#allocation72_spill] sm:$0xff] %v15401_v31  ;;  %v15404_v52 = vsel %vm11933_vm3, 4294967295, %v15403_v52  ;;  %vm11944_vm13 = vmpackc.low %vm779_vm0, %vm775_vm5  ;;  %vm781_vm5 = vcmp.eq.s32.totalorder %v15413_v54, %v15351_v16  ;;  %vm785_vm0 = vcmp.eq.s32.totalorder %v15414_v34, %v15351_v16 }
 0x934   :  { %7418 = vmatprep.subr.msk.bf16.mxu0 %vm11933_vm3, %v14957_v47  ;;  %v15406_v55 = vsel %vm11944_vm13, 4294967295, %v15405_v55  ;;  %vm11951_vm1 = vmpackc.low %vm776_vm6, %vm772_vm14  ;;  %vm783_vm6 = vcmp.eq.s32.totalorder %v15413_v54, %v11490_v40  ;;  %vm787_vm14 = vcmp.eq.s32.totalorder %v15414_v34, %v11490_v40 }
 0x935   :  { %7544 = vmatpush1.bf16.msk.msra.mxu1 %vm11922_vm12, %v14957_v47  ;;  %15407 = vst [vmem:[#allocation79_spill] sm:$0xff] %v15406_v55  ;;  %v15409_v59 = vsel %vm11951_vm1, 4294967295, %v15408_v59  ;;  %vm11958_vm15 = vmpackc.low %vm778_vm7, %vm774_vm8 }
 0x936   :  { %7546 = vmatprep.subr.msk.bf16.mxu1 %vm11944_vm13, %v14957_v47  ;;  %v15411_v1 = vsel %vm11958_vm15, 4294967295, %v15410_v1  ;;  %vm11973_vm8 = vmpackc.low %vm785_vm0, %vm781_vm5  ;;  %vm4007_vm5 = vsmask.f32 1280  ;;  %vm15431_vm0 = vcmp.eq.s32.totalorder %v15413_v54, %v11497_v32 }
 0x937   :  { %7420 = vmatpush1.bf16.msk.msra.mxu0 %vm11951_vm1, %v14957_v47  ;;  %15412 = vst [vmem:[#allocation80_spill] sm:$0xff] %v15411_v1  ;;  %v15416_v58 = vsel %vm11973_vm8, 4294967295, %v15415_v58  ;;  %vm11980_vm7 = vmpackc.low %vm787_vm14, %vm783_vm6  ;;  %vm780_vm6 = vcmp.eq.s32.totalorder %v15413_v54, %v15356_v0  ;;  %vm15432_vm14 = vcmp.eq.s32.totalorder %v15414_v34, %v11497_v32 }
 0x938   :  { %7422 = vmatprep.subr.msk.bf16.mxu0 %vm11973_vm8, %v14957_v47  ;;  %v15418_v25 = vsel %vm11980_vm7, 4294967295, %v15417_v25  ;;  %vm12038_vm13 = vmpackc.low %vm15432_vm14, %vm15431_vm0  ;;  %vm15436_vm8 = vcmask 1042432  }
 0x939   :  { %7548 = vmatpush1.bf16.msk.msra.mxu1 %vm11958_vm15, %v14957_v47  ;;  %15419 = vst [vmem:[#allocation87_spill] sm:$0xff] %v15418_v25  ;;  %vm15423_vm15 = vcmask 1041408   ;;  %vm15449_vm12 = vmmov %vm15436_vm8 }
 0x93a   :  { %7550 = vmatprep.subr.msk.bf16.mxu1 %vm11980_vm7, %v14957_v47  ;;  %vm12010_vm7 = vmand %vm15423_vm15, %vm4007_vm5  ;;  %vm15427_vm15 = vcmp.eq.s32.totalorder %v15414_v34, %v15356_v0 }
 0x93b   :  { %vm12028_vm5 = vmpackc.low %vm15427_vm15, %vm780_vm6 }
 0x9cf   :  { %v3923_v41 = vpop.f32.mrb[16].mxu1 }
 0x9d0   :  { %v11990_v60 = vadd.f32 %v3923_v41, %v11987_v50  ;;  %v3925_v61 = vpop.f32.mrb[17].mxu1 }
 0x9d1   :  { %v8896_v62 = vadd.f32 %v3925_v61, %v11987_v50 }
 0x9d2   :  { %v3934_v4 = vpack.c.bf16 %v11990_v60, %v11990_v60 }
 0x9d3   :  { %v3931_v39 = vrot.slane %v8896_v62, 3  ;;  %v3935_v28 = vpack.c.bf16 %v8896_v62, %v8896_v62 }
 0x9d4   :  { %v3938_v1 = vunpack.c.l.bf16 %v3934_v4 }
 0x9d5   :  { %v3937_v55 = vpack.c.bf16 %v3931_v39, %v3931_v39  ;;  %v3939_v31 = vunpack.c.l.bf16 %v3935_v28 }
 0x9d6   :  { %v3942_v25 = vsub.f32 %v11990_v60, %v3938_v1 }
 0x9d7   :  { %v3941_v24 = vunpack.c.l.bf16 %v3937_v55  ;;  %v3943_v12 = vsub.f32 %v8896_v62, %v3939_v31  ;;  %v15421_v62 = vld [vmem:[#allocation41_spill] sm:$0xff] }
 0x9d8   :  { %v3946_v29 = vpack.c.bf16 %v3942_v25, %v3942_v25  ;;  %vm15437_vm1 = vcmp.eq.s32.totalorder %v15421_v62, %v15351_v16  ;;  %vm15443_vm15 = vcmp.eq.s32.totalorder %v15421_v62, %v11490_v40 }
 0x9d9   :  { %v3945_v41 = vsub.f32 %v3931_v39, %v3941_v24  ;;  %v3947_v61 = vpack.c.bf16 %v3943_v12, %v3943_v12  ;;  %v15422_v39 = vld [vmem:[#allocation42_spill] sm:$0xff] }
 0x9da   :  { %v3950_v1 = vunpack.c.l.bf16 %v3946_v29  ;;  %v3963_v50 = vshrl.u32 %v3946_v29, 16  ;;  %v3966_v31 = vshll.u32 %v3946_v29, 16  ;;  %v15424_v29 = vmov 0 }
 0x9db   :  { %v3949_v33 = vpack.c.bf16 %v3945_v41, %v3945_v41  ;;  %v3951_v15 = vunpack.c.l.bf16 %v3947_v61  ;;  %v3971_v37 = vshrl.u32 %v3947_v61, 16  ;;  %v3974_v18 = vshll.u32 %v3947_v61, 16 }
 0x9dc   :  { %v3954_v8 = vsub.f32 %v3942_v25, %v3950_v1  ;;  %v3965_v56 = vrot.slane %v3963_v50, 6  ;;  %v3968_v24 = vrot.slane %v3966_v31, 7  ;;  %v15425_v29 = vsel %vm12010_vm7, 4294967295, %v15424_v29 }
 0x9dd   :  { %v3955_v22 = vsub.f32 %v3943_v12, %v3951_v15  ;;  %v3973_v11 = vrot.slane %v3971_v37, 6  ;;  %v3976_v57 = vrot.slane %v3974_v18, 7  ;;  %v3953_v19 = vunpack.c.l.bf16 %v3949_v33  ;;  %15426 = vst [vmem:[#allocation95_spill] sm:$0xff] %v15425_v29 }
 0x9de   :  { %v3958_v51 = vpack.c.bf16 %v3954_v8, %v3954_v8  ;;  %v3969_v14 = vor.u32 %v3968_v24, %v3965_v56  ;;  %v3987_v48 = vshrl.u32 %v3949_v33, 16  ;;  %v3990_v61 = vshll.u32 %v3949_v33, 16  ;;  %v15442_v33 = vld [vmem:[#allocation49_spill] sm:$0xff] }
 0x9df   :  { %v3959_v25 = vpack.c.bf16 %v3955_v22, %v3955_v22  ;;  %v3977_v50 = vor.u32 %v3976_v57, %v3973_v11  ;;  %v3957_v1 = vsub.f32 %v3945_v41, %v3953_v19  ;;  %v15433_v19 = vmov 0 }
 0x9e0   :  { %v4002_v15 = vrot.slane %v3958_v51, 5  ;;  %v3989_v37 = vrot.slane %v3987_v48, 6  ;;  %v3992_v18 = vrot.slane %v3990_v61, 7  ;;  %v4009_v56 = vsel %vm12010_vm7, %v3934_v4, %v3969_v14  ;;  %v15468_v61 = vld [vmem:[#allocation58_spill] sm:$0xff] }
 0x9e1   :  { %v4003_v8 = vrot.slane %v3959_v25, 5  ;;  %v4010_v12 = vsel %vm12010_vm7, %v3935_v28, %v3977_v50  ;;  %v15428_v51 = vmov 0  ;;  %v3961_v48 = vpack.c.bf16 %v3957_v1, %v3957_v1  ;;  %v15448_v28 = vld [vmem:[#allocation50_spill] sm:$0xff] }
 0x9e2   :  { %v15429_v51 = vsel %vm12028_vm5, 4294967295, %v15428_v51  ;;  %v15434_v19 = vsel %vm12038_vm13, 4294967295, %v15433_v19  ;;  %v3993_v14 = vor.u32 %v3992_v18, %v3989_v37  ;;  %vm15438_vm0 = vcmp.eq.s32.totalorder %v15422_v39, %v15351_v16  ;;  %v15481_v37 = vld [vmem:[#allocation65_spill] sm:$0xff]  ;;  %v15482_v18 = vld [vmem:[#allocation66_spill] sm:$0xff] }
 0x9e3   :  { %15430 = vst [vmem:[#allocation96_spill] sm:$0xff] %v15429_v51  ;;  %15435 = vst [vmem:[#allocation35_spill] sm:$0xff] %v15434_v19  ;;  %v4020_v57 = vsel %vm15436_vm8, %v4010_v12, %v4003_v8  ;;  %v4005_v11 = vrot.slane %v3961_v48, 5  ;;  %v15439_v22 = vmov 0  ;;  %v4016_v54 = vsel %vm15436_vm8, %v4009_v56, %v4002_v15 }
 0x9e4   :  { %vm12055_vm14 = vmpackc.low %vm15438_vm0, %vm15437_vm1  ;;  %4062 = vmatprep.mubr.bf16.mxu0 %v4020_v57  ;;  %4148 = vmatprep.mubr.bf16.mxu1 %v4020_v57  ;;  %v4012_v34 = vsel %vm12010_vm7, %v3937_v55, %v3993_v14  ;;  %vm15444_vm1 = vcmp.eq.s32.totalorder %v15422_v39, %v11490_v40  ;;  %v15445_v4 = vmov 0  ;;  %vm801_vm6 = vcmp.eq.s32.totalorder %v15448_v28, %v15351_v16  ;;  %v15495_v14 = vld [vmem:[#allocation73_spill] sm:$0xff]  ;;  %v15496_v57 = vld [vmem:[#allocation74_spill] sm:$0xff] }
 0x9e5   :  { %v15440_v22 = vsel %vm12055_vm14, 4294967295, %v15439_v22  ;;  %vm12072_vm0 = vmpackc.low %vm15444_vm1, %vm15443_vm15  ;;  %4063 = vmatmul.mubr.bf16.vlgmr.msra.gmra.mrb[8].mxu0 %v4016_v54  ;;  %4149 = vmatmul.mubr.bf16.vlgmr.msra.gmra.mrb[20].mxu1 %v4016_v54  ;;  %v4028_v41 = vsel %vm15449_vm12, %v4012_v34, %v4005_v11  ;;  %vm15450_vm8 = vcmp.eq.s32.totalorder %v15421_v62, %v15356_v0  ;;  %vm15451_vm3 = vcmp.eq.s32.totalorder %v15422_v39, %v15356_v0 }
 0x9e6   :  { %15441 = vst [vmem:[#allocation36_spill] sm:$0xff] %v15440_v22  ;;  %v15446_v4 = vsel %vm12072_vm0, 4294967295, %v15445_v4  ;;  %vm12085_vm11 = vmpackc.low %vm15451_vm3, %vm15450_vm8  ;;  %v15452_v55 = vmov 0  ;;  %vm799_vm15 = vcmp.eq.s32.totalorder %v15442_v33, %v11490_v40  ;;  %vm803_vm1 = vcmp.eq.s32.totalorder %v15448_v28, %v11490_v40  ;;  %7424 = vmatpush1.bf16.msk.msra.mxu0 %vm12028_vm5, %v14957_v47  ;;  %7552 = vmatpush1.bf16.msk.msra.mxu1 %vm12038_vm13, %v14957_v47 }
 0x9e7   :  { %15447 = vst [vmem:[#allocation41_spill] sm:$0xff] %v15446_v4  ;;  %v15453_v55 = vsel %vm12085_vm11, 4294967295, %v15452_v55  ;;  %vm15455_vm3 = vcmp.eq.s32.totalorder %v15421_v62, %v11497_v32  ;;  %vm15456_vm12 = vcmp.eq.s32.totalorder %v15422_v39, %v11497_v32  ;;  %v15457_v31 = vmov 0  ;;  %4105 = vmatprep.mubr.bf16.mxu0 %v4028_v41  ;;  %4191 = vmatprep.mubr.bf16.mxu1 %v4028_v41  ;;  %vm12130_vm9 = vmpackc.low %vm803_vm1, %vm799_vm15  ;;  %v15467_v39 = vld [vmem:[#allocation57_spill] sm:$0xff]  ;;  %v15510_v41 = vld [vmem:[#allocation82_spill] sm:$0xff] }
 0x9e8   :  { %15454 = vst [vmem:[#allocation42_spill] sm:$0xff] %v15453_v55  ;;  %vm12105_vm8 = vmpackc.low %vm15456_vm12, %vm15455_vm3  ;;  %vm796_vm2 = vcmp.eq.s32.totalorder %v15442_v33, %v15356_v0  ;;  %vm800_vm5 = vcmp.eq.s32.totalorder %v15448_v28, %v15356_v0  ;;  %vm15460_vm13 = vcmp.eq.s32.totalorder %v15442_v33, %v15351_v16  ;;  %v15461_v62 = vmov 0  ;;  %7426 = vmatprep.subr.msk.bf16.mxu0 %vm12055_vm14, %v14957_v47 }
 0x9e9   :  { %v15458_v31 = vsel %vm12105_vm8, 4294967295, %v15457_v31  ;;  %vm12116_vm10 = vmpackc.low %vm801_vm6, %vm15460_vm13  ;;  %vm798_vm3 = vcmp.eq.s32.totalorder %v15442_v33, %v11497_v32  ;;  %vm802_vm12 = vcmp.eq.s32.totalorder %v15448_v28, %v11497_v32  ;;  %7554 = vmatprep.subr.msk.bf16.mxu1 %vm12072_vm0, %v14957_v47  ;;  %v15464_v24 = vmov 0  ;;  %v15509_v28 = vld [vmem:[#allocation81_spill] sm:$0xff] }
 0x9ea   :  { %15459 = vst [vmem:[#allocation49_spill] sm:$0xff] %v15458_v31  ;;  %v15462_v62 = vsel %vm12116_vm10, 4294967295, %v15461_v62  ;;  %v15465_v24 = vsel %vm12130_vm9, 4294967295, %v15464_v24  ;;  %vm805_vm13 = vcmp.eq.s32.totalorder %v15467_v39, %v15351_v16  ;;  %vm809_vm6 = vcmp.eq.s32.totalorder %v15468_v61, %v15351_v16  ;;  %vm12138_vm4 = vmpackc.low %vm800_vm5, %vm796_vm2  ;;  %7428 = vmatpush1.bf16.msk.msra.mxu0 %vm12085_vm11, %v14957_v47  ;;  %7556 = vmatpush1.bf16.msk.msra.mxu1 %vm12105_vm8, %v14957_v47 }
 0x9eb   :  { %15463 = vst [vmem:[#allocation50_spill] sm:$0xff] %v15462_v62  ;;  %15466 = vst [vmem:[#allocation179_spill] sm:$0xff] %v15465_v24  ;;  %v15469_v25 = vmov 0  ;;  %vm807_vm14 = vcmp.eq.s32.totalorder %v15467_v39, %v11490_v40  ;;  %vm811_vm0 = vcmp.eq.s32.totalorder %v15468_v61, %v11490_v40  ;;  %v15472_v50 = vmov 0  ;;  %7430 = vmatprep.subr.msk.bf16.mxu0 %vm12116_vm10, %v14957_v47  ;;  %7558 = vmatprep.subr.msk.bf16.mxu1 %vm12130_vm9, %v14957_v47 }
 0x9ec   :  { %v15470_v25 = vsel %vm12138_vm4, 4294967295, %v15469_v25  ;;  %vm12152_vm15 = vmpackc.low %vm802_vm12, %vm798_vm3  ;;  %vm804_vm2 = vcmp.eq.s32.totalorder %v15467_v39, %v15356_v0  ;;  %vm808_vm5 = vcmp.eq.s32.totalorder %v15468_v61, %v15356_v0  ;;  %v15475_v1 = vmov 0 }
 0x9ed   :  { %15471 = vst [vmem:[#allocation57_spill] sm:$0xff] %v15470_v25  ;;  %v15473_v50 = vsel %vm12152_vm15, 4294967295, %v15472_v50  ;;  %vm12166_vm1 = vmpackc.low %vm809_vm6, %vm805_vm13  ;;  %vm806_vm3 = vcmp.eq.s32.totalorder %v15467_v39, %v11497_v32  ;;  %vm810_vm12 = vcmp.eq.s32.totalorder %v15468_v61, %v11497_v32  ;;  %v15478_v15 = vmov 0 }
 0x9ee   :  { %15474 = vst [vmem:[#allocation58_spill] sm:$0xff] %v15473_v50  ;;  %v15476_v1 = vsel %vm12166_vm1, 4294967295, %v15475_v1  ;;  %vm12174_vm8 = vmpackc.low %vm811_vm0, %vm807_vm14  ;;  %vm813_vm10 = vcmp.eq.s32.totalorder %v15481_v37, %v15351_v16  ;;  %vm817_vm9 = vcmp.eq.s32.totalorder %v15482_v18, %v15351_v16  ;;  %v15483_v8 = vmov 0  ;;  %7432 = vmatpush1.bf16.msk.msra.mxu0 %vm12138_vm4, %v14957_v47  ;;  %7560 = vmatpush1.bf16.msk.msra.mxu1 %vm12152_vm15, %v14957_v47 }
 0x9ef   :  { %15477 = vst [vmem:[#allocation180_spill] sm:$0xff] %v15476_v1  ;;  %v15479_v15 = vsel %vm12174_vm8, 4294967295, %v15478_v15  ;;  %vm12182_vm13 = vmpackc.low %vm808_vm5, %vm804_vm2  ;;  %vm815_vm6 = vcmp.eq.s32.totalorder %v15481_v37, %v11490_v40  ;;  %vm819_vm11 = vcmp.eq.s32.totalorder %v15482_v18, %v11490_v40  ;;  %v15486_v12 = vmov 0  ;;  %7434 = vmatprep.subr.msk.bf16.mxu0 %vm12166_vm1, %v14957_v47  ;;  %7562 = vmatprep.subr.msk.bf16.mxu1 %vm12174_vm8, %v14957_v47 }
 0x9f0   :  { %15480 = vst [vmem:[#allocation181_spill] sm:$0xff] %v15479_v15  ;;  %v15484_v8 = vsel %vm12182_vm13, 4294967295, %v15483_v8  ;;  %vm12196_vm14 = vmpackc.low %vm810_vm12, %vm806_vm3  ;;  %vm812_vm0 = vcmp.eq.s32.totalorder %v15481_v37, %v15356_v0  ;;  %vm816_vm2 = vcmp.eq.s32.totalorder %v15482_v18, %v15356_v0  ;;  %v15489_v56 = vmov 0 }
 0x9f1   :  { %15485 = vst [vmem:[#allocation65_spill] sm:$0xff] %v15484_v8  ;;  %v15487_v12 = vsel %vm12196_vm14, 4294967295, %v15486_v12  ;;  %vm12210_vm5 = vmpackc.low %vm817_vm9, %vm813_vm10  ;;  %vm814_vm3 = vcmp.eq.s32.totalorder %v15481_v37, %v11497_v32  ;;  %vm818_vm12 = vcmp.eq.s32.totalorder %v15482_v18, %v11497_v32  ;;  %v15492_v48 = vmov 0 }
 0x9f2   :  { %15488 = vst [vmem:[#allocation66_spill] sm:$0xff] %v15487_v12  ;;  %v15490_v56 = vsel %vm12210_vm5, 4294967295, %v15489_v56  ;;  %vm12218_vm15 = vmpackc.low %vm819_vm11, %vm815_vm6  ;;  %vm821_vm1 = vcmp.eq.s32.totalorder %v15495_v14, %v15351_v16  ;;  %vm825_vm8 = vcmp.eq.s32.totalorder %v15496_v57, %v15351_v16  ;;  %v15497_v11 = vmov 0  ;;  %7436 = vmatpush1.bf16.msk.msra.mxu0 %vm12182_vm13, %v14957_v47  ;;  %7564 = vmatpush1.bf16.msk.msra.mxu1 %vm12196_vm14, %v14957_v47 }
 0x9f3   :  { %15491 = vst [vmem:[#allocation182_spill] sm:$0xff] %v15490_v56  ;;  %v15493_v48 = vsel %vm12218_vm15, 4294967295, %v15492_v48  ;;  %vm12226_vm9 = vmpackc.low %vm816_vm2, %vm812_vm0  ;;  %vm823_vm10 = vcmp.eq.s32.totalorder %v15495_v14, %v11490_v40  ;;  %vm827_vm4 = vcmp.eq.s32.totalorder %v15496_v57, %v11490_v40  ;;  %v15500_v33 = vmov 0  ;;  %7438 = vmatprep.subr.msk.bf16.mxu0 %vm12210_vm5, %v14957_v47  ;;  %7566 = vmatprep.subr.msk.bf16.mxu1 %vm12218_vm15, %v14957_v47 }
 0x9f4   :  { %15494 = vst [vmem:[#allocation183_spill] sm:$0xff] %v15493_v48  ;;  %v15498_v11 = vsel %vm12226_vm9, 4294967295, %v15497_v11  ;;  %vm12240_vm11 = vmpackc.low %vm818_vm12, %vm814_vm3  ;;  %vm820_vm6 = vcmp.eq.s32.totalorder %v15495_v14, %v15356_v0  ;;  %vm824_vm0 = vcmp.eq.s32.totalorder %v15496_v57, %v15356_v0  ;;  %v15503_v54 = vmov 0 }
 0x9f5   :  { %15499 = vst [vmem:[#allocation73_spill] sm:$0xff] %v15498_v11  ;;  %v15501_v33 = vsel %vm12240_vm11, 4294967295, %v15500_v33  ;;  %vm12254_vm2 = vmpackc.low %vm825_vm8, %vm821_vm1  ;;  %vm822_vm3 = vcmp.eq.s32.totalorder %v15495_v14, %v11497_v32  ;;  %vm826_vm12 = vcmp.eq.s32.totalorder %v15496_v57, %v11497_v32  ;;  %v15506_v34 = vmov 0  ;;  %v15523_v14 = vld [vmem:[#allocation89_spill] sm:$0xff]  ;;  %v15524_v57 = vld [vmem:[#allocation90_spill] sm:$0xff] }
 0x9f6   :  { %15502 = vst [vmem:[#allocation74_spill] sm:$0xff] %v15501_v33  ;;  %v15504_v54 = vsel %vm12254_vm2, 4294967295, %v15503_v54  ;;  %vm12262_vm14 = vmpackc.low %vm827_vm4, %vm823_vm10  ;;  %vm829_vm5 = vcmp.eq.s32.totalorder %v15509_v28, %v15351_v16  ;;  %vm833_vm15 = vcmp.eq.s32.totalorder %v15510_v41, %v15351_v16  ;;  %v15511_v39 = vmov 0  ;;  %7440 = vmatpush1.bf16.msk.msra.mxu0 %vm12226_vm9, %v14957_v47  ;;  %7568 = vmatpush1.bf16.msk.msra.mxu1 %vm12240_vm11, %v14957_v47 }
 0x9f7   :  { %15505 = vst [vmem:[#allocation184_spill] sm:$0xff] %v15504_v54  ;;  %v15507_v34 = vsel %vm12262_vm14, 4294967295, %v15506_v34  ;;  %vm12270_vm8 = vmpackc.low %vm824_vm0, %vm820_vm6  ;;  %vm831_vm1 = vcmp.eq.s32.totalorder %v15509_v28, %v11490_v40  ;;  %vm835_vm13 = vcmp.eq.s32.totalorder %v15510_v41, %v11490_v40  ;;  %v15514_v61 = vmov 0  ;;  %7442 = vmatprep.subr.msk.bf16.mxu0 %vm12254_vm2, %v14957_v47  ;;  %7570 = vmatprep.subr.msk.bf16.mxu1 %vm12262_vm14, %v14957_v47 }
 0x9f8   :  { %15508 = vst [vmem:[#allocation185_spill] sm:$0xff] %v15507_v34  ;;  %v15512_v39 = vsel %vm12270_vm8, 4294967295, %v15511_v39  ;;  %vm12284_vm4 = vmpackc.low %vm826_vm12, %vm822_vm3  ;;  %vm828_vm10 = vcmp.eq.s32.totalorder %v15509_v28, %v15356_v0  ;;  %vm832_vm6 = vcmp.eq.s32.totalorder %v15510_v41, %v15356_v0  ;;  %v15517_v37 = vmov 0 }
 0x9f9   :  { %15513 = vst [vmem:[#allocation81_spill] sm:$0xff] %v15512_v39  ;;  %v15515_v61 = vsel %vm12284_vm4, 4294967295, %v15514_v61  ;;  %vm12298_vm0 = vmpackc.low %vm833_vm15, %vm829_vm5  ;;  %vm830_vm3 = vcmp.eq.s32.totalorder %v15509_v28, %v11497_v32  ;;  %vm834_vm12 = vcmp.eq.s32.totalorder %v15510_v41, %v11497_v32  ;;  %v15520_v18 = vmov 0 }
 0x9fa   :  { %15516 = vst [vmem:[#allocation82_spill] sm:$0xff] %v15515_v61  ;;  %v15518_v37 = vsel %vm12298_vm0, 4294967295, %v15517_v37  ;;  %vm12306_vm11 = vmpackc.low %vm835_vm13, %vm831_vm1  ;;  %vm837_vm2 = vcmp.eq.s32.totalorder %v15523_v14, %v15351_v16  ;;  %vm841_vm14 = vcmp.eq.s32.totalorder %v15524_v57, %v15351_v16  ;;  %v620_v34 = vadd.s32 384, %v9114_v2  ;;  %7444 = vmatpush1.bf16.msk.msra.mxu0 %vm12270_vm8, %v14957_v47  ;;  %7572 = vmatpush1.bf16.msk.msra.mxu1 %vm12284_vm4, %v14957_v47 }
 0x9fb   :  { %15519 = vst [vmem:[#allocation186_spill] sm:$0xff] %v15518_v37  ;;  %v15521_v18 = vsel %vm12306_vm11, 4294967295, %v15520_v18  ;;  %v621_v54 = vadd.s32 392, %v9114_v2  ;;  %vm12316_vm15 = vmpackc.low %vm832_vm6, %vm828_vm10  ;;  %v15525_v33 = vmov 0  ;;  %vm839_vm13 = vcmp.eq.s32.totalorder %v15523_v14, %v11490_v40  ;;  %7446 = vmatprep.subr.msk.bf16.mxu0 %vm12298_vm0, %v14957_v47  ;;  %7574 = vmatprep.subr.msk.bf16.mxu1 %vm12306_vm11, %v14957_v47 }
 0x9fc   :  { %15522 = vst [vmem:[#allocation187_spill] sm:$0xff] %v15521_v18  ;;  %v15526_v33 = vsel %vm12316_vm15, 4294967295, %v15525_v33  ;;  %vm843_vm5 = vcmp.eq.s32.totalorder %v15524_v57, %v11490_v40  ;;  %vm12330_vm1 = vmpackc.low %vm834_vm12, %vm830_vm3  ;;  %v15528_v28 = vmov 0  ;;  %vm836_vm10 = vcmp.eq.s32.totalorder %v15523_v14, %v15356_v0 }
 0x9fd   :  { %15527 = vst [vmem:[#allocation89_spill] sm:$0xff] %v15526_v33  ;;  %v15529_v28 = vsel %vm12330_vm1, 4294967295, %v15528_v28  ;;  %vm840_vm6 = vcmp.eq.s32.totalorder %v15524_v57, %v15356_v0  ;;  %vm12344_vm8 = vmpackc.low %vm841_vm14, %vm837_vm2  ;;  %v15531_v41 = vmov 0  ;;  %vm838_vm3 = vcmp.eq.s32.totalorder %v15523_v14, %v11497_v32 }
 0x9fe   :  { %15530 = vst [vmem:[#allocation90_spill] sm:$0xff] %v15529_v28  ;;  %v15532_v41 = vsel %vm12344_vm8, 4294967295, %v15531_v41  ;;  %vm842_vm12 = vcmp.eq.s32.totalorder %v15524_v57, %v11497_v32  ;;  %vm12352_vm4 = vmpackc.low %vm843_vm5, %vm839_vm13  ;;  %v15534_v61 = vmov 0  ;;  %vm845_vm0 = vcmp.eq.s32.totalorder %v620_v34, %v15351_v16  ;;  %7448 = vmatpush1.bf16.msk.msra.mxu0 %vm12316_vm15, %v14957_v47  ;;  %7576 = vmatpush1.bf16.msk.msra.mxu1 %vm12330_vm1, %v14957_v47 }
 0x9ff   :  { %15533 = vst [vmem:[#allocation188_spill] sm:$0xff] %v15532_v41  ;;  %v15535_v61 = vsel %vm12352_vm4, 4294967295, %v15534_v61  ;;  %vm849_vm9 = vcmp.eq.s32.totalorder %v621_v54, %v15351_v16  ;;  %v622_v18 = vadd.s32 400, %v9114_v2  ;;  %v623_v37 = vadd.s32 408, %v9114_v2  ;;  %vm12360_vm14 = vmpackc.low %vm840_vm6, %vm836_vm10  ;;  %7450 = vmatprep.subr.msk.bf16.mxu0 %vm12344_vm8, %v14957_v47  ;;  %7578 = vmatprep.subr.msk.bf16.mxu1 %vm12352_vm4, %v14957_v47 }
 0xa00   :  { %15536 = vst [vmem:[#allocation189_spill] sm:$0xff] %v15535_v61  ;;  %v15537_v39 = vmov 0  ;;  %vm847_vm2 = vcmp.eq.s32.totalorder %v620_v34, %v11490_v40  ;;  %vm851_vm11 = vcmp.eq.s32.totalorder %v621_v54, %v11490_v40  ;;  %vm12372_vm13 = vmpackc.low %vm842_vm12, %vm838_vm3  ;;  %v15540_v14 = vmov 0 }
 0xa01   :  { %v15538_v39 = vsel %vm12360_vm14, 4294967295, %v15537_v39  ;;  %v15541_v14 = vsel %vm12372_vm13, 4294967295, %v15540_v14  ;;  %vm844_vm5 = vcmp.eq.s32.totalorder %v620_v34, %v15356_v0  ;;  %vm848_vm10 = vcmp.eq.s32.totalorder %v621_v54, %v15356_v0  ;;  %vm12384_vm6 = vmpackc.low %vm849_vm9, %vm845_vm0 }
 0xa02   :  { %15539 = vst [vmem:[#allocation190_spill] sm:$0xff] %v15538_v39  ;;  %15542 = vst [vmem:[#allocation191_spill] sm:$0xff] %v15541_v14  ;;  %v15543_v57 = vmov 0  ;;  %vm846_vm3 = vcmp.eq.s32.totalorder %v620_v34, %v11497_v32  ;;  %vm850_vm12 = vcmp.eq.s32.totalorder %v621_v54, %v11497_v32  ;;  %v624_v28 = vadd.s32 416, %v9114_v2  ;;  %7452 = vmatpush1.bf16.msk.msra.mxu0 %vm12360_vm14, %v14957_v47  ;;  %7580 = vmatpush1.bf16.msk.msra.mxu1 %vm12372_vm13, %v14957_v47 }
 0xa03   :  { %v15544_v57 = vsel %vm12384_vm6, 4294967295, %v15543_v57  ;;  %v3930_v33 = vrot.slane %v11990_v60, 3  ;;  %vm12392_vm1 = vmpackc.low %vm851_vm11, %vm847_vm2  ;;  %v15546_v11 = vmov 0  ;;  %vm853_vm8 = vcmp.eq.s32.totalorder %v622_v18, %v15351_v16  ;;  %7454 = vmatprep.subr.msk.bf16.mxu0 %vm12384_vm6, %v14957_v47 }
 0xa04   :  { %15545 = vst [vmem:[#allocation192_spill] sm:$0xff] %v15544_v57  ;;  %v15547_v11 = vsel %vm12392_vm1, 4294967295, %v15546_v11  ;;  %vm857_vm4 = vcmp.eq.s32.totalorder %v623_v37, %v15351_v16  ;;  %v625_v61 = vadd.s32 424, %v9114_v2  ;;  %vm12399_vm9 = vmpackc.low %vm848_vm10, %vm844_vm5  ;;  %v15549_v41 = vmov 0  ;;  %7582 = vmatprep.subr.msk.bf16.mxu1 %vm12392_vm1, %v14957_v47 }
 0xa05   :  { %15548 = vst [vmem:[#allocation193_spill] sm:$0xff] %v15547_v11  ;;  %v15550_v41 = vsel %vm12399_vm9, 4294967295, %v15549_v41  ;;  %vm855_vm0 = vcmp.eq.s32.totalorder %v622_v18, %v11490_v40  ;;  %vm859_vm15 = vcmp.eq.s32.totalorder %v623_v37, %v11490_v40  ;;  %vm12411_vm11 = vmpackc.low %vm850_vm12, %vm846_vm3  ;;  %v15552_v60 = vmov 0 }
 0xa06   :  { %15551 = vst [vmem:[#allocation194_spill] sm:$0xff] %v15550_v41  ;;  %v15553_v60 = vsel %vm12411_vm11, 4294967295, %v15552_v60  ;;  %vm852_vm2 = vcmp.eq.s32.totalorder %v622_v18, %v15356_v0  ;;  %vm856_vm5 = vcmp.eq.s32.totalorder %v623_v37, %v15356_v0  ;;  %vm12423_vm10 = vmpackc.low %vm857_vm4, %vm853_vm8  ;;  %v15555_v54 = vmov 0  ;;  %7456 = vmatpush1.bf16.msk.msra.mxu0 %vm12399_vm9, %v14957_v47  ;;  %7584 = vmatpush1.bf16.msk.msra.mxu1 %vm12411_vm11, %v14957_v47 }
 0xa07   :  { %15554 = vst [vmem:[#allocation195_spill] sm:$0xff] %v15553_v60  ;;  %v15556_v54 = vsel %vm12423_vm10, 4294967295, %v15555_v54  ;;  %vm854_vm3 = vcmp.eq.s32.totalorder %v622_v18, %v11497_v32  ;;  %vm858_vm12 = vcmp.eq.s32.totalorder %v623_v37, %v11497_v32  ;;  %v12430_v34 = vpack.c.bf16 %v3930_v33, %v3930_v33  ;;  %vm12432_vm14 = vmpackc.low %vm859_vm15, %vm855_vm0  ;;  %v7613_v18 = vld [vmem:[%s14133_s0 + $0x2] sm:$0x3]  ;;  %7458 = vmatprep.subr.msk.bf16.mxu0 %vm12423_vm10, %v14957_v47 }
 0xa08   :  { %15557 = vst [vmem:[#allocation196_spill] sm:$0xff] %v15556_v54  ;;  %v15558_v14 = vmov 0  ;;  %vm865_vm6 = vcmp.eq.s32.totalorder %v625_v61, %v15351_v16  ;;  %v626_v11 = vadd.s32 432, %v9114_v2  ;;  %v627_v57 = vadd.s32 440, %v9114_v2  ;;  %vm12439_vm8 = vmpackc.low %vm856_vm5, %vm852_vm2  ;;  %7586 = vmatprep.subr.msk.bf16.mxu1 %vm12432_vm14, %v14957_v47 }
 0xa09   :  { %v15559_v14 = vsel %vm12432_vm14, 4294967295, %v15558_v14  ;;  %v15561_v39 = vmov 0  ;;  %vm867_vm13 = vcmp.eq.s32.totalorder %v625_v61, %v11490_v40  ;;  %vm12451_vm15 = vmpackc.low %vm858_vm12, %vm854_vm3  ;;  %v15564_v37 = vmov 0 }
 0xa0a   :  { %15560 = vst [vmem:[#allocation197_spill] sm:$0xff] %v15559_v14  ;;  %v15562_v39 = vsel %vm12439_vm8, 4294967295, %v15561_v39  ;;  %v15565_v37 = vsel %vm12451_vm15, 4294967295, %v15564_v37  ;;  %vm860_vm0 = vcmp.eq.s32.totalorder %v624_v28, %v15356_v0  ;;  %vm864_vm2 = vcmp.eq.s32.totalorder %v625_v61, %v15356_v0  ;;  %7460 = vmatpush1.bf16.msk.msra.mxu0 %vm12439_vm8, %v14957_v47  ;;  %7588 = vmatpush1.bf16.msk.msra.mxu1 %vm12451_vm15, %v14957_v47 }
 0xa0b   :  { %15563 = vst [vmem:[#allocation198_spill] sm:$0xff] %v15562_v39  ;;  %15566 = vst [vmem:[#allocation199_spill] sm:$0xff] %v15565_v37  ;;  %vm15567_vm5 = vcmp.eq.s32.totalorder %v624_v28, %v15351_v16  ;;  %v15568_v60 = vmov 0  ;;  %vm862_vm12 = vcmp.eq.s32.totalorder %v624_v28, %v11497_v32  ;;  %vm866_vm4 = vcmp.eq.s32.totalorder %v625_v61, %v11497_v32 }
 0xa0c   :  { %vm12468_vm3 = vmpackc.low %vm865_vm6, %vm15567_vm5  ;;  %v628_v41 = vadd.s32 448, %v9114_v2  ;;  %v3940_v48 = vunpack.c.l.bf16 %v12430_v34  ;;  %vm15571_vm10 = vcmp.eq.s32.totalorder %v624_v28, %v11490_v40  ;;  %v15572_v54 = vmov 0 }
 0xa0d   :  { %v15569_v60 = vsel %vm12468_vm3, 4294967295, %v15568_v60  ;;  %vm12478_vm11 = vmpackc.low %vm867_vm13, %vm15571_vm10  ;;  %vm869_vm14 = vcmp.eq.s32.totalorder %v626_v11, %v15351_v16  ;;  %vm873_vm6 = vcmp.eq.s32.totalorder %v627_v57, %v15351_v16  ;;  %v629_v14 = vadd.s32 456, %v9114_v2  ;;  %7462 = vmatprep.subr.msk.bf16.mxu0 %vm12468_vm3, %v14957_v47 }
 0xa0e   :  { %15570 = vst [vmem:[#allocation200_spill] sm:$0xff] %v15569_v60  ;;  %v15573_v54 = vsel %vm12478_vm11, 4294967295, %v15572_v54  ;;  %vm12485_vm5 = vmpackc.low %vm864_vm2, %vm860_vm0  ;;  %v15575_v56 = vmov 0  ;;  %vm875_vm1 = vcmp.eq.s32.totalorder %v627_v57, %v11490_v40  ;;  %v15578_v61 = vmov 0  ;;  %7590 = vmatprep.subr.msk.bf16.mxu1 %vm12478_vm11, %v14957_v47 }
 0xa0f   :  { %15574 = vst [vmem:[#allocation201_spill] sm:$0xff] %v15573_v54  ;;  %v15576_v56 = vsel %vm12485_vm5, 4294967295, %v15575_v56  ;;  %vm12497_vm13 = vmpackc.low %vm866_vm4, %vm862_vm12  ;;  %vm868_vm10 = vcmp.eq.s32.totalorder %v626_v11, %v15356_v0  ;;  %vm872_vm0 = vcmp.eq.s32.totalorder %v627_v57, %v15356_v0  ;;  %v12503_v28 = vpack.c.bf16 %v7613_v18, %v7613_v18  ;;  %7464 = vmatpush1.bf16.msk.msra.mxu0 %vm12485_vm5, %v14957_v47 }
 0xa10   :  { %15577 = vst [vmem:[#allocation202_spill] sm:$0xff] %v15576_v56  ;;  %v15579_v61 = vsel %vm12497_vm13, 4294967295, %v15578_v61  ;;  %vm12511_vm2 = vmpackc.low %vm873_vm6, %vm869_vm14  ;;  %v15581_v37 = vmov 0  ;;  %vm870_vm4 = vcmp.eq.s32.totalorder %v626_v11, %v11497_v32  ;;  %vm874_vm12 = vcmp.eq.s32.totalorder %v627_v57, %v11497_v32  ;;  %7592 = vmatpush1.bf16.msk.msra.mxu1 %vm12497_vm13, %v14957_v47 }
 0xa11   :  { %15580 = vst [vmem:[#allocation203_spill] sm:$0xff] %v15579_v61  ;;  %v15582_v37 = vsel %vm12511_vm2, 4294967295, %v15581_v37  ;;  %v12518_v39 = vsub.f32 %v3930_v33, %v3940_v48  ;;  %vm15584_vm15 = vcmp.eq.s32.totalorder %v626_v11, %v11490_v40  ;;  %v15585_v60 = vmov 0  ;;  %vm12529_vm14 = vmpackc.low %vm872_vm0, %vm868_vm10  ;;  %7466 = vmatprep.subr.msk.bf16.mxu0 %vm12511_vm2, %v14957_v47 }
 0xa12   :  { %15583 = vst [vmem:[#allocation204_spill] sm:$0xff] %v15582_v37  ;;  %vm12522_vm8 = vmpackc.low %vm875_vm1, %vm15584_vm15  ;;  %vm881_vm11 = vcmp.eq.s32.totalorder %v629_v14, %v15351_v16  ;;  %v630_v54 = vadd.s32 464, %v9114_v2  ;;  %v631_v12 = vadd.s32 472, %v9114_v2  ;;  %v15588_v8 = vmov 0 }
 0xa13   :  { %v15586_v60 = vsel %vm12522_vm8, 4294967295, %v15585_v60  ;;  %v15589_v8 = vsel %vm12529_vm14, 4294967295, %v15588_v8  ;;  %vm883_vm9 = vcmp.eq.s32.totalorder %v629_v14, %v11490_v40  ;;  %vm12541_vm1 = vmpackc.low %vm874_vm12, %vm870_vm4  ;;  %v15591_v48 = vmov 0  ;;  %7594 = vmatprep.subr.msk.bf16.mxu1 %vm12522_vm8, %v14957_v47  ;;  %7468 = vmatpush1.bf16.msk.msra.mxu0 %vm12529_vm14, %v14957_v47 }
 0xa14   :  { %15587 = vst [vmem:[#allocation205_spill] sm:$0xff] %v15586_v60  ;;  %15590 = vst [vmem:[#allocation206_spill] sm:$0xff] %v15589_v8  ;;  %v15592_v48 = vsel %vm12541_vm1, 4294967295, %v15591_v48  ;;  %vm876_vm15 = vcmp.eq.s32.totalorder %v628_v41, %v15356_v0  ;;  %vm880_vm10 = vcmp.eq.s32.totalorder %v629_v14, %v15356_v0  ;;  %v4257_v11 = vunpack.c.l.bf16 %v12503_v28  ;;  %7596 = vmatpush1.bf16.msk.msra.mxu1 %vm12541_vm1, %v14957_v47 }
 0xa15   :  { %15593 = vst [vmem:[#allocation207_spill] sm:$0xff] %v15592_v48  ;;  %vm15594_vm0 = vcmp.eq.s32.totalorder %v628_v41, %v15351_v16  ;;  %v15595_v33 = vmov 0  ;;  %vm878_vm12 = vcmp.eq.s32.totalorder %v628_v41, %v11497_v32  ;;  %vm882_vm6 = vcmp.eq.s32.totalorder %v629_v14, %v11497_v32  ;;  %vm12574_vm8 = vmpackc.low %vm880_vm10, %vm876_vm15 }
 0xa16   :  { %vm12556_vm4 = vmpackc.low %vm881_vm11, %vm15594_vm0  ;;  %v632_v57 = vadd.s32 480, %v9114_v2  ;;  %v3948_v37 = vpack.c.bf16 %v12518_v39, %v12518_v39  ;;  %vm15598_vm2 = vcmp.eq.s32.totalorder %v628_v41, %v11490_v40  ;;  %v15599_v60 = vmov 0 }
 0xa17   :  { %v15596_v33 = vsel %vm12556_vm4, 4294967295, %v15595_v33  ;;  %vm12567_vm13 = vmpackc.low %vm883_vm9, %vm15598_vm2  ;;  %vm885_vm11 = vcmp.eq.s32.totalorder %v630_v54, %v15351_v16  ;;  %vm889_vm0 = vcmp.eq.s32.totalorder %v631_v12, %v15351_v16  ;;  %v633_v61 = vadd.s32 488, %v9114_v2  ;;  %7470 = vmatprep.subr.msk.bf16.mxu0 %vm12556_vm4, %v14957_v47 }
 0xa18   :  { %15597 = vst [vmem:[#allocation208_spill] sm:$0xff] %v15596_v33  ;;  %v15600_v60 = vsel %vm12567_vm13, 4294967295, %v15599_v60  ;;  %v15602_v56 = vmov 0  ;;  %vm887_vm5 = vcmp.eq.s32.totalorder %v630_v54, %v11490_v40  ;;  %vm891_vm3 = vcmp.eq.s32.totalorder %v631_v12, %v11490_v40  ;;  %vm12586_vm9 = vmpackc.low %vm882_vm6, %vm878_vm12  ;;  %7598 = vmatprep.subr.msk.bf16.mxu1 %vm12567_vm13, %v14957_v47  ;;  %7472 = vmatpush1.bf16.msk.msra.mxu0 %vm12574_vm8, %v14957_v47 }
 0xa19   :  { %15601 = vst [vmem:[#allocation209_spill] sm:$0xff] %v15600_v60  ;;  %v15603_v56 = vsel %vm12574_vm8, 4294967295, %v15602_v56  ;;  %v15605_v41 = vmov 0  ;;  %vm884_vm2 = vcmp.eq.s32.totalorder %v630_v54, %v15356_v0  ;;  %vm888_vm15 = vcmp.eq.s32.totalorder %v631_v12, %v15356_v0  ;;  %vm12598_vm10 = vmpackc.low %vm889_vm0, %vm885_vm11  ;;  %7600 = vmatpush1.bf16.msk.msra.mxu1 %vm12586_vm9, %v14957_v47 }
 0xa1a   :  { %15604 = vst [vmem:[#allocation210_spill] sm:$0xff] %v15603_v56  ;;  %v15606_v41 = vsel %vm12586_vm9, 4294967295, %v15605_v41  ;;  %v4258_v14 = vsub.f32 %v7613_v18, %v4257_v11  ;;  %v15608_v48 = vmov 0  ;;  %vm890_vm12 = vcmp.eq.s32.totalorder %v631_v12, %v11497_v32  ;;  %vm12605_vm14 = vmpackc.low %vm891_vm3, %vm887_vm5  ;;  %7474 = vmatprep.subr.msk.bf16.mxu0 %vm12598_vm10, %v14957_v47 }
 0xa1b   :  { %15607 = vst [vmem:[#allocation211_spill] sm:$0xff] %v15606_v41  ;;  %v15609_v48 = vsel %vm12598_vm10, 4294967295, %v15608_v48  ;;  %vm893_vm1 = vcmp.eq.s32.totalorder %v632_v57, %v15351_v16  ;;  %v15611_v18 = vmov 0  ;;  %vm897_vm4 = vcmp.eq.s32.totalorder %v633_v61, %v15351_v16  ;;  %vm12612_vm11 = vmpackc.low %vm888_vm15, %vm884_vm2  ;;  %7602 = vmatprep.subr.msk.bf16.mxu1 %vm12605_vm14, %v14957_v47 }
 0xa1c   :  { %15610 = vst [vmem:[#allocation212_spill] sm:$0xff] %v15609_v48  ;;  %v15612_v18 = vsel %vm12605_vm14, 4294967295, %v15611_v18  ;;  %v634_v11 = vadd.s32 496, %v9114_v2  ;;  %v635_v60 = vadd.s32 504, %v9114_v2  ;;  %v3952_v33 = vunpack.c.l.bf16 %v3948_v37  ;;  %7476 = vmatpush1.bf16.msk.msra.mxu0 %vm12612_vm11, %v14957_v47 }
 0xa1d   :  { %15613 = vst [vmem:[#allocation213_spill] sm:$0xff] %v15612_v18  ;;  %v15614_v8 = vmov 0  ;;  %vm899_vm6 = vcmp.eq.s32.totalorder %v633_v61, %v11490_v40  ;;  %v3979_v12 = vshrl.u32 %v3948_v37, 16  ;;  %v3982_v15 = vshll.u32 %v3948_v37, 16 }
 0xa1e   :  { %v15615_v8 = vsel %vm12612_vm11, 4294967295, %v15614_v8  ;;  %vm15617_vm3 = vcmp.eq.s32.totalorder %v630_v54, %v11497_v32  ;;  %v15618_v2 = vmov 0  ;;  %vm892_vm2 = vcmp.eq.s32.totalorder %v632_v57, %v15356_v0 }
 0xa1f   :  { %15616 = vst [vmem:[#allocation214_spill] sm:$0xff] %v15615_v8  ;;  %vm12626_vm5 = vmpackc.low %vm890_vm12, %vm15617_vm3  ;;  %vm896_vm15 = vcmp.eq.s32.totalorder %v633_v61, %v15356_v0  ;;  %v4259_v1 = vpack.c.bf16 %v4258_v14, %v4258_v14  ;;  %v15621_v54 = vmov 0  ;;  %vm894_vm3 = vcmp.eq.s32.totalorder %v632_v57, %v11497_v32 }
 0xa20   :  { %v15619_v2 = vsel %vm12626_vm5, 4294967295, %v15618_v2  ;;  %vm12642_vm12 = vmpackc.low %vm897_vm4, %vm893_vm1  ;;  %vm898_vm0 = vcmp.eq.s32.totalorder %v633_v61, %v11497_v32  ;;  %vm15624_vm9 = vcmp.eq.s32.totalorder %v632_v57, %v11490_v40  ;;  %v15625_v37 = vmov 0  ;;  %7604 = vmatpush1.bf16.msk.msra.mxu1 %vm12626_vm5, %v14957_v47 }
 0xa21   :  { %15620 = vst [vmem:[#allocation215_spill] sm:$0xff] %v15619_v2  ;;  %v15622_v54 = vsel %vm12642_vm12, 4294967295, %v15621_v54  ;;  %vm12650_vm8 = vmpackc.low %vm899_vm6, %vm15624_vm9  ;;  %vm901_vm14 = vcmp.eq.s32.totalorder %v634_v11, %v15351_v16  ;;  %vm905_vm10 = vcmp.eq.s32.totalorder %v635_v60, %v15351_v16  ;;  %v3956_v18 = vsub.f32 %v12518_v39, %v3952_v33  ;;  %7478 = vmatprep.subr.msk.bf16.mxu0 %vm12642_vm12, %v14957_v47 }
 0xa22   :  { %15623 = vst [vmem:[#allocation216_spill] sm:$0xff] %v15622_v54  ;;  %v15626_v37 = vsel %vm12650_vm8, 4294967295, %v15625_v37  ;;  %vm12657_vm1 = vmpackc.low %vm896_vm15, %vm892_vm2  ;;  %v15628_v48 = vmov 0  ;;  %vm903_vm4 = vcmp.eq.s32.totalorder %v634_v11, %v11490_v40  ;;  %vm907_vm13 = vcmp.eq.s32.totalorder %v635_v60, %v11490_v40  ;;  %7606 = vmatprep.subr.msk.bf16.mxu1 %vm12650_vm8, %v14957_v47 }
 0xa23   :  { %15627 = vst [vmem:[#allocation217_spill] sm:$0xff] %v15626_v37  ;;  %v15629_v48 = vsel %vm12657_vm1, 4294967295, %v15628_v48  ;;  %v3981_v61 = vrot.slane %v3979_v12, 6  ;;  %v3984_v57 = vrot.slane %v3982_v15, 7  ;;  %vm12669_vm9 = vmpackc.low %vm898_vm0, %vm894_vm3  ;;  %v15631_v16 = vmov 0  ;;  %7480 = vmatpush1.bf16.msk.msra.mxu0 %vm12657_vm1, %v14957_v47 }
 0xa24   :  { %15630 = vst [vmem:[#allocation218_spill] sm:$0xff] %v15629_v48  ;;  %v15632_v16 = vsel %vm12669_vm9, 4294967295, %v15631_v16  ;;  %v4260_v39 = vunpack.c.l.bf16 %v4259_v1  ;;  %vm12679_vm6 = vmpackc.low %vm905_vm10, %vm901_vm14  ;;  %v15634_v40 = vmov 0  ;;  %vm900_vm2 = vcmp.eq.s32.totalorder %v634_v11, %v15356_v0  ;;  %7608 = vmatpush1.bf16.msk.msra.mxu1 %vm12669_vm9, %v14957_v47 }
 0xa25   :  { %15633 = vst [vmem:[#allocation219_spill] sm:$0xff] %v15632_v16  ;;  %v15635_v40 = vsel %vm12679_vm6, 4294967295, %v15634_v40  ;;  %vm904_vm0 = vcmp.eq.s32.totalorder %v635_v60, %v15356_v0  ;;  %vm12685_vm15 = vmpackc.low %vm907_vm13, %vm903_vm4  ;;  %v15637_v15 = vmov 0  ;;  %vm902_vm3 = vcmp.eq.s32.totalorder %v634_v11, %v11497_v32  ;;  %7482 = vmatprep.subr.msk.bf16.mxu0 %vm12679_vm6, %v14957_v47  ;;  %v15646_v11 = vld [vmem:[#allocation4_spill] sm:$0xff] }
 0xa26   :  { %15636 = vst [vmem:[#allocation220_spill] sm:$0xff] %v15635_v40  ;;  %v15638_v15 = vsel %vm12685_vm15, 4294967295, %v15637_v15  ;;  %vm906_vm12 = vcmp.eq.s32.totalorder %v635_v60, %v11497_v32  ;;  %v3960_v33 = vpack.c.bf16 %v3956_v18, %v3956_v18  ;;  %v3985_v12 = vor.u32 %v3984_v57, %v3981_v61  ;;  %vm12697_vm14 = vmpackc.low %vm904_vm0, %vm900_vm2  ;;  %7610 = vmatprep.subr.msk.bf16.mxu1 %vm12685_vm15, %v14957_v47 }
 0xa27   :  { %15639 = vst [vmem:[#allocation221_spill] sm:$0xff] %v15638_v15  ;;  %v15640_v0 = vmov 0  ;;  %v4261_v37 = vsub.f32 %v4258_v14, %v4260_v39  ;;  %vm12707_vm13 = vmpackc.low %vm906_vm12, %vm902_vm3  ;;  %v15643_v32 = vmov 0  ;;  %7484 = vmatpush1.bf16.msk.msra.mxu0 %vm12697_vm14, %v14957_v47  ;;  %vm15647_vm10 = vnez %v15646_v11  ;;  %v15661_v11 = vld [vmem:[#allocation11_spill] sm:$0xff] }
 0xa28   :  { %v15641_v0 = vsel %vm12697_vm14, 4294967295, %v15640_v0  ;;  %v15644_v32 = vsel %vm12707_vm13, 4294967295, %v15643_v32  ;;  %v4004_v60 = vrot.slane %v3960_v33, 5  ;;  %v4011_v18 = vsel %vm12010_vm7, %v12430_v34, %v3985_v12  ;;  %7612 = vmatpush1.bf16.msk.msra.mxu1 %vm12707_vm13, %v14957_v47  ;;  %7615 = vmatprep.subr.msk.bf16.mxu0 %vm15647_vm10, %v14957_v47  ;;  %v15650_v34 = vld [vmem:[#allocation5_spill] sm:$0xff] }
 0xa29   :  { %15642 = vst [vmem:[#allocation222_spill] sm:$0xff] %v15641_v0  ;;  %15645 = vst [vmem:[#allocation223_spill] sm:$0xff] %v15644_v32  ;;  %v4262_v14 = vpack.c.bf16 %v4261_v37, %v4261_v37  ;;  %v4264_v61 = vrot.slane %v4259_v1, 7  ;;  %v15648_v57 = vmov 0.0|0.0   ;;  %vm15649_vm12 = vcmask 1042432   ;;  %v15653_v37 = vld [vmem:[#allocation6_spill] sm:$0xff] }
 0xa2a   :  { %8720 = vmatprep.subr.bf16.mxu1 %v15648_v57  ;;  %v4024_v39 = vsel %vm15649_vm12, %v4011_v18, %v4004_v60  ;;  %vm15651_vm4 = vnez %v15650_v34  ;;  %v15652_v33 = vmov 0   ;;  %vm15654_vm2 = vnez %v15653_v37  ;;  %v15657_v60 = vld [vmem:[#allocation7_spill] sm:$0xff] }
 0xa2b   :  { %4106 = vmatmul.mubr.bf16.vlgmr.msra.gmra.mrb[8].mxu0 %v4024_v39  ;;  %4192 = vmatmul.mubr.bf16.vlgmr.msra.gmra.mrb[20].mxu1 %v4024_v39  ;;  %v4266_v12 = vrot.slane %v4262_v14, 6  ;;  %vm15655_vm0 = vcmask 1040384   ;;  %vm15656_vm3 = vmmov 0   ;;  %vm15658_vm10 = vnez %v15657_v60 }
 0xa2c   :  { %7617 = vmatpush1.bf16.msk.msra.mxu0 %vm15651_vm4, %v14957_v47  ;;  %4306 = vmatprep.mubr.bf16.mxu0 %v15652_v33  ;;  %v4269_v1 = vsel %vm15655_vm0, %v12503_v28, %v4264_v61  ;;  %vm15659_vm12 = vcmask 1041408   ;;  %vm15660_vm4 = vcmask 261120   ;;  %vm15666_vm13 = vcmask 1042432  }
 0xa2d   :  { %7619 = vmatprep.subr.msk.bf16.mxu0 %vm15654_vm2, %v14957_v47  ;;  %8454 = vmatprep.mubr.msk.f32.mxu1 %vm15656_vm3, %v15268_v27  ;;  %v4271_v18 = vsel %vm15659_vm12, %v4269_v1, %v4266_v12  ;;  %vm15662_vm2 = vmmov %vm15659_vm12 }
 0xa2e   :  { %vm15663_vm0 = vmmov %vm15662_vm2 }
 0xa2f   :  { %vm15664_vm12 = vmmov %vm15663_vm0 }
 0xa30   :  { %7621 = vmatpush1.bf16.msk.msra.mxu0 %vm15658_vm10, %v14957_v47  ;;  %vm4251_vm10 = vcmask 522244  }
 0xa31   :  { %vm12747_vm14 = vmor %vm4251_vm10, %vm15666_vm13  ;;  %vm15670_vm13 = vcmask 7168  }
 0xa33   :  { %7622 = vmatmul.mubr.msk.bf16.vlgmr.msra.gmra.mrb[12].mxu0 %vm15660_vm4, %v4271_v18  ;;  %vm15665_vm4 = vmmov %vm15663_vm0 }
 0xa34   :  { %8410 = vmatprep.mubr.f32.mxu0 %v15661_v11 }
 0xafe   :  { %v4107_v14 = vpop.f32.mrb[8].mxu0  ;;  %v4193_v39 = vpop.f32.mrb[20].mxu1 }
 0xaff   :  { %v4206_v34 = vrot.slane %v4107_v14, 3  ;;  %v4222_v37 = vrot.slane %v4107_v14, 6  ;;  %v4208_v32 = vrot.slane %v4193_v39, 3  ;;  %v4228_v0 = vrot.slane %v4193_v39, 6  ;;  %v4109_v28 = vpop.f32.mrb[9].mxu0  ;;  %v4195_v61 = vpop.f32.mrb[21].mxu1 }
 0xb00   :  { %v4207_v15 = vrot.slane %v4109_v28, 3  ;;  %v4225_v40 = vrot.slane %v4109_v28, 6  ;;  %v4209_v16 = vrot.slane %v4195_v61, 3  ;;  %v4231_v48 = vrot.slane %v4195_v61, 6  ;;  %v4111_v60 = vpop.f32.mrb[10].mxu0  ;;  %v4197_v54 = vpop.f32.mrb[22].mxu1 }
 0xb01   :  { %v4214_v2 = vadd.f32 %v4206_v34, %v4107_v14  ;;  %v4216_v12 = vadd.f32 %v4208_v32, %v4193_v39  ;;  %v4223_v1 = vrot.slane %v4111_v60, 6  ;;  %v4229_v18 = vrot.slane %v4197_v54, 6  ;;  %v4113_v8 = vpop.f32.mrb[11].mxu0  ;;  %v4199_v11 = vpop.f32.mrb[23].mxu1 }
 0xb02   :  { %v4215_v41 = vadd.f32 %v4207_v15, %v4109_v28  ;;  %v4217_v56 = vadd.f32 %v4209_v16, %v4195_v61  ;;  %v4226_v50 = vrot.slane %v4113_v8, 6  ;;  %v4232_v25 = vrot.slane %v4199_v11, 6 }
 0xb03   :  { %v4224_v24 = vsel %vm15662_vm2, %v4222_v37, %v4223_v1  ;;  %v4230_v62 = vsel %vm15663_vm0, %v4228_v0, %v4229_v18  ;;  %v15667_v54 = vmov 0  ;;  %vm15671_vm2 = vmmov %vm15663_vm0  ;;  %vm15672_vm0 = vcmask 15360  }
 0xb04   :  { %v4238_v31 = vadd.f32 %v4224_v24, %v4214_v2  ;;  %v4240_v55 = vadd.f32 %v4230_v62, %v4216_v12  ;;  %v4227_v4 = vsel %vm15664_vm12, %v4225_v40, %v4226_v50  ;;  %v4233_v14 = vsel %vm15665_vm4, %v4231_v48, %v4232_v25  ;;  %vm15673_vm10 = vmmov %vm15671_vm2 }
 0xb05   :  { %v4239_v32 = vadd.f32 %v4227_v4, %v4215_v41  ;;  %v4241_v39 = vadd.f32 %v4233_v14, %v4217_v56  ;;  %v15668_v54 = vsel %vm12747_vm14, 4294967295, %v15667_v54  ;;  %vm15674_vm12 = vcmask 1043456  }
 0xb06   :  { %15669 = vst [vmem:[#allocation4_spill] sm:$0xff] %v15668_v54  ;;  %v4308_v8 = vpop.f32.mrb[12].mxu0  ;;  %vm15675_vm4 = vmmov %vm15674_vm12 }
 0xb07   :  { %v4246_v16 = vcombine.low %v4238_v31, %v4239_v32  ;;  %v4247_v15 = vcombine.low %v4240_v55, %v4241_v39  ;;  %v4317_v34 = vrot.slane %v4308_v8, 2  ;;  %v4310_v37 = vpop.f32.mrb[13].mxu0  ;;  %v4323_v62 = vrot.slane %v4308_v8, 4 }
 0xb08   :  { %v4318_v0 = vrot.slane %v4310_v37, 2  ;;  %v4312_v28 = vpop.f32.mrb[14].mxu0  ;;  %v4324_v31 = vrot.slane %v4310_v37, 4 }
 0xb09   :  { %4250 = vst [vmem:[%s14143_s11] sm:$0x77] %v4246_v16  ;;  %4253 = vst.msk [vmem:[%s14143_s11 + $0x8] sm:$0x77] %vm12747_vm14, %v4247_v15  ;;  %v4321_v4 = vadd.f32 %v4317_v34, %v4308_v8  ;;  %v4313_v24 = vpop.f32.mrb[15].mxu0  ;;  %vm15676_vm14 = vcmask 1045504  }
 0xb0a   :  { %v4322_v25 = vadd.f32 %v4318_v0, %v4310_v37  ;;  %vm15677_vm15 = vmmov %vm15676_vm14  ;;  %v15679_v24 = vld [vmem:[#allocation22_spill] sm:$0xff] }
 0xb0b   :  { %v4327_v55 = vadd.f32 %v4323_v62, %v4321_v4 }
 0xb0c   :  { %v4328_v50 = vadd.f32 %v4324_v31, %v4322_v25  ;;  %v15680_v31 = vld [vmem:[#allocation8_spill] sm:$0xff] }
 0xb0d   :  { %v4331_v56 = vrot.slane %v4327_v55, 6  ;;  %v4340_v41 = vrot.slane %v4327_v55, 4  ;;  %v4349_v40 = vrot.slane %v4327_v55, 2 }
 0xb0e   :  { %v4332_v48 = vrot.slane %v4328_v50, 6  ;;  %v4341_v2 = vrot.slane %v4328_v50, 4 }
 0xb0f   :  { %4333 = vrot.lane.b32.xlu1 %v4331_v56, %s9033_s21  ;;  %v15681_v56 = vld [vmem:[#allocation19_spill] sm:$0xff] }
 0xb10   :  { %4335 = vrot.lane.b32.xlu0 %v4332_v48, %s9033_s21  ;;  %v15682_v48 = vld [vmem:[#allocation9_spill] sm:$0xff] }
 0xb13   :  { %4342 = vrot.lane.b32.xlu1 %v4340_v41, %s9032_s1  ;;  %v15683_v41 = vld [vmem:[#allocation20_spill] sm:$0xff] }
 0xb14   :  { %4344 = vrot.lane.b32.xlu0 %v4341_v2, %s9032_s1  ;;  %v15684_v2 = vld [vmem:[#allocation10_spill] sm:$0xff] }
 0xb17   :  { %4350 = vrot.lane.b32.xlu1 %v4349_v40, %s9034_s22  ;;  %v15685_v40 = vld [vmem:[#allocation21_spill] sm:$0xff] }
 0xb81   :  { %v4334_v61 = vpop.permute.xlu1 %4333 }
 0xb82   :  { %v4336_v60 = vpop.permute.xlu0 %4335  ;;  %v4353_v32 = vsel %vm15673_vm10, %v4327_v55, %v4334_v61 }
 0xb83   :  { %v4337_v12 = vsel %vm15670_vm13, %v4334_v61, %v4336_v60  ;;  %vm15678_vm13 = vcmask 1022976   ;;  %v15686_v61 = vld [vmem:[#allocation12_spill] sm:$0xff]  ;;  %v15688_v60 = vld [vmem:[#allocation13_spill] sm:$0xff] }
 0xb84   :  { %v4354_v11 = vsel %vm15671_vm2, %v4328_v50, %v4337_v12  ;;  %v15690_v12 = vld [vmem:[#allocation14_spill] sm:$0xff] }
 0xb85   :  { %v4343_v1 = vpop.permute.xlu1 %4342  ;;  %vm15691_vm2 = vnez %v15690_v12  ;;  %v15746_v12 = vld [vmem:[#allocation99_spill] sm:$0xff] }
 0xb86   :  { %v4345_v18 = vpop.permute.xlu0 %4344  ;;  %v4355_v8 = vsel %vm15675_vm4, %v4353_v32, %v4343_v1  ;;  %v15700_v32 = vld [vmem:[#allocation23_spill] sm:$0xff] }
 0xb87   :  { %v4346_v14 = vsel %vm15672_vm0, %v4343_v1, %v4345_v18  ;;  %v15692_v1 = vld [vmem:[#allocation15_spill] sm:$0xff]  ;;  %v15694_v18 = vld [vmem:[#allocation16_spill] sm:$0xff] }
 0xb88   :  { %v4356_v39 = vsel %vm15674_vm12, %v4354_v11, %v4346_v14  ;;  %vm15693_vm0 = vnez %v15692_v1  ;;  %vm15695_vm10 = vnez %v15694_v18  ;;  %v15696_v11 = vld [vmem:[#allocation17_spill] sm:$0xff]  ;;  %v15698_v14 = vld [vmem:[#allocation18_spill] sm:$0xff]  ;;  %v15748_v1 = vld [vmem:[#allocation100_spill] sm:$0xff] }
 0xb89   :  { %v4351_v16 = vpop.permute.xlu1 %4350  ;;  %vm15697_vm12 = vnez %v15696_v11  ;;  %vm15699_vm4 = vnez %v15698_v14  ;;  %v15750_v18 = vld [vmem:[#allocation38_spill] sm:$0xff] }
 0xb8a   :  { %v4357_v15 = vsel %vm15676_vm14, %v4355_v8, %v4351_v16  ;;  %v4358_v34 = vsel %vm15677_vm15, %v4356_v39, %v4351_v16  ;;  %vm15687_vm15 = vnez %v15686_v61  ;;  %vm15689_vm14 = vnez %v15688_v60  ;;  %v15702_v39 = vld [vmem:[#allocation24_spill] sm:$0xff]  ;;  %v15704_v8 = vld [vmem:[#allocation25_spill] sm:$0xff]  ;;  %v15706_v16 = vld [vmem:[#allocation27_spill] sm:$0xff] }
 0xb8b   :  { %4361 = vrot.lane.b32.xlu0 %v4357_v15, %s9035_s25  ;;  %4363 = vrot.lane.b32.xlu1 %v4358_v34, %s9035_s25  ;;  %v15708_v15 = vld [vmem:[#allocation28_spill] sm:$0xff]  ;;  %v15710_v34 = vld [vmem:[#allocation31_spill] sm:$0xff]  ;;  %v15742_v61 = vld [vmem:[#allocation93_spill] sm:$0xff] }
 0xb8c   :  { %v15744_v60 = vld [vmem:[#allocation97_spill] sm:$0xff] }
 0xbfd   :  { %v4364_v37 = vpop.permute.xlu1 %4363  ;;  %v4362_v0 = vpop.permute.xlu0 %4361 }
 0xbfe   :  { %v4365_v28 = vsel %vm15678_vm13, %v4362_v0, %v4364_v37  ;;  %vm15701_vm13 = vnez %v15700_v32  ;;  %v15712_v37 = vld [vmem:[#allocation32_spill] sm:$0xff]  ;;  %v15714_v0 = vld [vmem:[#allocation37_spill] sm:$0xff]  ;;  %v15752_v32 = vld [vmem:[#allocation102_spill] sm:$0xff] }
 0xbff   :  { %v4368_v4 = vand.u32 4294901760, %v4365_v28 }
 0xc01   :  { %v4455_v62 = vsub.f32 %v4365_v28, %v4368_v4  ;;  %8408 = vmatprep.subr.mxu0 %v4368_v4  ;;  %v15716_v28 = vld [vmem:[#allocation43_spill] sm:$0xff] }
 0xc02   :  { %8409 = vmatpush3.msra.mxu0 %v4368_v4 }
 0xc03   :  { %8411 = vmatmul.mubr.f32.vlgmr.msra.gmra.mrb[16].mxu0 %v15679_v24  ;;  %v4456_v25 = vand.u32 4294901760, %v4455_v62  ;;  %v15722_v24 = vld [vmem:[#allocation53_spill] sm:$0xff] }
 0xc04   :  { %8415 = vmatprep.mubr.f32.mxu0 %v15680_v31 }
 0xc05   :  { %v4457_v55 = vsub.f32 %v4455_v62, %v4456_v25 }
 0xc07   :  { %v4458_v50 = vand.u32 4294901760, %v4457_v55  ;;  %v15728_v55 = vld [vmem:[#allocation67_spill] sm:$0xff] }
 0xc09   :  { %8413 = vmatprep.subr.mxu0 %v4458_v50 }
 0xc0a   :  { %8414 = vmatpush3.msra.mxu0 %v4458_v50  ;;  %v15730_v50 = vld [vmem:[#allocation69_spill] sm:$0xff] }
 0xc0b   :  { %8416 = vmatmul.mubr.f32.vlgmr.msra.gmra.mrb[16].mxu0 %v15681_v56  ;;  %8418 = vmatprep.subr.mxu0 %v4455_v62 }
 0xc0c   :  { %8419 = vmatpush3.msra.mxu0 %v4455_v62  ;;  %8420 = vmatprep.mubr.f32.mxu0 %v15682_v48  ;;  %v15720_v62 = vld [vmem:[#allocation51_spill] sm:$0xff]  ;;  %v15734_v48 = vld [vmem:[#allocation77_spill] sm:$0xff] }
 0xc0d   :  { %8423 = vmatprep.subr.mxu0 %v4368_v4 }
 0xc13   :  { %8421 = vmatmul.mubr.f32.vlgmr.msra.gmra.mrb[16].mxu0 %v15683_v41  ;;  %v15736_v41 = vld [vmem:[#allocation83_spill] sm:$0xff] }
 0xc14   :  { %8424 = vmatpush3.msra.mxu0 %v4368_v4  ;;  %8425 = vmatprep.mubr.f32.mxu0 %v15684_v2  ;;  %v15738_v2 = vld [vmem:[#allocation85_spill] sm:$0xff] }
 0xc15   :  { %8428 = vmatprep.subr.mxu0 %v4456_v25 }
 0xc1b   :  { %8426 = vmatmul.mubr.f32.vlgmr.msra.gmra.mrb[16].mxu0 %v15685_v40  ;;  %v15740_v40 = vld [vmem:[#allocation91_spill] sm:$0xff] }
 0xc1c   :  { %8429 = vmatpush3.msra.mxu0 %v4456_v25  ;;  %8430 = vmatprep.mubr.f32.mxu0 %v15680_v31  ;;  %v15724_v25 = vld [vmem:[#allocation59_spill] sm:$0xff] }
 0xc1d   :  { %8433 = vmatprep.subr.mxu0 %v4368_v4 }
 0xc23   :  { %8431 = vmatmul.mubr.f32.vlgmr.msra.gmra.mrb[16].mxu0 %v15681_v56 }
 0xc24   :  { %8434 = vmatpush3.msra.mxu0 %v4368_v4  ;;  %8435 = vmatprep.mubr.f32.mxu0 %v15680_v31  ;;  %v15718_v4 = vld [vmem:[#allocation45_spill] sm:$0xff] }
 0xc25   :  { %7626 = vmatprep.subr.msk.bf16.mxu0 %vm15687_vm15, %v14957_v47  ;;  %vm15703_vm15 = vnez %v15702_v39  ;;  %v15726_v31 = vld [vmem:[#allocation61_spill] sm:$0xff] }
 0xc2b   :  { %8436 = vmatmul.mubr.f32.vlgmr.msra.gmra.mrb[16].mxu0 %v15681_v56  ;;  %v15732_v56 = vld [vmem:[#allocation75_spill] sm:$0xff] }
 0xc2c   :  { %7628 = vmatpush1.bf16.msk.msra.mxu0 %vm15689_vm14, %v14957_v47  ;;  %vm15705_vm14 = vnez %v15704_v8 }
 0xc2d   :  { %7630 = vmatprep.subr.msk.bf16.mxu0 %vm15691_vm2, %v14957_v47  ;;  %vm15707_vm2 = vnez %v15706_v16  ;;  %v15753_v16 = vld [vmem:[#allocation101_spill] sm:$0xff] }
 0xc30   :  { %7632 = vmatpush1.bf16.msk.msra.mxu0 %vm15693_vm0, %v14957_v47  ;;  %vm15709_vm0 = vnez %v15708_v15 }
 0xc31   :  { %7634 = vmatprep.subr.msk.bf16.mxu0 %vm15695_vm10, %v14957_v47  ;;  %vm15711_vm10 = vnez %v15710_v34 }
 0xc34   :  { %7636 = vmatpush1.bf16.msk.msra.mxu0 %vm15697_vm12, %v14957_v47  ;;  %vm15713_vm12 = vnez %v15712_v37 }
 0xc35   :  { %7638 = vmatprep.subr.msk.bf16.mxu0 %vm15699_vm4, %v14957_v47  ;;  %vm15715_vm4 = vnez %v15714_v0 }
 0xc38   :  { %7640 = vmatpush1.bf16.msk.msra.mxu0 %vm15701_vm13, %v14957_v47  ;;  %vm15717_vm13 = vnez %v15716_v28 }
 0xc39   :  { %7642 = vmatprep.subr.msk.bf16.mxu0 %vm15703_vm15, %v14957_v47  ;;  %vm15719_vm15 = vnez %v15718_v4 }
 0xc3c   :  { %7644 = vmatpush1.bf16.msk.msra.mxu0 %vm15705_vm14, %v14957_v47  ;;  %vm15721_vm14 = vnez %v15720_v62 }
 0xc3d   :  { %7646 = vmatprep.subr.msk.bf16.mxu0 %vm15707_vm2, %v14957_v47  ;;  %vm15723_vm2 = vnez %v15722_v24 }
 0xc40   :  { %7648 = vmatpush1.bf16.msk.msra.mxu0 %vm15709_vm0, %v14957_v47  ;;  %vm15725_vm0 = vnez %v15724_v25 }
 0xc41   :  { %7650 = vmatprep.subr.msk.bf16.mxu0 %vm15711_vm10, %v14957_v47  ;;  %vm15727_vm10 = vnez %v15726_v31 }
 0xc44   :  { %7652 = vmatpush1.bf16.msk.msra.mxu0 %vm15713_vm12, %v14957_v47  ;;  %vm15729_vm12 = vnez %v15728_v55 }
 0xc45   :  { %7654 = vmatprep.subr.msk.bf16.mxu0 %vm15715_vm4, %v14957_v47  ;;  %vm15731_vm4 = vnez %v15730_v50 }
 0xc48   :  { %7656 = vmatpush1.bf16.msk.msra.mxu0 %vm15717_vm13, %v14957_v47  ;;  %vm15733_vm13 = vnez %v15732_v56 }
 0xc49   :  { %7658 = vmatprep.subr.msk.bf16.mxu0 %vm15719_vm15, %v14957_v47  ;;  %vm15735_vm15 = vnez %v15734_v48 }
 0xc4c   :  { %7660 = vmatpush1.bf16.msk.msra.mxu0 %vm15721_vm14, %v14957_v47  ;;  %vm15737_vm14 = vnez %v15736_v41 }
 0xc4d   :  { %7662 = vmatprep.subr.msk.bf16.mxu0 %vm15723_vm2, %v14957_v47  ;;  %vm15739_vm2 = vnez %v15738_v2 }
 0xc50   :  { %7664 = vmatpush1.bf16.msk.msra.mxu0 %vm15725_vm0, %v14957_v47  ;;  %vm15741_vm0 = vnez %v15740_v40 }
 0xc51   :  { %7666 = vmatprep.subr.msk.bf16.mxu0 %vm15727_vm10, %v14957_v47  ;;  %vm15743_vm10 = vnez %v15742_v61 }
 0xc54   :  { %7668 = vmatpush1.bf16.msk.msra.mxu0 %vm15729_vm12, %v14957_v47  ;;  %vm15745_vm12 = vnez %v15744_v60 }
 0xc55   :  { %7670 = vmatprep.subr.msk.bf16.mxu0 %vm15731_vm4, %v14957_v47  ;;  %vm15747_vm4 = vnez %v15746_v12 }
 0xc58   :  { %7672 = vmatpush1.bf16.msk.msra.mxu0 %vm15733_vm13, %v14957_v47  ;;  %vm15749_vm13 = vnez %v15748_v1 }
 0xc59   :  { %7674 = vmatprep.subr.msk.bf16.mxu0 %vm15735_vm15, %v14957_v47  ;;  %vm15751_vm15 = vnez %v15750_v18 }
 0xc5c   :  { %7676 = vmatpush1.bf16.msk.msra.mxu0 %vm15737_vm14, %v14957_v47  ;;  %vm15754_vm14 = vcmask 1041408  }
 0xc5d   :  { %7678 = vmatprep.subr.msk.bf16.mxu0 %vm15739_vm2, %v14957_v47  ;;  %vm15755_vm2 = vcmask 1043456  }
 0xc60   :  { %7680 = vmatpush1.bf16.msk.msra.mxu0 %vm15741_vm0, %v14957_v47  ;;  %vm15756_vm0 = vmmov %vm15754_vm14 }
 0xc61   :  { %7682 = vmatprep.subr.msk.bf16.mxu0 %vm15743_vm10, %v14957_v47  ;;  %vm15757_vm10 = vmmov %vm15755_vm2 }
 0xc64   :  { %7684 = vmatpush1.bf16.msk.msra.mxu0 %vm15745_vm12, %v14957_v47 }
 0xc65   :  { %7686 = vmatprep.subr.msk.bf16.mxu0 %vm15747_vm4, %v14957_v47 }
 0xc68   :  { %7688 = vmatpush1.bf16.msk.msra.mxu0 %vm15749_vm13, %v14957_v47 }
 0xc69   :  { %7690 = vmatprep.subr.msk.bf16.mxu0 %vm15751_vm15, %v14957_v47 }
 0xcfe   :  { %v8437_v11 = vpop.f32.mrb[16].mxu0 }
 0xcff   :  { %v4846_v14 = vpop.f32.mrb[17].mxu0  ;;  %v8897_v15 = vadd.f32 %v8437_v11, %v15753_v16 }
 0xd00   :  { %v8898_v39 = vadd.f32 %v4846_v14, %v15752_v32 }
 0xd01   :  { %v7624_v34 = vmul.f32 -1.442695, %v8897_v15 }
 0xd02   :  { %v7623_v8 = vmul.f32 -1.442695, %v8898_v39 }
 0xd04   :  { %9018 = vpow2.f32 %v7623_v8 }
 0xd05   :  { %9020 = vpow2.f32 %v7624_v34 }
 0xd0e   :  { %v9019_v37 = vpop.eup %9018 }
 0xd0f   :  { %v4862_v0 = vadd.f32 1.0, %v9019_v37  ;;  %v9021_v28 = vpop.eup %9020 }
 0xd10   :  { %v4863_v62 = vadd.f32 1.0, %v9021_v28 }
 0xd11   :  { %9022 = vrcp.f32 %v4862_v0 }
 0xd12   :  { %9024 = vrcp.f32 %v4863_v62 }
 0xd1b   :  { %v9023_v4 = vpop.eup %9022 }
 0xd1c   :  { %v4868_v24 = vmul.f32 %v9023_v4, %v8898_v39  ;;  %v9025_v1 = vpop.eup %9024 }
 0xd1d   :  { %v4869_v39 = vmul.f32 %v9025_v1, %v8897_v15  ;;  %v15760_v15 = vld [vmem:[#allocation46_spill] sm:$0xff]  ;;  %v15778_v1 = vld [vmem:[#allocation84_spill] sm:$0xff] }
 0xd1e   :  { %v4871_v25 = vrot.slane %v4868_v24, 4  ;;  %v4873_v31 = vpack.c.bf16 %v4868_v24, %v4868_v24  ;;  %vm15761_vm4 = vnez %v15760_v15  ;;  %v15800_v15 = vld [vmem:[#allocation108_spill] sm:$0xff] }
 0xd1f   :  { %v4875_v4 = vpack.c.bf16 %v4869_v39, %v4869_v39 }
 0xd20   :  { %v4876_v55 = vunpack.c.l.bf16 %v4873_v31  ;;  %v4874_v50 = vpack.c.bf16 %v4871_v25, %v4871_v25 }
 0xd22   :  { %v4879_v56 = vsub.f32 %v4868_v24, %v4876_v55  ;;  %v4877_v48 = vunpack.c.l.bf16 %v4874_v50  ;;  %v15758_v24 = vld [vmem:[#allocation44_spill] sm:$0xff] }
 0xd23   :  { %vm15759_vm12 = vnez %v15758_v24  ;;  %v15762_v55 = vld [vmem:[#allocation52_spill] sm:$0xff]  ;;  %v15796_v24 = vld [vmem:[#allocation106_spill] sm:$0xff] }
 0xd24   :  { %v4882_v41 = vpack.c.bf16 %v4879_v56, %v4879_v56  ;;  %v4880_v2 = vsub.f32 %v4871_v25, %v4877_v48  ;;  %v4878_v25 = vunpack.c.l.bf16 %v4875_v4  ;;  %vm15763_vm13 = vnez %v15762_v55  ;;  %v15804_v55 = vld [vmem:[#allocation114_spill] sm:$0xff] }
 0xd26   :  { %v4883_v40 = vpack.c.bf16 %v4880_v2, %v4880_v2  ;;  %v4885_v61 = vunpack.c.l.bf16 %v4882_v41  ;;  %v4897_v8 = vrot.slane %v4882_v41, 6  ;;  %v15770_v41 = vld [vmem:[#allocation68_spill] sm:$0xff] }
 0xd28   :  { %v4886_v60 = vunpack.c.l.bf16 %v4883_v40  ;;  %v4888_v12 = vsub.f32 %v4879_v56, %v4885_v61  ;;  %v4898_v14 = vrot.slane %v4883_v40, 6  ;;  %v4908_v28 = vsel %vm15756_vm0, %v4873_v31, %v4897_v8  ;;  %v15764_v31 = vld [vmem:[#allocation54_spill] sm:$0xff]  ;;  %v15766_v56 = vld [vmem:[#allocation60_spill] sm:$0xff] }
 0xd29   :  { %vm15765_vm15 = vnez %v15764_v31  ;;  %vm15771_vm0 = vnez %v15770_v41  ;;  %v15774_v61 = vld [vmem:[#allocation76_spill] sm:$0xff]  ;;  %v15784_v8 = vld [vmem:[#allocation94_spill] sm:$0xff]  ;;  %v15806_v31 = vld [vmem:[#allocation115_spill] sm:$0xff] }
 0xd2a   :  { %v4889_v18 = vsub.f32 %v4880_v2, %v4886_v60  ;;  %v4891_v11 = vpack.c.bf16 %v4888_v12, %v4888_v12  ;;  %v4911_v37 = vsel %vm15754_vm14, %v4874_v50, %v4898_v14  ;;  %v4881_v50 = vsub.f32 %v4869_v39, %v4878_v25  ;;  %v15772_v2 = vld [vmem:[#allocation70_spill] sm:$0xff]  ;;  %v15782_v14 = vld [vmem:[#allocation92_spill] sm:$0xff]  ;;  %v15802_v25 = vld [vmem:[#allocation109_spill] sm:$0xff] }
 0xd2b   :  { %vm15767_vm14 = vnez %v15766_v56  ;;  %v15776_v60 = vld [vmem:[#allocation78_spill] sm:$0xff]  ;;  %v15810_v56 = vld [vmem:[#allocation117_spill] sm:$0xff]  ;;  %v15816_v41 = vld [vmem:[#allocation120_spill] sm:$0xff] }
 0xd2c   :  { %v4892_v32 = vpack.c.bf16 %v4889_v18, %v4889_v18  ;;  %v4903_v16 = vrot.slane %v4891_v11, 4  ;;  %v4884_v48 = vpack.c.bf16 %v4881_v50, %v4881_v50  ;;  %v15780_v18 = vld [vmem:[#allocation86_spill] sm:$0xff] }
 0xd2e   :  { %v4904_v34 = vrot.slane %v4892_v32, 4  ;;  %v4916_v62 = vsel %vm15757_vm10, %v4908_v28, %v4903_v16  ;;  %vm15773_vm10 = vnez %v15772_v2  ;;  %v4887_v40 = vunpack.c.l.bf16 %v4884_v48  ;;  %v15786_v16 = vld [vmem:[#allocation98_spill] sm:$0xff]  ;;  %v15792_v28 = vld [vmem:[#allocation104_spill] sm:$0xff]  ;;  %v15818_v2 = vld [vmem:[#allocation121_spill] sm:$0xff] }
 0xd2f   :  { %v4899_v32 = vrot.slane %v4884_v48, 6  ;;  %v15814_v48 = vld [vmem:[#allocation119_spill] sm:$0xff] }
 0xd30   :  { %v4919_v0 = vsel %vm15755_vm2, %v4911_v37, %v4904_v34  ;;  %v4890_v12 = vsub.f32 %v4881_v50, %v4887_v40  ;;  %v15789_v37 = vld [vmem:[#allocation103_spill] sm:$0xff]  ;;  %v15808_v50 = vld [vmem:[#allocation116_spill] sm:$0xff]  ;;  %v15820_v40 = vld [vmem:[#allocation122_spill] sm:$0xff] }
 0xd31   :  { %4956 = vmatprep.mubr.bf16.mxu0 %v4919_v0 }
 0xd32   :  { %4957 = vmatmul.mubr.bf16.vlgmr.msra.gmra.mrb[20].mxu0 %v4916_v62  ;;  %v4893_v11 = vpack.c.bf16 %v4890_v12, %v4890_v12  ;;  %v15794_v62 = vld [vmem:[#allocation105_spill] sm:$0xff]  ;;  %v15826_v12 = vld [vmem:[#allocation127_spill] sm:$0xff] }
 0xd33   :  { %7692 = vmatpush1.bf16.msk.msra.mxu0 %vm15759_vm12, %v14957_v47  ;;  %4999 = vmatprep.mubr.bf16.mxu0 %v15652_v33  ;;  %v15768_v33 = vld [vmem:[#allocation62_spill] sm:$0xff]  ;;  %vm15775_vm12 = vnez %v15774_v61  ;;  %v15822_v61 = vld [vmem:[#allocation123_spill] sm:$0xff] }
 0xd34   :  { %7694 = vmatprep.subr.msk.bf16.mxu0 %vm15761_vm4, %v14957_v47  ;;  %vm15769_vm2 = vnez %v15768_v33  ;;  %vm15777_vm4 = vnez %v15776_v60  ;;  %v4905_v39 = vrot.slane %v4893_v11, 4  ;;  %v15812_v33 = vld [vmem:[#allocation118_spill] sm:$0xff]  ;;  %v15824_v60 = vld [vmem:[#allocation125_spill] sm:$0xff] }
 0xd35   :  { %v15832_v11 = vld [vmem:[#allocation133_spill] sm:$0xff] }
 0xd37   :  { %7696 = vmatpush1.bf16.msk.msra.mxu0 %vm15763_vm13, %v14957_v47  ;;  %vm15779_vm13 = vnez %v15778_v1  ;;  %v15828_v1 = vld [vmem:[#allocation129_spill] sm:$0xff] }
 0xd38   :  { %7698 = vmatprep.subr.msk.bf16.mxu0 %vm15765_vm15, %v14957_v47  ;;  %vm15781_vm15 = vnez %v15780_v18  ;;  %v15830_v18 = vld [vmem:[#allocation131_spill] sm:$0xff] }
 0xd3b   :  { %7700 = vmatpush1.bf16.msk.msra.mxu0 %vm15767_vm14, %v14957_v47  ;;  %vm15783_vm14 = vnez %v15782_v14  ;;  %v15834_v14 = vld [vmem:[#allocation135_spill] sm:$0xff] }
 0xd3c   :  { %7702 = vmatprep.subr.msk.bf16.mxu0 %vm15769_vm2, %v14957_v47  ;;  %vm15785_vm2 = vnez %v15784_v8  ;;  %v15838_v8 = vld [vmem:[#allocation139_spill] sm:$0xff] }
 0xd3f   :  { %7704 = vmatpush1.bf16.msk.msra.mxu0 %vm15771_vm0, %v14957_v47  ;;  %vm15787_vm0 = vnez %v15786_v16  ;;  %v15842_v16 = vld [vmem:[#allocation143_spill] sm:$0xff] }
 0xd40   :  { %7706 = vmatprep.subr.msk.bf16.mxu0 %vm15773_vm10, %v14957_v47  ;;  %vm15788_vm10 = vcmask 1041408  }
 0xd41   :  { %v4914_v34 = vsel %vm15788_vm10, %v4875_v4, %v4899_v32  ;;  %v15798_v4 = vld [vmem:[#allocation107_spill] sm:$0xff]  ;;  %vm15803_vm10 = vnez %v15802_v25  ;;  %v15836_v32 = vld [vmem:[#allocation137_spill] sm:$0xff] }
 0xd43   :  { %7708 = vmatpush1.bf16.msk.msra.mxu0 %vm15775_vm12, %v14957_v47  ;;  %vm15790_vm12 = vnez %v15789_v37  ;;  %v15846_v37 = vld [vmem:[#allocation147_spill] sm:$0xff] }
 0xd44   :  { %7710 = vmatprep.subr.msk.bf16.mxu0 %vm15777_vm4, %v14957_v47  ;;  %vm15791_vm4 = vcmask 1043456  }
 0xd45   :  { %v4922_v0 = vsel %vm15791_vm4, %v4914_v34, %v4905_v39  ;;  %vm15807_vm4 = vnez %v15806_v31  ;;  %v15840_v39 = vld [vmem:[#allocation141_spill] sm:$0xff] }
 0xd46   :  { %v15844_v34 = vld [vmem:[#allocation145_spill] sm:$0xff] }
 0xd47   :  { %7712 = vmatpush1.bf16.msk.msra.mxu0 %vm15779_vm13, %v14957_v47  ;;  %vm15793_vm13 = vnez %v15792_v28  ;;  %v15850_v28 = vld [vmem:[#allocation151_spill] sm:$0xff] }
 0xd48   :  { %7714 = vmatprep.subr.msk.bf16.mxu0 %vm15781_vm15, %v14957_v47  ;;  %vm15795_vm15 = vnez %v15794_v62  ;;  %v15852_v62 = vld [vmem:[#allocation153_spill] sm:$0xff] }
 0xd4b   :  { %7716 = vmatpush1.bf16.msk.msra.mxu0 %vm15783_vm14, %v14957_v47  ;;  %vm15797_vm14 = vnez %v15796_v24 }
 0xd4c   :  { %7718 = vmatprep.subr.msk.bf16.mxu0 %vm15785_vm2, %v14957_v47  ;;  %vm15799_vm2 = vnez %v15798_v4 }
 0xd4f   :  { %7720 = vmatpush1.bf16.msk.msra.mxu0 %vm15787_vm0, %v14957_v47  ;;  %vm15801_vm0 = vnez %v15800_v15 }
 0xd50   :  { %7723 = vmatprep.subr.msk.bf16.mxu0 %vm15790_vm12, %v14957_v47  ;;  %vm15805_vm12 = vnez %v15804_v55 }
 0xd52   :  { %5000 = vmatmul.mubr.bf16.vlgmr.msra.gmra.mrb[20].mxu0 %v4922_v0  ;;  %v15848_v0 = vld [vmem:[#allocation149_spill] sm:$0xff] }
 0xd53   :  { %7725 = vmatpush1.bf16.msk.msra.mxu0 %vm15793_vm13, %v14957_v47  ;;  %vm15809_vm13 = vnez %v15808_v50 }
 0xd54   :  { %7727 = vmatprep.subr.msk.bf16.mxu0 %vm15795_vm15, %v14957_v47  ;;  %vm15811_vm15 = vnez %v15810_v56 }
 0xd57   :  { %7729 = vmatpush1.bf16.msk.msra.mxu0 %vm15797_vm14, %v14957_v47  ;;  %vm15813_vm14 = vnez %v15812_v33 }
 0xd58   :  { %7731 = vmatprep.subr.msk.bf16.mxu0 %vm15799_vm2, %v14957_v47  ;;  %vm15815_vm2 = vnez %v15814_v48 }
 0xd5b   :  { %7733 = vmatpush1.bf16.msk.msra.mxu0 %vm15801_vm0, %v14957_v47  ;;  %vm15817_vm0 = vnez %v15816_v41 }
 0xd5c   :  { %7735 = vmatprep.subr.msk.bf16.mxu0 %vm15803_vm10, %v14957_v47  ;;  %vm15819_vm10 = vnez %v15818_v2 }
 0xd5f   :  { %7737 = vmatpush1.bf16.msk.msra.mxu0 %vm15805_vm12, %v14957_v47  ;;  %vm15821_vm12 = vnez %v15820_v40 }
 0xd60   :  { %7739 = vmatprep.subr.msk.bf16.mxu0 %vm15807_vm4, %v14957_v47  ;;  %vm15823_vm4 = vnez %v15822_v61 }
 0xd63   :  { %7741 = vmatpush1.bf16.msk.msra.mxu0 %vm15809_vm13, %v14957_v47  ;;  %vm15825_vm13 = vnez %v15824_v60 }
 0xd64   :  { %7743 = vmatprep.subr.msk.bf16.mxu0 %vm15811_vm15, %v14957_v47  ;;  %vm15827_vm15 = vnez %v15826_v12 }
 0xd67   :  { %7745 = vmatpush1.bf16.msk.msra.mxu0 %vm15813_vm14, %v14957_v47  ;;  %vm15829_vm14 = vnez %v15828_v1 }
 0xd68   :  { %7747 = vmatprep.subr.msk.bf16.mxu0 %vm15815_vm2, %v14957_v47  ;;  %vm15831_vm2 = vnez %v15830_v18 }
 0xd6b   :  { %7749 = vmatpush1.bf16.msk.msra.mxu0 %vm15817_vm0, %v14957_v47  ;;  %vm15833_vm0 = vnez %v15832_v11 }
 0xd6c   :  { %7751 = vmatprep.subr.msk.bf16.mxu0 %vm15819_vm10, %v14957_v47  ;;  %vm15835_vm10 = vnez %v15834_v14 }
 0xd6f   :  { %7753 = vmatpush1.bf16.msk.msra.mxu0 %vm15821_vm12, %v14957_v47  ;;  %vm15837_vm12 = vnez %v15836_v32 }
 0xd70   :  { %7755 = vmatprep.subr.msk.bf16.mxu0 %vm15823_vm4, %v14957_v47  ;;  %vm15839_vm4 = vnez %v15838_v8 }
 0xd73   :  { %7757 = vmatpush1.bf16.msk.msra.mxu0 %vm15825_vm13, %v14957_v47  ;;  %vm15841_vm13 = vnez %v15840_v39 }
 0xd74   :  { %7759 = vmatprep.subr.msk.bf16.mxu0 %vm15827_vm15, %v14957_v47  ;;  %vm15843_vm15 = vnez %v15842_v16 }
 0xd77   :  { %7761 = vmatpush1.bf16.msk.msra.mxu0 %vm15829_vm14, %v14957_v47  ;;  %vm15845_vm14 = vnez %v15844_v34 }
 0xd78   :  { %7763 = vmatprep.subr.msk.bf16.mxu0 %vm15831_vm2, %v14957_v47  ;;  %vm15847_vm2 = vnez %v15846_v37 }
 0xd7b   :  { %7765 = vmatpush1.bf16.msk.msra.mxu0 %vm15833_vm0, %v14957_v47  ;;  %vm15849_vm0 = vnez %v15848_v0 }
 0xd7c   :  { %7767 = vmatprep.subr.msk.bf16.mxu0 %vm15835_vm10, %v14957_v47  ;;  %vm15851_vm10 = vnez %v15850_v28 }
 0xd7f   :  { %7769 = vmatpush1.bf16.msk.msra.mxu0 %vm15837_vm12, %v14957_v47  ;;  %vm15853_vm12 = vnez %v15852_v62 }
 0xd80   :  { %7771 = vmatprep.subr.msk.bf16.mxu0 %vm15839_vm4, %v14957_v47  ;;  %vm15854_vm4 = vcmask 7168  }
 0xd83   :  { %7773 = vmatpush1.bf16.msk.msra.mxu0 %vm15841_vm13, %v14957_v47  ;;  %vm15855_vm13 = vcmask 1043456  }
 0xd84   :  { %7775 = vmatprep.subr.msk.bf16.mxu0 %vm15843_vm15, %v14957_v47  ;;  %vm15856_vm15 = vmmov %vm15855_vm13 }
 0xd87   :  { %7777 = vmatpush1.bf16.msk.msra.mxu0 %vm15845_vm14, %v14957_v47  ;;  %vm15857_vm14 = vcmask 15360  }
 0xd88   :  { %7779 = vmatprep.subr.msk.bf16.mxu0 %vm15847_vm2, %v14957_v47  ;;  %vm15858_vm2 = vcmask 23552  }
 0xd8b   :  { %7781 = vmatpush1.bf16.msk.msra.mxu0 %vm15849_vm0, %v14957_v47  ;;  %vm15859_vm0 = vmmov %vm15855_vm13 }
 0xd8c   :  { %7783 = vmatprep.subr.msk.bf16.mxu0 %vm15851_vm10, %v14957_v47  ;;  %vm15860_vm10 = vmmov %vm15859_vm0 }
 0xd8f   :  { %7785 = vmatpush1.bf16.msk.msra.mxu0 %vm15853_vm12, %v14957_v47  ;;  %vm15861_vm12 = vcmask 31744  }
 0xe25   :  { %v5001_v24 = vpop.f32.mrb[20].mxu0 }
 0xe26   :  { %v5012_v4 = vrot.slane %v5001_v24, 4  ;;  %v5003_v15 = vpop.f32.mrb[21].mxu0 }
 0xe27   :  { %v5013_v25 = vrot.slane %v5003_v15, 4  ;;  %v5005_v55 = vpop.f32.mrb[22].mxu0 }
 0xe28   :  { %v5016_v31 = vadd.f32 %v5012_v4, %v5001_v24  ;;  %v5007_v50 = vpop.f32.mrb[23].mxu0 }
 0xe29   :  { %v5017_v56 = vadd.f32 %v5013_v25, %v5003_v15 }
 0xe2a   :  { %v5018_v33 = vadd.f32 %v5016_v31, %v5005_v55 }
 0xe2b   :  { %v5019_v48 = vadd.f32 %v5017_v56, %v5007_v50 }
 0xe2c   :  { %5031 = vrot.lane.b32.xlu0 %v5018_v33, %s9032_s1  ;;  %v5022_v2 = vrot.slane %v5018_v33, 4 }
 0xe2d   :  { %5033 = vrot.lane.b32.xlu1 %v5019_v48, %s9032_s1  ;;  %v5023_v41 = vrot.slane %v5019_v48, 4 }
 0xe30   :  { %5045 = vrot.lane.b32.xlu0 %v5018_v33, %s9036_s2 }
 0xe31   :  { %5047 = vrot.lane.b32.xlu1 %v5019_v48, %s9036_s2 }
 0xe34   :  { %5059 = vrot.lane.b32.xlu0 %v5018_v33, %s9037_s13 }
 0xe35   :  { %5061 = vrot.lane.b32.xlu1 %v5019_v48, %s9037_s13 }
 0xe38   :  { %5073 = vrot.lane.b32.xlu0 %v5018_v33, %s9038_s14 }
 0xe39   :  { %5075 = vrot.lane.b32.xlu1 %v5019_v48, %s9038_s14 }
 0xe3c   :  { %5087 = vrot.lane.b32.xlu0 %v5018_v33, %s9039_s15 }
 0xe3d   :  { %5089 = vrot.lane.b32.xlu1 %v5019_v48, %s9039_s15 }
 0xe40   :  { %5101 = vrot.lane.b32.xlu0 %v5018_v33, %s9040_s16 }
 0xe41   :  { %5103 = vrot.lane.b32.xlu1 %v5019_v48, %s9040_s16 }
 0xe44   :  { %5115 = vrot.lane.b32.xlu0 %v5018_v33, %s9041_s17 }
 0xe45   :  { %5026 = vrot.lane.b32.xlu1 %v5023_v41, %s9033_s21 }
 0xe48   :  { %5024 = vrot.lane.b32.xlu0 %v5022_v2, %s9033_s21 }
 0xe49   :  { %5040 = vrot.lane.b32.xlu1 %v5023_v41, %s9034_s22 }
 0xe4c   :  { %5038 = vrot.lane.b32.xlu0 %v5022_v2, %s9034_s22 }
 0xe4d   :  { %5054 = vrot.lane.b32.xlu1 %v5023_v41, %s9042_s18 }
 0xe50   :  { %5052 = vrot.lane.b32.xlu0 %v5022_v2, %s9042_s18 }
 0xe51   :  { %5068 = vrot.lane.b32.xlu1 %v5023_v41, %s9043_s19 }
 0xe54   :  { %5066 = vrot.lane.b32.xlu0 %v5022_v2, %s9043_s19 }
 0xe55   :  { %5082 = vrot.lane.b32.xlu1 %v5023_v41, %s9044_s20 }
 0xe58   :  { %5080 = vrot.lane.b32.xlu0 %v5022_v2, %s9044_s20 }
 0xe59   :  { %5096 = vrot.lane.b32.xlu1 %v5023_v41, %s9045_s23 }
 0xe5c   :  { %5094 = vrot.lane.b32.xlu0 %v5022_v2, %s9045_s23 }
 0xe5d   :  { %5110 = vrot.lane.b32.xlu1 %v5023_v41, %s9046_s24 }
 0xe60   :  { %5108 = vrot.lane.b32.xlu0 %v5022_v2, %s9046_s24 }
 0xe61   :  { %5117 = vrot.lane.b32.xlu1 %v5019_v48, %s9041_s17 }
 0xe64   :  { %5122 = vrot.lane.b32.xlu0 %v5022_v2, %s9047_s26 }
 0xe9e   :  { %v5032_v40 = vpop.permute.xlu0 %5031 }
 0xe9f   :  { %v5034_v61 = vpop.permute.xlu1 %5033 }
 0xea0   :  { %v5035_v25 = vsel %vm15857_vm14, %v5032_v40, %v5034_v61  ;;  %vm15865_vm14 = vcmask 48128  }
 0xea2   :  { %v5046_v60 = vpop.permute.xlu0 %5045 }
 0xea3   :  { %v5048_v12 = vpop.permute.xlu1 %5047 }
 0xea4   :  { %v5049_v41 = vsel %vm15861_vm12, %v5046_v60, %v5048_v12  ;;  %vm15868_vm12 = vcmask 64512  }
 0xea6   :  { %v5060_v1 = vpop.permute.xlu0 %5059 }
 0xea7   :  { %v5062_v18 = vpop.permute.xlu1 %5061 }
 0xeaa   :  { %v5074_v11 = vpop.permute.xlu0 %5073 }
 0xeab   :  { %v5076_v14 = vpop.permute.xlu1 %5075 }
 0xeae   :  { %v5088_v32 = vpop.permute.xlu0 %5087 }
 0xeaf   :  { %v5090_v8 = vpop.permute.xlu1 %5089 }
 0xeb2   :  { %v5102_v39 = vpop.permute.xlu0 %5101 }
 0xeb3   :  { %v5104_v16 = vpop.permute.xlu1 %5103 }
 0xeb6   :  { %v5116_v34 = vpop.permute.xlu0 %5115 }
 0xeb7   :  { %v5027_v37 = vpop.permute.xlu1 %5026 }
 0xeba   :  { %v5025_v0 = vpop.permute.xlu0 %5024 }
 0xebb   :  { %v5028_v28 = vsel %vm15854_vm4, %v5025_v0, %v5027_v37  ;;  %v5041_v62 = vpop.permute.xlu1 %5040  ;;  %v5125_v24 = vsel %vm15855_vm13, %v5018_v33, %v5025_v0  ;;  %vm15862_vm4 = vcmask 39936   ;;  %vm15863_vm13 = vmmov %vm15859_vm0  ;;  %v5063_v0 = vsel %vm15865_vm14, %v5060_v1, %v5062_v18 }
 0xebc   :  { %5157 = vrot.lane.b32.xlu1 %v5125_v24, %s9048_s27  ;;  %v5126_v4 = vsel %vm15856_vm15, %v5019_v48, %v5028_v28  ;;  %vm15864_vm15 = vmmov %vm15859_vm0  ;;  %vm15872_vm14 = vcmask 80896  }
 0xebd   :  { %5159 = vrot.lane.b32.xlu0 %v5126_v4, %s9048_s27  ;;  %v5077_v4 = vsel %vm15868_vm12, %v5074_v11, %v5076_v14  ;;  %vm15875_vm12 = vcmask 97280  }
 0xebe   :  { %v5039_v15 = vpop.permute.xlu0 %5038 }
 0xebf   :  { %v5042_v55 = vsel %vm15858_vm2, %v5039_v15, %v5041_v62  ;;  %v5127_v31 = vsel %vm15859_vm0, %v5032_v40, %v5039_v15  ;;  %v5055_v50 = vpop.permute.xlu1 %5054  ;;  %vm15866_vm2 = vcmask 56320  }
 0xec0   :  { %5161 = vrot.lane.b32.xlu1 %v5127_v31, %s9048_s27  ;;  %v5128_v56 = vsel %vm15860_vm10, %v5035_v25, %v5042_v55  ;;  %vm15867_vm10 = vmmov %vm15859_vm0  ;;  %v5091_v31 = vsel %vm15872_vm14, %v5088_v32, %v5090_v8  ;;  %vm15879_vm14 = vcmask 113664  }
 0xec1   :  { %5163 = vrot.lane.b32.xlu0 %v5128_v56, %s9048_s27 }
 0xec2   :  { %v5053_v33 = vpop.permute.xlu0 %5052 }
 0xec3   :  { %v5056_v48 = vsel %vm15862_vm4, %v5053_v33, %v5055_v50  ;;  %v5129_v2 = vsel %vm15863_vm13, %v5046_v60, %v5053_v33  ;;  %v5069_v37 = vpop.permute.xlu1 %5068  ;;  %vm15869_vm4 = vcmask 72704   ;;  %vm15870_vm13 = vmmov %vm15859_vm0 }
 0xec4   :  { %5165 = vrot.lane.b32.xlu1 %v5129_v2, %s9048_s27  ;;  %v5130_v61 = vsel %vm15864_vm15, %v5049_v41, %v5056_v48  ;;  %vm15871_vm15 = vmmov %vm15859_vm0  ;;  %v5105_v41 = vsel %vm15875_vm12, %v5102_v39, %v5104_v16 }
 0xec5   :  { %5167 = vrot.lane.b32.xlu0 %v5130_v61, %s9048_s27 }
 0xec6   :  { %v5067_v40 = vpop.permute.xlu0 %5066 }
 0xec7   :  { %v5070_v28 = vsel %vm15866_vm2, %v5067_v40, %v5069_v37  ;;  %v5131_v62 = vsel %vm15859_vm0, %v5060_v1, %v5067_v40  ;;  %v5083_v24 = vpop.permute.xlu1 %5082  ;;  %vm15873_vm2 = vcmask 89088  }
 0xec8   :  { %5169 = vrot.lane.b32.xlu1 %v5131_v62, %s9048_s27  ;;  %v5132_v12 = vsel %vm15867_vm10, %v5063_v0, %v5070_v28  ;;  %vm15874_vm10 = vmmov %vm15859_vm0 }
 0xec9   :  { %5171 = vrot.lane.b32.xlu0 %v5132_v12, %s9048_s27 }
 0xeca   :  { %v5081_v60 = vpop.permute.xlu0 %5080 }
 0xecb   :  { %v5084_v15 = vsel %vm15869_vm4, %v5081_v60, %v5083_v24  ;;  %v5133_v25 = vsel %vm15870_vm13, %v5074_v11, %v5081_v60  ;;  %v5097_v55 = vpop.permute.xlu1 %5096  ;;  %vm15876_vm4 = vcmask 105472   ;;  %vm15877_vm13 = vmmov %vm15859_vm0 }
 0xecc   :  { %5173 = vrot.lane.b32.xlu1 %v5133_v25, %s9048_s27  ;;  %v5134_v18 = vsel %vm15871_vm15, %v5077_v4, %v5084_v15  ;;  %vm15878_vm15 = vmmov %vm15859_vm0 }
 0xecd   :  { %5175 = vrot.lane.b32.xlu0 %v5134_v18, %s9048_s27 }
 0xece   :  { %v5095_v1 = vpop.permute.xlu0 %5094 }
 0xecf   :  { %v5098_v50 = vsel %vm15873_vm2, %v5095_v1, %v5097_v55  ;;  %v5135_v56 = vsel %vm15859_vm0, %v5088_v32, %v5095_v1  ;;  %v5111_v33 = vpop.permute.xlu1 %5110  ;;  %vm15880_vm2 = vmmov %vm15859_vm0 }
 0xed0   :  { %5177 = vrot.lane.b32.xlu1 %v5135_v56, %s9048_s27  ;;  %v5136_v14 = vsel %vm15874_vm10, %v5091_v31, %v5098_v50  ;;  %vm15881_vm10 = vcmask 924672  }
 0xed1   :  { %5179 = vrot.lane.b32.xlu0 %v5136_v14, %s9048_s27  ;;  %vm15882_vm12 = vmmov %vm15881_vm10 }
 0xed2   :  { %v5109_v11 = vpop.permute.xlu0 %5108 }
 0xed3   :  { %v5112_v48 = vsel %vm15876_vm4, %v5109_v11, %v5111_v33  ;;  %v5137_v2 = vsel %vm15877_vm13, %v5102_v39, %v5109_v11  ;;  %v5118_v37 = vpop.permute.xlu1 %5117  ;;  %vm15883_vm4 = vmmov %vm15881_vm10 }
 0xed4   :  { %5181 = vrot.lane.b32.xlu1 %v5137_v2, %s9048_s27  ;;  %v5138_v8 = vsel %vm15878_vm15, %v5105_v41, %v5112_v48  ;;  %v5119_v32 = vsel %vm15879_vm14, %v5116_v34, %v5118_v37  ;;  %vm15884_vm13 = vmmov %vm15883_vm4 }
 0xed5   :  { %5183 = vrot.lane.b32.xlu0 %v5138_v8, %s9048_s27  ;;  %vm15885_vm15 = vmmov %vm15883_vm4 }
 0xed6   :  { %v5123_v61 = vpop.permute.xlu0 %5122  ;;  %vm15886_vm14 = vmmov %vm15883_vm4 }
 0xed7   :  { %v5139_v40 = vsel %vm15880_vm2, %v5116_v34, %v5123_v61  ;;  %v5140_v0 = vsel %vm15859_vm0, %v5119_v32, %v5123_v61  ;;  %vm15887_vm2 = vmmov %vm15883_vm4 }
 0xed8   :  { %5185 = vrot.lane.b32.xlu1 %v5139_v40, %s9048_s27  ;;  %vm15888_vm0 = vmmov %vm15887_vm2 }
 0xed9   :  { %5187 = vrot.lane.b32.xlu0 %v5140_v0, %s9048_s27 }
 0xf2e   :  { %v5158_v16 = vpop.permute.xlu1 %5157 }
 0xf2f   :  { %v5160_v39 = vpop.permute.xlu0 %5159 }
 0xf30   :  { %v5189_v28 = vsel %vm15881_vm10, %v5158_v16, %v5160_v39 }
 0xf31   :  { %v5206_v60 = vand.u32 4294901760, %v5189_v28 }
 0xf32   :  { %v5162_v62 = vpop.permute.xlu1 %5161 }
 0xf33   :  { %v5164_v24 = vpop.permute.xlu0 %5163  ;;  %v13125_v8 = vsub.f32 %v5189_v28, %v5206_v60 }
 0xf34   :  { %v5190_v12 = vsel %vm15882_vm12, %v5162_v62, %v5164_v24 }
 0xf35   :  { %v5209_v4 = vand.u32 4294901760, %v5190_v12 }
 0xf36   :  { %v5166_v15 = vpop.permute.xlu1 %5165 }
 0xf37   :  { %v13112_v25 = vpack.c.bf16 %v5209_v4, %v5206_v60  ;;  %v5168_v34 = vpop.permute.xlu0 %5167  ;;  %v13121_v41 = vsub.f32 %v5190_v12, %v5209_v4  ;;  %v5291_v12 = vand.u32 4294901760, %v13125_v8 }
 0xf38   :  { %v5191_v55 = vsel %vm15883_vm4, %v5166_v15, %v5168_v34 }
 0xf39   :  { %8722 = vmatpush3.bf16.msra.mxu1 %v13112_v25  ;;  %v5212_v50 = vand.u32 4294901760, %v5191_v55  ;;  %v14718_v0 = vand.u32 4294901760, %v13121_v41 }
 0xf3a   :  { %v5170_v18 = vpop.permute.xlu1 %5169  ;;  %8723 = vmatprep.subr.bf16.mxu1 %v15648_v57 }
 0xf3b   :  { %v5172_v1 = vpop.permute.xlu0 %5171  ;;  %v13134_v4 = vsub.f32 %v5191_v55, %v5212_v50  ;;  %v5299_v28 = vsub.f32 %v13121_v41, %v14718_v0  ;;  %v5292_v55 = vsub.f32 %v13125_v8, %v5291_v12 }
 0xf3c   :  { %v5192_v31 = vsel %vm15884_vm13, %v5170_v18, %v5172_v1 }
 0xf3d   :  { %v5215_v56 = vand.u32 4294901760, %v5192_v31 }
 0xf3e   :  { %v5174_v33 = vpop.permute.xlu1 %5173 }
 0xf3f   :  { %v13118_v14 = vpack.c.bf16 %v5215_v56, %v5212_v50  ;;  %v5176_v11 = vpop.permute.xlu0 %5175  ;;  %v13129_v39 = vsub.f32 %v5192_v31, %v5215_v56  ;;  %v14716_v50 = vand.u32 4294901760, %v13134_v4 }
 0xf40   :  { %v5193_v48 = vsel %vm15885_vm15, %v5174_v33, %v5176_v11 }
 0xf41   :  { %8725 = vmatpush3.bf16.msra.mxu1 %v13118_v14  ;;  %v5218_v61 = vand.u32 4294901760, %v5193_v48  ;;  %v14715_v34 = vand.u32 4294901760, %v13129_v39 }
 0xf42   :  { %v5178_v2 = vpop.permute.xlu1 %5177  ;;  %8726 = vmatprep.subr.bf16.mxu1 %v15648_v57 }
 0xf43   :  { %v5180_v37 = vpop.permute.xlu0 %5179  ;;  %v13150_v56 = vsub.f32 %v5193_v48, %v5218_v61 }
 0xf44   :  { %v5194_v32 = vsel %vm15886_vm14, %v5178_v2, %v5180_v37  ;;  %v5300_v2 = vand.u32 4294901760, %v5299_v28  ;;  %v5313_v37 = vsub.f32 %v13129_v39, %v14715_v34 }
 0xf45   :  { %v5221_v40 = vand.u32 4294901760, %v5194_v32  ;;  %v5319_v48 = vand.u32 4294901760, %v13150_v56 }
 0xf46   :  { %v5182_v16 = vpop.permute.xlu1 %5181  ;;  %v5314_v28 = vand.u32 4294901760, %v5313_v37 }
 0xf47   :  { %v13131_v62 = vpack.c.bf16 %v5221_v40, %v5218_v61  ;;  %v5184_v24 = vpop.permute.xlu0 %5183  ;;  %v13143_v18 = vsub.f32 %v5194_v32, %v5221_v40 }
 0xf48   :  { %v5195_v60 = vsel %vm15887_vm2, %v5182_v16, %v5184_v24  ;;  %v5293_v24 = vand.u32 4294901760, %v5292_v55 }
 0xf49   :  { %8728 = vmatpush3.bf16.msra.mxu1 %v13131_v62  ;;  %v5224_v33 = vand.u32 4294901760, %v5195_v60  ;;  %v14717_v32 = vand.u32 4294901760, %v13143_v18 }
 0xf4a   :  { %v5186_v15 = vpop.permute.xlu1 %5185  ;;  %8729 = vmatprep.subr.bf16.mxu1 %v15648_v57  ;;  %v8733_v55 = vpack.c.bf16 %v5300_v2, %v5293_v24 }
 0xf4b   :  { %v5188_v1 = vpop.permute.xlu0 %5187  ;;  %v13164_v61 = vsub.f32 %v5195_v60, %v5224_v33 }
 0xf4c   :  { %v5196_v31 = vsel %vm15888_vm0, %v5186_v15, %v5188_v1  ;;  %v5306_v15 = vsub.f32 %v13134_v4, %v14716_v50  ;;  %v5327_v1 = vsub.f32 %v13143_v18, %v14717_v32  ;;  %v5320_v50 = vsub.f32 %v13150_v56, %v5319_v48 }
 0xf4d   :  { %v5227_v11 = vand.u32 4294901760, %v5196_v31  ;;  %v5333_v60 = vand.u32 4294901760, %v13164_v61 }
 0xf4e   :  { %v5307_v34 = vand.u32 4294901760, %v5306_v15  ;;  %v5321_v0 = vand.u32 4294901760, %v5320_v50  ;;  %v8751_v50 = vpack.c.bf16 %v13143_v18, %v13150_v56  ;;  %v15892_v56 = vand.u32 4294901760, %v13121_v41 }
 0xf4f   :  { %v13156_v40 = vpack.c.bf16 %v5227_v11, %v5224_v33  ;;  %v13158_v16 = vsub.f32 %v5196_v31, %v5227_v11  ;;  %v15889_v11 = vld [vmem:[#allocation113_spill] sm:$0xff]  ;;  %v5328_v33 = vand.u32 4294901760, %v5327_v1  ;;  %v5334_v2 = vsub.f32 %v13164_v61, %v5333_v60 }
 0xf50   :  { %v8736_v32 = vpack.c.bf16 %v5314_v28, %v5307_v34  ;;  %v8745_v1 = vpack.c.bf16 %v13121_v41, %v13125_v8  ;;  %v15890_v34 = vld [vmem:[#allocation110_spill] sm:$0xff]  ;;  %v15891_v28 = vld [vmem:[#allocation111_spill] sm:$0xff]  ;;  %v15896_v8 = vand.u32 4294901760, %v13143_v18  ;;  %v15909_v18 = vld [vmem:[#allocation136_spill] sm:$0xff] }
 0xf51   :  { %8731 = vmatpush3.bf16.msra.mxu1 %v13156_v40  ;;  %v5340_v31 = vand.u32 4294901760, %v13158_v16  ;;  %v8739_v15 = vpack.c.bf16 %v5328_v33, %v5321_v0  ;;  %v8748_v0 = vpack.c.bf16 %v13129_v39, %v13134_v4  ;;  %v15894_v33 = vand.u32 4294901760, %v13134_v4  ;;  %v15907_v4 = vld [vmem:[#allocation134_spill] sm:$0xff] }
 0xf52   :  { %8732 = vmatprep.subr.bf16.mxu1 %v15648_v57  ;;  %v8775_v41 = vpack.c.bf16 %v15896_v8, %v5319_v48  ;;  %vm15908_vm15 = vnez %v15907_v4  ;;  %vm15910_vm14 = vnez %v15909_v18  ;;  %v15913_v48 = vld [vmem:[#allocation140_spill] sm:$0xff] }
 0xf53   :  { %v5341_v37 = vsub.f32 %v13158_v16, %v5340_v31  ;;  %vm15914_vm0 = vnez %v15913_v48 }
 0xf54   :  { %8455 = vmatmul.mubr.f32.vlgmr.msra.gmra.mrb[18].mxu1 %v15889_v11  ;;  %v5335_v11 = vand.u32 4294901760, %v5334_v2 }
 0xf55   :  { %8734 = vmatpush3.bf16.msra.mxu1 %v8733_v55  ;;  %8473 = vmatprep.mubr.msk.f32.mxu1 %vm15656_vm3, %v15268_v27  ;;  %v5342_v24 = vand.u32 4294901760, %v5341_v37  ;;  %v15895_v37 = vand.u32 4294901760, %v13129_v39  ;;  %v15897_v39 = vld [vmem:[#allocation124_spill] sm:$0xff] }
 0xf56   :  { %8735 = vmatprep.subr.bf16.mxu1 %v15648_v57  ;;  %vm15898_vm10 = vnez %v15897_v39 }
 0xf57   :  { %v8742_v55 = vpack.c.bf16 %v5342_v24, %v5335_v11  ;;  %v8772_v2 = vpack.c.bf16 %v15895_v37, %v15894_v33  ;;  %v15919_v24 = vld [vmem:[#allocation146_spill] sm:$0xff] }
 0xf58   :  { %v15923_v11 = vld [vmem:[#allocation150_spill] sm:$0xff] }
 0xf59   :  { %8737 = vmatpush3.bf16.msra.mxu1 %v8736_v32  ;;  %v8754_v32 = vpack.c.bf16 %v13158_v16, %v13164_v61  ;;  %v8769_v16 = vpack.c.bf16 %v15892_v56, %v5291_v12  ;;  %v15893_v61 = vld [vmem:[#allocation112_spill] sm:$0xff]  ;;  %v8778_v12 = vpack.c.bf16 %v5340_v31, %v5333_v60  ;;  %v15915_v31 = vld [vmem:[#allocation142_spill] sm:$0xff] }
 0xf5a   :  { %8738 = vmatprep.subr.bf16.mxu1 %v15648_v57  ;;  %v15917_v60 = vld [vmem:[#allocation144_spill] sm:$0xff] }
 0xf5d   :  { %8740 = vmatpush3.bf16.msra.mxu1 %v8739_v15  ;;  %v15921_v15 = vld [vmem:[#allocation148_spill] sm:$0xff] }
 0xf5e   :  { %8741 = vmatprep.subr.bf16.mxu1 %v15648_v57 }
 0xf61   :  { %8743 = vmatpush3.bf16.msra.mxu1 %v8742_v55  ;;  %v15925_v55 = vld [vmem:[#allocation152_spill] sm:$0xff] }
 0xf62   :  { %8744 = vmatprep.subr.bf16.mxu1 %v15648_v57 }
 0xf64   :  { %8474 = vmatmul.mubr.f32.vlgmr.msra.gmra.mrb[18].mxu1 %v15890_v34 }
 0xf65   :  { %8746 = vmatpush3.bf16.msra.mxu1 %v8745_v1  ;;  %8492 = vmatprep.mubr.msk.f32.mxu1 %vm15656_vm3, %v15268_v27  ;;  %v15927_v1 = vld [vmem:[#allocation154_spill] sm:$0xff] }
 0xf66   :  { %8747 = vmatprep.subr.bf16.mxu1 %v15648_v57 }
 0xf69   :  { %8749 = vmatpush3.bf16.msra.mxu1 %v8748_v0 }
 0xf6a   :  { %8750 = vmatprep.subr.bf16.mxu1 %v15648_v57 }
 0xf6d   :  { %8752 = vmatpush3.bf16.msra.mxu1 %v8751_v50  ;;  %v15931_v50 = vld [vmem:[#allocation155_spill] sm:$0xff] }
 0xf6e   :  { %8753 = vmatprep.subr.bf16.mxu1 %v15648_v57 }
 0xf71   :  { %8755 = vmatpush3.bf16.msra.mxu1 %v8754_v32 }
 0xf72   :  { %8756 = vmatprep.subr.bf16.mxu1 %v15648_v57 }
 0xf74   :  { %8493 = vmatmul.mubr.f32.vlgmr.msra.gmra.mrb[18].mxu1 %v15891_v28 }
 0xf75   :  { %8758 = vmatpush3.bf16.msra.mxu1 %v13112_v25  ;;  %8511 = vmatprep.mubr.msk.f32.mxu1 %vm15656_vm3, %v15268_v27 }
 0xf76   :  { %8759 = vmatprep.subr.bf16.mxu1 %v15648_v57 }
 0xf79   :  { %8761 = vmatpush3.bf16.msra.mxu1 %v13118_v14 }
 0xf7a   :  { %8762 = vmatprep.subr.bf16.mxu1 %v15648_v57 }
 0xf7d   :  { %8764 = vmatpush3.bf16.msra.mxu1 %v13131_v62 }
 0xf7e   :  { %8765 = vmatprep.subr.bf16.mxu1 %v15648_v57 }
 0xf81   :  { %8767 = vmatpush3.bf16.msra.mxu1 %v13156_v40 }
 0xf82   :  { %8768 = vmatprep.subr.bf16.mxu1 %v15648_v57 }
 0xf84   :  { %8512 = vmatmul.mubr.f32.vlgmr.msra.gmra.mrb[18].mxu1 %v15893_v61 }
 0xf85   :  { %8770 = vmatpush3.bf16.msra.mxu1 %v8769_v16  ;;  %8530 = vmatprep.mubr.msk.f32.mxu1 %vm15656_vm3, %v15268_v27 }
 0xf86   :  { %8771 = vmatprep.subr.bf16.mxu1 %v15648_v57 }
 0xf89   :  { %8773 = vmatpush3.bf16.msra.mxu1 %v8772_v2 }
 0xf8a   :  { %8774 = vmatprep.subr.bf16.mxu1 %v15648_v57 }
 0xf8d   :  { %8776 = vmatpush3.bf16.msra.mxu1 %v8775_v41 }
 0xf8e   :  { %8777 = vmatprep.subr.bf16.mxu1 %v15648_v57 }
 0xf91   :  { %8779 = vmatpush3.bf16.msra.mxu1 %v8778_v12 }
 0xf92   :  { %8780 = vmatprep.subr.bf16.mxu1 %v15648_v57 }
 0xf94   :  { %8531 = vmatmul.mubr.f32.vlgmr.msra.gmra.mrb[18].mxu1 %v15890_v34 }
 0xf95   :  { %8782 = vmatpush3.bf16.msra.mxu1 %v13112_v25  ;;  %8549 = vmatprep.mubr.msk.f32.mxu1 %vm15656_vm3, %v15268_v27  ;;  %v15899_v25 = vld [vmem:[#allocation126_spill] sm:$0xff] }
 0xf96   :  { %8783 = vmatprep.subr.bf16.mxu1 %v15648_v57  ;;  %vm15900_vm3 = vnez %v15899_v25 }
 0xf99   :  { %8785 = vmatpush3.bf16.msra.mxu1 %v13118_v14  ;;  %v15901_v14 = vld [vmem:[#allocation128_spill] sm:$0xff] }
 0xf9a   :  { %8786 = vmatprep.subr.bf16.mxu1 %v15648_v57  ;;  %vm15902_vm12 = vnez %v15901_v14 }
 0xf9d   :  { %8788 = vmatpush3.bf16.msra.mxu1 %v13131_v62  ;;  %v15903_v62 = vld [vmem:[#allocation130_spill] sm:$0xff] }
 0xf9e   :  { %8789 = vmatprep.subr.bf16.mxu1 %v15648_v57  ;;  %vm15904_vm4 = vnez %v15903_v62  ;;  %v15905_v57 = vld [vmem:[#allocation132_spill] sm:$0xff] }
 0xf9f   :  { %vm15906_vm13 = vnez %v15905_v57 }
 0xfa1   :  { %8791 = vmatpush3.bf16.msra.mxu1 %v13156_v40  ;;  %v15911_v40 = vld [vmem:[#allocation138_spill] sm:$0xff] }
 0xfa2   :  { %8242 = vmatprep.subr.msk.bf16.mxu1 %vm15898_vm10, %v14957_v47  ;;  %vm15912_vm2 = vnez %v15911_v40  ;;  %vm15916_vm10 = vnez %v15915_v31 }
 0xfa4   :  { %8550 = vmatmul.mubr.f32.vlgmr.msra.gmra.mrb[18].mxu1 %v15890_v34  ;;  %v15929_v34 = vld [vmem:[#allocation156_spill] sm:$0xff] }
 0xfa5   :  { %8243 = vmatpush3.bf16.msk.msra.mxu1 %vm15900_vm3, %v14957_v47  ;;  %vm15918_vm3 = vnez %v15917_v60 }
 0xfa6   :  { %8244 = vmatprep.subr.msk.bf16.mxu1 %vm15902_vm12, %v14957_v47  ;;  %vm15920_vm12 = vnez %v15919_v24 }
 0xfa9   :  { %8245 = vmatpush3.bf16.msk.msra.mxu1 %vm15904_vm4, %v14957_v47  ;;  %vm15922_vm4 = vnez %v15921_v15 }
 0xfaa   :  { %8246 = vmatprep.subr.msk.bf16.mxu1 %vm15906_vm13, %v14957_v47  ;;  %vm15924_vm13 = vnez %v15923_v11 }
 0xfad   :  { %8247 = vmatpush3.bf16.msk.msra.mxu1 %vm15908_vm15, %v14957_v47  ;;  %vm15926_vm15 = vnez %v15925_v55 }
 0xfae   :  { %8248 = vmatprep.subr.msk.bf16.mxu1 %vm15910_vm14, %v14957_v47  ;;  %vm15928_vm14 = vnez %v15927_v1 }
 0xfb1   :  { %8249 = vmatpush3.bf16.msk.msra.mxu1 %vm15912_vm2, %v14957_v47  ;;  %vm15930_vm2 = vnez %v15929_v34 }
 0xfb2   :  { %8250 = vmatprep.subr.msk.bf16.mxu1 %vm15914_vm0, %v14957_v47  ;;  %vm15932_vm0 = vcmask 1041408  }
 0xfb5   :  { %8251 = vmatpush3.bf16.msk.msra.mxu1 %vm15916_vm10, %v14957_v47  ;;  %vm15933_vm10 = vcmask 1043456  }
 0xfb6   :  { %8252 = vmatprep.subr.msk.bf16.mxu1 %vm15918_vm3, %v14957_v47  ;;  %vm15934_vm3 = vmmov %vm15932_vm0 }
 0xfb9   :  { %8253 = vmatpush3.bf16.msk.msra.mxu1 %vm15920_vm12, %v14957_v47  ;;  %vm15935_vm12 = vmmov %vm15933_vm10 }
 0xfba   :  { %8254 = vmatprep.subr.msk.bf16.mxu1 %vm15922_vm4, %v14957_v47 }
 0xfbd   :  { %8255 = vmatpush3.bf16.msk.msra.mxu1 %vm15924_vm13, %v14957_v47 }
 0xfbe   :  { %8256 = vmatprep.subr.msk.bf16.mxu1 %vm15926_vm15, %v14957_v47 }
 0xfc1   :  { %8257 = vmatpush3.bf16.msk.msra.mxu1 %vm15928_vm14, %v14957_v47 }
 0xfc2   :  { %7819 = vmatprep.subr.msk.bf16.mxu1 %vm15930_vm2, %v14957_v47 }
0x1077   :  { %v5738_v0 = vpop.f32.mrb[18].mxu1 }
0x1078   :  { %v8899_v32 = vadd.f32 %v5738_v0, %v15931_v50  ;;  %v8551_v28 = vpop.f32.mrb[19].mxu1 }
0x1079   :  { %v15938_v28 = vld [vmem:[#allocation158_spill] sm:$0xff] }
0x107a   :  { %v7721_v56 = vmul.f32 -1.442695, %v8899_v32  ;;  %vm15939_vm13 = vnez %v15938_v28 }
0x107c   :  { %9026 = vpow2.f32 %v7721_v56  ;;  %v15940_v56 = vld [vmem:[#allocation159_spill] sm:$0xff] }
0x107d   :  { %vm15941_vm15 = vnez %v15940_v56 }
0x1086   :  { %v9027_v16 = vpop.eup %9026 }
0x1087   :  { %v5745_v61 = vadd.f32 1.0, %v9027_v16  ;;  %v15942_v16 = vld [vmem:[#allocation160_spill] sm:$0xff] }
0x1088   :  { %vm15943_vm14 = vnez %v15942_v16 }
0x1089   :  { %9028 = vrcp.f32 %v5745_v61  ;;  %v15944_v61 = vld [vmem:[#allocation161_spill] sm:$0xff] }
0x108a   :  { %vm15945_vm2 = vnez %v15944_v61 }
0x1093   :  { %v9029_v33 = vpop.eup %9028 }
0x1094   :  { %v5748_v37 = vmul.f32 %v9029_v33, %v8899_v32  ;;  %v15936_v32 = vld [vmem:[#allocation157_spill] sm:$0xff]  ;;  %v15946_v33 = vld [vmem:[#allocation162_spill] sm:$0xff] }
0x1095   :  { %vm15937_vm4 = vnez %v15936_v32 }
0x1096   :  { %v5750_v2 = vrot.slane %v5748_v37, 4  ;;  %v5752_v8 = vpack.c.bf16 %v5748_v37, %v5748_v37 }
0x1098   :  { %v5754_v41 = vunpack.c.l.bf16 %v5752_v8  ;;  %v5753_v12 = vpack.c.bf16 %v5750_v2, %v5750_v2 }
0x109a   :  { %v5756_v39 = vsub.f32 %v5748_v37, %v5754_v41  ;;  %v5755_v25 = vunpack.c.l.bf16 %v5753_v12  ;;  %v15948_v37 = vld [vmem:[#allocation163_spill] sm:$0xff]  ;;  %v15954_v41 = vld [vmem:[#allocation166_spill] sm:$0xff] }
0x109c   :  { %v5758_v14 = vpack.c.bf16 %v5756_v39, %v5756_v39  ;;  %v5757_v62 = vsub.f32 %v5750_v2, %v5755_v25  ;;  %v15950_v2 = vld [vmem:[#allocation164_spill] sm:$0xff]  ;;  %v15960_v25 = vld [vmem:[#allocation169_spill] sm:$0xff] }
0x109e   :  { %v5759_v57 = vpack.c.bf16 %v5757_v62, %v5757_v62  ;;  %v5760_v4 = vunpack.c.l.bf16 %v5758_v14  ;;  %v5768_v15 = vrot.slane %v5758_v14, 6  ;;  %v15962_v14 = vld [vmem:[#allocation171_spill] sm:$0xff] }
0x10a0   :  { %v5761_v18 = vunpack.c.l.bf16 %v5759_v57  ;;  %v5762_v40 = vsub.f32 %v5756_v39, %v5760_v4  ;;  %v5769_v60 = vrot.slane %v5759_v57, 6  ;;  %v5776_v0 = vsel %vm15934_vm3, %v5752_v8, %v5768_v15  ;;  %v15952_v8 = vld [vmem:[#allocation165_spill] sm:$0xff]  ;;  %v15958_v39 = vld [vmem:[#allocation168_spill] sm:$0xff]  ;;  %v15968_v4 = vld [vmem:[#allocation174_spill] sm:$0xff] }
0x10a1   :  { %vm15951_vm3 = vnez %v15950_v2  ;;  %v15966_v57 = vld [vmem:[#allocation173_spill] sm:$0xff] }
0x10a2   :  { %v5763_v48 = vsub.f32 %v5757_v62, %v5761_v18  ;;  %v5764_v31 = vpack.c.bf16 %v5762_v40, %v5762_v40  ;;  %v5779_v1 = vsel %vm15932_vm0, %v5753_v12, %v5769_v60  ;;  %vm15947_vm0 = vnez %v15946_v33  ;;  %v15956_v12 = vld [vmem:[#allocation167_spill] sm:$0xff]  ;;  %v15964_v62 = vld [vmem:[#allocation172_spill] sm:$0xff] }
0x10a3   :  { %v15970_v18 = vld [vmem:[#allocation175_spill] sm:$0xff]  ;;  %v15972_v40 = vld [vmem:[#allocation176_spill] sm:$0xff] }
0x10a4   :  { %v5765_v24 = vpack.c.bf16 %v5763_v48, %v5763_v48  ;;  %v5772_v11 = vrot.slane %v5764_v31, 4  ;;  %v15974_v48 = vld [vmem:[#allocation177_spill] sm:$0xff]  ;;  %v15976_v31 = vld [vmem:[#allocation178_spill] sm:$0xff] }
0x10a6   :  { %v5773_v55 = vrot.slane %v5765_v24, 4  ;;  %v5781_v50 = vsel %vm15935_vm12, %v5776_v0, %v5772_v11  ;;  %vm15953_vm12 = vnez %v15952_v8 }
0x10a8   :  { %v5784_v34 = vsel %vm15933_vm10, %v5779_v1, %v5773_v55  ;;  %vm15949_vm10 = vnez %v15948_v37 }
0x10a9   :  { %5818 = vmatprep.mubr.bf16.mxu0 %v5784_v34  ;;  %5861 = vmatprep.mubr.bf16.mxu1 %v5784_v34 }
0x10aa   :  { %5819 = vmatmul.mubr.bf16.vlgmr.msra.gmra.mrb[24].mxu0 %v5781_v50  ;;  %5862 = vmatmul.mubr.bf16.vlgmr.msra.gmra.mrb[24].mxu1 %v5781_v50 }
0x10ab   :  { %6261 = vmatprep.mubr.f32.mxu0 %v15268_v27  ;;  %7821 = vmatpush1.bf16.msk.msra.mxu1 %vm15937_vm4, %v14957_v47  ;;  %vm15955_vm4 = vnez %v15954_v41 }
0x10ac   :  { %7823 = vmatprep.subr.msk.bf16.mxu1 %vm15939_vm13, %v14957_v47  ;;  %vm15957_vm13 = vnez %v15956_v12 }
0x10af   :  { %7825 = vmatpush1.bf16.msk.msra.mxu1 %vm15941_vm15, %v14957_v47  ;;  %vm15959_vm15 = vnez %v15958_v39 }
0x10b0   :  { %7827 = vmatprep.subr.msk.bf16.mxu1 %vm15943_vm14, %v14957_v47  ;;  %vm15961_vm14 = vnez %v15960_v25 }
0x10b3   :  { %7829 = vmatpush1.bf16.msk.msra.mxu1 %vm15945_vm2, %v14957_v47  ;;  %vm15963_vm2 = vnez %v15962_v14 }
0x10b4   :  { %7831 = vmatprep.subr.msk.bf16.mxu1 %vm15947_vm0, %v14957_v47  ;;  %vm15965_vm0 = vnez %v15964_v62 }
0x10b7   :  { %7833 = vmatpush1.bf16.msk.msra.mxu1 %vm15949_vm10, %v14957_v47  ;;  %vm15967_vm10 = vnez %v15966_v57 }
0x10b8   :  { %7835 = vmatprep.subr.msk.bf16.mxu1 %vm15951_vm3, %v14957_v47  ;;  %vm15969_vm3 = vnez %v15968_v4 }
0x10bb   :  { %7837 = vmatpush1.bf16.msk.msra.mxu1 %vm15953_vm12, %v14957_v47  ;;  %vm15971_vm12 = vnez %v15970_v18 }
0x10bc   :  { %7839 = vmatprep.subr.msk.bf16.mxu1 %vm15955_vm4, %v14957_v47  ;;  %vm15973_vm4 = vnez %v15972_v40 }
0x10bf   :  { %7841 = vmatpush1.bf16.msk.msra.mxu1 %vm15957_vm13, %v14957_v47  ;;  %vm15975_vm13 = vnez %v15974_v48 }
0x10c0   :  { %7843 = vmatprep.subr.msk.bf16.mxu1 %vm15959_vm15, %v14957_v47  ;;  %vm15977_vm15 = vnez %v15976_v31 }
0x10c3   :  { %7845 = vmatpush1.bf16.msk.msra.mxu1 %vm15961_vm14, %v14957_v47  ;;  %vm15978_vm14 = vnez %v15355_v3 }
0x10c4   :  { %7847 = vmatprep.subr.msk.bf16.mxu1 %vm15963_vm2, %v14957_v47  ;;  %vm15979_vm2 = vnez %v15361_v63 }
0x10c7   :  { %7849 = vmatpush1.bf16.msk.msra.mxu1 %vm15965_vm0, %v14957_v47  ;;  %vm15980_vm0 = vnez %v15368_v7 }
0x10c8   :  { %7851 = vmatprep.subr.msk.bf16.mxu1 %vm15967_vm10, %v14957_v47  ;;  %vm15981_vm10 = vnez %v15373_v5 }
0x10cb   :  { %7853 = vmatpush1.bf16.msk.msra.mxu1 %vm15969_vm3, %v14957_v47  ;;  %vm15982_vm3 = vnez %v15380_v13 }
0x10cc   :  { %7855 = vmatprep.subr.msk.bf16.mxu1 %vm15971_vm12, %v14957_v47  ;;  %vm15983_vm12 = vnez %v15385_v43 }
0x10cf   :  { %7857 = vmatpush1.bf16.msk.msra.mxu1 %vm15973_vm4, %v14957_v47  ;;  %vm15984_vm4 = vnez %v15392_v26 }
0x10d0   :  { %7859 = vmatprep.subr.msk.bf16.mxu1 %vm15975_vm13, %v14957_v47  ;;  %vm15985_vm13 = vnez %v15397_v46 }
0x10d3   :  { %7861 = vmatpush1.bf16.msk.msra.mxu1 %vm15977_vm15, %v14957_v47  ;;  %vm15986_vm15 = vnez %v15404_v52 }
0x10d4   :  { %7863 = vmatprep.subr.msk.bf16.mxu1 %vm15978_vm14, %v14957_v47  ;;  %vm15987_vm14 = vnez %v15409_v59 }
0x10d7   :  { %7865 = vmatpush1.bf16.msk.msra.mxu1 %vm15979_vm2, %v14957_v47  ;;  %vm15988_vm2 = vnez %v15416_v58 }
0x10d8   :  { %7867 = vmatprep.subr.msk.bf16.mxu1 %vm15980_vm0, %v14957_v47  ;;  %vm15989_vm0 = vcmask 1043456  }
0x10db   :  { %7869 = vmatpush1.bf16.msk.msra.mxu1 %vm15981_vm10, %v14957_v47  ;;  %vm15990_vm10 = vmmov %vm15989_vm0 }
0x10dc   :  { %7871 = vmatprep.subr.msk.bf16.mxu1 %vm15982_vm3, %v14957_v47  ;;  %vm15991_vm3 = vmmov %vm15989_vm0 }
0x10df   :  { %7873 = vmatpush1.bf16.msk.msra.mxu1 %vm15983_vm12, %v14957_v47  ;;  %vm15992_vm12 = vmmov %vm15989_vm0 }
0x10e0   :  { %7875 = vmatprep.subr.msk.bf16.mxu1 %vm15984_vm4, %v14957_v47  ;;  %vm15993_vm4 = vmmov %vm15989_vm0 }
0x10e3   :  { %7877 = vmatpush1.bf16.msk.msra.mxu1 %vm15985_vm13, %v14957_v47  ;;  %vm15994_vm13 = vcmask 7168  }
0x10e4   :  { %7879 = vmatprep.subr.msk.bf16.mxu1 %vm15986_vm15, %v14957_v47  ;;  %vm15995_vm15 = vmmov %vm15989_vm0 }
0x10e7   :  { %7881 = vmatpush1.bf16.msk.msra.mxu1 %vm15987_vm14, %v14957_v47  ;;  %vm15996_vm14 = vmmov %vm15989_vm0 }
0x10e8   :  { %7883 = vmatprep.subr.msk.bf16.mxu1 %vm15988_vm2, %v14957_v47  ;;  %vm15997_vm2 = vcmask 23552  }
0x117d   :  { %v5820_v3 = vpop.f32.mrb[24].mxu0  ;;  %v8258_v63 = vpop.f32.mrb[24].mxu1 }
0x117e   :  { %v5873_v7 = vrot.slane %v5820_v3, 4  ;;  %v5822_v5 = vpop.f32.mrb[25].mxu0  ;;  %v8259_v13 = vpop.f32.mrb[25].mxu1 }
0x117f   :  { %v5874_v43 = vrot.slane %v5822_v5, 4  ;;  %v8260_v26 = vadd.f32 %v8259_v13, %v8258_v63  ;;  %v5824_v46 = vpop.f32.mrb[26].mxu0  ;;  %v8261_v60 = vpop.f32.mrb[26].mxu1 }
0x1180   :  { %v5879_v24 = vadd.f32 %v5873_v7, %v5820_v3  ;;  %v5826_v52 = vpop.f32.mrb[27].mxu0  ;;  %v8262_v15 = vpop.f32.mrb[27].mxu1 }
0x1181   :  { %v5880_v11 = vadd.f32 %v5874_v43, %v5822_v5  ;;  %v5875_v55 = vrot.slane %v8260_v26, 4  ;;  %v8263_v59 = vadd.f32 %v8262_v15, %v8261_v60 }
0x1182   :  { %v13390_v1 = vadd.f32 %v5879_v24, %v5824_v46 }
0x1183   :  { %v5881_v34 = vadd.f32 %v8260_v26, %v5875_v55  ;;  %v13392_v58 = vadd.f32 %v5880_v11, %v5826_v52 }
0x1184   :  { %5902 = vrot.lane.b32.xlu0 %v13390_v1, %s9032_s1  ;;  %v5888_v32 = vrot.slane %v13390_v1, 4 }
0x1185   :  { %v13396_v0 = vadd.f32 %v8263_v59, %v5881_v34  ;;  %5904 = vrot.lane.b32.xlu1 %v13392_v58, %s9032_s1  ;;  %v5889_v50 = vrot.slane %v13392_v58, 4 }
0x1187   :  { %v5890_v28 = vrot.slane %v13396_v0, 4 }
0x1188   :  { %5924 = vrot.lane.b32.xlu0 %v13390_v1, %s9036_s2 }
0x1189   :  { %5926 = vrot.lane.b32.xlu1 %v13392_v58, %s9036_s2 }
0x118c   :  { %5946 = vrot.lane.b32.xlu0 %v13390_v1, %s9037_s13 }
0x118d   :  { %5948 = vrot.lane.b32.xlu1 %v13392_v58, %s9037_s13 }
0x1190   :  { %5968 = vrot.lane.b32.xlu0 %v13390_v1, %s9038_s14 }
0x1191   :  { %5970 = vrot.lane.b32.xlu1 %v13392_v58, %s9038_s14 }
0x1194   :  { %5990 = vrot.lane.b32.xlu0 %v13390_v1, %s9039_s15 }
0x1195   :  { %5992 = vrot.lane.b32.xlu1 %v13392_v58, %s9039_s15 }
0x1198   :  { %6012 = vrot.lane.b32.xlu0 %v13390_v1, %s9040_s16 }
0x1199   :  { %6014 = vrot.lane.b32.xlu1 %v13392_v58, %s9040_s16 }
0x119c   :  { %6034 = vrot.lane.b32.xlu0 %v13390_v1, %s9041_s17 }
0x119d   :  { %6036 = vrot.lane.b32.xlu1 %v13392_v58, %s9041_s17 }
0x11a0   :  { %5893 = vrot.lane.b32.xlu0 %v5889_v50, %s9033_s21 }
0x11a1   :  { %5891 = vrot.lane.b32.xlu1 %v5888_v32, %s9033_s21 }
0x11a4   :  { %5906 = vrot.lane.b32.xlu0 %v13396_v0, %s9032_s1 }
0x11a5   :  { %5913 = vrot.lane.b32.xlu1 %v5888_v32, %s9034_s22 }
0x11a8   :  { %5915 = vrot.lane.b32.xlu0 %v5889_v50, %s9034_s22 }
0x11a9   :  { %5935 = vrot.lane.b32.xlu1 %v5888_v32, %s9042_s18 }
0x11ac   :  { %5928 = vrot.lane.b32.xlu0 %v13396_v0, %s9036_s2 }
0x11ad   :  { %5957 = vrot.lane.b32.xlu1 %v5888_v32, %s9043_s19 }
0x11b0   :  { %5937 = vrot.lane.b32.xlu0 %v5889_v50, %s9042_s18 }
0x11b1   :  { %5979 = vrot.lane.b32.xlu1 %v5888_v32, %s9044_s20 }
0x11b4   :  { %5950 = vrot.lane.b32.xlu0 %v13396_v0, %s9037_s13 }
0x11b5   :  { %6001 = vrot.lane.b32.xlu1 %v5888_v32, %s9045_s23 }
0x11b8   :  { %5959 = vrot.lane.b32.xlu0 %v5889_v50, %s9043_s19 }
0x11b9   :  { %6023 = vrot.lane.b32.xlu1 %v5888_v32, %s9046_s24 }
0x11bc   :  { %5972 = vrot.lane.b32.xlu0 %v13396_v0, %s9038_s14 }
0x11bd   :  { %5895 = vrot.lane.b32.xlu1 %v5890_v28, %s9033_s21 }
0x11c0   :  { %5981 = vrot.lane.b32.xlu0 %v5889_v50, %s9044_s20 }
0x11c1   :  { %5917 = vrot.lane.b32.xlu1 %v5890_v28, %s9034_s22 }
0x11c4   :  { %5994 = vrot.lane.b32.xlu0 %v13396_v0, %s9039_s15 }
0x11c5   :  { %5939 = vrot.lane.b32.xlu1 %v5890_v28, %s9042_s18 }
0x11c8   :  { %6003 = vrot.lane.b32.xlu0 %v5889_v50, %s9045_s23 }
0x11c9   :  { %5961 = vrot.lane.b32.xlu1 %v5890_v28, %s9043_s19 }
0x11cc   :  { %6016 = vrot.lane.b32.xlu0 %v13396_v0, %s9040_s16 }
0x11cd   :  { %5983 = vrot.lane.b32.xlu1 %v5890_v28, %s9044_s20 }
0x11d0   :  { %6025 = vrot.lane.b32.xlu0 %v5889_v50, %s9046_s24 }
0x11d1   :  { %6005 = vrot.lane.b32.xlu1 %v5890_v28, %s9045_s23 }
0x11d4   :  { %6038 = vrot.lane.b32.xlu0 %v13396_v0, %s9041_s17 }
0x11d5   :  { %6027 = vrot.lane.b32.xlu1 %v5890_v28, %s9046_s24 }
0x11d8   :  { %6047 = vrot.lane.b32.xlu0 %v5889_v50, %s9047_s26 }
0x11d9   :  { %6045 = vrot.lane.b32.xlu1 %v5888_v32, %s9047_s26 }
0x11f6   :  { %v5903_v56 = vpop.permute.xlu0 %5902 }
0x11f7   :  { %v13464_v16 = vpop.permute.xlu1 %5904 }
0x11fa   :  { %v5925_v61 = vpop.permute.xlu0 %5924 }
0x11fb   :  { %v13466_v33 = vpop.permute.xlu1 %5926 }
0x11fe   :  { %v5947_v37 = vpop.permute.xlu0 %5946 }
0x11ff   :  { %v13468_v2 = vpop.permute.xlu1 %5948 }
0x1202   :  { %v5969_v8 = vpop.permute.xlu0 %5968 }
0x1203   :  { %v13470_v41 = vpop.permute.xlu1 %5970 }
0x1206   :  { %v5991_v12 = vpop.permute.xlu0 %5990 }
0x1207   :  { %v13472_v39 = vpop.permute.xlu1 %5992 }
0x120a   :  { %v13474_v25 = vpop.permute.xlu0 %6012 }
0x120b   :  { %v13476_v14 = vpop.permute.xlu1 %6014 }
0x120e   :  { %v13478_v62 = vpop.permute.xlu0 %6034 }
0x120f   :  { %v13480_v57 = vpop.permute.xlu1 %6036 }
0x1212   :  { %v13482_v4 = vpop.permute.xlu0 %5893 }
0x1213   :  { %v5892_v18 = vpop.permute.xlu1 %5891 }
0x1214   :  { %v6053_v40 = vsel %vm15989_vm0, %v13390_v1, %v5892_v18  ;;  %v5897_v52 = vsel %vm15994_vm13, %v5892_v18, %v13482_v4  ;;  %vm15998_vm0 = vcmask 15360   ;;  %vm16002_vm13 = vcmask 56320  }
0x1215   :  { %6101 = vrot.lane.b32.xlu1 %v6053_v40, %s9048_s27  ;;  %v6054_v59 = vsel %vm15996_vm14, %v13392_v58, %v5897_v52  ;;  %v5908_v50 = vsel %vm15998_vm0, %v5903_v56, %v13464_v16  ;;  %vm16004_vm14 = vmmov %vm15993_vm4  ;;  %vm16006_vm0 = vcmask 64512  }
0x1216   :  { %v13487_v48 = vpop.permute.xlu0 %5906 }
0x1217   :  { %v5914_v31 = vpop.permute.xlu1 %5913 }
0x1218   :  { %v6056_v3 = vsel %vm15990_vm10, %v5903_v56, %v5914_v31  ;;  %vm15999_vm10 = vmmov %vm15991_vm3 }
0x1219   :  { %6107 = vrot.lane.b32.xlu0 %v6056_v3, %s9048_s27 }
0x121a   :  { %v13491_v63 = vpop.permute.xlu0 %5915 }
0x121b   :  { %v5936_v7 = vpop.permute.xlu1 %5935  ;;  %v5919_v1 = vsel %vm15997_vm2, %v5914_v31, %v13491_v63  ;;  %vm16005_vm2 = vcmask 72704  }
0x121c   :  { %v6059_v5 = vsel %vm15991_vm3, %v5925_v61, %v5936_v7  ;;  %v6057_v28 = vsel %vm15999_vm10, %v5908_v50, %v5919_v1  ;;  %vm16000_vm3 = vcmask 39936   ;;  %vm16007_vm10 = vmmov %vm15993_vm4 }
0x121d   :  { %6113 = vrot.lane.b32.xlu1 %v6059_v5, %s9048_s27 }
0x121e   :  { %v13495_v13 = vpop.permute.xlu0 %5928 }
0x121f   :  { %v5958_v43 = vpop.permute.xlu1 %5957 }
0x1220   :  { %v6062_v26 = vsel %vm15992_vm12, %v5947_v37, %v5958_v43  ;;  %vm16001_vm12 = vcmask 31744  }
0x1221   :  { %6119 = vrot.lane.b32.xlu0 %v6062_v26, %s9048_s27  ;;  %v5930_v40 = vsel %vm16001_vm12, %v5925_v61, %v13466_v33  ;;  %v5974_v61 = vsel %vm16006_vm0, %v5969_v8, %v13470_v41  ;;  %vm16009_vm12 = vcmask 89088   ;;  %vm16014_vm0 = vmmov %vm15993_vm4 }
0x1222   :  { %v13499_v46 = vpop.permute.xlu0 %5937 }
0x1223   :  { %v5980_v60 = vpop.permute.xlu1 %5979  ;;  %v5941_v18 = vsel %vm16000_vm3, %v5936_v7, %v13499_v46  ;;  %vm16008_vm3 = vcmask 80896  }
0x1224   :  { %v6065_v24 = vsel %vm15993_vm4, %v5969_v8, %v5980_v60  ;;  %v6060_v3 = vsel %vm15993_vm4, %v5930_v40, %v5941_v18 }
0x1225   :  { %6125 = vrot.lane.b32.xlu1 %v6065_v24, %s9048_s27 }
0x1226   :  { %v13505_v15 = vpop.permute.xlu0 %5950 }
0x1227   :  { %v6002_v11 = vpop.permute.xlu1 %6001 }
0x1228   :  { %v6068_v55 = vsel %vm15995_vm15, %v5991_v12, %v6002_v11  ;;  %vm16003_vm15 = vcmask 48128  }
0x1229   :  { %6131 = vrot.lane.b32.xlu0 %v6068_v55, %s9048_s27  ;;  %6103 = vrot.lane.b32.xlu1 %v6054_v59, %s9048_s27  ;;  %v5952_v26 = vsel %vm16003_vm15, %v5947_v37, %v13468_v2  ;;  %v5996_v37 = vsel %vm16008_vm3, %v5991_v12, %v13472_v39  ;;  %vm16011_vm15 = vcmask 105472   ;;  %vm16016_vm3 = vcmask 7168  }
0x122a   :  { %v5960_v34 = vpop.permute.xlu0 %5959 }
0x122b   :  { %v6024_v32 = vpop.permute.xlu1 %6023  ;;  %v5963_v5 = vsel %vm16002_vm13, %v5958_v43, %v5960_v34  ;;  %vm16010_vm13 = vcmask 97280  }
0x122c   :  { %v6063_v7 = vsel %vm16004_vm14, %v5952_v26, %v5963_v5  ;;  %v6018_v8 = vsel %vm16010_vm13, %v13474_v25, %v13476_v14  ;;  %vm16012_vm14 = vmmov %vm15993_vm4 }
0x122d   :  { %6109 = vrot.lane.b32.xlu1 %v6057_v28, %s9048_s27  ;;  %vm16019_vm13 = vmmov %vm16014_vm0 }
0x122e   :  { %v5973_v58 = vpop.permute.xlu0 %5972 }
0x122f   :  { %v5896_v31 = vpop.permute.xlu1 %5895 }
0x1231   :  { %6115 = vrot.lane.b32.xlu1 %v6060_v3, %s9048_s27 }
0x1232   :  { %v5982_v56 = vpop.permute.xlu0 %5981 }
0x1233   :  { %v5918_v24 = vpop.permute.xlu1 %5917  ;;  %v5985_v52 = vsel %vm16005_vm2, %v5980_v60, %v5982_v56  ;;  %vm16013_vm2 = vcmask 113664  }
0x1234   :  { %v6066_v43 = vsel %vm16007_vm10, %v5974_v61, %v5985_v52  ;;  %vm16015_vm10 = vmmov %vm16013_vm2 }
0x1235   :  { %6121 = vrot.lane.b32.xlu1 %v6063_v7, %s9048_s27 }
0x1236   :  { %v5995_v55 = vpop.permute.xlu0 %5994 }
0x1237   :  { %v5940_v59 = vpop.permute.xlu1 %5939 }
0x1239   :  { %6127 = vrot.lane.b32.xlu1 %v6066_v43, %s9048_s27 }
0x123a   :  { %v6004_v1 = vpop.permute.xlu0 %6003 }
0x123b   :  { %v6007_v50 = vsel %vm16009_vm12, %v6002_v11, %v6004_v1  ;;  %v5962_v28 = vpop.permute.xlu1 %5961  ;;  %vm16017_vm12 = vcmask 121856  }
0x123c   :  { %v6069_v60 = vsel %vm15993_vm4, %v5996_v37, %v6007_v50  ;;  %v6040_v50 = vsel %vm16015_vm10, %v13478_v62, %v13480_v57  ;;  %vm16018_vm4 = vmmov %vm16014_vm0  ;;  %vm16023_vm10 = vcmask 39936  }
0x123d   :  { %6133 = vrot.lane.b32.xlu1 %v6069_v60, %s9048_s27  ;;  %v5898_v60 = vsel %vm16016_vm3, %v13482_v4, %v5896_v31  ;;  %vm16024_vm3 = vcmask 31744  }
0x123e   :  { %v6017_v18 = vpop.permute.xlu0 %6016 }
0x123f   :  { %v5984_v40 = vpop.permute.xlu1 %5983 }
0x1242   :  { %v6026_v3 = vpop.permute.xlu0 %6025 }
0x1243   :  { %v6029_v5 = vsel %vm16011_vm15, %v6024_v32, %v6026_v3  ;;  %v6006_v26 = vpop.permute.xlu1 %6005  ;;  %vm16020_vm15 = vcmask 23552  }
0x1244   :  { %v6072_v7 = vsel %vm16012_vm14, %v6018_v8, %v6029_v5  ;;  %vm16021_vm14 = vmmov %vm16014_vm0 }
0x1245   :  { %6139 = vrot.lane.b32.xlu1 %v6072_v7, %s9048_s27  ;;  %v6055_v7 = vsel %vm16019_vm13, %v13396_v0, %v5898_v60  ;;  %v5931_v0 = vsel %vm16024_vm3, %v13466_v33, %v13495_v13  ;;  %vm16027_vm13 = vcmask 48128   ;;  %vm16032_vm3 = vcmask 80896  }
0x1246   :  { %v6039_v12 = vpop.permute.xlu0 %6038 }
0x1247   :  { %v6028_v11 = vpop.permute.xlu1 %6027  ;;  %v6041_v52 = vsel %vm16013_vm2, %v13480_v57, %v6039_v12  ;;  %v5920_v12 = vsel %vm16020_vm15, %v13491_v63, %v5918_v24  ;;  %v6071_v57 = vsel %vm16021_vm14, %v13474_v25, %v6024_v32  ;;  %vm16022_vm2 = vcmask 15360   ;;  %vm16028_vm15 = vmmov %vm16014_vm0 }
0x1248   :  { %v5909_v4 = vsel %vm16022_vm2, %v13464_v16, %v13487_v48  ;;  %v5953_v16 = vsel %vm16027_vm13, %v13468_v2, %v13505_v15  ;;  %vm16029_vm14 = vcmask 72704   ;;  %vm16030_vm2 = vcmask 64512  }
0x1249   :  { %v6058_v31 = vsel %vm16014_vm0, %v5909_v4, %v5920_v12  ;;  %v5975_v32 = vsel %vm16030_vm2, %v13470_v41, %v5973_v58  ;;  %vm16035_vm13 = vcmask 97280   ;;  %vm16038_vm2 = vcmask 924672  }
0x124a   :  { %v6048_v61 = vpop.permute.xlu0 %6047 }
0x124b   :  { %v6076_v43 = vsel %vm16014_vm0, %v6041_v52, %v6048_v61  ;;  %v6046_v37 = vpop.permute.xlu1 %6045  ;;  %v5942_v52 = vsel %vm16023_vm10, %v13499_v46, %v5940_v59  ;;  %v5986_v46 = vsel %vm16029_vm14, %v5982_v56, %v5984_v40  ;;  %vm16031_vm10 = vcmask 89088   ;;  %vm16037_vm14 = vmmov %vm16014_vm0 }
0x124c   :  { %v6049_v8 = vsel %vm16017_vm12, %v6046_v37, %v6048_v61  ;;  %6147 = vrot.lane.b32.xlu0 %v6076_v43, %s9048_s27  ;;  %vm16025_vm12 = vmmov %vm16014_vm0  ;;  %v6067_v33 = vsel %vm16014_vm0, %v5975_v32, %v5986_v46  ;;  %v6008_v13 = vsel %vm16031_vm10, %v6004_v1, %v6006_v26  ;;  %v6019_v56 = vsel %vm16035_vm13, %v13476_v14, %v6017_v18 }
0x124d   :  { %v6075_v5 = vsel %vm16018_vm4, %v6040_v50, %v6049_v8  ;;  %v6061_v63 = vsel %vm16025_vm12, %v5931_v0, %v5942_v52  ;;  %vm16026_vm4 = vcmask 56320   ;;  %vm16033_vm12 = vmmov %vm16014_vm0  ;;  %v6074_v58 = vsel %vm16037_vm14, %v13478_v62, %v6046_v37 }
0x124e   :  { %6145 = vrot.lane.b32.xlu1 %v6075_v5, %s9048_s27  ;;  %v5964_v25 = vsel %vm16026_vm4, %v5960_v34, %v5962_v28  ;;  %v5997_v34 = vsel %vm16032_vm3, %v13472_v39, %v5995_v55  ;;  %vm16034_vm4 = vcmask 105472  }
0x124f   :  { %v6064_v48 = vsel %vm16028_vm15, %v5953_v16, %v5964_v25  ;;  %v6070_v2 = vsel %vm16033_vm12, %v5997_v34, %v6008_v13  ;;  %v6030_v15 = vsel %vm16034_vm4, %v6026_v3, %v6028_v11  ;;  %vm16036_vm15 = vmmov %vm16014_vm0 }
0x1250   :  { %6105 = vrot.lane.b32.xlu0 %v6055_v7, %s9048_s27  ;;  %v6073_v41 = vsel %vm16036_vm15, %v6019_v56, %v6030_v15  ;;  %vm16039_vm0 = vmmov %vm16038_vm2 }
0x1251   :  { %vm16040_vm10 = vmmov %vm16039_vm0 }
0x1252   :  { %6137 = vrot.lane.b32.xlu1 %v6071_v57, %s9048_s27  ;;  %vm16041_vm3 = vmmov %vm16039_vm0 }
0x1253   :  { %vm16042_vm12 = vmmov %vm16039_vm0 }
0x1254   :  { %6111 = vrot.lane.b32.xlu0 %v6058_v31, %s9048_s27  ;;  %vm16043_vm4 = vmmov %vm16039_vm0 }
0x1255   :  { %vm16044_vm13 = vmmov %vm16039_vm0 }
0x1256   :  { %vm16045_vm15 = vmmov %vm16039_vm0 }
0x1257   :  { %vm16046_vm14 = vmmov %vm16039_vm0 }
0x1258   :  { %6117 = vrot.lane.b32.xlu0 %v6061_v63, %s9048_s27 }
0x125c   :  { %6123 = vrot.lane.b32.xlu0 %v6064_v48, %s9048_s27 }
0x1260   :  { %6129 = vrot.lane.b32.xlu0 %v6067_v33, %s9048_s27 }
0x1264   :  { %6135 = vrot.lane.b32.xlu0 %v6070_v2, %s9048_s27 }
0x1268   :  { %6141 = vrot.lane.b32.xlu0 %v6073_v41, %s9048_s27 }
0x126c   :  { %6143 = vrot.lane.b32.xlu0 %v6074_v58, %s9048_s27 }
0x1287   :  { %v6102_v24 = vpop.permute.xlu1 %6101 }
0x128b   :  { %v6108_v1 = vpop.permute.xlu0 %6107 }
0x128f   :  { %v6114_v39 = vpop.permute.xlu1 %6113 }
0x1293   :  { %v6120_v40 = vpop.permute.xlu0 %6119 }
0x1297   :  { %v6126_v55 = vpop.permute.xlu1 %6125 }
0x129b   :  { %v6104_v59 = vpop.permute.xlu1 %6103  ;;  %v6132_v3 = vpop.permute.xlu0 %6131 }
0x129c   :  { %v6149_v62 = vsel %vm16040_vm10, %v6102_v24, %v6104_v59  ;;  %vm16048_vm10 = vmmov %vm16039_vm0 }
0x129d   :  { %v6183_v12 = vand.u32 4294901760, %v6149_v62 }
0x129f   :  { %v6110_v28 = vpop.permute.xlu1 %6109  ;;  %v13617_v15 = vsub.f32 %v6149_v62, %v6183_v12 }
0x12a0   :  { %v6151_v61 = vsel %vm16038_vm2, %v6108_v1, %v6110_v28  ;;  %vm16047_vm2 = vmmov %vm16039_vm0 }
0x12a1   :  { %v6187_v60 = vand.u32 4294901760, %v6151_v61 }
0x12a3   :  { %v6116_v26 = vpop.permute.xlu1 %6115  ;;  %v13607_v31 = vpack.c.bf16 %v6187_v60, %v6183_v12  ;;  %v13615_v32 = vsub.f32 %v6151_v61, %v6187_v60 }
0x12a4   :  { %v6153_v25 = vsel %vm16044_vm13, %v6114_v39, %v6116_v26  ;;  %vm16053_vm13 = vmmov %vm16039_vm0 }
0x12a5   :  { %v6191_v2 = vand.u32 4294901760, %v6153_v25  ;;  %v14719_v39 = vand.u32 4294901760, %v13615_v32 }
0x12a7   :  { %v6122_v14 = vpop.permute.xlu1 %6121 }
0x12a8   :  { %v6155_v52 = vsel %vm16042_vm12, %v6120_v40, %v6122_v14  ;;  %vm16050_vm12 = vmmov %vm16039_vm0 }
0x12a9   :  { %v6195_v48 = vand.u32 4294901760, %v6155_v52 }
0x12ab   :  { %v6128_v37 = vpop.permute.xlu1 %6127  ;;  %v13623_v24 = vpack.c.bf16 %v6195_v48, %v6191_v2 }
0x12af   :  { %v6134_v0 = vpop.permute.xlu1 %6133 }
0x12b7   :  { %v6140_v33 = vpop.permute.xlu1 %6139 }
0x12be   :  { %v6148_v11 = vpop.permute.xlu0 %6147 }
0x12c0   :  { %v6146_v1 = vpop.permute.xlu1 %6145 }
0x12c2   :  { %v6106_v18 = vpop.permute.xlu0 %6105 }
0x12c3   :  { %v6150_v43 = vsel %vm16039_vm0, %v6104_v59, %v6106_v18  ;;  %v6159_v59 = vsel %vm16046_vm14, %v6132_v3, %v6134_v0  ;;  %vm16080_vm14 = vnez %v15290_v35  ;;  %v16098_v35 = vld [vmem:[#allocation33_spill] sm:$0xff] }
0x12c4   :  { %v6181_v5 = vand.u32 4294901760, %v6150_v43  ;;  %v6203_v62 = vand.u32 4294901760, %v6159_v59 }
0x12c6   :  { %v6112_v50 = vpop.permute.xlu0 %6111 }
0x12c7   :  { %v6152_v8 = vsel %vm16041_vm3, %v6110_v28, %v6112_v50  ;;  %v13628_v28 = vsub.f32 %v6150_v43, %v6181_v5  ;;  %v13641_v43 = vsub.f32 %v13615_v32, %v14719_v39  ;;  %vm16049_vm3 = vmmov %vm16039_vm0 }
0x12c8   :  { %v6185_v7 = vand.u32 4294901760, %v6152_v8 }
0x12ca   :  { %v6118_v57 = vpop.permute.xlu0 %6117  ;;  %v13605_v4 = vpack.c.bf16 %v6185_v7, %v6181_v5  ;;  %v13619_v56 = vsub.f32 %v6152_v8, %v6185_v7  ;;  %v6164_v7 = vsel %vm16049_vm3, %v6146_v1, %v6148_v11  ;;  %vm16084_vm3 = vnez %v15298_v10  ;;  %v16106_v10 = vld [vmem:[#allocation47_spill] sm:$0xff] }
0x12cb   :  { %v6154_v63 = vsel %vm16043_vm4, %v6116_v26, %v6118_v57  ;;  %v14720_v26 = vand.u32 4294901760, %v13617_v15  ;;  %v13650_v57 = vsub.f32 %v6155_v52, %v6195_v48  ;;  %v13664_v52 = vsub.f32 %v6153_v25, %v6191_v2  ;;  %vm16051_vm4 = vmmov %vm16039_vm0 }
0x12cc   :  { %8793 = vmatprep.subr.bf16.mxu0 %v13605_v4  ;;  %v6189_v13 = vand.u32 4294901760, %v6154_v63  ;;  %v14721_v18 = vand.u32 4294901760, %v13619_v56  ;;  %v6209_v48 = vand.u32 4294901760, %v6164_v7  ;;  %v13676_v25 = vsub.f32 %v6159_v59, %v6203_v62 }
0x12cd   :  { %8795 = vmatpush1.bf16.msra.mxu0 %v13607_v31  ;;  %v6282_v12 = vsub.f32 %v13617_v15, %v14720_v26 }
0x12ce   :  { %v6124_v16 = vpop.permute.xlu0 %6123 }
0x12cf   :  { %v6156_v46 = vsel %vm16045_vm15, %v6122_v14, %v6124_v16  ;;  %v6157_v14 = vsel %vm16039_vm0, %v6126_v55, %v6128_v37  ;;  %v6283_v22 = vand.u32 4294901760, %v6282_v12  ;;  %v16060_v12 = vand.u32 4294901760, %v13676_v25 }
0x12d0   :  { %v6193_v34 = vand.u32 4294901760, %v6156_v46  ;;  %v6199_v5 = vand.u32 4294901760, %v6157_v14  ;;  %vm16079_vm15 = vnez %v15288_v38  ;;  %vm16082_vm0 = vnez %v15294_v6  ;;  %v16096_v38 = vld [vmem:[#allocation30_spill] sm:$0xff]  ;;  %v16102_v6 = vld [vmem:[#allocation39_spill] sm:$0xff] }
0x12d2   :  { %v6130_v41 = vpop.permute.xlu0 %6129  ;;  %v13621_v58 = vpack.c.bf16 %v6193_v34, %v6189_v13  ;;  %v13635_v50 = vsub.f32 %v6156_v46, %v6193_v34  ;;  %v6288_v34 = vsub.f32 %v13619_v56, %v14721_v18  ;;  %v13688_v54 = vsub.f32 %v6157_v14, %v6199_v5 }
0x12d3   :  { %v6158_v40 = vsel %vm16047_vm2, %v6128_v37, %v6130_v41  ;;  %v13645_v37 = vsub.f32 %v6154_v63, %v6189_v13  ;;  %v13657_v41 = vpack.c.bf16 %v6203_v62, %v6199_v5  ;;  %vm16081_vm2 = vnez %v15292_v42  ;;  %v16100_v42 = vld [vmem:[#allocation34_spill] sm:$0xff] }
0x12d4   :  { %8797 = vmatprep.subr.bf16.mxu0 %v13621_v58  ;;  %v6197_v60 = vand.u32 4294901760, %v6158_v40  ;;  %v6289_v11 = vand.u32 4294901760, %v6288_v34  ;;  %v16063_v51 = vand.u32 4294901760, %v13688_v54 }
0x12d5   :  { %8799 = vmatpush1.bf16.msra.mxu0 %v13623_v24 }
0x12d6   :  { %v6136_v61 = vpop.permute.xlu0 %6135  ;;  %v13669_v55 = vsub.f32 %v6158_v40, %v6197_v60 }
0x12d7   :  { %v6160_v3 = vsel %vm16048_vm10, %v6134_v0, %v6136_v61  ;;  %v6138_v0 = vpop.permute.xlu1 %6137  ;;  %v6295_v61 = vand.u32 4294901760, %v13641_v43  ;;  %v13691_v43 = vsub.f32 %v6164_v7, %v6209_v48  ;;  %vm16083_vm10 = vnez %v15296_v9  ;;  %v16104_v9 = vld [vmem:[#allocation40_spill] sm:$0xff] }
0x12d8   :  { %v6201_v8 = vand.u32 4294901760, %v6160_v3  ;;  %v6161_v26 = vsel %vm16051_vm4, %v6138_v0, %v6140_v33  ;;  %vm16086_vm4 = vnez %v15302_v21  ;;  %v16110_v21 = vld [vmem:[#allocation55_spill] sm:$0xff] }
0x12d9   :  { %v6207_v59 = vand.u32 4294901760, %v6161_v26 }
0x12da   :  { %v6142_v16 = vpop.permute.xlu0 %6141  ;;  %v13652_v46 = vpack.c.bf16 %v6201_v8, %v6197_v60  ;;  %v13660_v63 = vsub.f32 %v6160_v3, %v6201_v8  ;;  %v16052_v3 = vand.u32 4294901760, %v13628_v28  ;;  %v16054_v60 = vand.u32 4294901760, %v13635_v50 }
0x12db   :  { %v6162_v13 = vsel %vm16050_vm12, %v6140_v33, %v6142_v16  ;;  %v13713_v14 = vsub.f32 %v6161_v26, %v6207_v59  ;;  %v16061_v26 = vld [vmem:[#allocation170_spill] sm:$0xff]  ;;  %vm16085_vm12 = vnez %v15300_v20  ;;  %v16108_v20 = vld [vmem:[#allocation48_spill] sm:$0xff] }
0x12dc   :  { %v6205_v39 = vand.u32 4294901760, %v6162_v13  ;;  %8801 = vmatprep.subr.bf16.mxu0 %v13652_v46  ;;  %v6276_v8 = vsub.f32 %v13628_v28, %v16052_v3  ;;  %v6312_v18 = vsub.f32 %v13635_v50, %v16054_v60 }
0x12dd   :  { %8803 = vmatpush1.bf16.msra.mxu0 %v13657_v41 }
0x12de   :  { %v6144_v2 = vpop.permute.xlu0 %6143  ;;  %v13678_v16 = vpack.c.bf16 %v6209_v48, %v6205_v39  ;;  %v13681_v0 = vsub.f32 %v6162_v13, %v6205_v39  ;;  %v6277_v39 = vand.u32 4294901760, %v6276_v8  ;;  %v16055_v13 = vand.u32 4294901760, %v13645_v37 }
0x12df   :  { %v6163_v40 = vsel %vm16053_vm13, %v6144_v2, %v6146_v1  ;;  %v16056_v2 = vand.u32 4294901760, %v13650_v57  ;;  %v6313_v33 = vand.u32 4294901760, %v6312_v18  ;;  %v16057_v8 = vand.u32 4294901760, %v13660_v63 }
0x12e0   :  { %v6211_v62 = vand.u32 4294901760, %v6163_v40  ;;  %8805 = vmatprep.subr.bf16.mxu0 %v13678_v16  ;;  %v6300_v1 = vsub.f32 %v13645_v37, %v16055_v13  ;;  %v8808_v48 = vpack.c.bf16 %v6289_v11, %v6277_v39  ;;  %v16058_v13 = vand.u32 4294901760, %v13664_v52 }
0x12e1   :  { %v6318_v60 = vsub.f32 %v13650_v57, %v16056_v2  ;;  %v6336_v34 = vsub.f32 %v13660_v63, %v16057_v8  ;;  %v16059_v18 = vand.u32 4294901760, %v13669_v55  ;;  %v6342_v8 = vsub.f32 %v13676_v25, %v16060_v12 }
0x12e2   :  { %v13701_v5 = vpack.c.bf16 %v6211_v62, %v6207_v59  ;;  %v13703_v3 = vsub.f32 %v6163_v40, %v6211_v62  ;;  %v6306_v19 = vsub.f32 %v13664_v52, %v16058_v13  ;;  %v6301_v11 = vand.u32 4294901760, %v6300_v1 }
0x12e3   :  { %v6324_v62 = vsub.f32 %v13669_v55, %v16059_v18  ;;  %v6319_v39 = vand.u32 4294901760, %v6318_v60  ;;  %v8810_v2 = vpack.c.bf16 %v6295_v61, %v6283_v22  ;;  %v6337_v7 = vand.u32 4294901760, %v6336_v34 }
0x12e4   :  { %8807 = vmatpush1.bf16.msra.mxu0 %v13701_v5  ;;  %v6365_v13 = vand.u32 4294901760, %v13703_v3  ;;  %v8812_v59 = vpack.c.bf16 %v6313_v33, %v6301_v11  ;;  %v16062_v40 = vand.u32 4294901760, %v13681_v0  ;;  %v6330_v60 = vsub.f32 %v13688_v54, %v16063_v51 }
0x12e5   :  { %8809 = vmatprep.subr.bf16.mxu0 %v8808_v48  ;;  %v6307_v48 = vand.u32 4294901760, %v6306_v19  ;;  %v6353_v18 = vand.u32 4294901760, %v13713_v14  ;;  %v6325_v22 = vand.u32 4294901760, %v6324_v62  ;;  %v16064_v61 = vand.u32 4294901760, %v13691_v43 }
0x12e6   :  { %v6348_v1 = vsub.f32 %v13681_v0, %v16062_v40  ;;  %v6343_v34 = vand.u32 4294901760, %v6342_v8  ;;  %v6366_v19 = vsub.f32 %v13703_v3, %v6365_v13  ;;  %v6331_v51 = vand.u32 4294901760, %v6330_v60 }
0x12e7   :  { %6267 = vmatmul.mubr.f32.vlgmr.msra.gmra.mrb[18].mxu0 %v16061_v26  ;;  %v6360_v33 = vsub.f32 %v13691_v43, %v16064_v61  ;;  %v8814_v40 = vpack.c.bf16 %v6319_v39, %v6307_v48  ;;  %v8816_v11 = vpack.c.bf16 %v6337_v7, %v6325_v22  ;;  %v8824_v39 = vpack.c.bf16 %v13619_v56, %v13628_v28 }
0x12e8   :  { %8811 = vmatpush1.bf16.msra.mxu0 %v8810_v2  ;;  %6417 = vmatprep.mubr.f32.mxu0 %v15268_v27  ;;  %v6349_v12 = vand.u32 4294901760, %v6348_v1  ;;  %v6354_v2 = vsub.f32 %v13713_v14, %v6353_v18  ;;  %v6367_v26 = vand.u32 4294901760, %v6366_v19  ;;  %v8826_v7 = vpack.c.bf16 %v13615_v32, %v13617_v15 }
0x12e9   :  { %8813 = vmatprep.subr.bf16.mxu0 %v8812_v59  ;;  %v6361_v62 = vand.u32 4294901760, %v6360_v33  ;;  %v8818_v59 = vpack.c.bf16 %v6343_v34, %v6331_v51  ;;  %v8828_v1 = vpack.c.bf16 %v13635_v50, %v13645_v37  ;;  %v8832_v48 = vpack.c.bf16 %v13660_v63, %v13669_v55 }
0x12ea   :  { %v6355_v61 = vand.u32 4294901760, %v6354_v2  ;;  %v8834_v60 = vpack.c.bf16 %v13676_v25, %v13688_v54  ;;  %v8836_v22 = vpack.c.bf16 %v13691_v43, %v13681_v0  ;;  %v8838_v33 = vpack.c.bf16 %v13703_v3, %v13713_v14 }
0x12eb   :  { %v8820_v29 = vpack.c.bf16 %v6361_v62, %v6349_v12  ;;  %v16065_v34 = vand.u32 4294901760, %v13628_v28  ;;  %v16066_v19 = vand.u32 4294901760, %v13619_v56  ;;  %v16069_v51 = vand.u32 4294901760, %v13645_v37 }
0x12ec   :  { %8815 = vmatpush1.bf16.msra.mxu0 %v8814_v40  ;;  %v8822_v8 = vpack.c.bf16 %v6367_v26, %v6355_v61  ;;  %v16070_v2 = vand.u32 4294901760, %v13635_v50  ;;  %v16071_v56 = vand.u32 4294901760, %v13664_v52  ;;  %v16072_v28 = vand.u32 4294901760, %v13650_v57 }
0x12ed   :  { %8817 = vmatprep.subr.bf16.mxu0 %v8816_v11  ;;  %v8856_v40 = vpack.c.bf16 %v16066_v19, %v16065_v34  ;;  %v16068_v11 = vand.u32 4294901760, %v13615_v32  ;;  %v16074_v32 = vand.u32 4294901760, %v13660_v63  ;;  %v16076_v50 = vand.u32 4294901760, %v13676_v25 }
0x12ee   :  { %v8860_v62 = vpack.c.bf16 %v16070_v2, %v16069_v51  ;;  %v8862_v26 = vpack.c.bf16 %v16072_v28, %v16071_v56  ;;  %v16077_v61 = vand.u32 4294901760, %v13681_v0  ;;  %vm16087_vm13 = vnez %v15304_v23  ;;  %v16112_v23 = vld [vmem:[#allocation56_spill] sm:$0xff] }
0x12f0   :  { %8819 = vmatpush1.bf16.msra.mxu0 %v8818_v59 }
0x12f1   :  { %8821 = vmatprep.subr.bf16.mxu0 %v8820_v29  ;;  %v8830_v29 = vpack.c.bf16 %v13650_v57, %v13664_v52 }
0x12f4   :  { %8823 = vmatpush1.bf16.msra.mxu0 %v8822_v8  ;;  %v16078_v8 = vand.u32 4294901760, %v13691_v43 }
0x12f5   :  { %8825 = vmatprep.subr.bf16.mxu0 %v8824_v39 }
0x12f6   :  { %v8868_v52 = vpack.c.bf16 %v16078_v8, %v16077_v61 }
0x12f7   :  { %6419 = vmatmul.mubr.f32.vlgmr.msra.gmra.mrb[18].mxu0 %v11046_v44 }
0x12f8   :  { %8827 = vmatpush1.bf16.msra.mxu0 %v8826_v7  ;;  %6521 = vmatprep.mubr.f32.mxu0 %v15268_v27 }
0x12f9   :  { %8829 = vmatprep.subr.bf16.mxu0 %v8828_v1 }
0x12fc   :  { %8831 = vmatpush1.bf16.msra.mxu0 %v8830_v29 }
0x12fd   :  { %8833 = vmatprep.subr.bf16.mxu0 %v8832_v48 }
0x1300   :  { %8835 = vmatpush1.bf16.msra.mxu0 %v8834_v60 }
0x1301   :  { %8837 = vmatprep.subr.bf16.mxu0 %v8836_v22 }
0x1304   :  { %8839 = vmatpush1.bf16.msra.mxu0 %v8838_v33 }
0x1305   :  { %8841 = vmatprep.subr.bf16.mxu0 %v13605_v4 }
0x1307   :  { %6524 = vmatmul.mubr.f32.vlgmr.msra.gmra.mrb[18].mxu0 %v11078_v30  ;;  %v16067_v30 = vand.u32 4294901760, %v13617_v15  ;;  %v16073_v15 = vand.u32 4294901760, %v13669_v55  ;;  %v8870_v55 = vpack.c.bf16 %v6365_v13, %v6353_v18 }
0x1308   :  { %8843 = vmatpush1.bf16.msra.mxu0 %v13607_v31  ;;  %6610 = vmatprep.mubr.f32.mxu0 %v15268_v27 }
0x1309   :  { %8845 = vmatprep.subr.bf16.mxu0 %v13621_v58  ;;  %v8858_v12 = vpack.c.bf16 %v16068_v11, %v16067_v30  ;;  %v8864_v59 = vpack.c.bf16 %v16074_v32, %v16073_v15 }
0x130c   :  { %8847 = vmatpush1.bf16.msra.mxu0 %v13623_v24 }
0x130d   :  { %8849 = vmatprep.subr.bf16.mxu0 %v13652_v46 }
0x1310   :  { %8851 = vmatpush1.bf16.msra.mxu0 %v13657_v41 }
0x1311   :  { %8853 = vmatprep.subr.bf16.mxu0 %v13678_v16 }
0x1314   :  { %8855 = vmatpush1.bf16.msra.mxu0 %v13701_v5 }
0x1315   :  { %8857 = vmatprep.subr.bf16.mxu0 %v8856_v40 }
0x1317   :  { %6614 = vmatmul.mubr.f32.vlgmr.msra.gmra.mrb[18].mxu0 %v11125_v49  ;;  %v16075_v49 = vand.u32 4294901760, %v13688_v54  ;;  %v16122_v54 = vld [vmem:[#allocation71_spill] sm:$0xff] }
0x1318   :  { %8859 = vmatpush1.bf16.msra.mxu0 %v8858_v12  ;;  %6732 = vmatprep.mubr.f32.mxu0 %v15268_v27 }
0x1319   :  { %8861 = vmatprep.subr.bf16.mxu0 %v8860_v62  ;;  %v8866_v37 = vpack.c.bf16 %v16076_v50, %v16075_v49 }
0x131c   :  { %8863 = vmatpush1.bf16.msra.mxu0 %v8862_v26 }
0x131d   :  { %8865 = vmatprep.subr.bf16.mxu0 %v8864_v59 }
0x1320   :  { %8867 = vmatpush1.bf16.msra.mxu0 %v8866_v37 }
0x1321   :  { %8869 = vmatprep.subr.bf16.mxu0 %v8868_v52 }
0x1324   :  { %8871 = vmatpush1.bf16.msra.mxu0 %v8870_v55 }
0x1325   :  { %8873 = vmatprep.subr.bf16.mxu0 %v13605_v4  ;;  %v16124_v4 = vld [vmem:[#allocation72_spill] sm:$0xff] }
0x1327   :  { %6734 = vmatmul.mubr.f32.vlgmr.msra.gmra.mrb[18].mxu0 %v11046_v44 }
0x1328   :  { %8875 = vmatpush1.bf16.msra.mxu0 %v13607_v31  ;;  %6820 = vmatprep.mubr.f32.mxu0 %v15268_v27  ;;  %v16094_v27 = vld [vmem:[#allocation29_spill] sm:$0xff]  ;;  %v16126_v31 = vld [vmem:[#allocation79_spill] sm:$0xff] }
0x1329   :  { %8877 = vmatprep.subr.bf16.mxu0 %v13621_v58  ;;  %v16128_v58 = vld [vmem:[#allocation80_spill] sm:$0xff] }
0x132c   :  { %8879 = vmatpush1.bf16.msra.mxu0 %v13623_v24  ;;  %v16130_v24 = vld [vmem:[#allocation87_spill] sm:$0xff] }
0x132d   :  { %8881 = vmatprep.subr.bf16.mxu0 %v13652_v46  ;;  %v16132_v46 = vld [vmem:[#allocation88_spill] sm:$0xff] }
0x1330   :  { %8883 = vmatpush1.bf16.msra.mxu0 %v13657_v41 }
0x1331   :  { %8885 = vmatprep.subr.bf16.mxu0 %v13678_v16 }
0x1334   :  { %8887 = vmatpush1.bf16.msra.mxu0 %v13701_v5 }
0x1335   :  { %7947 = vmatprep.subr.msk.bf16.mxu0 %vm16079_vm15, %v14957_v47  ;;  %vm16088_vm15 = vnez %v15307_v36  ;;  %v16114_v36 = vld [vmem:[#allocation2_spill] sm:$0xff] }
0x1337   :  { %6822 = vmatmul.mubr.f32.vlgmr.msra.gmra.mrb[18].mxu0 %v11046_v44  ;;  %v16092_v44 = vld [vmem:[#allocation26_spill] sm:$0xff] }
0x1338   :  { %7949 = vmatpush1.bf16.msk.msra.mxu0 %vm16080_vm14, %v14957_v47  ;;  %vm16089_vm14 = vnez %v15309_v45  ;;  %v16116_v45 = vld [vmem:[#allocation63_spill] sm:$0xff] }
0x1339   :  { %7951 = vmatprep.subr.msk.bf16.mxu0 %vm16081_vm2, %v14957_v47  ;;  %vm16090_vm2 = vnez %v15313_v17  ;;  %v16118_v17 = vld [vmem:[#allocation64_spill] sm:$0xff] }
0x133c   :  { %7953 = vmatpush1.bf16.msk.msra.mxu0 %vm16082_vm0, %v14957_v47  ;;  %vm16091_vm0 = vnez %v15315_v53  ;;  %v16120_v53 = vld [vmem:[#allocation3_spill] sm:$0xff] }
0x133d   :  { %7955 = vmatprep.subr.msk.bf16.mxu0 %vm16083_vm10, %v14957_v47  ;;  %vm16093_vm10 = vnez %v16092_v44 }
0x1340   :  { %7957 = vmatpush1.bf16.msk.msra.mxu0 %vm16084_vm3, %v14957_v47  ;;  %vm16095_vm3 = vnez %v16094_v27 }
0x1341   :  { %7959 = vmatprep.subr.msk.bf16.mxu0 %vm16085_vm12, %v14957_v47  ;;  %vm16097_vm12 = vnez %v16096_v38 }
0x1344   :  { %7961 = vmatpush1.bf16.msk.msra.mxu0 %vm16086_vm4, %v14957_v47  ;;  %vm16099_vm4 = vnez %v16098_v35 }
0x1345   :  { %7963 = vmatprep.subr.msk.bf16.mxu0 %vm16087_vm13, %v14957_v47  ;;  %vm16101_vm13 = vnez %v16100_v42 }
0x1348   :  { %7965 = vmatpush1.bf16.msk.msra.mxu0 %vm16088_vm15, %v14957_v47  ;;  %vm16103_vm15 = vnez %v16102_v6 }
0x1349   :  { %7967 = vmatprep.subr.msk.bf16.mxu0 %vm16089_vm14, %v14957_v47  ;;  %vm16105_vm14 = vnez %v16104_v9 }
0x134c   :  { %7969 = vmatpush1.bf16.msk.msra.mxu0 %vm16090_vm2, %v14957_v47  ;;  %vm16107_vm2 = vnez %v16106_v10 }
0x134d   :  { %7971 = vmatprep.subr.msk.bf16.mxu0 %vm16091_vm0, %v14957_v47  ;;  %vm16109_vm0 = vnez %v16108_v20 }
0x1350   :  { %7973 = vmatpush1.bf16.msk.msra.mxu0 %vm16093_vm10, %v14957_v47  ;;  %vm16111_vm10 = vnez %v16110_v21  ;;  %v16137_v21 = vld [vmem:[#allocation96_spill] sm:$0xff] }
0x1351   :  { %7975 = vmatprep.subr.msk.bf16.mxu0 %vm16095_vm3, %v14957_v47  ;;  %vm16113_vm3 = vnez %v16112_v23  ;;  %v16139_v23 = vld [vmem:[#allocation35_spill] sm:$0xff] }
0x1354   :  { %7977 = vmatpush1.bf16.msk.msra.mxu0 %vm16097_vm12, %v14957_v47  ;;  %vm16115_vm12 = vnez %v16114_v36  ;;  %v16141_v36 = vld [vmem:[#allocation36_spill] sm:$0xff] }
0x1355   :  { %7979 = vmatprep.subr.msk.bf16.mxu0 %vm16099_vm4, %v14957_v47  ;;  %vm16117_vm4 = vnez %v16116_v45  ;;  %v16143_v45 = vld [vmem:[#allocation41_spill] sm:$0xff] }
0x1358   :  { %7981 = vmatpush1.bf16.msk.msra.mxu0 %vm16101_vm13, %v14957_v47  ;;  %vm16119_vm13 = vnez %v16118_v17  ;;  %v16145_v17 = vld [vmem:[#allocation42_spill] sm:$0xff] }
0x1359   :  { %7983 = vmatprep.subr.msk.bf16.mxu0 %vm16103_vm15, %v14957_v47  ;;  %vm16121_vm15 = vnez %v16120_v53  ;;  %v16147_v53 = vld [vmem:[#allocation49_spill] sm:$0xff] }
0x135c   :  { %7985 = vmatpush1.bf16.msk.msra.mxu0 %vm16105_vm14, %v14957_v47  ;;  %vm16123_vm14 = vnez %v16122_v54  ;;  %v16149_v54 = vld [vmem:[#allocation50_spill] sm:$0xff] }
0x135d   :  { %7987 = vmatprep.subr.msk.bf16.mxu0 %vm16107_vm2, %v14957_v47  ;;  %vm16125_vm2 = vnez %v16124_v4  ;;  %v16151_v4 = vld [vmem:[#allocation179_spill] sm:$0xff] }
0x1360   :  { %7989 = vmatpush1.bf16.msk.msra.mxu0 %vm16109_vm0, %v14957_v47  ;;  %vm16127_vm0 = vnez %v16126_v31  ;;  %v16153_v31 = vld [vmem:[#allocation57_spill] sm:$0xff] }
0x1361   :  { %7991 = vmatprep.subr.msk.bf16.mxu0 %vm16111_vm10, %v14957_v47  ;;  %vm16129_vm10 = vnez %v16128_v58  ;;  %v16155_v58 = vld [vmem:[#allocation58_spill] sm:$0xff] }
0x1364   :  { %7993 = vmatpush1.bf16.msk.msra.mxu0 %vm16113_vm3, %v14957_v47  ;;  %vm16131_vm3 = vnez %v16130_v24  ;;  %v16157_v24 = vld [vmem:[#allocation180_spill] sm:$0xff] }
0x1365   :  { %7995 = vmatprep.subr.msk.bf16.mxu0 %vm16115_vm12, %v14957_v47  ;;  %vm16134_vm12 = vcmask 1042432  }
0x1368   :  { %7997 = vmatpush1.bf16.msk.msra.mxu0 %vm16117_vm4, %v14957_v47  ;;  %vm16135_vm4 = vmmov %vm16134_vm12 }
0x1369   :  { %7999 = vmatprep.subr.msk.bf16.mxu0 %vm16119_vm13, %v14957_v47  ;;  %vm16136_vm13 = vmmov %vm16135_vm4 }
0x136c   :  { %8001 = vmatpush1.bf16.msk.msra.mxu0 %vm16121_vm15, %v14957_v47  ;;  %vm16138_vm15 = vnez %v16137_v21 }
0x136d   :  { %8003 = vmatprep.subr.msk.bf16.mxu0 %vm16123_vm14, %v14957_v47  ;;  %vm16140_vm14 = vnez %v16139_v23 }
0x1370   :  { %8005 = vmatpush1.bf16.msk.msra.mxu0 %vm16125_vm2, %v14957_v47  ;;  %vm16142_vm2 = vnez %v16141_v36 }
0x1371   :  { %8007 = vmatprep.subr.msk.bf16.mxu0 %vm16127_vm0, %v14957_v47  ;;  %vm16144_vm0 = vnez %v16143_v45  ;;  %v16243_v45 = vld [vmem:[#allocation216_spill] sm:$0xff] }
0x1374   :  { %8009 = vmatpush1.bf16.msk.msra.mxu0 %vm16129_vm10, %v14957_v47  ;;  %vm16146_vm10 = vnez %v16145_v17 }
0x1375   :  { %8011 = vmatprep.subr.msk.bf16.mxu0 %vm16131_vm3, %v14957_v47  ;;  %vm16148_vm3 = vnez %v16147_v53 }
0x140a   :  { %v6823_v57 = vpop.f32.mrb[18].mxu0 }
0x140b   :  { %v13915_v41 = vadd.f32 %v6823_v57, %v16132_v46  ;;  %v6825_v63 = vpop.f32.mrb[19].mxu0  ;;  %v16159_v57 = vld [vmem:[#allocation181_spill] sm:$0xff] }
0x140c   :  { %v8901_v43 = vadd.f32 %v6825_v63, %v16132_v46  ;;  %v16161_v46 = vld [vmem:[#allocation65_spill] sm:$0xff]  ;;  %v16163_v63 = vld [vmem:[#allocation66_spill] sm:$0xff] }
0x140d   :  { %v6834_v25 = vpack.c.bf16 %v13915_v41, %v13915_v41 }
0x140e   :  { %v6831_v16 = vrot.slane %v8901_v43, 3  ;;  %v6835_v0 = vpack.c.bf16 %v8901_v43, %v8901_v43 }
0x140f   :  { %v6838_v3 = vunpack.c.l.bf16 %v6834_v25 }
0x1410   :  { %v6837_v14 = vpack.c.bf16 %v6831_v16, %v6831_v16  ;;  %v6839_v5 = vunpack.c.l.bf16 %v6835_v0 }
0x1411   :  { %v6842_v13 = vsub.f32 %v13915_v41, %v6838_v3  ;;  %v16173_v3 = vld [vmem:[#allocation184_spill] sm:$0xff] }
0x1412   :  { %v6841_v18 = vunpack.c.l.bf16 %v6837_v14  ;;  %v6843_v39 = vsub.f32 %v8901_v43, %v6839_v5  ;;  %v16165_v43 = vld [vmem:[#allocation182_spill] sm:$0xff]  ;;  %v16177_v5 = vld [vmem:[#allocation81_spill] sm:$0xff] }
0x1413   :  { %v6846_v7 = vpack.c.bf16 %v6842_v13, %v6842_v13 }
0x1414   :  { %v6845_v1 = vsub.f32 %v6831_v16, %v6841_v18  ;;  %v6847_v29 = vpack.c.bf16 %v6843_v39, %v6843_v39  ;;  %v16169_v16 = vld [vmem:[#allocation73_spill] sm:$0xff]  ;;  %v16181_v18 = vld [vmem:[#allocation186_spill] sm:$0xff] }
0x1415   :  { %v6850_v48 = vunpack.c.l.bf16 %v6846_v7  ;;  %v6863_v60 = vshrl.u32 %v6846_v7, 16  ;;  %v6866_v22 = vshll.u32 %v6846_v7, 16  ;;  %v16185_v7 = vld [vmem:[#allocation89_spill] sm:$0xff] }
0x1416   :  { %v6849_v33 = vpack.c.bf16 %v6845_v1, %v6845_v1  ;;  %v6851_v34 = vunpack.c.l.bf16 %v6847_v29  ;;  %v6871_v19 = vshrl.u32 %v6847_v29, 16  ;;  %v6874_v40 = vshll.u32 %v6847_v29, 16  ;;  %v16189_v29 = vld [vmem:[#allocation188_spill] sm:$0xff] }
0x1417   :  { %v6854_v30 = vsub.f32 %v6842_v13, %v6850_v48  ;;  %v6865_v11 = vrot.slane %v6863_v60, 6  ;;  %v6868_v12 = vrot.slane %v6866_v22, 7  ;;  %v16179_v13 = vld [vmem:[#allocation82_spill] sm:$0xff]  ;;  %v16191_v48 = vld [vmem:[#allocation189_spill] sm:$0xff]  ;;  %v6830_v60 = vrot.slane %v13915_v41, 3  ;;  %v16203_v41 = vld [vmem:[#allocation195_spill] sm:$0xff] }
0x1418   :  { %v6855_v51 = vsub.f32 %v6843_v39, %v6851_v34  ;;  %v6873_v2 = vrot.slane %v6871_v19, 6  ;;  %v6876_v62 = vrot.slane %v6874_v40, 7  ;;  %v6853_v56 = vunpack.c.l.bf16 %v6849_v33  ;;  %v16183_v39 = vld [vmem:[#allocation187_spill] sm:$0xff]  ;;  %v16193_v22 = vld [vmem:[#allocation190_spill] sm:$0xff]  ;;  %v16197_v34 = vld [vmem:[#allocation192_spill] sm:$0xff] }
0x1419   :  { %v6858_v28 = vpack.c.bf16 %v6854_v30, %v6854_v30  ;;  %v6869_v26 = vor.u32 %v6868_v12, %v6865_v11  ;;  %v6887_v15 = vshrl.u32 %v6849_v33, 16  ;;  %v6890_v32 = vshll.u32 %v6849_v33, 16  ;;  %v16195_v33 = vld [vmem:[#allocation191_spill] sm:$0xff]  ;;  %v16199_v19 = vld [vmem:[#allocation193_spill] sm:$0xff]  ;;  %v16201_v30 = vld [vmem:[#allocation194_spill] sm:$0xff] }
0x141a   :  { %v6859_v59 = vpack.c.bf16 %v6855_v51, %v6855_v51  ;;  %v6877_v49 = vor.u32 %v6876_v62, %v6873_v2  ;;  %v6857_v50 = vsub.f32 %v6845_v1, %v6853_v56  ;;  %v16187_v1 = vld [vmem:[#allocation90_spill] sm:$0xff]  ;;  %v6836_v40 = vpack.c.bf16 %v6830_v60, %v6830_v60  ;;  %v16205_v11 = vld [vmem:[#allocation196_spill] sm:$0xff]  ;;  %v16207_v12 = vld [vmem:[#allocation197_spill] sm:$0xff] }
0x141b   :  { %v6902_v37 = vrot.slane %v6858_v28, 5  ;;  %v6889_v61 = vrot.slane %v6887_v15, 6  ;;  %v6892_v8 = vrot.slane %v6890_v32, 7  ;;  %v6906_v27 = vsel %vm12010_vm7, %v6834_v25, %v6869_v26  ;;  %v16167_v25 = vld [vmem:[#allocation183_spill] sm:$0xff]  ;;  %v16209_v2 = vld [vmem:[#allocation198_spill] sm:$0xff]  ;;  %v16213_v56 = vld [vmem:[#allocation200_spill] sm:$0xff] }
0x141c   :  { %v6903_v52 = vrot.slane %v6859_v59, 5  ;;  %v6907_v44 = vsel %vm12010_vm7, %v6835_v0, %v6877_v49  ;;  %v6861_v38 = vpack.c.bf16 %v6857_v50, %v6857_v50  ;;  %v16171_v0 = vld [vmem:[#allocation74_spill] sm:$0xff]  ;;  %v6840_v51 = vunpack.c.l.bf16 %v6836_v40  ;;  %v16211_v62 = vld [vmem:[#allocation199_spill] sm:$0xff]  ;;  %v16215_v28 = vld [vmem:[#allocation201_spill] sm:$0xff] }
0x141d   :  { %v6893_v35 = vor.u32 %v6892_v8, %v6889_v61  ;;  %v6912_v9 = vsel %vm16135_vm4, %v6906_v27, %v6902_v37  ;;  %vm16152_vm4 = vnez %v16151_v4  ;;  %v16217_v15 = vld [vmem:[#allocation202_spill] sm:$0xff]  ;;  %v16219_v32 = vld [vmem:[#allocation203_spill] sm:$0xff]  ;;  %v16221_v59 = vld [vmem:[#allocation204_spill] sm:$0xff] }
0x141e   :  { %v6916_v42 = vsel %vm16134_vm12, %v6907_v44, %v6903_v52  ;;  %v6905_v6 = vrot.slane %v6861_v38, 5  ;;  %vm16150_vm12 = vnez %v16149_v54  ;;  %v6844_v26 = vsub.f32 %v6830_v60, %v6840_v51  ;;  %v16223_v49 = vld [vmem:[#allocation205_spill] sm:$0xff]  ;;  %v16225_v37 = vld [vmem:[#allocation206_spill] sm:$0xff]  ;;  %v16227_v61 = vld [vmem:[#allocation207_spill] sm:$0xff] }
0x141f   :  { %6958 = vmatprep.mubr.bf16.mxu1 %v6916_v42  ;;  %7044 = vmatprep.mubr.bf16.mxu0 %v6916_v42  ;;  %v6909_v10 = vsel %vm12010_vm7, %v6837_v14, %v6893_v35  ;;  %v16175_v14 = vld [vmem:[#allocation185_spill] sm:$0xff]  ;;  %v16229_v8 = vld [vmem:[#allocation208_spill] sm:$0xff]  ;;  %v16233_v35 = vld [vmem:[#allocation210_spill] sm:$0xff] }
0x1420   :  { %6959 = vmatmul.mubr.bf16.vlgmr.msra.gmra.mrb[28].mxu1 %v6912_v9  ;;  %7045 = vmatmul.mubr.bf16.vlgmr.msra.gmra.mrb[28].mxu0 %v6912_v9  ;;  %v6924_v20 = vsel %vm16136_vm13, %v6909_v10, %v6905_v6  ;;  %vm16154_vm13 = vnez %v16153_v31  ;;  %v6848_v50 = vpack.c.bf16 %v6844_v26, %v6844_v26  ;;  %v16231_v52 = vld [vmem:[#allocation209_spill] sm:$0xff]  ;;  %v16235_v42 = vld [vmem:[#allocation211_spill] sm:$0xff]  ;;  %v16237_v6 = vld [vmem:[#allocation212_spill] sm:$0xff] }
0x1421   :  { %7885 = vmatpush1.bf16.msk.msra.mxu1 %vm16138_vm15, %v14957_v47  ;;  %8013 = vmatpush1.bf16.msk.msra.mxu0 %vm16140_vm14, %v14957_v47  ;;  %vm16156_vm15 = vnez %v16155_v58  ;;  %vm16158_vm14 = vnez %v16157_v24  ;;  %v16239_v9 = vld [vmem:[#allocation213_spill] sm:$0xff] }
0x1422   :  { %7001 = vmatprep.mubr.bf16.mxu1 %v6924_v20  ;;  %7087 = vmatprep.mubr.bf16.mxu0 %v6924_v20  ;;  %v6852_v44 = vunpack.c.l.bf16 %v6848_v50  ;;  %v6879_v27 = vshrl.u32 %v6848_v50, 16  ;;  %v6882_v38 = vshll.u32 %v6848_v50, 16  ;;  %v16249_v24 = vld [vmem:[#allocation221_spill] sm:$0xff]  ;;  %v16260_v50 = vld [vmem:[#allocation4_spill] sm:$0xff] }
0x1423   :  { %7887 = vmatprep.subr.msk.bf16.mxu1 %vm16142_vm2, %v14957_v47  ;;  %8015 = vmatprep.subr.msk.bf16.mxu0 %vm16144_vm0, %v14957_v47  ;;  %vm16160_vm2 = vnez %v16159_v57  ;;  %vm16162_vm0 = vnez %v16161_v46 }
0x1424   :  { %v6856_v10 = vsub.f32 %v6844_v26, %v6852_v44  ;;  %v6881_v20 = vrot.slane %v6879_v27, 6  ;;  %v6884_v21 = vrot.slane %v6882_v38, 7 }
0x1425   :  { %7889 = vmatpush1.bf16.msk.msra.mxu1 %vm16146_vm10, %v14957_v47  ;;  %8017 = vmatpush1.bf16.msk.msra.mxu0 %vm16148_vm3, %v14957_v47  ;;  %vm16164_vm10 = vnez %v16163_v63  ;;  %vm16166_vm3 = vnez %v16165_v43  ;;  %v16251_v63 = vld [vmem:[#allocation222_spill] sm:$0xff]  ;;  %v16253_v43 = vld [vmem:[#allocation223_spill] sm:$0xff] }
0x1426   :  { %7891 = vmatprep.subr.msk.bf16.mxu1 %vm16150_vm12, %v14957_v47  ;;  %8019 = vmatprep.subr.msk.bf16.mxu0 %vm16152_vm4, %v14957_v47  ;;  %vm16168_vm12 = vnez %v16167_v25  ;;  %vm16170_vm4 = vnez %v16169_v16  ;;  %v6860_v53 = vpack.c.bf16 %v6856_v10, %v6856_v10  ;;  %v6885_v54 = vor.u32 %v6884_v21, %v6881_v20 }
0x1428   :  { %v6904_v57 = vrot.slane %v6860_v53, 5  ;;  %v6908_v46 = vsel %vm12010_vm7, %v6836_v40, %v6885_v54  ;;  %vm16256_vm7 = vcmask 1041408  }
0x1429   :  { %7893 = vmatpush1.bf16.msk.msra.mxu1 %vm16154_vm13, %v14957_v47  ;;  %8021 = vmatpush1.bf16.msk.msra.mxu0 %vm16156_vm15, %v14957_v47  ;;  %vm16172_vm13 = vnez %v16171_v0  ;;  %vm16174_vm15 = vnez %v16173_v3 }
0x142a   :  { %7895 = vmatprep.subr.msk.bf16.mxu1 %vm16158_vm14, %v14957_v47  ;;  %8023 = vmatprep.subr.msk.bf16.mxu0 %vm16160_vm2, %v14957_v47  ;;  %vm16176_vm14 = vnez %v16175_v14  ;;  %vm16178_vm2 = vnez %v16177_v5 }
0x142d   :  { %7897 = vmatpush1.bf16.msk.msra.mxu1 %vm16162_vm0, %v14957_v47  ;;  %8025 = vmatpush1.bf16.msk.msra.mxu0 %vm16164_vm10, %v14957_v47  ;;  %vm16180_vm0 = vnez %v16179_v13  ;;  %vm16182_vm10 = vnez %v16181_v18 }
0x142e   :  { %7899 = vmatprep.subr.msk.bf16.mxu1 %vm16166_vm3, %v14957_v47  ;;  %8027 = vmatprep.subr.msk.bf16.mxu0 %vm16168_vm12, %v14957_v47  ;;  %vm16184_vm3 = vnez %v16183_v39  ;;  %vm16186_vm12 = vnez %v16185_v7 }
0x1431   :  { %7901 = vmatpush1.bf16.msk.msra.mxu1 %vm16170_vm4, %v14957_v47  ;;  %8029 = vmatpush1.bf16.msk.msra.mxu0 %vm16172_vm13, %v14957_v47  ;;  %vm16188_vm4 = vnez %v16187_v1  ;;  %vm16190_vm13 = vnez %v16189_v29 }
0x1432   :  { %7903 = vmatprep.subr.msk.bf16.mxu1 %vm16174_vm15, %v14957_v47  ;;  %8031 = vmatprep.subr.msk.bf16.mxu0 %vm16176_vm14, %v14957_v47  ;;  %vm16192_vm15 = vnez %v16191_v48  ;;  %vm16194_vm14 = vnez %v16193_v22 }
0x1435   :  { %7905 = vmatpush1.bf16.msk.msra.mxu1 %vm16178_vm2, %v14957_v47  ;;  %8033 = vmatpush1.bf16.msk.msra.mxu0 %vm16180_vm0, %v14957_v47  ;;  %vm16196_vm2 = vnez %v16195_v33  ;;  %vm16198_vm0 = vnez %v16197_v34 }
0x1436   :  { %7907 = vmatprep.subr.msk.bf16.mxu1 %vm16182_vm10, %v14957_v47  ;;  %8035 = vmatprep.subr.msk.bf16.mxu0 %vm16184_vm3, %v14957_v47  ;;  %vm16200_vm10 = vnez %v16199_v19  ;;  %vm16202_vm3 = vnez %v16201_v30 }
0x1439   :  { %7909 = vmatpush1.bf16.msk.msra.mxu1 %vm16186_vm12, %v14957_v47  ;;  %8037 = vmatpush1.bf16.msk.msra.mxu0 %vm16188_vm4, %v14957_v47  ;;  %vm16204_vm12 = vnez %v16203_v41  ;;  %vm16206_vm4 = vnez %v16205_v11 }
0x143a   :  { %7911 = vmatprep.subr.msk.bf16.mxu1 %vm16190_vm13, %v14957_v47  ;;  %8039 = vmatprep.subr.msk.bf16.mxu0 %vm16192_vm15, %v14957_v47  ;;  %vm16208_vm13 = vnez %v16207_v12  ;;  %vm16210_vm15 = vnez %v16209_v2 }
0x143d   :  { %7913 = vmatpush1.bf16.msk.msra.mxu1 %vm16194_vm14, %v14957_v47  ;;  %8041 = vmatpush1.bf16.msk.msra.mxu0 %vm16196_vm2, %v14957_v47  ;;  %vm16212_vm14 = vnez %v16211_v62  ;;  %vm16214_vm2 = vnez %v16213_v56 }
0x143e   :  { %7915 = vmatprep.subr.msk.bf16.mxu1 %vm16198_vm0, %v14957_v47  ;;  %8043 = vmatprep.subr.msk.bf16.mxu0 %vm16200_vm10, %v14957_v47  ;;  %vm16216_vm0 = vnez %v16215_v28  ;;  %vm16218_vm10 = vnez %v16217_v15 }
0x1441   :  { %7917 = vmatpush1.bf16.msk.msra.mxu1 %vm16202_vm3, %v14957_v47  ;;  %8045 = vmatpush1.bf16.msk.msra.mxu0 %vm16204_vm12, %v14957_v47  ;;  %vm16220_vm3 = vnez %v16219_v32  ;;  %vm16222_vm12 = vnez %v16221_v59 }
0x1442   :  { %7919 = vmatprep.subr.msk.bf16.mxu1 %vm16206_vm4, %v14957_v47  ;;  %8047 = vmatprep.subr.msk.bf16.mxu0 %vm16208_vm13, %v14957_v47  ;;  %vm16224_vm4 = vnez %v16223_v49  ;;  %vm16226_vm13 = vnez %v16225_v37 }
0x1445   :  { %7921 = vmatpush1.bf16.msk.msra.mxu1 %vm16210_vm15, %v14957_v47  ;;  %8049 = vmatpush1.bf16.msk.msra.mxu0 %vm16212_vm14, %v14957_v47  ;;  %vm16228_vm15 = vnez %v16227_v61  ;;  %vm16230_vm14 = vnez %v16229_v8 }
0x1446   :  { %7923 = vmatprep.subr.msk.bf16.mxu1 %vm16214_vm2, %v14957_v47  ;;  %8051 = vmatprep.subr.msk.bf16.mxu0 %vm16216_vm0, %v14957_v47  ;;  %vm16232_vm2 = vnez %v16231_v52  ;;  %vm16234_vm0 = vnez %v16233_v35 }
0x1449   :  { %7925 = vmatpush1.bf16.msk.msra.mxu1 %vm16218_vm10, %v14957_v47  ;;  %8053 = vmatpush1.bf16.msk.msra.mxu0 %vm16220_vm3, %v14957_v47  ;;  %vm16236_vm10 = vnez %v16235_v42  ;;  %vm16238_vm3 = vnez %v16237_v6 }
0x144a   :  { %7927 = vmatprep.subr.msk.bf16.mxu1 %vm16222_vm12, %v14957_v47  ;;  %8055 = vmatprep.subr.msk.bf16.mxu0 %vm16224_vm4, %v14957_v47  ;;  %vm16240_vm12 = vnez %v16239_v9  ;;  %vm16244_vm4 = vnez %v16243_v45 }
0x144d   :  { %7929 = vmatpush1.bf16.msk.msra.mxu1 %vm16226_vm13, %v14957_v47  ;;  %8057 = vmatpush1.bf16.msk.msra.mxu0 %vm16228_vm15, %v14957_v47  ;;  %vm16261_vm15 = vnez %v16260_v50 }
0x144e   :  { %7931 = vmatprep.subr.msk.bf16.mxu1 %vm16230_vm14, %v14957_v47  ;;  %8059 = vmatprep.subr.msk.bf16.mxu0 %vm16232_vm2, %v14957_v47 }
0x1451   :  { %7933 = vmatpush1.bf16.msk.msra.mxu1 %vm16234_vm0, %v14957_v47  ;;  %8061 = vmatpush1.bf16.msk.msra.mxu0 %vm16236_vm10, %v14957_v47 }
0x1452   :  { %7935 = vmatprep.subr.msk.bf16.mxu1 %vm16238_vm3, %v14957_v47  ;;  %8063 = vmatprep.subr.msk.bf16.mxu0 %vm16240_vm12, %v14957_v47 }
0x1455   :  { %7937 = vmatpush1.bf16.msk.msra.mxu1 %vm12612_vm11, %v14957_v47  ;;  %8065 = vmatpush1.bf16.msk.msra.mxu0 %vm12626_vm5, %v14957_v47  ;;  %vm16250_vm11 = vnez %v16249_v24  ;;  %vm16254_vm5 = vnez %v16253_v43 }
0x1456   :  { %7939 = vmatprep.subr.msk.bf16.mxu1 %vm16244_vm4, %v14957_v47  ;;  %8067 = vmatprep.subr.msk.bf16.mxu0 %vm12650_vm8, %v14957_v47  ;;  %vm16252_vm8 = vnez %v16251_v63 }
0x1459   :  { %7941 = vmatpush1.bf16.msk.msra.mxu1 %vm12657_vm1, %v14957_v47  ;;  %8069 = vmatpush1.bf16.msk.msra.mxu0 %vm12669_vm9, %v14957_v47  ;;  %vm16255_vm1 = vcmask 1042432   ;;  %vm16257_vm9 = vmmov %vm16256_vm7 }
0x145a   :  { %7943 = vmatprep.subr.msk.bf16.mxu1 %vm12679_vm6, %v14957_v47  ;;  %8071 = vmatprep.subr.msk.bf16.mxu0 %vm16250_vm11, %v14957_v47  ;;  %v6920_v25 = vsel %vm16255_vm1, %v6908_v46, %v6904_v57  ;;  %vm16258_vm6 = vmmov %vm16256_vm7 }
0x145b   :  { %vm16259_vm13 = vmmov %vm16258_vm6 }
0x145d   :  { %7945 = vmatpush1.bf16.msk.msra.mxu1 %vm16252_vm8, %v14957_v47  ;;  %8073 = vmatpush1.bf16.msk.msra.mxu0 %vm16254_vm5, %v14957_v47 }
0x1460   :  { %7002 = vmatmul.mubr.bf16.vlgmr.msra.gmra.mrb[28].mxu1 %v6920_v25  ;;  %7088 = vmatmul.mubr.bf16.vlgmr.msra.gmra.mrb[28].mxu0 %v6920_v25 }
0x1533   :  { %v7003_v16 = vpop.f32.mrb[28].mxu1  ;;  %v7089_v0 = vpop.f32.mrb[28].mxu0 }
0x1534   :  { %v7102_v3 = vrot.slane %v7003_v16, 3  ;;  %v7118_v14 = vrot.slane %v7003_v16, 6  ;;  %v7104_v5 = vrot.slane %v7089_v0, 3  ;;  %v7124_v13 = vrot.slane %v7089_v0, 6  ;;  %v7005_v55 = vpop.f32.mrb[29].mxu1  ;;  %v7091_v18 = vpop.f32.mrb[29].mxu0 }
0x1535   :  { %v7103_v39 = vrot.slane %v7005_v55, 3  ;;  %v7121_v7 = vrot.slane %v7005_v55, 6  ;;  %v7105_v1 = vrot.slane %v7091_v18, 3  ;;  %v7127_v29 = vrot.slane %v7091_v18, 6  ;;  %v7007_v48 = vpop.f32.mrb[30].mxu1  ;;  %v7093_v60 = vpop.f32.mrb[30].mxu0 }
0x1536   :  { %v7110_v22 = vadd.f32 %v7102_v3, %v7003_v16  ;;  %v7112_v47 = vadd.f32 %v7104_v5, %v7089_v0  ;;  %v7119_v33 = vrot.slane %v7007_v48, 6  ;;  %v7125_v34 = vrot.slane %v7093_v60, 6  ;;  %v7009_v19 = vpop.f32.mrb[31].mxu1  ;;  %v7095_v40 = vpop.f32.mrb[31].mxu0 }
0x1537   :  { %v7111_v30 = vadd.f32 %v7103_v39, %v7005_v55  ;;  %v7113_v41 = vadd.f32 %v7105_v1, %v7091_v18  ;;  %v7122_v11 = vrot.slane %v7009_v19, 6  ;;  %v7128_v12 = vrot.slane %v7095_v40, 6 }
0x1538   :  { %v7120_v51 = vsel %vm16256_vm7, %v7118_v14, %v7119_v33  ;;  %v7126_v2 = vsel %vm16257_vm9, %v7124_v13, %v7125_v34 }
0x1539   :  { %v7134_v62 = vadd.f32 %v7120_v51, %v7110_v22  ;;  %v7136_v56 = vadd.f32 %v7126_v2, %v7112_v47  ;;  %v7123_v28 = vsel %vm16258_vm6, %v7121_v7, %v7122_v11  ;;  %v7129_v26 = vsel %vm16259_vm13, %v7127_v29, %v7128_v12 }
0x153a   :  { %v7135_v15 = vadd.f32 %v7123_v28, %v7111_v30  ;;  %v7137_v32 = vadd.f32 %v7129_v26, %v7113_v41 }
0x153c   :  { %v7142_v59 = vcombine.low %v7134_v62, %v7135_v15  ;;  %v7143_v49 = vcombine.low %v7136_v56, %v7137_v32 }
0x153e   :  { %8074 = vst [vmem:[%s14143_s11 + $0x10] sm:$0x77] %v7142_v59  ;;  %8075 = vst.msk [vmem:[%s14143_s11 + $0x18] sm:$0x77] %vm16261_vm15, %v7143_v49 }

</bundles_post_ra>
